<compile_context>
chip_gen: v6e
topology: v6e:2x2x1
jax: 0.10.0
libtpu: 0.0.40
codegen_flags: <defaults>
</compile_context>

<pallas_src>
import math
import numpy as np
import jax
import jax.numpy as jnp
from jax.experimental import pallas as pl
from jax.experimental.pallas import tpu as pltpu

# ----------------------- small synthetic configuration -----------------------
B = 2
C_IN, IMG, PATCH = 3, 16, 8
NP_SIDE = IMG // PATCH
N_PATCH = NP_SIDE * NP_SIDE                      # 4 patches (+1 cls token)
V_SEQ = N_PATCH + 1
V_HID, V_LAYERS, V_HEADS, V_MLP = 128, 2, 4, 256   # stands in for ViT-g

Q_TOK, Q_HID, Q_LAYERS, Q_HEADS, Q_MLP = 8, 128, 2, 4, 256   # Q-Former (BERT)
CROSS_FREQ = 2
Q_VOCAB, Q_MAXPOS, T_QF = 64, 32, 6

LLM_HID, LLM_LAYERS, LLM_HEADS, LLM_MLP, LLM_VOCAB = 128, 2, 4, 256, 256  # Vicuna
P_PROMPT = 4                                      # QAPrompting soft tokens
T_IN, T_OUT = 5, 6
PAD_ID = 0

F32 = jnp.float32
BF16 = jnp.bfloat16
NEG_INF = -1e9

PARALLEL = pltpu.CompilerParams(dimension_semantics=("parallel",))


def _round_up(x, m):
    return ((x + m - 1) // m) * m


# --------------------------- BlockSpec helpers -------------------------------
def _batched_spec(shape):
    """(B, ...) array, one batch row per (1-D) grid step."""
    rest = tuple(shape[1:])
    zeros = (0,) * len(rest)
    return pl.BlockSpec((1,) + rest, lambda b, _z=zeros: (b,) + _z)


def _shared_spec(shape):
    """Full-array block with a constant index_map (weights / tables stay resident)."""
    zeros = (0,) * len(shape)
    return pl.BlockSpec(tuple(shape), lambda i, _z=zeros: _z)


# --------------------------- in-kernel math helpers ---------------------------
def _ln(x, g, b, eps=1e-5):
    mu = jnp.mean(x, axis=-1, keepdims=True)
    var = jnp.mean((x - mu) ** 2, axis=-1, keepdims=True)
    return (x - mu) * jax.lax.rsqrt(var + eps) * g + b


def _rms(x, g, eps=1e-6):
    var = jnp.mean(x * x, axis=-1, keepdims=True)
    return x * jax.lax.rsqrt(var + eps) * g


def _gelu(x):
    # TODO(synk): exact erf-GELU replaced by the tanh approximation (EUP tanh).
    c = math.sqrt(2.0 / math.pi)
    return 0.5 * x * (1.0 + jnp.tanh(c * (x + 0.044715 * x * x * x)))


def _silu(x):
    return x * pl.reciprocal(1.0 + jnp.exp(-x), approx=True)


def _softmax(s):
    s = s - jnp.max(s, axis=-1, keepdims=True)
    p = jnp.exp(s)
    return p * pl.reciprocal(jnp.sum(p, axis=-1, keepdims=True), approx=True)


def _mm(a, w):
    """bf16 MXU matmul with f32 accumulation (w already bf16)."""
    return jnp.dot(a.astype(BF16), w, preferred_element_type=F32)


def _attn_heads(q, k, v, nh, hd, bias):
    """Per-head softmax attention. q is pre-scaled.  q,k,v: (Tq,H)/(Tk,H) f32.
    Returns the (Tq, H) lane-concatenated context (Wo matmul happens outside,
    once, against the full un-reshaped weight)."""
    ctx = []
    for h in range(nh):
        sl = slice(h * hd, (h + 1) * hd)
        qh = q[:, sl].astype(BF16)
        kh = k[:, sl].astype(BF16)
        vh = v[:, sl].astype(BF16)
        s = jax.lax.dot_general(qh, kh, (((1,), (1,)), ((), ())),
                                preferred_element_type=F32)
        if bias is not None:
            s = s + bias
        p = _softmax(s).astype(BF16)
        ctx.append(jnp.dot(p, vh, preferred_element_type=F32))
    return jnp.concatenate(ctx, axis=-1)


def _rope(xh, cos_h, sin_h, hd2):
    """rotate_half RoPE on one head slice (T, hd) -- lane slice + negate, no matmul."""
    x1 = xh[:, :hd2]
    x2 = xh[:, hd2:]
    rot = jnp.concatenate([-x2, x1], axis=-1)
    return xh * cos_h + rot * sin_h


# ===================== generic row-tiled linear / layernorm ==================
def pallas_linear(x, w, b=None, tile_m=256):
    """Fused matmul + bias on the flattened (M, K) slab, M tiled with a parallel grid."""
    shp = x.shape
    x2 = x.reshape(-1, shp[-1]).astype(F32)
    M, K = x2.shape
    N = w.shape[1]
    Mp = _round_up(M, 8)
    tm = min(tile_m, Mp)
    Mp = _round_up(Mp, tm)
    if Mp != M:
        x2 = jnp.pad(x2, ((0, Mp - M), (0, 0)))
    has_b = b is not None

    def kernel(*refs):
        if has_b:
            x_ref, w_ref, b_ref, o_ref = refs
            o_ref[...] = _mm(x_ref[...], w_ref[...]) + b_ref[...]
        else:
            x_ref, w_ref, o_ref = refs
            o_ref[...] = _mm(x_ref[...], w_ref[...])

    in_specs = [pl.BlockSpec((tm, K), lambda i: (i, 0)), _shared_spec((K, N))]
    args = [x2, w]
    if has_b:
        in_specs.append(_shared_spec((1, N)))
        args.append(b)

    out = pl.pallas_call(
        kernel,
        out_shape=jax.ShapeDtypeStruct((Mp, N), F32),
        grid=(Mp // tm,),
        in_specs=in_specs,
        out_specs=pl.BlockSpec((tm, N), lambda i: (i, 0)),
        compiler_params=PARALLEL,
    )(*args)
    return out[:M].reshape(shp[:-1] + (N,))


def pallas_layernorm(x, g, b, tile_m=256):
    shp = x.shape
    x2 = x.reshape(-1, shp[-1]).astype(F32)
    M, H = x2.shape
    Mp = _round_up(M, 8)
    tm = min(tile_m, Mp)
    Mp = _round_up(Mp, tm)
    if Mp != M:
        x2 = jnp.pad(x2, ((0, Mp - M), (0, 0)))

    def kernel(x_ref, g_ref, b_ref, o_ref):
        o_ref[...] = _ln(x_ref[...], g_ref[...], b_ref[...])

    out = pl.pallas_call(
        kernel,
        out_shape=jax.ShapeDtypeStruct((Mp, H), F32),
        grid=(Mp // tm,),
        in_specs=[pl.BlockSpec((tm, H), lambda i: (i, 0)),
                  _shared_spec((1, H)), _shared_spec((1, H))],
        out_specs=pl.BlockSpec((tm, H), lambda i: (i, 0)),
        compiler_params=PARALLEL,
    )(x2, g, b)
    return out[:M].reshape(shp)


# ========================= fused per-layer Pallas kernels =====================
def vit_layer_block(x, ln1_g, ln1_b, wqkv, bqkv, wo, bo,
                    ln2_g, ln2_b, w1, b1, w2, b2, nh):
    """Pre-LN ViT block: attention + MLP fused in one kernel, grid over batch."""
    Bq, T, H = x.shape
    H3 = wqkv.shape[1]
    MH = w1.shape[1]
    hd = H // nh
    scale = 1.0 / math.sqrt(hd)

    def kernel(x_ref, g1_ref, b1_ref, wqkv_ref, bqkv_ref, wo_ref, bo_ref,
               g2_ref, b2_ref, w1_ref, fb1_ref, w2_ref, fb2_ref, o_ref):
        xv = x_ref[0]
        hn = _ln(xv, g1_ref[...], b1_ref[...])
        qkv = _mm(hn, wqkv_ref[...]) + bqkv_ref[...]
        q = qkv[:, :H] * scale
        k = qkv[:, H:2 * H]
        v = qkv[:, 2 * H:]
        ctx = _attn_heads(q, k, v, nh, hd, None)
        x1 = xv + _mm(ctx, wo_ref[...]) + bo_ref[...]
        hn2 = _ln(x1, g2_ref[...], b2_ref[...])
        y = _gelu(_mm(hn2, w1_ref[...]) + fb1_ref[...])
        o_ref[0] = x1 + _mm(y, w2_ref[...]) + fb2_ref[...]

    return pl.pallas_call(
        kernel,
        out_shape=jax.ShapeDtypeStruct((Bq, T, H), F32),
        grid=(Bq,),
        in_specs=[_batched_spec((Bq, T, H)),
                  _shared_spec((1, H)), _shared_spec((1, H)),
                  _shared_spec((H, H3)), _shared_spec((1, H3)),
                  _shared_spec((H, H)), _shared_spec((1, H)),
                  _shared_spec((1, H)), _shared_spec((1, H)),
                  _shared_spec((H, MH)), _shared_spec((1, MH)),
                  _shared_spec((MH, H)), _shared_spec((1, H))],
        out_specs=_batched_spec((Bq, T, H)),
        compiler_params=PARALLEL,
    )(x, ln1_g, ln1_b, wqkv, bqkv, wo, bo, ln2_g, ln2_b, w1, b1, w2, b2)


def qformer_layer_block(h, mask3, img, p, pre, has_cross, nh):
    """Post-LN BERT Q-Former layer: self-attn (+ cross-attn on the query slice)
    + split query/text FFNs, all fused in one kernel, grid over batch."""
    Bq, L, H = h.shape
    Ti, Hi = img.shape[1], img.shape[2]
    hd = H // nh
    scale = 1.0 / math.sqrt(hd)
    QT = Q_TOK

    def kernel(*refs):
        h_ref, m_ref = refs[0], refs[1]
        idx = 2
        if has_cross:
            img_ref = refs[idx]; idx += 1
        sa_wqkv, sa_bqkv, sa_wo, sa_bo, sa_g, sa_b = refs[idx:idx + 6]; idx += 6
        if has_cross:
            (ca_wq, ca_bq, ca_wkv, ca_bkv,
             ca_wo, ca_bo, ca_g, ca_b) = refs[idx:idx + 8]; idx += 8
        ffq1_w, ffq1_b, ffq2_w, ffq2_b, ffq_g, ffq_b = refs[idx:idx + 6]; idx += 6
        fft1_w, fft1_b, fft2_w, fft2_b, fft_g, fft_b = refs[idx:idx + 6]; idx += 6
        o_ref = refs[idx]

        hv = h_ref[0]                                         # (L, H)
        bias = jnp.where(m_ref[0] > 0, 0.0, NEG_INF)          # (1, L) key-padding
        qkv = _mm(hv, sa_wqkv[...]) + sa_bqkv[...]
        q = qkv[:, :H] * scale
        k = qkv[:, H:2 * H]
        v = qkv[:, 2 * H:]
        ctx = _attn_heads(q, k, v, nh, hd, bias)
        h1 = _ln(hv + _mm(ctx, sa_wo[...]) + sa_bo[...], sa_g[...], sa_b[...])
        hq = h1[:QT]
        ht = h1[QT:]
        if has_cross:                     # cross-attn only on the query tokens
            iv = img_ref[0]
            qc = (_mm(hq, ca_wq[...]) + ca_bq[...]) * scale
            kvc = _mm(iv, ca_wkv[...]) + ca_bkv[...]
            kc, vc = kvc[:, :H], kvc[:, H:]
            ctxc = _attn_heads(qc, kc, vc, nh, hd, None)
            hq = _ln(hq + _mm(ctxc, ca_wo[...]) + ca_bo[...], ca_g[...], ca_b[...])
        yq = _gelu(_mm(hq, ffq1_w[...]) + ffq1_b[...])
        hq2 = _ln(hq + _mm(yq, ffq2_w[...]) + ffq2_b[...], ffq_g[...], ffq_b[...])
        yt = _gelu(_mm(ht, fft1_w[...]) + fft1_b[...])
        ht2 = _ln(ht + _mm(yt, fft2_w[...]) + fft2_b[...], fft_g[...], fft_b[...])
        o_ref[0] = jnp.concatenate([hq2, ht2], axis=0)

    args = [h, mask3]
    in_specs = [_batched_spec((Bq, L, H)), _batched_spec((Bq, 1, L))]
    if has_cross:
        args.append(img)
        in_specs.append(_batched_spec((Bq, Ti, Hi)))

    def add(name):
        arr = p[pre + name]
        args.append(arr)
        in_specs.append(_shared_spec(arr.shape))

    for nme in ('sa_wqkv', 'sa_bqkv', 'sa_wo', 'sa_bo', 'sa_ln_g', 'sa_ln_b'):
        add(nme)
    if has_cross:
        for nme in ('ca_wq', 'ca_bq', 'ca_wkv', 'ca_bkv',
                    'ca_wo', 'ca_bo', 'ca_ln_g', 'ca_ln_b'):
            add(nme)
    for nme in ('ffq1_w', 'ffq1_b', 'ffq2_w', 'ffq2_b', 'ffq_ln_g', 'ffq_ln_b',
                'fft1_w', 'fft1_b', 'fft2_w', 'fft2_b', 'fft_ln_g', 'fft_ln_b'):
        add(nme)

    return pl.pallas_call(
        kernel,
        out_shape=jax.ShapeDtypeStruct((Bq, L, H), F32),
        grid=(Bq,),
        in_specs=in_specs,
        out_specs=_batched_spec((Bq, L, H)),
        compiler_params=PARALLEL,
    )(*args)


def llama_layer_block(x, mask3, cos, sin, g_attn, wqkv, wo, g_mlp, wgu, wd, nh):
    """LLaMA decoder layer: RMSNorm -> QKV -> RoPE -> causal attention -> Wo
    -> RMSNorm -> SwiGLU MLP, fused in one kernel.  The causal + padding bias is
    built in-kernel from the (B,1,L) int mask via broadcasted_iota."""
    Bq, T, H = x.shape
    H3 = wqkv.shape[1]
    M2 = wgu.shape[1]
    MLPD = M2 // 2
    hd = H // nh
    hd2 = hd // 2
    scale = 1.0 / math.sqrt(hd)

    def kernel(x_ref, m_ref, cos_ref, sin_ref, ga_ref, wqkv_ref, wo_ref,
               gm_ref, wgu_ref, wd_ref, o_ref):
        xv = x_ref[0]                                          # (T, H)
        mrow = m_ref[0]                                        # (1, T) int32
        row = jax.lax.broadcasted_iota(jnp.int32, (T, T), 0)
        col = jax.lax.broadcasted_iota(jnp.int32, (T, T), 1)
        keep = (col <= row) & (mrow > 0)
        bias = jnp.where(keep, 0.0, NEG_INF)                   # (T, T)

        hn = _rms(xv, ga_ref[...])
        qkv = _mm(hn, wqkv_ref[...])
        q = qkv[:, :H] * scale                                 # scale folded once
        k = qkv[:, H:2 * H]
        v = qkv[:, 2 * H:]
        cosv, sinv = cos_ref[...], sin_ref[...]                # (T, hd)
        ctx = []
        for hh in range(nh):
            sl = slice(hh * hd, (hh + 1) * hd)
            qh = _rope(q[:, sl], cosv, sinv, hd2).astype(BF16)
            kh = _rope(k[:, sl], cosv, sinv, hd2).astype(BF16)
            vh = v[:, sl].astype(BF16)
            s = jax.lax.dot_general(qh, kh, (((1,), (1,)), ((), ())),
                                    preferred_element_type=F32) + bias
            p = _softmax(s).astype(BF16)
            ctx.append(jnp.dot(p, vh, preferred_element_type=F32))
        ctx = jnp.concatenate(ctx, axis=-1)
        x1 = xv + _mm(ctx, wo_ref[...])

        hn2 = _rms(x1, gm_ref[...])
        gu = _mm(hn2, wgu_ref[...])                            # stacked gate|up
        gt, up = gu[:, :MLPD], gu[:, MLPD:]
        o_ref[0] = x1 + _mm(_silu(gt) * up, wd_ref[...])

    return pl.pallas_call(
        kernel,
        out_shape=jax.ShapeDtypeStruct((Bq, T, H), F32),
        grid=(Bq,),
        in_specs=[_batched_spec((Bq, T, H)),
                  _batched_spec((Bq, 1, T)),
                  _shared_spec(cos.shape), _shared_spec(sin.shape),
                  _shared_spec((1, H)),
                  _shared_spec((H, H3)),
                  _shared_spec((H, H)),
                  _shared_spec((1, H)),
                  _shared_spec((H, M2)),
                  _shared_spec((MLPD, H))],
        out_specs=_batched_spec((Bq, T, H)),
        compiler_params=PARALLEL,
    )(x, mask3, cos, sin, g_attn, wqkv, wo, g_mlp, wgu, wd)


# ------------- fused final RMSNorm + lm_head + cross-entropy ------------------
def fused_rmsnorm_lmhead_ce(h2, labels2, g, w, tile_n=8):
    """Row-tiled per-token CE (ignore_index=-100).  Each tile reduces its losses
    to a lane-dense (1,128) [loss_sum, valid_count] row; logits never leave VMEM.
    TODO(synk): vocab-tiled online-LSE accumulation for production vocab sizes."""
    N, H = h2.shape
    V = w.shape[1]
    Np = _round_up(N, tile_n)
    if Np != N:
        h2 = jnp.pad(h2, ((0, Np - N), (0, 0)))
        labels2 = jnp.pad(labels2, ((0, Np - N), (0, 0)), constant_values=-100)
    n_tiles = Np // tile_n

    def kernel(h_ref, lab_ref, g_ref, w_ref, o_ref):
        hn = _rms(h_ref[...], g_ref[...])
        logits = _mm(hn, w_ref[...])                            # (tile_n, V)
        lab = lab_ref[...]                                      # (tile_n, 1)
        m = jnp.max(logits, axis=-1, keepdims=True)
        lse = m + jnp.log(jnp.sum(jnp.exp(logits - m), axis=-1, keepdims=True))
        iota = jax.lax.broadcasted_iota(jnp.int32, logits.shape, 1)
        tgt = jnp.sum(jnp.where(iota == lab, logits, 0.0), axis=-1, keepdims=True)
        valid = lab != -100
        loss_sum = jnp.sum(jnp.where(valid, lse - tgt, 0.0))
        cnt = jnp.sum(valid.astype(F32))
        lane = jax.lax.broadcasted_iota(jnp.int32, (1, 128), 1)
        o_ref[0] = jnp.where(lane == 0, loss_sum, jnp.where(lane == 1, cnt, 0.0))

    parts = pl.pallas_call(
        kernel,
        out_shape=jax.ShapeDtypeStruct((n_tiles, 1, 128), F32),
        grid=(n_tiles,),
        in_specs=[pl.BlockSpec((tile_n, H), lambda i: (i, 0)),
                  pl.BlockSpec((tile_n, 1), lambda i: (i, 0)),
                  _shared_spec((1, H)), _shared_spec((H, V))],
        out_specs=pl.BlockSpec((1, 1, 128), lambda i: (i, 0, 0)),
        compiler_params=PARALLEL,
    )(h2, labels2, g, w)
    total = jnp.sum(parts[:, 0, 0])
    cnt = jnp.sum(parts[:, 0, 1])
    return total / jnp.maximum(cnt, 1.0)


# =========================== JAX glue around kernels =========================
def make_rope_tables(T, hd):
    """RoPE cos/sin tables, per-head shape (T, hd) (shared across heads)."""
    inv = 1.0 / (10000.0 ** (np.arange(0, hd, 2, dtype=np.float32) / hd))
    freqs = np.arange(T, dtype=np.float32)[:, None] * inv[None, :]
    emb = np.concatenate([freqs, freqs], axis=-1)               # (T, hd)
    return jnp.asarray(np.cos(emb)), jnp.asarray(np.sin(emb))


# ------------------------------- Vision (ViT) --------------------------------
def vision_model(pixel_values, p):
    Bq = pixel_values.shape[0]
    # im2col of the patch conv (kernel == stride == PATCH), channel-major order.
    x = pixel_values.reshape(Bq, C_IN, NP_SIDE, PATCH, NP_SIDE, PATCH)
    x = x.transpose(0, 2, 4, 1, 3, 5).reshape(Bq, N_PATCH, C_IN * PATCH * PATCH)
    emb = pallas_linear(x, p['v_patch_w'], p['v_patch_b'])
    cls = jnp.broadcast_to(p['v_cls'], (Bq, 1, V_HID))
    h = jnp.concatenate([cls, emb], axis=1) + p['v_pos']
    for i in range(V_LAYERS):
        pre = f'v{i}_'
        h = vit_layer_block(h,
                            p[pre + 'ln1_g'], p[pre + 'ln1_b'],
                            p[pre + 'attn_wqkv'], p[pre + 'attn_bqkv'],
                            p[pre + 'attn_wo'], p[pre + 'attn_bo'],
                            p[pre + 'ln2_g'], p[pre + 'ln2_b'],
                            p[pre + 'fc1_w'], p[pre + 'fc1_b'],
                            p[pre + 'fc2_w'], p[pre + 'fc2_b'], V_HEADS)
    return pallas_layernorm(h, p['v_post_g'], p['v_post_b'])


# ------------------------------ Q-Former (BERT) -------------------------------
def qformer_bert(text_ids, qformer_atts, query_tokens, image_embeds, p):
    Bq, Tt = text_ids.shape
    # TODO(synk): embedding lookup (gather) done in plain JAX outside the kernels.
    text_emb = p['q_word_emb'][text_ids] + p['q_pos_emb'][:Tt][None]
    h = jnp.concatenate([query_tokens, text_emb], axis=1)
    h = pallas_layernorm(h, p['q_emb_ln_g'], p['q_emb_ln_b'])
    mask3 = qformer_atts.astype(jnp.int32)[:, None, :]           # (B, 1, L)
    for i in range(Q_LAYERS):
        has_cross = (i % CROSS_FREQ == 0)
        h = qformer_layer_block(h, mask3, image_embeds, p, f'qf{i}_',
                                has_cross, Q_HEADS)
    return h


# ------------------------------- LLM (LLaMA) ----------------------------------
def llm_forward(inputs_embeds, attention_mask, labels, p):
    Bq, L, H = inputs_embeds.shape
    cos, sin = make_rope_tables(L, H // LLM_HEADS)               # hoisted once
    mask3 = attention_mask.astype(jnp.int32)[:, None, :]         # (B, 1, L)
    h = inputs_embeds.astype(F32)
    for i in range(LLM_LAYERS):
        pre = f'llm{i}_'
        h = llama_layer_block(h, mask3, cos, sin,
                              p[pre + 'an_g'], p[pre + 'wqkv'], p[pre + 'wo'],
                              p[pre + 'mn_g'], p[pre + 'wgu'], p[pre + 'wd'],
                              LLM_HEADS)
    h_shift = h[:, :-1, :].reshape(-1, H)
    lab_shift = labels[:, 1:].reshape(-1, 1).astype(jnp.int32)
    return fused_rmsnorm_lmhead_ce(h_shift, lab_shift,
                                   p['llm_fn_g'], p['lm_head_w'])


# --------------------------- full Blip2 forward pass ---------------------------
def blip2_forward(p, pixel_values, qf_ids, qf_atts, llm_ids, llm_atts,
                  text_targets):
    Bq = pixel_values.shape[0]
    # ----- encode() -----
    image_embeds = vision_model(pixel_values, p)
    query_tokens = jnp.broadcast_to(p['query_tokens'], (Bq, Q_TOK, Q_HID))
    query_atts = jnp.ones((Bq, Q_TOK), jnp.int32)
    qformer_atts = jnp.concatenate([query_atts, qf_atts], axis=1)
    qout = qformer_bert(qf_ids, qformer_atts, query_tokens, image_embeds, p)
    inputs_llm = pallas_linear(qout[:, :Q_TOK], p['proj_w'], p['proj_b'])
    atts_llm = jnp.ones((Bq, Q_TOK), jnp.int32)
    # TODO(synk): QAPrompting module is undefined in the reference; modeled as a
    # mean-pooled image embedding projected to P_PROMPT soft prompt tokens.
    pooled = jnp.mean(image_embeds, axis=1)
    prompt_tokens = pallas_linear(pooled, p['qa_w'], p['qa_b']).reshape(
        Bq, P_PROMPT, LLM_HID)
    inputs_llm = jnp.concatenate([inputs_llm, prompt_tokens], axis=1)
    atts_llm = jnp.concatenate([atts_llm,
                                jnp.ones((Bq, P_PROMPT), jnp.int32)], axis=1)
    # ----- forward() -----
    empty_targets = jnp.full(atts_llm.shape, -100, jnp.int32)
    targets = jnp.concatenate([empty_targets, text_targets], axis=1)
    inputs_embeds = p['llm_embed'][llm_ids]
    inputs_embeds = jnp.concatenate([inputs_llm, inputs_embeds], axis=1)
    attention_mask = jnp.concatenate([atts_llm, llm_atts], axis=1)
    return llm_forward(inputs_embeds, attention_mask, targets, p)


# ----------------------------- deterministic params ----------------------------
def build_params():
    key = [jax.random.PRNGKey(0)]

    def nk():
        key[0], sub = jax.random.split(key[0])
        return sub

    def w(shape, scale=0.02):                      # bf16 matmul weights
        return (jax.random.normal(nk(), shape, F32) * scale).astype(BF16)

    def wf(shape, scale=0.02):                     # f32 (embeddings etc.)
        return jax.random.normal(nk(), shape, F32) * scale

    zeros = lambda s: jnp.zeros(s, F32)
    ones = lambda s: jnp.ones(s, F32)
    p = {}

    def attn_self(pre, H):
        p[pre + 'wqkv'] = w((H, 3 * H))            # stacked Q|K|V
        p[pre + 'bqkv'] = zeros((1, 3 * H))
        p[pre + 'wo'] = w((H, H))                  # un-reshaped: single Wo matmul
        p[pre + 'bo'] = zeros((1, H))

    def attn_cross(pre, Hq, Hkv, H):
        p[pre + 'wq'] = w((Hq, H)); p[pre + 'bq'] = zeros((1, H))
        p[pre + 'wkv'] = w((Hkv, 2 * H)); p[pre + 'bkv'] = zeros((1, 2 * H))
        p[pre + 'wo'] = w((H, H)); p[pre + 'bo'] = zeros((1, H))

    # vision model
    p['v_patch_w'] = w((C_IN * PATCH * PATCH, V_HID))
    p['v_patch_b'] = zeros((1, V_HID))
    p['v_cls'] = wf((1, 1, V_HID)); p['v_pos'] = wf((1, V_SEQ, V_HID))
    for i in range(V_LAYERS):
        pre = f'v{i}_'
        p[pre + 'ln1_g'] = ones((1, V_HID)); p[pre + 'ln1_b'] = zeros((1, V_HID))
        attn_self(pre + 'attn_', V_HID)
        p[pre + 'ln2_g'] = ones((1, V_HID)); p[pre + 'ln2_b'] = zeros((1, V_HID))
        p[pre + 'fc1_w'] = w((V_HID, V_MLP)); p[pre + 'fc1_b'] = zeros((1, V_MLP))
        p[pre + 'fc2_w'] = w((V_MLP, V_HID)); p[pre + 'fc2_b'] = zeros((1, V_HID))
    p['v_post_g'] = ones((1, V_HID)); p['v_post_b'] = zeros((1, V_HID))

    # Q-Former
    p['q_word_emb'] = wf((Q_VOCAB, Q_HID)); p['q_pos_emb'] = wf((Q_MAXPOS, Q_HID))
    p['q_emb_ln_g'] = ones((1, Q_HID)); p['q_emb_ln_b'] = zeros((1, Q_HID))
    p['query_tokens'] = wf((1, Q_TOK, Q_HID))
    for i in range(Q_LAYERS):
        pre = f'qf{i}_'
        attn_self(pre + 'sa_', Q_HID)
        p[pre + 'sa_ln_g'] = ones((1, Q_HID)); p[pre + 'sa_ln_b'] = zeros((1, Q_HID))
        if i % CROSS_FREQ == 0:
            attn_cross(pre + 'ca_', Q_HID, V_HID, Q_HID)
            p[pre + 'ca_ln_g'] = ones((1, Q_HID)); p[pre + 'ca_ln_b'] = zeros((1, Q_HID))
        for tag in ('ffq', 'fft'):
            p[pre + tag + '1_w'] = w((Q_HID, Q_MLP))
            p[pre + tag + '1_b'] = zeros((1, Q_MLP))
            p[pre + tag + '2_w'] = w((Q_MLP, Q_HID))
            p[pre + tag + '2_b'] = zeros((1, Q_HID))
            p[pre + tag + '_ln_g'] = ones((1, Q_HID))
            p[pre + tag + '_ln_b'] = zeros((1, Q_HID))

    # llm_proj
    p['proj_w'] = w((Q_HID, LLM_HID)); p['proj_b'] = zeros((1, LLM_HID))
    # QAPrompting (synthetic, see TODO above)
    p['qa_w'] = w((V_HID, P_PROMPT * LLM_HID))
    p['qa_b'] = zeros((1, P_PROMPT * LLM_HID))

    # LLM (LLaMA-style)
    p['llm_embed'] = wf((LLM_VOCAB, LLM_HID))
    for i in range(LLM_LAYERS):
        pre = f'llm{i}_'
        p[pre + 'an_g'] = ones((1, LLM_HID))
        p[pre + 'wqkv'] = w((LLM_HID, 3 * LLM_HID))
        p[pre + 'wo'] = w((LLM_HID, LLM_HID))
        p[pre + 'mn_g'] = ones((1, LLM_HID))
        p[pre + 'wgu'] = w((LLM_HID, 2 * LLM_MLP))     # stacked gate|up
        p[pre + 'wd'] = w((LLM_MLP, LLM_HID))
    p['llm_fn_g'] = ones((1, LLM_HID))
    p['lm_head_w'] = w((LLM_HID, LLM_VOCAB))
    return p


# ------------------- host-side concat_text_input_output (numpy) -----------------
def concat_text_input_output_np(input_ids, input_atts, output_ids, output_atts):
    ids_list, atts_list, lens = [], [], []
    for i in range(input_ids.shape[0]):
        l = int(input_atts[i].sum())
        lens.append(l)
        ids_list.append(np.concatenate(
            [input_ids[i][:l], output_ids[i][1:], input_ids[i][l:]]))
        atts_list.append(np.concatenate(
            [input_atts[i][:l], output_atts[i][1:], input_atts[i][l:]]))
    return np.stack(ids_list), np.stack(atts_list), lens


if __name__ == "__main__":
    params = build_params()
    key = jax.random.PRNGKey(0)
    k1, k2, k3, k4 = jax.random.split(key, 4)

    pixel_values = jax.random.normal(k1, (B, C_IN, IMG, IMG), jnp.float32)

    # TODO(synk): BERT / LLaMA tokenizers have no Pallas equivalent; token ids
    # are synthesized directly (pre-tokenized samples).
    qf_ids = np.asarray(jax.random.randint(k2, (B, T_QF), 1, Q_VOCAB), np.int32)
    qf_atts = np.ones((B, T_QF), np.int32)
    qf_atts[0, -1] = 0
    qf_atts[1, -2:] = 0

    in_ids = np.asarray(jax.random.randint(k3, (B, T_IN), 3, LLM_VOCAB), np.int32)
    in_atts = np.array([[1, 1, 1, 1, 0], [1, 1, 1, 0, 0]], np.int32)
    in_ids = np.where(in_atts == 1, in_ids, PAD_ID)
    out_ids = np.asarray(jax.random.randint(k4, (B, T_OUT), 3, LLM_VOCAB), np.int32)
    out_atts = np.array([[1, 1, 1, 1, 1, 1], [1, 1, 1, 1, 1, 0]], np.int32)
    out_ids = np.where(out_atts == 1, out_ids, PAD_ID)

    llm_ids, llm_atts, in_lens = concat_text_input_output_np(
        in_ids, in_atts, out_ids, out_atts)
    text_targets = np.where(llm_ids == PAD_ID, -100, llm_ids).astype(np.int32)
    for i, l in enumerate(in_lens):
        text_targets[i, :l] = -100

    loss = jax.jit(blip2_forward)(
        params, pixel_values,
        jnp.asarray(qf_ids), jnp.asarray(qf_atts),
        jnp.asarray(llm_ids), jnp.asarray(llm_atts),
        jnp.asarray(text_targets))
    jax.block_until_ready(loss)
    assert np.isfinite(float(loss))
    print("KERNEL_OK")
</pallas_src>

<mosaic_0001>
module attributes {stable_mosaic.version = 11 : i64} {
  func.func @kernel(%arg0: i32, %arg1: memref<8x192xf32, #tpu.memory_space<vmem>>, %arg2: memref<192x128xbf16, #tpu.memory_space<vmem>>, %arg3: memref<1x128xf32, #tpu.memory_space<vmem>>, %arg4: memref<8x128xf32, #tpu.memory_space<vmem>>) attributes {dimension_semantics = [#tpu.dimension_semantics<parallel>], iteration_bounds = array<i64: 1>, scalar_prefetch = 0 : i64, scratch_operands = 0 : i64, tpu.core_type = #tpu.core_type<tc>, window_params = [{transform_indices = @transform_0, window_bounds = array<i64: 8, 192>}, {pipeline_mode = #tpu.pipeline_mode<synchronous>, transform_indices = @transform_1, window_bounds = array<i64: 192, 128>}, {pipeline_mode = #tpu.pipeline_mode<synchronous>, transform_indices = @transform_2, window_bounds = array<i64: 1, 128>}, {transform_indices = @transform_3, window_bounds = array<i64: 8, 128>}]} {
    %c0 = arith.constant 0 : index
    %c0_0 = arith.constant 0 : index
    %0 = vector.load %arg1[%c0, %c0_0] : memref<8x192xf32, #tpu.memory_space<vmem>>, vector<8x192xf32>
    %c0_1 = arith.constant 0 : index
    %c0_2 = arith.constant 0 : index
    %1 = vector.load %arg2[%c0_1, %c0_2] : memref<192x128xbf16, #tpu.memory_space<vmem>>, vector<192x128xbf16>
    %2 = arith.truncf %0 : vector<8x192xf32> to vector<8x192xbf16>
    %cst = arith.constant dense<0.000000e+00> : vector<8x128xf32>
    %3 = tpu.matmul %2, %1, %cst {dimension_numbers = #tpu.dot_dimension_numbers<[1], [0], [0], [1], [0, 0, 1, 1], [], []>} : vector<8x192xbf16>, vector<192x128xbf16>, vector<8x128xf32> -> vector<8x128xf32>
    %c0_3 = arith.constant 0 : index
    %c0_4 = arith.constant 0 : index
    %4 = vector.load %arg3[%c0_3, %c0_4] : memref<1x128xf32, #tpu.memory_space<vmem>>, vector<1x128xf32>
    %5 = vector.broadcast %4 : vector<1x128xf32> to vector<8x128xf32>
    %6 = arith.addf %3, %5 : vector<8x128xf32>
    %c0_5 = arith.constant 0 : index
    %c0_6 = arith.constant 0 : index
    %7 = vector.load %arg4[%c0_5, %c0_6] : memref<8x128xf32, #tpu.memory_space<vmem>>, vector<8x128xf32>
    tpu.vector_store %arg4[%c0_5, %c0_6], %6 {strides = array<i32>} : memref<8x128xf32, #tpu.memory_space<vmem>>, vector<8x128xf32>,
    return
  }
  func.func @transform_0(%arg0: i32) -> (i32, i32) {
    %c0_i32 = arith.constant 0 : i32
    %c0_i32_0 = arith.constant 0 : i32
    return %arg0, %c0_i32 : i32, i32
  }
  func.func @transform_1(%arg0: i32) -> (i32, i32) {
    %c0_i32 = arith.constant 0 : i32
    %c0_i32_0 = arith.constant 0 : i32
    %c0_i32_1 = arith.constant 0 : i32
    return %c0_i32, %c0_i32_0 : i32, i32
  }
  func.func @transform_2(%arg0: i32) -> (i32, i32) {
    %c0_i32 = arith.constant 0 : i32
    %c0_i32_0 = arith.constant 0 : i32
    %c0_i32_1 = arith.constant 0 : i32
    return %c0_i32, %c0_i32_0 : i32, i32
  }
  func.func @transform_3(%arg0: i32) -> (i32, i32) {
    %c0_i32 = arith.constant 0 : i32
    %c0_i32_0 = arith.constant 0 : i32
    return %arg0, %c0_i32 : i32, i32
  }
}

module attributes {stable_mosaic.version = 11 : i64} {
  func.func @kernel(%arg0: i32, %arg1: memref<16x128xf32, #tpu.memory_space<vmem>>, %arg2: memref<1x128xf32, #tpu.memory_space<vmem>>, %arg3: memref<1x128xf32, #tpu.memory_space<vmem>>, %arg4: memref<16x128xf32, #tpu.memory_space<vmem>>) attributes {dimension_semantics = [#tpu.dimension_semantics<parallel>], iteration_bounds = array<i64: 1>, scalar_prefetch = 0 : i64, scratch_operands = 0 : i64, tpu.core_type = #tpu.core_type<tc>, window_params = [{transform_indices = @transform_0, window_bounds = array<i64: 16, 128>}, {pipeline_mode = #tpu.pipeline_mode<synchronous>, transform_indices = @transform_1, window_bounds = array<i64: 1, 128>}, {pipeline_mode = #tpu.pipeline_mode<synchronous>, transform_indices = @transform_2, window_bounds = array<i64: 1, 128>}, {transform_indices = @transform_3, window_bounds = array<i64: 16, 128>}]} {
    %c0 = arith.constant 0 : index
    %c0_0 = arith.constant 0 : index
    %0 = vector.load %arg1[%c0, %c0_0] : memref<16x128xf32, #tpu.memory_space<vmem>>, vector<16x128xf32>
    %c0_1 = arith.constant 0 : index
    %c0_2 = arith.constant 0 : index
    %1 = vector.load %arg2[%c0_1, %c0_2] : memref<1x128xf32, #tpu.memory_space<vmem>>, vector<1x128xf32>
    %c0_3 = arith.constant 0 : index
    %c0_4 = arith.constant 0 : index
    %2 = vector.load %arg3[%c0_3, %c0_4] : memref<1x128xf32, #tpu.memory_space<vmem>>, vector<1x128xf32>
    %cst = arith.constant dense<0.000000e+00> : vector<16xf32>
    %3 = vector.multi_reduction <add>, %0, %cst [1] : vector<16x128xf32> to vector<16xf32>
    %4 = vector.shape_cast %3 : vector<16xf32> to vector<16x1xf32>
    %cst_5 = arith.constant 1.280000e+02 : f32
    %5 = vector.broadcast %cst_5 : f32 to vector<16x1xf32>
    %6 = arith.divf %4, %5 : vector<16x1xf32>
    %7 = vector.broadcast %6 : vector<16x1xf32> to vector<16x128xf32>
    %8 = arith.subf %0, %7 : vector<16x128xf32>
    %9 = arith.mulf %8, %8 : vector<16x128xf32>
    %cst_6 = arith.constant dense<0.000000e+00> : vector<16xf32>
    %10 = vector.multi_reduction <add>, %9, %cst_6 [1] : vector<16x128xf32> to vector<16xf32>
    %11 = vector.shape_cast %10 : vector<16xf32> to vector<16x1xf32>
    %cst_7 = arith.constant 1.280000e+02 : f32
    %12 = vector.broadcast %cst_7 : f32 to vector<16x1xf32>
    %13 = arith.divf %11, %12 : vector<16x1xf32>
    %14 = vector.broadcast %6 : vector<16x1xf32> to vector<16x128xf32>
    %15 = arith.subf %0, %14 : vector<16x128xf32>
    %cst_8 = arith.constant 9.99999974E-6 : f32
    %16 = vector.broadcast %cst_8 : f32 to vector<16x1xf32>
    %17 = arith.addf %13, %16 : vector<16x1xf32>
    %18 = math.rsqrt %17 : vector<16x1xf32>
    %19 = vector.broadcast %18 : vector<16x1xf32> to vector<16x128xf32>
    %20 = arith.mulf %15, %19 : vector<16x128xf32>
    %21 = vector.broadcast %1 : vector<1x128xf32> to vector<16x128xf32>
    %22 = arith.mulf %20, %21 : vector<16x128xf32>
    %23 = vector.broadcast %2 : vector<1x128xf32> to vector<16x128xf32>
    %24 = arith.addf %22, %23 : vector<16x128xf32>
    %c0_9 = arith.constant 0 : index
    %c0_10 = arith.constant 0 : index
    %25 = vector.load %arg4[%c0_9, %c0_10] : memref<16x128xf32, #tpu.memory_space<vmem>>, vector<16x128xf32>
    tpu.vector_store %arg4[%c0_9, %c0_10], %24 {strides = array<i32>} : memref<16x128xf32, #tpu.memory_space<vmem>>, vector<16x128xf32>,
    return
  }
  func.func @transform_0(%arg0: i32) -> (i32, i32) {
    %c0_i32 = arith.constant 0 : i32
    %c0_i32_0 = arith.constant 0 : i32
    return %arg0, %c0_i32 : i32, i32
  }
  func.func @transform_1(%arg0: i32) -> (i32, i32) {
    %c0_i32 = arith.constant 0 : i32
    %c0_i32_0 = arith.constant 0 : i32
    %c0_i32_1 = arith.constant 0 : i32
    return %c0_i32, %c0_i32_0 : i32, i32
  }
  func.func @transform_2(%arg0: i32) -> (i32, i32) {
    %c0_i32 = arith.constant 0 : i32
    %c0_i32_0 = arith.constant 0 : i32
    %c0_i32_1 = arith.constant 0 : i32
    return %c0_i32, %c0_i32_0 : i32, i32
  }
  func.func @transform_3(%arg0: i32) -> (i32, i32) {
    %c0_i32 = arith.constant 0 : i32
    %c0_i32_0 = arith.constant 0 : i32
    return %arg0, %c0_i32 : i32, i32
  }
}

module attributes {stable_mosaic.version = 11 : i64} {
  func.func @kernel(%arg0: i32, %arg1: memref<1x5x128xf32, #tpu.memory_space<vmem>>, %arg2: memref<1x128xf32, #tpu.memory_space<vmem>>, %arg3: memref<1x128xf32, #tpu.memory_space<vmem>>, %arg4: memref<128x384xbf16, #tpu.memory_space<vmem>>, %arg5: memref<1x384xf32, #tpu.memory_space<vmem>>, %arg6: memref<128x128xbf16, #tpu.memory_space<vmem>>, %arg7: memref<1x128xf32, #tpu.memory_space<vmem>>, %arg8: memref<1x128xf32, #tpu.memory_space<vmem>>, %arg9: memref<1x128xf32, #tpu.memory_space<vmem>>, %arg10: memref<128x256xbf16, #tpu.memory_space<vmem>>, %arg11: memref<1x256xf32, #tpu.memory_space<vmem>>, %arg12: memref<256x128xbf16, #tpu.memory_space<vmem>>, %arg13: memref<1x128xf32, #tpu.memory_space<vmem>>, %arg14: memref<1x5x128xf32, #tpu.memory_space<vmem>>) attributes {dimension_semantics = [#tpu.dimension_semantics<parallel>], iteration_bounds = array<i64: 2>, scalar_prefetch = 0 : i64, scratch_operands = 0 : i64, tpu.core_type = #tpu.core_type<tc>, window_params = [{transform_indices = @transform_0, window_bounds = array<i64: 1, 5, 128>}, {pipeline_mode = #tpu.pipeline_mode<synchronous>, transform_indices = @transform_1, window_bounds = array<i64: 1, 128>}, {pipeline_mode = #tpu.pipeline_mode<synchronous>, transform_indices = @transform_2, window_bounds = array<i64: 1, 128>}, {pipeline_mode = #tpu.pipeline_mode<synchronous>, transform_indices = @transform_3, window_bounds = array<i64: 128, 384>}, {pipeline_mode = #tpu.pipeline_mode<synchronous>, transform_indices = @transform_4, window_bounds = array<i64: 1, 384>}, {pipeline_mode = #tpu.pipeline_mode<synchronous>, transform_indices = @transform_5, window_bounds = array<i64: 128, 128>}, {pipeline_mode = #tpu.pipeline_mode<synchronous>, transform_indices = @transform_6, window_bounds = array<i64: 1, 128>}, {pipeline_mode = #tpu.pipeline_mode<synchronous>, transform_indices = @transform_7, window_bounds = array<i64: 1, 128>}, {pipeline_mode = #tpu.pipeline_mode<synchronous>, transform_indices = @transform_8, window_bounds = array<i64: 1, 128>}, {pipeline_mode = #tpu.pipeline_mode<synchronous>, transform_indices = @transform_9, window_bounds = array<i64: 128, 256>}, {pipeline_mode = #tpu.pipeline_mode<synchronous>, transform_indices = @transform_10, window_bounds = array<i64: 1, 256>}, {pipeline_mode = #tpu.pipeline_mode<synchronous>, transform_indices = @transform_11, window_bounds = array<i64: 256, 128>}, {pipeline_mode = #tpu.pipeline_mode<synchronous>, transform_indices = @transform_12, window_bounds = array<i64: 1, 128>}, {transform_indices = @transform_13, window_bounds = array<i64: 1, 5, 128>}]} {
    %c0 = arith.constant 0 : index
    %c0_0 = arith.constant 0 : index
    %c0_1 = arith.constant 0 : index
    %0 = vector.load %arg1[%c0, %c0_0, %c0_1] : memref<1x5x128xf32, #tpu.memory_space<vmem>>, vector<1x5x128xf32>
    %1 = vector.shape_cast %0 : vector<1x5x128xf32> to vector<5x128xf32>
    %c0_2 = arith.constant 0 : index
    %c0_3 = arith.constant 0 : index
    %2 = vector.load %arg2[%c0_2, %c0_3] : memref<1x128xf32, #tpu.memory_space<vmem>>, vector<1x128xf32>
    %c0_4 = arith.constant 0 : index
    %c0_5 = arith.constant 0 : index
    %3 = vector.load %arg3[%c0_4, %c0_5] : memref<1x128xf32, #tpu.memory_space<vmem>>, vector<1x128xf32>
    %cst = arith.constant dense<0.000000e+00> : vector<5xf32>
    %4 = vector.multi_reduction <add>, %1, %cst [1] : vector<5x128xf32> to vector<5xf32>
    %5 = vector.shape_cast %4 : vector<5xf32> to vector<5x1xf32>
    %cst_6 = arith.constant 1.280000e+02 : f32
    %6 = vector.broadcast %cst_6 : f32 to vector<5x1xf32>
    %7 = arith.divf %5, %6 : vector<5x1xf32>
    %8 = vector.broadcast %7 : vector<5x1xf32> to vector<5x128xf32>
    %9 = arith.subf %1, %8 : vector<5x128xf32>
    %10 = arith.mulf %9, %9 : vector<5x128xf32>
    %cst_7 = arith.constant dense<0.000000e+00> : vector<5xf32>
    %11 = vector.multi_reduction <add>, %10, %cst_7 [1] : vector<5x128xf32> to vector<5xf32>
    %12 = vector.shape_cast %11 : vector<5xf32> to vector<5x1xf32>
    %cst_8 = arith.constant 1.280000e+02 : f32
    %13 = vector.broadcast %cst_8 : f32 to vector<5x1xf32>
    %14 = arith.divf %12, %13 : vector<5x1xf32>
    %15 = vector.broadcast %7 : vector<5x1xf32> to vector<5x128xf32>
    %16 = arith.subf %1, %15 : vector<5x128xf32>
    %cst_9 = arith.constant 9.99999974E-6 : f32
    %17 = vector.broadcast %cst_9 : f32 to vector<5x1xf32>
    %18 = arith.addf %14, %17 : vector<5x1xf32>
    %19 = math.rsqrt %18 : vector<5x1xf32>
    %20 = vector.broadcast %19 : vector<5x1xf32> to vector<5x128xf32>
    %21 = arith.mulf %16, %20 : vector<5x128xf32>
    %22 = vector.broadcast %2 : vector<1x128xf32> to vector<5x128xf32>
    %23 = arith.mulf %21, %22 : vector<5x128xf32>
    %24 = vector.broadcast %3 : vector<1x128xf32> to vector<5x128xf32>
    %25 = arith.addf %23, %24 : vector<5x128xf32>
    %c0_10 = arith.constant 0 : index
    %c0_11 = arith.constant 0 : index
    %26 = vector.load %arg4[%c0_10, %c0_11] : memref<128x384xbf16, #tpu.memory_space<vmem>>, vector<128x384xbf16>
    %27 = arith.truncf %25 : vector<5x128xf32> to vector<5x128xbf16>
    %cst_12 = arith.constant dense<0.000000e+00> : vector<5x384xf32>
    %28 = tpu.matmul %27, %26, %cst_12 {dimension_numbers = #tpu.dot_dimension_numbers<[1], [0], [0], [1], [0, 0, 1, 1], [], []>} : vector<5x128xbf16>, vector<128x384xbf16>, vector<5x384xf32> -> vector<5x384xf32>
    %c0_13 = arith.constant 0 : index
    %c0_14 = arith.constant 0 : index
    %29 = vector.load %arg5[%c0_13, %c0_14] : memref<1x384xf32, #tpu.memory_space<vmem>>, vector<1x384xf32>
    %30 = vector.broadcast %29 : vector<1x384xf32> to vector<5x384xf32>
    %31 = arith.addf %28, %30 : vector<5x384xf32>
    %32 = vector.extract_strided_slice %31 {offsets = [0, 0], sizes = [5, 128], strides = [1, 1]} : vector<5x384xf32> to vector<5x128xf32>
    %cst_15 = arith.constant 0.176776692 : f32
    %33 = vector.broadcast %cst_15 : f32 to vector<5x128xf32>
    %34 = arith.mulf %32, %33 : vector<5x128xf32>
    %35 = vector.extract_strided_slice %31 {offsets = [0, 128], sizes = [5, 128], strides = [1, 1]} : vector<5x384xf32> to vector<5x128xf32>
    %36 = vector.extract_strided_slice %31 {offsets = [0, 256], sizes = [5, 128], strides = [1, 1]} : vector<5x384xf32> to vector<5x128xf32>
    %37 = vector.extract_strided_slice %34 {offsets = [0, 0], sizes = [5, 32], strides = [1, 1]} : vector<5x128xf32> to vector<5x32xf32>
    %38 = arith.truncf %37 : vector<5x32xf32> to vector<5x32xbf16>
    %39 = vector.extract_strided_slice %35 {offsets = [0, 0], sizes = [5, 32], strides = [1, 1]} : vector<5x128xf32> to vector<5x32xf32>
    %40 = arith.truncf %39 : vector<5x32xf32> to vector<5x32xbf16>
    %41 = vector.extract_strided_slice %36 {offsets = [0, 0], sizes = [5, 32], strides = [1, 1]} : vector<5x128xf32> to vector<5x32xf32>
    %42 = arith.truncf %41 : vector<5x32xf32> to vector<5x32xbf16>
    %cst_16 = arith.constant dense<0.000000e+00> : vector<5x5xf32>
    %43 = tpu.matmul %38, %40, %cst_16 {dimension_numbers = #tpu.dot_dimension_numbers<[1], [1], [0], [0], [0, 0, 1, 0], [], []>} : vector<5x32xbf16>, vector<5x32xbf16>, vector<5x5xf32> -> vector<5x5xf32>
    %cst_17 = arith.constant dense<0xFF800000> : vector<5xf32>
    %44 = vector.multi_reduction <maximumf>, %43, %cst_17 [1] : vector<5x5xf32> to vector<5xf32>
    %45 = vector.shape_cast %44 : vector<5xf32> to vector<5x1xf32>
    %46 = vector.broadcast %45 : vector<5x1xf32> to vector<5x5xf32>
    %47 = arith.subf %43, %46 : vector<5x5xf32>
    %48 = math.exp %47 : vector<5x5xf32>
    %cst_18 = arith.constant dense<0.000000e+00> : vector<5xf32>
    %49 = vector.multi_reduction <add>, %48, %cst_18 [1] : vector<5x5xf32> to vector<5xf32>
    %50 = vector.shape_cast %49 : vector<5xf32> to vector<5x1xf32>
    %51 = tpu.reciprocal %50 {approx = true} : vector<5x1xf32> -> vector<5x1xf32>
    %52 = vector.broadcast %51 : vector<5x1xf32> to vector<5x5xf32>
    %53 = arith.mulf %48, %52 : vector<5x5xf32>
    %54 = arith.truncf %53 : vector<5x5xf32> to vector<5x5xbf16>
    %cst_19 = arith.constant dense<0.000000e+00> : vector<5x32xf32>
    %55 = tpu.matmul %54, %42, %cst_19 {dimension_numbers = #tpu.dot_dimension_numbers<[1], [0], [0], [1], [0, 0, 1, 1], [], []>} : vector<5x5xbf16>, vector<5x32xbf16>, vector<5x32xf32> -> vector<5x32xf32>
    %56 = vector.extract_strided_slice %34 {offsets = [0, 32], sizes = [5, 32], strides = [1, 1]} : vector<5x128xf32> to vector<5x32xf32>
    %57 = arith.truncf %56 : vector<5x32xf32> to vector<5x32xbf16>
    %58 = vector.extract_strided_slice %35 {offsets = [0, 32], sizes = [5, 32], strides = [1, 1]} : vector<5x128xf32> to vector<5x32xf32>
    %59 = arith.truncf %58 : vector<5x32xf32> to vector<5x32xbf16>
    %60 = vector.extract_strided_slice %36 {offsets = [0, 32], sizes = [5, 32], strides = [1, 1]} : vector<5x128xf32> to vector<5x32xf32>
    %61 = arith.truncf %60 : vector<5x32xf32> to vector<5x32xbf16>
    %cst_20 = arith.constant dense<0.000000e+00> : vector<5x5xf32>
    %62 = tpu.matmul %57, %59, %cst_20 {dimension_numbers = #tpu.dot_dimension_numbers<[1], [1], [0], [0], [0, 0, 1, 0], [], []>} : vector<5x32xbf16>, vector<5x32xbf16>, vector<5x5xf32> -> vector<5x5xf32>
    %cst_21 = arith.constant dense<0xFF800000> : vector<5xf32>
    %63 = vector.multi_reduction <maximumf>, %62, %cst_21 [1] : vector<5x5xf32> to vector<5xf32>
    %64 = vector.shape_cast %63 : vector<5xf32> to vector<5x1xf32>
    %65 = vector.broadcast %64 : vector<5x1xf32> to vector<5x5xf32>
    %66 = arith.subf %62, %65 : vector<5x5xf32>
    %67 = math.exp %66 : vector<5x5xf32>
    %cst_22 = arith.constant dense<0.000000e+00> : vector<5xf32>
    %68 = vector.multi_reduction <add>, %67, %cst_22 [1] : vector<5x5xf32> to vector<5xf32>
    %69 = vector.shape_cast %68 : vector<5xf32> to vector<5x1xf32>
    %70 = tpu.reciprocal %69 {approx = true} : vector<5x1xf32> -> vector<5x1xf32>
    %71 = vector.broadcast %70 : vector<5x1xf32> to vector<5x5xf32>
    %72 = arith.mulf %67, %71 : vector<5x5xf32>
    %73 = arith.truncf %72 : vector<5x5xf32> to vector<5x5xbf16>
    %cst_23 = arith.constant dense<0.000000e+00> : vector<5x32xf32>
    %74 = tpu.matmul %73, %61, %cst_23 {dimension_numbers = #tpu.dot_dimension_numbers<[1], [0], [0], [1], [0, 0, 1, 1], [], []>} : vector<5x5xbf16>, vector<5x32xbf16>, vector<5x32xf32> -> vector<5x32xf32>
    %75 = vector.extract_strided_slice %34 {offsets = [0, 64], sizes = [5, 32], strides = [1, 1]} : vector<5x128xf32> to vector<5x32xf32>
    %76 = arith.truncf %75 : vector<5x32xf32> to vector<5x32xbf16>
    %77 = vector.extract_strided_slice %35 {offsets = [0, 64], sizes = [5, 32], strides = [1, 1]} : vector<5x128xf32> to vector<5x32xf32>
    %78 = arith.truncf %77 : vector<5x32xf32> to vector<5x32xbf16>
    %79 = vector.extract_strided_slice %36 {offsets = [0, 64], sizes = [5, 32], strides = [1, 1]} : vector<5x128xf32> to vector<5x32xf32>
    %80 = arith.truncf %79 : vector<5x32xf32> to vector<5x32xbf16>
    %cst_24 = arith.constant dense<0.000000e+00> : vector<5x5xf32>
    %81 = tpu.matmul %76, %78, %cst_24 {dimension_numbers = #tpu.dot_dimension_numbers<[1], [1], [0], [0], [0, 0, 1, 0], [], []>} : vector<5x32xbf16>, vector<5x32xbf16>, vector<5x5xf32> -> vector<5x5xf32>
    %cst_25 = arith.constant dense<0xFF800000> : vector<5xf32>
    %82 = vector.multi_reduction <maximumf>, %81, %cst_25 [1] : vector<5x5xf32> to vector<5xf32>
    %83 = vector.shape_cast %82 : vector<5xf32> to vector<5x1xf32>
    %84 = vector.broadcast %83 : vector<5x1xf32> to vector<5x5xf32>
    %85 = arith.subf %81, %84 : vector<5x5xf32>
    %86 = math.exp %85 : vector<5x5xf32>
    %cst_26 = arith.constant dense<0.000000e+00> : vector<5xf32>
    %87 = vector.multi_reduction <add>, %86, %cst_26 [1] : vector<5x5xf32> to vector<5xf32>
    %88 = vector.shape_cast %87 : vector<5xf32> to vector<5x1xf32>
    %89 = tpu.reciprocal %88 {approx = true} : vector<5x1xf32> -> vector<5x1xf32>
    %90 = vector.broadcast %89 : vector<5x1xf32> to vector<5x5xf32>
    %91 = arith.mulf %86, %90 : vector<5x5xf32>
    %92 = arith.truncf %91 : vector<5x5xf32> to vector<5x5xbf16>
    %cst_27 = arith.constant dense<0.000000e+00> : vector<5x32xf32>
    %93 = tpu.matmul %92, %80, %cst_27 {dimension_numbers = #tpu.dot_dimension_numbers<[1], [0], [0], [1], [0, 0, 1, 1], [], []>} : vector<5x5xbf16>, vector<5x32xbf16>, vector<5x32xf32> -> vector<5x32xf32>
    %94 = vector.extract_strided_slice %34 {offsets = [0, 96], sizes = [5, 32], strides = [1, 1]} : vector<5x128xf32> to vector<5x32xf32>
    %95 = arith.truncf %94 : vector<5x32xf32> to vector<5x32xbf16>
    %96 = vector.extract_strided_slice %35 {offsets = [0, 96], sizes = [5, 32], strides = [1, 1]} : vector<5x128xf32> to vector<5x32xf32>
    %97 = arith.truncf %96 : vector<5x32xf32> to vector<5x32xbf16>
    %98 = vector.extract_strided_slice %36 {offsets = [0, 96], sizes = [5, 32], strides = [1, 1]} : vector<5x128xf32> to vector<5x32xf32>
    %99 = arith.truncf %98 : vector<5x32xf32> to vector<5x32xbf16>
    %cst_28 = arith.constant dense<0.000000e+00> : vector<5x5xf32>
    %100 = tpu.matmul %95, %97, %cst_28 {dimension_numbers = #tpu.dot_dimension_numbers<[1], [1], [0], [0], [0, 0, 1, 0], [], []>} : vector<5x32xbf16>, vector<5x32xbf16>, vector<5x5xf32> -> vector<5x5xf32>
    %cst_29 = arith.constant dense<0xFF800000> : vector<5xf32>
    %101 = vector.multi_reduction <maximumf>, %100, %cst_29 [1] : vector<5x5xf32> to vector<5xf32>
    %102 = vector.shape_cast %101 : vector<5xf32> to vector<5x1xf32>
    %103 = vector.broadcast %102 : vector<5x1xf32> to vector<5x5xf32>
    %104 = arith.subf %100, %103 : vector<5x5xf32>
    %105 = math.exp %104 : vector<5x5xf32>
    %cst_30 = arith.constant dense<0.000000e+00> : vector<5xf32>
    %106 = vector.multi_reduction <add>, %105, %cst_30 [1] : vector<5x5xf32> to vector<5xf32>
    %107 = vector.shape_cast %106 : vector<5xf32> to vector<5x1xf32>
    %108 = tpu.reciprocal %107 {approx = true} : vector<5x1xf32> -> vector<5x1xf32>
    %109 = vector.broadcast %108 : vector<5x1xf32> to vector<5x5xf32>
    %110 = arith.mulf %105, %109 : vector<5x5xf32>
    %111 = arith.truncf %110 : vector<5x5xf32> to vector<5x5xbf16>
    %cst_31 = arith.constant dense<0.000000e+00> : vector<5x32xf32>
    %112 = tpu.matmul %111, %99, %cst_31 {dimension_numbers = #tpu.dot_dimension_numbers<[1], [0], [0], [1], [0, 0, 1, 1], [], []>} : vector<5x5xbf16>, vector<5x32xbf16>, vector<5x32xf32> -> vector<5x32xf32>
    %113 = tpu.concatenate %55, %74, %93, %112 in 1 : vector<5x32xf32>, vector<5x32xf32>, vector<5x32xf32>, vector<5x32xf32> -> vector<5x128xf32>
    %c0_32 = arith.constant 0 : index
    %c0_33 = arith.constant 0 : index
    %114 = vector.load %arg6[%c0_32, %c0_33] : memref<128x128xbf16, #tpu.memory_space<vmem>>, vector<128x128xbf16>
    %115 = arith.truncf %113 : vector<5x128xf32> to vector<5x128xbf16>
    %cst_34 = arith.constant dense<0.000000e+00> : vector<5x128xf32>
    %116 = tpu.matmul %115, %114, %cst_34 {dimension_numbers = #tpu.dot_dimension_numbers<[1], [0], [0], [1], [0, 0, 1, 1], [], []>} : vector<5x128xbf16>, vector<128x128xbf16>, vector<5x128xf32> -> vector<5x128xf32>
    %117 = arith.addf %1, %116 : vector<5x128xf32>
    %c0_35 = arith.constant 0 : index
    %c0_36 = arith.constant 0 : index
    %118 = vector.load %arg7[%c0_35, %c0_36] : memref<1x128xf32, #tpu.memory_space<vmem>>, vector<1x128xf32>
    %119 = vector.broadcast %118 : vector<1x128xf32> to vector<5x128xf32>
    %120 = arith.addf %117, %119 : vector<5x128xf32>
    %c0_37 = arith.constant 0 : index
    %c0_38 = arith.constant 0 : index
    %121 = vector.load %arg8[%c0_37, %c0_38] : memref<1x128xf32, #tpu.memory_space<vmem>>, vector<1x128xf32>
    %c0_39 = arith.constant 0 : index
    %c0_40 = arith.constant 0 : index
    %122 = vector.load %arg9[%c0_39, %c0_40] : memref<1x128xf32, #tpu.memory_space<vmem>>, vector<1x128xf32>
    %cst_41 = arith.constant dense<0.000000e+00> : vector<5xf32>
    %123 = vector.multi_reduction <add>, %120, %cst_41 [1] : vector<5x128xf32> to vector<5xf32>
    %124 = vector.shape_cast %123 : vector<5xf32> to vector<5x1xf32>
    %cst_42 = arith.constant 1.280000e+02 : f32
    %125 = vector.broadcast %cst_42 : f32 to vector<5x1xf32>
    %126 = arith.divf %124, %125 : vector<5x1xf32>
    %127 = vector.broadcast %126 : vector<5x1xf32> to vector<5x128xf32>
    %128 = arith.subf %120, %127 : vector<5x128xf32>
    %129 = arith.mulf %128, %128 : vector<5x128xf32>
    %cst_43 = arith.constant dense<0.000000e+00> : vector<5xf32>
    %130 = vector.multi_reduction <add>, %129, %cst_43 [1] : vector<5x128xf32> to vector<5xf32>
    %131 = vector.shape_cast %130 : vector<5xf32> to vector<5x1xf32>
    %cst_44 = arith.constant 1.280000e+02 : f32
    %132 = vector.broadcast %cst_44 : f32 to vector<5x1xf32>
    %133 = arith.divf %131, %132 : vector<5x1xf32>
    %134 = vector.broadcast %126 : vector<5x1xf32> to vector<5x128xf32>
    %135 = arith.subf %120, %134 : vector<5x128xf32>
    %cst_45 = arith.constant 9.99999974E-6 : f32
    %136 = vector.broadcast %cst_45 : f32 to vector<5x1xf32>
    %137 = arith.addf %133, %136 : vector<5x1xf32>
    %138 = math.rsqrt %137 : vector<5x1xf32>
    %139 = vector.broadcast %138 : vector<5x1xf32> to vector<5x128xf32>
    %140 = arith.mulf %135, %139 : vector<5x128xf32>
    %141 = vector.broadcast %121 : vector<1x128xf32> to vector<5x128xf32>
    %142 = arith.mulf %140, %141 : vector<5x128xf32>
    %143 = vector.broadcast %122 : vector<1x128xf32> to vector<5x128xf32>
    %144 = arith.addf %142, %143 : vector<5x128xf32>
    %c0_46 = arith.constant 0 : index
    %c0_47 = arith.constant 0 : index
    %145 = vector.load %arg10[%c0_46, %c0_47] : memref<128x256xbf16, #tpu.memory_space<vmem>>, vector<128x256xbf16>
    %146 = arith.truncf %144 : vector<5x128xf32> to vector<5x128xbf16>
    %cst_48 = arith.constant dense<0.000000e+00> : vector<5x256xf32>
    %147 = tpu.matmul %146, %145, %cst_48 {dimension_numbers = #tpu.dot_dimension_numbers<[1], [0], [0], [1], [0, 0, 1, 1], [], []>} : vector<5x128xbf16>, vector<128x256xbf16>, vector<5x256xf32> -> vector<5x256xf32>
    %c0_49 = arith.constant 0 : index
    %c0_50 = arith.constant 0 : index
    %148 = vector.load %arg11[%c0_49, %c0_50] : memref<1x256xf32, #tpu.memory_space<vmem>>, vector<1x256xf32>
    %149 = vector.broadcast %148 : vector<1x256xf32> to vector<5x256xf32>
    %150 = arith.addf %147, %149 : vector<5x256xf32>
    %cst_51 = arith.constant 5.000000e-01 : f32
    %151 = vector.broadcast %cst_51 : f32 to vector<5x256xf32>
    %152 = arith.mulf %151, %150 : vector<5x256xf32>
    %cst_52 = arith.constant 4.471500e-02 : f32
    %153 = vector.broadcast %cst_52 : f32 to vector<5x256xf32>
    %154 = arith.mulf %153, %150 : vector<5x256xf32>
    %155 = arith.mulf %154, %150 : vector<5x256xf32>
    %156 = arith.mulf %155, %150 : vector<5x256xf32>
    %157 = arith.addf %150, %156 : vector<5x256xf32>
    %cst_53 = arith.constant 0.797884583 : f32
    %158 = vector.broadcast %cst_53 : f32 to vector<5x256xf32>
    %159 = arith.mulf %158, %157 : vector<5x256xf32>
    %160 = math.tanh %159 : vector<5x256xf32>
    %cst_54 = arith.constant 1.000000e+00 : f32
    %161 = vector.broadcast %cst_54 : f32 to vector<5x256xf32>
    %162 = arith.addf %161, %160 : vector<5x256xf32>
    %163 = arith.mulf %152, %162 : vector<5x256xf32>
    %c0_55 = arith.constant 0 : index
    %c0_56 = arith.constant 0 : index
    %164 = vector.load %arg12[%c0_55, %c0_56] : memref<256x128xbf16, #tpu.memory_space<vmem>>, vector<256x128xbf16>
    %165 = arith.truncf %163 : vector<5x256xf32> to vector<5x256xbf16>
    %cst_57 = arith.constant dense<0.000000e+00> : vector<5x128xf32>
    %166 = tpu.matmul %165, %164, %cst_57 {dimension_numbers = #tpu.dot_dimension_numbers<[1], [0], [0], [1], [0, 0, 1, 1], [], []>} : vector<5x256xbf16>, vector<256x128xbf16>, vector<5x128xf32> -> vector<5x128xf32>
    %167 = arith.addf %120, %166 : vector<5x128xf32>
    %c0_58 = arith.constant 0 : index
    %c0_59 = arith.constant 0 : index
    %168 = vector.load %arg13[%c0_58, %c0_59] : memref<1x128xf32, #tpu.memory_space<vmem>>, vector<1x128xf32>
    %169 = vector.broadcast %168 : vector<1x128xf32> to vector<5x128xf32>
    %170 = arith.addf %167, %169 : vector<5x128xf32>
    %c0_60 = arith.constant 0 : index
    %c0_61 = arith.constant 0 : index
    %c0_62 = arith.constant 0 : index
    %171 = vector.load %arg14[%c0_60, %c0_61, %c0_62] : memref<1x5x128xf32, #tpu.memory_space<vmem>>, vector<1x5x128xf32>
    %172 = vector.shape_cast %171 : vector<1x5x128xf32> to vector<5x128xf32>
    %173 = vector.shape_cast %170 : vector<5x128xf32> to vector<1x5x128xf32>
    tpu.vector_store %arg14[%c0_60, %c0_61, %c0_62], %173 {strides = array<i32>} : memref<1x5x128xf32, #tpu.memory_space<vmem>>, vector<1x5x128xf32>,
    return
  }
  func.func @transform_0(%arg0: i32) -> (i32, i32, i32) {
    %c0_i32 = arith.constant 0 : i32
    %c0_i32_0 = arith.constant 0 : i32
    %c0_i32_1 = arith.constant 0 : i32
    return %arg0, %c0_i32, %c0_i32_0 : i32, i32, i32
  }
  func.func @transform_1(%arg0: i32) -> (i32, i32) {
    %c0_i32 = arith.constant 0 : i32
    %c0_i32_0 = arith.constant 0 : i32
    %c0_i32_1 = arith.constant 0 : i32
    return %c0_i32, %c0_i32_0 : i32, i32
  }
  func.func @transform_2(%arg0: i32) -> (i32, i32) {
    %c0_i32 = arith.constant 0 : i32
    %c0_i32_0 = arith.constant 0 : i32
    %c0_i32_1 = arith.constant 0 : i32
    return %c0_i32, %c0_i32_0 : i32, i32
  }
  func.func @transform_3(%arg0: i32) -> (i32, i32) {
    %c0_i32 = arith.constant 0 : i32
    %c0_i32_0 = arith.constant 0 : i32
    %c0_i32_1 = arith.constant 0 : i32
    return %c0_i32, %c0_i32_0 : i32, i32
  }
  func.func @transform_4(%arg0: i32) -> (i32, i32) {
    %c0_i32 = arith.constant 0 : i32
    %c0_i32_0 = arith.constant 0 : i32
    %c0_i32_1 = arith.constant 0 : i32
    return %c0_i32, %c0_i32_0 : i32, i32
  }
  func.func @transform_5(%arg0: i32) -> (i32, i32) {
    %c0_i32 = arith.constant 0 : i32
    %c0_i32_0 = arith.constant 0 : i32
    %c0_i32_1 = arith.constant 0 : i32
    return %c0_i32, %c0_i32_0 : i32, i32
  }
  func.func @transform_6(%arg0: i32) -> (i32, i32) {
    %c0_i32 = arith.constant 0 : i32
    %c0_i32_0 = arith.constant 0 : i32
    %c0_i32_1 = arith.constant 0 : i32
    return %c0_i32, %c0_i32_0 : i32, i32
  }
  func.func @transform_7(%arg0: i32) -> (i32, i32) {
    %c0_i32 = arith.constant 0 : i32
    %c0_i32_0 = arith.constant 0 : i32
    %c0_i32_1 = arith.constant 0 : i32
    return %c0_i32, %c0_i32_0 : i32, i32
  }
  func.func @transform_8(%arg0: i32) -> (i32, i32) {
    %c0_i32 = arith.constant 0 : i32
    %c0_i32_0 = arith.constant 0 : i32
    %c0_i32_1 = arith.constant 0 : i32
    return %c0_i32, %c0_i32_0 : i32, i32
  }
  func.func @transform_9(%arg0: i32) -> (i32, i32) {
    %c0_i32 = arith.constant 0 : i32
    %c0_i32_0 = arith.constant 0 : i32
    %c0_i32_1 = arith.constant 0 : i32
    return %c0_i32, %c0_i32_0 : i32, i32
  }
  func.func @transform_10(%arg0: i32) -> (i32, i32) {
    %c0_i32 = arith.constant 0 : i32
    %c0_i32_0 = arith.constant 0 : i32
    %c0_i32_1 = arith.constant 0 : i32
    return %c0_i32, %c0_i32_0 : i32, i32
  }
  func.func @transform_11(%arg0: i32) -> (i32, i32) {
    %c0_i32 = arith.constant 0 : i32
    %c0_i32_0 = arith.constant 0 : i32
    %c0_i32_1 = arith.constant 0 : i32
    return %c0_i32, %c0_i32_0 : i32, i32
  }
  func.func @transform_12(%arg0: i32) -> (i32, i32) {
    %c0_i32 = arith.constant 0 : i32
    %c0_i32_0 = arith.constant 0 : i32
    %c0_i32_1 = arith.constant 0 : i32
    return %c0_i32, %c0_i32_0 : i32, i32
  }
  func.func @transform_13(%arg0: i32) -> (i32, i32, i32) {
    %c0_i32 = arith.constant 0 : i32
    %c0_i32_0 = arith.constant 0 : i32
    %c0_i32_1 = arith.constant 0 : i32
    return %arg0, %c0_i32, %c0_i32_0 : i32, i32, i32
  }
}

module attributes {stable_mosaic.version = 11 : i64} {
  func.func @kernel(%arg0: i32, %arg1: memref<32x128xf32, #tpu.memory_space<vmem>>, %arg2: memref<1x128xf32, #tpu.memory_space<vmem>>, %arg3: memref<1x128xf32, #tpu.memory_space<vmem>>, %arg4: memref<32x128xf32, #tpu.memory_space<vmem>>) attributes {dimension_semantics = [#tpu.dimension_semantics<parallel>], iteration_bounds = array<i64: 1>, scalar_prefetch = 0 : i64, scratch_operands = 0 : i64, tpu.core_type = #tpu.core_type<tc>, window_params = [{transform_indices = @transform_0, window_bounds = array<i64: 32, 128>}, {pipeline_mode = #tpu.pipeline_mode<synchronous>, transform_indices = @transform_1, window_bounds = array<i64: 1, 128>}, {pipeline_mode = #tpu.pipeline_mode<synchronous>, transform_indices = @transform_2, window_bounds = array<i64: 1, 128>}, {transform_indices = @transform_3, window_bounds = array<i64: 32, 128>}]} {
    %c0 = arith.constant 0 : index
    %c0_0 = arith.constant 0 : index
    %0 = vector.load %arg1[%c0, %c0_0] : memref<32x128xf32, #tpu.memory_space<vmem>>, vector<32x128xf32>
    %c0_1 = arith.constant 0 : index
    %c0_2 = arith.constant 0 : index
    %1 = vector.load %arg2[%c0_1, %c0_2] : memref<1x128xf32, #tpu.memory_space<vmem>>, vector<1x128xf32>
    %c0_3 = arith.constant 0 : index
    %c0_4 = arith.constant 0 : index
    %2 = vector.load %arg3[%c0_3, %c0_4] : memref<1x128xf32, #tpu.memory_space<vmem>>, vector<1x128xf32>
    %cst = arith.constant dense<0.000000e+00> : vector<32xf32>
    %3 = vector.multi_reduction <add>, %0, %cst [1] : vector<32x128xf32> to vector<32xf32>
    %4 = vector.shape_cast %3 : vector<32xf32> to vector<32x1xf32>
    %cst_5 = arith.constant 1.280000e+02 : f32
    %5 = vector.broadcast %cst_5 : f32 to vector<32x1xf32>
    %6 = arith.divf %4, %5 : vector<32x1xf32>
    %7 = vector.broadcast %6 : vector<32x1xf32> to vector<32x128xf32>
    %8 = arith.subf %0, %7 : vector<32x128xf32>
    %9 = arith.mulf %8, %8 : vector<32x128xf32>
    %cst_6 = arith.constant dense<0.000000e+00> : vector<32xf32>
    %10 = vector.multi_reduction <add>, %9, %cst_6 [1] : vector<32x128xf32> to vector<32xf32>
    %11 = vector.shape_cast %10 : vector<32xf32> to vector<32x1xf32>
    %cst_7 = arith.constant 1.280000e+02 : f32
    %12 = vector.broadcast %cst_7 : f32 to vector<32x1xf32>
    %13 = arith.divf %11, %12 : vector<32x1xf32>
    %14 = vector.broadcast %6 : vector<32x1xf32> to vector<32x128xf32>
    %15 = arith.subf %0, %14 : vector<32x128xf32>
    %cst_8 = arith.constant 9.99999974E-6 : f32
    %16 = vector.broadcast %cst_8 : f32 to vector<32x1xf32>
    %17 = arith.addf %13, %16 : vector<32x1xf32>
    %18 = math.rsqrt %17 : vector<32x1xf32>
    %19 = vector.broadcast %18 : vector<32x1xf32> to vector<32x128xf32>
    %20 = arith.mulf %15, %19 : vector<32x128xf32>
    %21 = vector.broadcast %1 : vector<1x128xf32> to vector<32x128xf32>
    %22 = arith.mulf %20, %21 : vector<32x128xf32>
    %23 = vector.broadcast %2 : vector<1x128xf32> to vector<32x128xf32>
    %24 = arith.addf %22, %23 : vector<32x128xf32>
    %c0_9 = arith.constant 0 : index
    %c0_10 = arith.constant 0 : index
    %25 = vector.load %arg4[%c0_9, %c0_10] : memref<32x128xf32, #tpu.memory_space<vmem>>, vector<32x128xf32>
    tpu.vector_store %arg4[%c0_9, %c0_10], %24 {strides = array<i32>} : memref<32x128xf32, #tpu.memory_space<vmem>>, vector<32x128xf32>,
    return
  }
  func.func @transform_0(%arg0: i32) -> (i32, i32) {
    %c0_i32 = arith.constant 0 : i32
    %c0_i32_0 = arith.constant 0 : i32
    return %arg0, %c0_i32 : i32, i32
  }
  func.func @transform_1(%arg0: i32) -> (i32, i32) {
    %c0_i32 = arith.constant 0 : i32
    %c0_i32_0 = arith.constant 0 : i32
    %c0_i32_1 = arith.constant 0 : i32
    return %c0_i32, %c0_i32_0 : i32, i32
  }
  func.func @transform_2(%arg0: i32) -> (i32, i32) {
    %c0_i32 = arith.constant 0 : i32
    %c0_i32_0 = arith.constant 0 : i32
    %c0_i32_1 = arith.constant 0 : i32
    return %c0_i32, %c0_i32_0 : i32, i32
  }
  func.func @transform_3(%arg0: i32) -> (i32, i32) {
    %c0_i32 = arith.constant 0 : i32
    %c0_i32_0 = arith.constant 0 : i32
    return %arg0, %c0_i32 : i32, i32
  }
}

module attributes {stable_mosaic.version = 11 : i64} {
  func.func @kernel(%arg0: i32, %arg1: memref<1x14x128xf32, #tpu.memory_space<vmem>>, %arg2: memref<1x1x14xi32, #tpu.memory_space<vmem>>, %arg3: memref<128x384xbf16, #tpu.memory_space<vmem>>, %arg4: memref<1x384xf32, #tpu.memory_space<vmem>>, %arg5: memref<128x128xbf16, #tpu.memory_space<vmem>>, %arg6: memref<1x128xf32, #tpu.memory_space<vmem>>, %arg7: memref<1x128xf32, #tpu.memory_space<vmem>>, %arg8: memref<1x128xf32, #tpu.memory_space<vmem>>, %arg9: memref<128x256xbf16, #tpu.memory_space<vmem>>, %arg10: memref<1x256xf32, #tpu.memory_space<vmem>>, %arg11: memref<256x128xbf16, #tpu.memory_space<vmem>>, %arg12: memref<1x128xf32, #tpu.memory_space<vmem>>, %arg13: memref<1x128xf32, #tpu.memory_space<vmem>>, %arg14: memref<1x128xf32, #tpu.memory_space<vmem>>, %arg15: memref<128x256xbf16, #tpu.memory_space<vmem>>, %arg16: memref<1x256xf32, #tpu.memory_space<vmem>>, %arg17: memref<256x128xbf16, #tpu.memory_space<vmem>>, %arg18: memref<1x128xf32, #tpu.memory_space<vmem>>, %arg19: memref<1x128xf32, #tpu.memory_space<vmem>>, %arg20: memref<1x128xf32, #tpu.memory_space<vmem>>, %arg21: memref<1x14x128xf32, #tpu.memory_space<vmem>>) attributes {dimension_semantics = [#tpu.dimension_semantics<parallel>], iteration_bounds = array<i64: 2>, scalar_prefetch = 0 : i64, scratch_operands = 0 : i64, tpu.core_type = #tpu.core_type<tc>, window_params = [{transform_indices = @transform_0, window_bounds = array<i64: 1, 14, 128>}, {transform_indices = @transform_1, window_bounds = array<i64: 1, 1, 14>}, {pipeline_mode = #tpu.pipeline_mode<synchronous>, transform_indices = @transform_2, window_bounds = array<i64: 128, 384>}, {pipeline_mode = #tpu.pipeline_mode<synchronous>, transform_indices = @transform_3, window_bounds = array<i64: 1, 384>}, {pipeline_mode = #tpu.pipeline_mode<synchronous>, transform_indices = @transform_4, window_bounds = array<i64: 128, 128>}, {pipeline_mode = #tpu.pipeline_mode<synchronous>, transform_indices = @transform_5, window_bounds = array<i64: 1, 128>}, {pipeline_mode = #tpu.pipeline_mode<synchronous>, transform_indices = @transform_6, window_bounds = array<i64: 1, 128>}, {pipeline_mode = #tpu.pipeline_mode<synchronous>, transform_indices = @transform_7, window_bounds = array<i64: 1, 128>}, {pipeline_mode = #tpu.pipeline_mode<synchronous>, transform_indices = @transform_8, window_bounds = array<i64: 128, 256>}, {pipeline_mode = #tpu.pipeline_mode<synchronous>, transform_indices = @transform_9, window_bounds = array<i64: 1, 256>}, {pipeline_mode = #tpu.pipeline_mode<synchronous>, transform_indices = @transform_10, window_bounds = array<i64: 256, 128>}, {pipeline_mode = #tpu.pipeline_mode<synchronous>, transform_indices = @transform_11, window_bounds = array<i64: 1, 128>}, {pipeline_mode = #tpu.pipeline_mode<synchronous>, transform_indices = @transform_12, window_bounds = array<i64: 1, 128>}, {pipeline_mode = #tpu.pipeline_mode<synchronous>, transform_indices = @transform_13, window_bounds = array<i64: 1, 128>}, {pipeline_mode = #tpu.pipeline_mode<synchronous>, transform_indices = @transform_14, window_bounds = array<i64: 128, 256>}, {pipeline_mode = #tpu.pipeline_mode<synchronous>, transform_indices = @transform_15, window_bounds = array<i64: 1, 256>}, {pipeline_mode = #tpu.pipeline_mode<synchronous>, transform_indices = @transform_16, window_bounds = array<i64: 256, 128>}, {pipeline_mode = #tpu.pipeline_mode<synchronous>, transform_indices = @transform_17, window_bounds = array<i64: 1, 128>}, {pipeline_mode = #tpu.pipeline_mode<synchronous>, transform_indices = @transform_18, window_bounds = array<i64: 1, 128>}, {pipeline_mode = #tpu.pipeline_mode<synchronous>, transform_indices = @transform_19, window_bounds = array<i64: 1, 128>}, {transform_indices = @transform_20, window_bounds = array<i64: 1, 14, 128>}]} {
    %c0 = arith.constant 0 : index
    %c0_0 = arith.constant 0 : index
    %c0_1 = arith.constant 0 : index
    %0 = vector.load %arg1[%c0, %c0_0, %c0_1] : memref<1x14x128xf32, #tpu.memory_space<vmem>>, vector<1x14x128xf32>
    %1 = vector.shape_cast %0 : vector<1x14x128xf32> to vector<14x128xf32>
    %c0_2 = arith.constant 0 : index
    %c0_3 = arith.constant 0 : index
    %c0_4 = arith.constant 0 : index
    %2 = vector.load %arg2[%c0_2, %c0_3, %c0_4] : memref<1x1x14xi32, #tpu.memory_space<vmem>>, vector<1x1x14xi32>
    %3 = vector.shape_cast %2 : vector<1x1x14xi32> to vector<1x14xi32>
    %c0_i32 = arith.constant 0 : i32
    %4 = vector.broadcast %c0_i32 : i32 to vector<1x14xi32>
    %5 = arith.cmpi sgt, %3, %4 : vector<1x14xi32>
    %cst = arith.constant 0.000000e+00 : f32
    %cst_5 = arith.constant -1.000000e+09 : f32
    %6 = vector.broadcast %cst : f32 to vector<1x14xf32>
    %7 = vector.broadcast %cst_5 : f32 to vector<1x14xf32>
    %8 = arith.select %5, %6, %7 : vector<1x14xi1>, vector<1x14xf32>
    %c0_6 = arith.constant 0 : index
    %c0_7 = arith.constant 0 : index
    %9 = vector.load %arg3[%c0_6, %c0_7] : memref<128x384xbf16, #tpu.memory_space<vmem>>, vector<128x384xbf16>
    %10 = arith.truncf %1 : vector<14x128xf32> to vector<14x128xbf16>
    %cst_8 = arith.constant dense<0.000000e+00> : vector<14x384xf32>
    %11 = tpu.matmul %10, %9, %cst_8 {dimension_numbers = #tpu.dot_dimension_numbers<[1], [0], [0], [1], [0, 0, 1, 1], [], []>} : vector<14x128xbf16>, vector<128x384xbf16>, vector<14x384xf32> -> vector<14x384xf32>
    %c0_9 = arith.constant 0 : index
    %c0_10 = arith.constant 0 : index
    %12 = vector.load %arg4[%c0_9, %c0_10] : memref<1x384xf32, #tpu.memory_space<vmem>>, vector<1x384xf32>
    %13 = vector.broadcast %12 : vector<1x384xf32> to vector<14x384xf32>
    %14 = arith.addf %11, %13 : vector<14x384xf32>
    %15 = vector.extract_strided_slice %14 {offsets = [0, 0], sizes = [14, 128], strides = [1, 1]} : vector<14x384xf32> to vector<14x128xf32>
    %cst_11 = arith.constant 0.176776692 : f32
    %16 = vector.broadcast %cst_11 : f32 to vector<14x128xf32>
    %17 = arith.mulf %15, %16 : vector<14x128xf32>
    %18 = vector.extract_strided_slice %14 {offsets = [0, 128], sizes = [14, 128], strides = [1, 1]} : vector<14x384xf32> to vector<14x128xf32>
    %19 = vector.extract_strided_slice %14 {offsets = [0, 256], sizes = [14, 128], strides = [1, 1]} : vector<14x384xf32> to vector<14x128xf32>
    %20 = vector.extract_strided_slice %17 {offsets = [0, 0], sizes = [14, 32], strides = [1, 1]} : vector<14x128xf32> to vector<14x32xf32>
    %21 = arith.truncf %20 : vector<14x32xf32> to vector<14x32xbf16>
    %22 = vector.extract_strided_slice %18 {offsets = [0, 0], sizes = [14, 32], strides = [1, 1]} : vector<14x128xf32> to vector<14x32xf32>
    %23 = arith.truncf %22 : vector<14x32xf32> to vector<14x32xbf16>
    %24 = vector.extract_strided_slice %19 {offsets = [0, 0], sizes = [14, 32], strides = [1, 1]} : vector<14x128xf32> to vector<14x32xf32>
    %25 = arith.truncf %24 : vector<14x32xf32> to vector<14x32xbf16>
    %cst_12 = arith.constant dense<0.000000e+00> : vector<14x14xf32>
    %26 = tpu.matmul %21, %23, %cst_12 {dimension_numbers = #tpu.dot_dimension_numbers<[1], [1], [0], [0], [0, 0, 1, 0], [], []>} : vector<14x32xbf16>, vector<14x32xbf16>, vector<14x14xf32> -> vector<14x14xf32>
    %27 = vector.broadcast %8 : vector<1x14xf32> to vector<14x14xf32>
    %28 = arith.addf %26, %27 : vector<14x14xf32>
    %cst_13 = arith.constant dense<0xFF800000> : vector<14xf32>
    %29 = vector.multi_reduction <maximumf>, %28, %cst_13 [1] : vector<14x14xf32> to vector<14xf32>
    %30 = vector.shape_cast %29 : vector<14xf32> to vector<14x1xf32>
    %31 = vector.broadcast %30 : vector<14x1xf32> to vector<14x14xf32>
    %32 = arith.subf %28, %31 : vector<14x14xf32>
    %33 = math.exp %32 : vector<14x14xf32>
    %cst_14 = arith.constant dense<0.000000e+00> : vector<14xf32>
    %34 = vector.multi_reduction <add>, %33, %cst_14 [1] : vector<14x14xf32> to vector<14xf32>
    %35 = vector.shape_cast %34 : vector<14xf32> to vector<14x1xf32>
    %36 = tpu.reciprocal %35 {approx = true} : vector<14x1xf32> -> vector<14x1xf32>
    %37 = vector.broadcast %36 : vector<14x1xf32> to vector<14x14xf32>
    %38 = arith.mulf %33, %37 : vector<14x14xf32>
    %39 = arith.truncf %38 : vector<14x14xf32> to vector<14x14xbf16>
    %cst_15 = arith.constant dense<0.000000e+00> : vector<14x32xf32>
    %40 = tpu.matmul %39, %25, %cst_15 {dimension_numbers = #tpu.dot_dimension_numbers<[1], [0], [0], [1], [0, 0, 1, 1], [], []>} : vector<14x14xbf16>, vector<14x32xbf16>, vector<14x32xf32> -> vector<14x32xf32>
    %41 = vector.extract_strided_slice %17 {offsets = [0, 32], sizes = [14, 32], strides = [1, 1]} : vector<14x128xf32> to vector<14x32xf32>
    %42 = arith.truncf %41 : vector<14x32xf32> to vector<14x32xbf16>
    %43 = vector.extract_strided_slice %18 {offsets = [0, 32], sizes = [14, 32], strides = [1, 1]} : vector<14x128xf32> to vector<14x32xf32>
    %44 = arith.truncf %43 : vector<14x32xf32> to vector<14x32xbf16>
    %45 = vector.extract_strided_slice %19 {offsets = [0, 32], sizes = [14, 32], strides = [1, 1]} : vector<14x128xf32> to vector<14x32xf32>
    %46 = arith.truncf %45 : vector<14x32xf32> to vector<14x32xbf16>
    %cst_16 = arith.constant dense<0.000000e+00> : vector<14x14xf32>
    %47 = tpu.matmul %42, %44, %cst_16 {dimension_numbers = #tpu.dot_dimension_numbers<[1], [1], [0], [0], [0, 0, 1, 0], [], []>} : vector<14x32xbf16>, vector<14x32xbf16>, vector<14x14xf32> -> vector<14x14xf32>
    %48 = vector.broadcast %8 : vector<1x14xf32> to vector<14x14xf32>
    %49 = arith.addf %47, %48 : vector<14x14xf32>
    %cst_17 = arith.constant dense<0xFF800000> : vector<14xf32>
    %50 = vector.multi_reduction <maximumf>, %49, %cst_17 [1] : vector<14x14xf32> to vector<14xf32>
    %51 = vector.shape_cast %50 : vector<14xf32> to vector<14x1xf32>
    %52 = vector.broadcast %51 : vector<14x1xf32> to vector<14x14xf32>
    %53 = arith.subf %49, %52 : vector<14x14xf32>
    %54 = math.exp %53 : vector<14x14xf32>
    %cst_18 = arith.constant dense<0.000000e+00> : vector<14xf32>
    %55 = vector.multi_reduction <add>, %54, %cst_18 [1] : vector<14x14xf32> to vector<14xf32>
    %56 = vector.shape_cast %55 : vector<14xf32> to vector<14x1xf32>
    %57 = tpu.reciprocal %56 {approx = true} : vector<14x1xf32> -> vector<14x1xf32>
    %58 = vector.broadcast %57 : vector<14x1xf32> to vector<14x14xf32>
    %59 = arith.mulf %54, %58 : vector<14x14xf32>
    %60 = arith.truncf %59 : vector<14x14xf32> to vector<14x14xbf16>
    %cst_19 = arith.constant dense<0.000000e+00> : vector<14x32xf32>
    %61 = tpu.matmul %60, %46, %cst_19 {dimension_numbers = #tpu.dot_dimension_numbers<[1], [0], [0], [1], [0, 0, 1, 1], [], []>} : vector<14x14xbf16>, vector<14x32xbf16>, vector<14x32xf32> -> vector<14x32xf32>
    %62 = vector.extract_strided_slice %17 {offsets = [0, 64], sizes = [14, 32], strides = [1, 1]} : vector<14x128xf32> to vector<14x32xf32>
    %63 = arith.truncf %62 : vector<14x32xf32> to vector<14x32xbf16>
    %64 = vector.extract_strided_slice %18 {offsets = [0, 64], sizes = [14, 32], strides = [1, 1]} : vector<14x128xf32> to vector<14x32xf32>
    %65 = arith.truncf %64 : vector<14x32xf32> to vector<14x32xbf16>
    %66 = vector.extract_strided_slice %19 {offsets = [0, 64], sizes = [14, 32], strides = [1, 1]} : vector<14x128xf32> to vector<14x32xf32>
    %67 = arith.truncf %66 : vector<14x32xf32> to vector<14x32xbf16>
    %cst_20 = arith.constant dense<0.000000e+00> : vector<14x14xf32>
    %68 = tpu.matmul %63, %65, %cst_20 {dimension_numbers = #tpu.dot_dimension_numbers<[1], [1], [0], [0], [0, 0, 1, 0], [], []>} : vector<14x32xbf16>, vector<14x32xbf16>, vector<14x14xf32> -> vector<14x14xf32>
    %69 = vector.broadcast %8 : vector<1x14xf32> to vector<14x14xf32>
    %70 = arith.addf %68, %69 : vector<14x14xf32>
    %cst_21 = arith.constant dense<0xFF800000> : vector<14xf32>
    %71 = vector.multi_reduction <maximumf>, %70, %cst_21 [1] : vector<14x14xf32> to vector<14xf32>
    %72 = vector.shape_cast %71 : vector<14xf32> to vector<14x1xf32>
    %73 = vector.broadcast %72 : vector<14x1xf32> to vector<14x14xf32>
    %74 = arith.subf %70, %73 : vector<14x14xf32>
    %75 = math.exp %74 : vector<14x14xf32>
    %cst_22 = arith.constant dense<0.000000e+00> : vector<14xf32>
    %76 = vector.multi_reduction <add>, %75, %cst_22 [1] : vector<14x14xf32> to vector<14xf32>
    %77 = vector.shape_cast %76 : vector<14xf32> to vector<14x1xf32>
    %78 = tpu.reciprocal %77 {approx = true} : vector<14x1xf32> -> vector<14x1xf32>
    %79 = vector.broadcast %78 : vector<14x1xf32> to vector<14x14xf32>
    %80 = arith.mulf %75, %79 : vector<14x14xf32>
    %81 = arith.truncf %80 : vector<14x14xf32> to vector<14x14xbf16>
    %cst_23 = arith.constant dense<0.000000e+00> : vector<14x32xf32>
    %82 = tpu.matmul %81, %67, %cst_23 {dimension_numbers = #tpu.dot_dimension_numbers<[1], [0], [0], [1], [0, 0, 1, 1], [], []>} : vector<14x14xbf16>, vector<14x32xbf16>, vector<14x32xf32> -> vector<14x32xf32>
    %83 = vector.extract_strided_slice %17 {offsets = [0, 96], sizes = [14, 32], strides = [1, 1]} : vector<14x128xf32> to vector<14x32xf32>
    %84 = arith.truncf %83 : vector<14x32xf32> to vector<14x32xbf16>
    %85 = vector.extract_strided_slice %18 {offsets = [0, 96], sizes = [14, 32], strides = [1, 1]} : vector<14x128xf32> to vector<14x32xf32>
    %86 = arith.truncf %85 : vector<14x32xf32> to vector<14x32xbf16>
    %87 = vector.extract_strided_slice %19 {offsets = [0, 96], sizes = [14, 32], strides = [1, 1]} : vector<14x128xf32> to vector<14x32xf32>
    %88 = arith.truncf %87 : vector<14x32xf32> to vector<14x32xbf16>
    %cst_24 = arith.constant dense<0.000000e+00> : vector<14x14xf32>
    %89 = tpu.matmul %84, %86, %cst_24 {dimension_numbers = #tpu.dot_dimension_numbers<[1], [1], [0], [0], [0, 0, 1, 0], [], []>} : vector<14x32xbf16>, vector<14x32xbf16>, vector<14x14xf32> -> vector<14x14xf32>
    %90 = vector.broadcast %8 : vector<1x14xf32> to vector<14x14xf32>
    %91 = arith.addf %89, %90 : vector<14x14xf32>
    %cst_25 = arith.constant dense<0xFF800000> : vector<14xf32>
    %92 = vector.multi_reduction <maximumf>, %91, %cst_25 [1] : vector<14x14xf32> to vector<14xf32>
    %93 = vector.shape_cast %92 : vector<14xf32> to vector<14x1xf32>
    %94 = vector.broadcast %93 : vector<14x1xf32> to vector<14x14xf32>
    %95 = arith.subf %91, %94 : vector<14x14xf32>
    %96 = math.exp %95 : vector<14x14xf32>
    %cst_26 = arith.constant dense<0.000000e+00> : vector<14xf32>
    %97 = vector.multi_reduction <add>, %96, %cst_26 [1] : vector<14x14xf32> to vector<14xf32>
    %98 = vector.shape_cast %97 : vector<14xf32> to vector<14x1xf32>
    %99 = tpu.reciprocal %98 {approx = true} : vector<14x1xf32> -> vector<14x1xf32>
    %100 = vector.broadcast %99 : vector<14x1xf32> to vector<14x14xf32>
    %101 = arith.mulf %96, %100 : vector<14x14xf32>
    %102 = arith.truncf %101 : vector<14x14xf32> to vector<14x14xbf16>
    %cst_27 = arith.constant dense<0.000000e+00> : vector<14x32xf32>
    %103 = tpu.matmul %102, %88, %cst_27 {dimension_numbers = #tpu.dot_dimension_numbers<[1], [0], [0], [1], [0, 0, 1, 1], [], []>} : vector<14x14xbf16>, vector<14x32xbf16>, vector<14x32xf32> -> vector<14x32xf32>
    %104 = tpu.concatenate %40, %61, %82, %103 in 1 : vector<14x32xf32>, vector<14x32xf32>, vector<14x32xf32>, vector<14x32xf32> -> vector<14x128xf32>
    %c0_28 = arith.constant 0 : index
    %c0_29 = arith.constant 0 : index
    %105 = vector.load %arg5[%c0_28, %c0_29] : memref<128x128xbf16, #tpu.memory_space<vmem>>, vector<128x128xbf16>
    %106 = arith.truncf %104 : vector<14x128xf32> to vector<14x128xbf16>
    %cst_30 = arith.constant dense<0.000000e+00> : vector<14x128xf32>
    %107 = tpu.matmul %106, %105, %cst_30 {dimension_numbers = #tpu.dot_dimension_numbers<[1], [0], [0], [1], [0, 0, 1, 1], [], []>} : vector<14x128xbf16>, vector<128x128xbf16>, vector<14x128xf32> -> vector<14x128xf32>
    %108 = arith.addf %1, %107 : vector<14x128xf32>
    %c0_31 = arith.constant 0 : index
    %c0_32 = arith.constant 0 : index
    %109 = vector.load %arg6[%c0_31, %c0_32] : memref<1x128xf32, #tpu.memory_space<vmem>>, vector<1x128xf32>
    %110 = vector.broadcast %109 : vector<1x128xf32> to vector<14x128xf32>
    %111 = arith.addf %108, %110 : vector<14x128xf32>
    %c0_33 = arith.constant 0 : index
    %c0_34 = arith.constant 0 : index
    %112 = vector.load %arg7[%c0_33, %c0_34] : memref<1x128xf32, #tpu.memory_space<vmem>>, vector<1x128xf32>
    %c0_35 = arith.constant 0 : index
    %c0_36 = arith.constant 0 : index
    %113 = vector.load %arg8[%c0_35, %c0_36] : memref<1x128xf32, #tpu.memory_space<vmem>>, vector<1x128xf32>
    %cst_37 = arith.constant dense<0.000000e+00> : vector<14xf32>
    %114 = vector.multi_reduction <add>, %111, %cst_37 [1] : vector<14x128xf32> to vector<14xf32>
    %115 = vector.shape_cast %114 : vector<14xf32> to vector<14x1xf32>
    %cst_38 = arith.constant 1.280000e+02 : f32
    %116 = vector.broadcast %cst_38 : f32 to vector<14x1xf32>
    %117 = arith.divf %115, %116 : vector<14x1xf32>
    %118 = vector.broadcast %117 : vector<14x1xf32> to vector<14x128xf32>
    %119 = arith.subf %111, %118 : vector<14x128xf32>
    %120 = arith.mulf %119, %119 : vector<14x128xf32>
    %cst_39 = arith.constant dense<0.000000e+00> : vector<14xf32>
    %121 = vector.multi_reduction <add>, %120, %cst_39 [1] : vector<14x128xf32> to vector<14xf32>
    %122 = vector.shape_cast %121 : vector<14xf32> to vector<14x1xf32>
    %cst_40 = arith.constant 1.280000e+02 : f32
    %123 = vector.broadcast %cst_40 : f32 to vector<14x1xf32>
    %124 = arith.divf %122, %123 : vector<14x1xf32>
    %125 = vector.broadcast %117 : vector<14x1xf32> to vector<14x128xf32>
    %126 = arith.subf %111, %125 : vector<14x128xf32>
    %cst_41 = arith.constant 9.99999974E-6 : f32
    %127 = vector.broadcast %cst_41 : f32 to vector<14x1xf32>
    %128 = arith.addf %124, %127 : vector<14x1xf32>
    %129 = math.rsqrt %128 : vector<14x1xf32>
    %130 = vector.broadcast %129 : vector<14x1xf32> to vector<14x128xf32>
    %131 = arith.mulf %126, %130 : vector<14x128xf32>
    %132 = vector.broadcast %112 : vector<1x128xf32> to vector<14x128xf32>
    %133 = arith.mulf %131, %132 : vector<14x128xf32>
    %134 = vector.broadcast %113 : vector<1x128xf32> to vector<14x128xf32>
    %135 = arith.addf %133, %134 : vector<14x128xf32>
    %136 = vector.extract_strided_slice %135 {offsets = [0, 0], sizes = [8, 128], strides = [1, 1]} : vector<14x128xf32> to vector<8x128xf32>
    %137 = vector.extract_strided_slice %135 {offsets = [8, 0], sizes = [6, 128], strides = [1, 1]} : vector<14x128xf32> to vector<6x128xf32>
    %c0_42 = arith.constant 0 : index
    %c0_43 = arith.constant 0 : index
    %138 = vector.load %arg9[%c0_42, %c0_43] : memref<128x256xbf16, #tpu.memory_space<vmem>>, vector<128x256xbf16>
    %139 = arith.truncf %136 : vector<8x128xf32> to vector<8x128xbf16>
    %cst_44 = arith.constant dense<0.000000e+00> : vector<8x256xf32>
    %140 = tpu.matmul %139, %138, %cst_44 {dimension_numbers = #tpu.dot_dimension_numbers<[1], [0], [0], [1], [0, 0, 1, 1], [], []>} : vector<8x128xbf16>, vector<128x256xbf16>, vector<8x256xf32> -> vector<8x256xf32>
    %c0_45 = arith.constant 0 : index
    %c0_46 = arith.constant 0 : index
    %141 = vector.load %arg10[%c0_45, %c0_46] : memref<1x256xf32, #tpu.memory_space<vmem>>, vector<1x256xf32>
    %142 = vector.broadcast %141 : vector<1x256xf32> to vector<8x256xf32>
    %143 = arith.addf %140, %142 : vector<8x256xf32>
    %cst_47 = arith.constant 5.000000e-01 : f32
    %144 = vector.broadcast %cst_47 : f32 to vector<8x256xf32>
    %145 = arith.mulf %144, %143 : vector<8x256xf32>
    %cst_48 = arith.constant 4.471500e-02 : f32
    %146 = vector.broadcast %cst_48 : f32 to vector<8x256xf32>
    %147 = arith.mulf %146, %143 : vector<8x256xf32>
    %148 = arith.mulf %147, %143 : vector<8x256xf32>
    %149 = arith.mulf %148, %143 : vector<8x256xf32>
    %150 = arith.addf %143, %149 : vector<8x256xf32>
    %cst_49 = arith.constant 0.797884583 : f32
    %151 = vector.broadcast %cst_49 : f32 to vector<8x256xf32>
    %152 = arith.mulf %151, %150 : vector<8x256xf32>
    %153 = math.tanh %152 : vector<8x256xf32>
    %cst_50 = arith.constant 1.000000e+00 : f32
    %154 = vector.broadcast %cst_50 : f32 to vector<8x256xf32>
    %155 = arith.addf %154, %153 : vector<8x256xf32>
    %156 = arith.mulf %145, %155 : vector<8x256xf32>
    %c0_51 = arith.constant 0 : index
    %c0_52 = arith.constant 0 : index
    %157 = vector.load %arg11[%c0_51, %c0_52] : memref<256x128xbf16, #tpu.memory_space<vmem>>, vector<256x128xbf16>
    %158 = arith.truncf %156 : vector<8x256xf32> to vector<8x256xbf16>
    %cst_53 = arith.constant dense<0.000000e+00> : vector<8x128xf32>
    %159 = tpu.matmul %158, %157, %cst_53 {dimension_numbers = #tpu.dot_dimension_numbers<[1], [0], [0], [1], [0, 0, 1, 1], [], []>} : vector<8x256xbf16>, vector<256x128xbf16>, vector<8x128xf32> -> vector<8x128xf32>
    %160 = arith.addf %136, %159 : vector<8x128xf32>
    %c0_54 = arith.constant 0 : index
    %c0_55 = arith.constant 0 : index
    %161 = vector.load %arg12[%c0_54, %c0_55] : memref<1x128xf32, #tpu.memory_space<vmem>>, vector<1x128xf32>
    %162 = vector.broadcast %161 : vector<1x128xf32> to vector<8x128xf32>
    %163 = arith.addf %160, %162 : vector<8x128xf32>
    %c0_56 = arith.constant 0 : index
    %c0_57 = arith.constant 0 : index
    %164 = vector.load %arg13[%c0_56, %c0_57] : memref<1x128xf32, #tpu.memory_space<vmem>>, vector<1x128xf32>
    %c0_58 = arith.constant 0 : index
    %c0_59 = arith.constant 0 : index
    %165 = vector.load %arg14[%c0_58, %c0_59] : memref<1x128xf32, #tpu.memory_space<vmem>>, vector<1x128xf32>
    %cst_60 = arith.constant dense<0.000000e+00> : vector<8xf32>
    %166 = vector.multi_reduction <add>, %163, %cst_60 [1] : vector<8x128xf32> to vector<8xf32>
    %167 = vector.shape_cast %166 : vector<8xf32> to vector<8x1xf32>
    %cst_61 = arith.constant 1.280000e+02 : f32
    %168 = vector.broadcast %cst_61 : f32 to vector<8x1xf32>
    %169 = arith.divf %167, %168 : vector<8x1xf32>
    %170 = vector.broadcast %169 : vector<8x1xf32> to vector<8x128xf32>
    %171 = arith.subf %163, %170 : vector<8x128xf32>
    %172 = arith.mulf %171, %171 : vector<8x128xf32>
    %cst_62 = arith.constant dense<0.000000e+00> : vector<8xf32>
    %173 = vector.multi_reduction <add>, %172, %cst_62 [1] : vector<8x128xf32> to vector<8xf32>
    %174 = vector.shape_cast %173 : vector<8xf32> to vector<8x1xf32>
    %cst_63 = arith.constant 1.280000e+02 : f32
    %175 = vector.broadcast %cst_63 : f32 to vector<8x1xf32>
    %176 = arith.divf %174, %175 : vector<8x1xf32>
    %177 = vector.broadcast %169 : vector<8x1xf32> to vector<8x128xf32>
    %178 = arith.subf %163, %177 : vector<8x128xf32>
    %cst_64 = arith.constant 9.99999974E-6 : f32
    %179 = vector.broadcast %cst_64 : f32 to vector<8x1xf32>
    %180 = arith.addf %176, %179 : vector<8x1xf32>
    %181 = math.rsqrt %180 : vector<8x1xf32>
    %182 = vector.broadcast %181 : vector<8x1xf32> to vector<8x128xf32>
    %183 = arith.mulf %178, %182 : vector<8x128xf32>
    %184 = vector.broadcast %164 : vector<1x128xf32> to vector<8x128xf32>
    %185 = arith.mulf %183, %184 : vector<8x128xf32>
    %186 = vector.broadcast %165 : vector<1x128xf32> to vector<8x128xf32>
    %187 = arith.addf %185, %186 : vector<8x128xf32>
    %c0_65 = arith.constant 0 : index
    %c0_66 = arith.constant 0 : index
    %188 = vector.load %arg15[%c0_65, %c0_66] : memref<128x256xbf16, #tpu.memory_space<vmem>>, vector<128x256xbf16>
    %189 = arith.truncf %137 : vector<6x128xf32> to vector<6x128xbf16>
    %cst_67 = arith.constant dense<0.000000e+00> : vector<6x256xf32>
    %190 = tpu.matmul %189, %188, %cst_67 {dimension_numbers = #tpu.dot_dimension_numbers<[1], [0], [0], [1], [0, 0, 1, 1], [], []>} : vector<6x128xbf16>, vector<128x256xbf16>, vector<6x256xf32> -> vector<6x256xf32>
    %c0_68 = arith.constant 0 : index
    %c0_69 = arith.constant 0 : index
    %191 = vector.load %arg16[%c0_68, %c0_69] : memref<1x256xf32, #tpu.memory_space<vmem>>, vector<1x256xf32>
    %192 = vector.broadcast %191 : vector<1x256xf32> to vector<6x256xf32>
    %193 = arith.addf %190, %192 : vector<6x256xf32>
    %cst_70 = arith.constant 5.000000e-01 : f32
    %194 = vector.broadcast %cst_70 : f32 to vector<6x256xf32>
    %195 = arith.mulf %194, %193 : vector<6x256xf32>
    %cst_71 = arith.constant 4.471500e-02 : f32
    %196 = vector.broadcast %cst_71 : f32 to vector<6x256xf32>
    %197 = arith.mulf %196, %193 : vector<6x256xf32>
    %198 = arith.mulf %197, %193 : vector<6x256xf32>
    %199 = arith.mulf %198, %193 : vector<6x256xf32>
    %200 = arith.addf %193, %199 : vector<6x256xf32>
    %cst_72 = arith.constant 0.797884583 : f32
    %201 = vector.broadcast %cst_72 : f32 to vector<6x256xf32>
    %202 = arith.mulf %201, %200 : vector<6x256xf32>
    %203 = math.tanh %202 : vector<6x256xf32>
    %cst_73 = arith.constant 1.000000e+00 : f32
    %204 = vector.broadcast %cst_73 : f32 to vector<6x256xf32>
    %205 = arith.addf %204, %203 : vector<6x256xf32>
    %206 = arith.mulf %195, %205 : vector<6x256xf32>
    %c0_74 = arith.constant 0 : index
    %c0_75 = arith.constant 0 : index
    %207 = vector.load %arg17[%c0_74, %c0_75] : memref<256x128xbf16, #tpu.memory_space<vmem>>, vector<256x128xbf16>
    %208 = arith.truncf %206 : vector<6x256xf32> to vector<6x256xbf16>
    %cst_76 = arith.constant dense<0.000000e+00> : vector<6x128xf32>
    %209 = tpu.matmul %208, %207, %cst_76 {dimension_numbers = #tpu.dot_dimension_numbers<[1], [0], [0], [1], [0, 0, 1, 1], [], []>} : vector<6x256xbf16>, vector<256x128xbf16>, vector<6x128xf32> -> vector<6x128xf32>
    %210 = arith.addf %137, %209 : vector<6x128xf32>
    %c0_77 = arith.constant 0 : index
    %c0_78 = arith.constant 0 : index
    %211 = vector.load %arg18[%c0_77, %c0_78] : memref<1x128xf32, #tpu.memory_space<vmem>>, vector<1x128xf32>
    %212 = vector.broadcast %211 : vector<1x128xf32> to vector<6x128xf32>
    %213 = arith.addf %210, %212 : vector<6x128xf32>
    %c0_79 = arith.constant 0 : index
    %c0_80 = arith.constant 0 : index
    %214 = vector.load %arg19[%c0_79, %c0_80] : memref<1x128xf32, #tpu.memory_space<vmem>>, vector<1x128xf32>
    %c0_81 = arith.constant 0 : index
    %c0_82 = arith.constant 0 : index
    %215 = vector.load %arg20[%c0_81, %c0_82] : memref<1x128xf32, #tpu.memory_space<vmem>>, vector<1x128xf32>
    %cst_83 = arith.constant dense<0.000000e+00> : vector<6xf32>
    %216 = vector.multi_reduction <add>, %213, %cst_83 [1] : vector<6x128xf32> to vector<6xf32>
    %217 = vector.shape_cast %216 : vector<6xf32> to vector<6x1xf32>
    %cst_84 = arith.constant 1.280000e+02 : f32
    %218 = vector.broadcast %cst_84 : f32 to vector<6x1xf32>
    %219 = arith.divf %217, %218 : vector<6x1xf32>
    %220 = vector.broadcast %219 : vector<6x1xf32> to vector<6x128xf32>
    %221 = arith.subf %213, %220 : vector<6x128xf32>
    %222 = arith.mulf %221, %221 : vector<6x128xf32>
    %cst_85 = arith.constant dense<0.000000e+00> : vector<6xf32>
    %223 = vector.multi_reduction <add>, %222, %cst_85 [1] : vector<6x128xf32> to vector<6xf32>
    %224 = vector.shape_cast %223 : vector<6xf32> to vector<6x1xf32>
    %cst_86 = arith.constant 1.280000e+02 : f32
    %225 = vector.broadcast %cst_86 : f32 to vector<6x1xf32>
    %226 = arith.divf %224, %225 : vector<6x1xf32>
    %227 = vector.broadcast %219 : vector<6x1xf32> to vector<6x128xf32>
    %228 = arith.subf %213, %227 : vector<6x128xf32>
    %cst_87 = arith.constant 9.99999974E-6 : f32
    %229 = vector.broadcast %cst_87 : f32 to vector<6x1xf32>
    %230 = arith.addf %226, %229 : vector<6x1xf32>
    %231 = math.rsqrt %230 : vector<6x1xf32>
    %232 = vector.broadcast %231 : vector<6x1xf32> to vector<6x128xf32>
    %233 = arith.mulf %228, %232 : vector<6x128xf32>
    %234 = vector.broadcast %214 : vector<1x128xf32> to vector<6x128xf32>
    %235 = arith.mulf %233, %234 : vector<6x128xf32>
    %236 = vector.broadcast %215 : vector<1x128xf32> to vector<6x128xf32>
    %237 = arith.addf %235, %236 : vector<6x128xf32>
    %238 = tpu.concatenate %187, %237 in 0 : vector<8x128xf32>, vector<6x128xf32> -> vector<14x128xf32>
    %c0_88 = arith.constant 0 : index
    %c0_89 = arith.constant 0 : index
    %c0_90 = arith.constant 0 : index
    %239 = vector.load %arg21[%c0_88, %c0_89, %c0_90] : memref<1x14x128xf32, #tpu.memory_space<vmem>>, vector<1x14x128xf32>
    %240 = vector.shape_cast %239 : vector<1x14x128xf32> to vector<14x128xf32>
    %241 = vector.shape_cast %238 : vector<14x128xf32> to vector<1x14x128xf32>
    tpu.vector_store %arg21[%c0_88, %c0_89, %c0_90], %241 {strides = array<i32>} : memref<1x14x128xf32, #tpu.memory_space<vmem>>, vector<1x14x128xf32>,
    return
  }
  func.func @transform_0(%arg0: i32) -> (i32, i32, i32) {
    %c0_i32 = arith.constant 0 : i32
    %c0_i32_0 = arith.constant 0 : i32
    %c0_i32_1 = arith.constant 0 : i32
    return %arg0, %c0_i32, %c0_i32_0 : i32, i32, i32
  }
  func.func @transform_1(%arg0: i32) -> (i32, i32, i32) {
    %c0_i32 = arith.constant 0 : i32
    %c0_i32_0 = arith.constant 0 : i32
    %c0_i32_1 = arith.constant 0 : i32
    return %arg0, %c0_i32, %c0_i32_0 : i32, i32, i32
  }
  func.func @transform_2(%arg0: i32) -> (i32, i32) {
    %c0_i32 = arith.constant 0 : i32
    %c0_i32_0 = arith.constant 0 : i32
    %c0_i32_1 = arith.constant 0 : i32
    return %c0_i32, %c0_i32_0 : i32, i32
  }
  func.func @transform_3(%arg0: i32) -> (i32, i32) {
    %c0_i32 = arith.constant 0 : i32
    %c0_i32_0 = arith.constant 0 : i32
    %c0_i32_1 = arith.constant 0 : i32
    return %c0_i32, %c0_i32_0 : i32, i32
  }
  func.func @transform_4(%arg0: i32) -> (i32, i32) {
    %c0_i32 = arith.constant 0 : i32
    %c0_i32_0 = arith.constant 0 : i32
    %c0_i32_1 = arith.constant 0 : i32
    return %c0_i32, %c0_i32_0 : i32, i32
  }
  func.func @transform_5(%arg0: i32) -> (i32, i32) {
    %c0_i32 = arith.constant 0 : i32
    %c0_i32_0 = arith.constant 0 : i32
    %c0_i32_1 = arith.constant 0 : i32
    return %c0_i32, %c0_i32_0 : i32, i32
  }
  func.func @transform_6(%arg0: i32) -> (i32, i32) {
    %c0_i32 = arith.constant 0 : i32
    %c0_i32_0 = arith.constant 0 : i32
    %c0_i32_1 = arith.constant 0 : i32
    return %c0_i32, %c0_i32_0 : i32, i32
  }
  func.func @transform_7(%arg0: i32) -> (i32, i32) {
    %c0_i32 = arith.constant 0 : i32
    %c0_i32_0 = arith.constant 0 : i32
    %c0_i32_1 = arith.constant 0 : i32
    return %c0_i32, %c0_i32_0 : i32, i32
  }
  func.func @transform_8(%arg0: i32) -> (i32, i32) {
    %c0_i32 = arith.constant 0 : i32
    %c0_i32_0 = arith.constant 0 : i32
    %c0_i32_1 = arith.constant 0 : i32
    return %c0_i32, %c0_i32_0 : i32, i32
  }
  func.func @transform_9(%arg0: i32) -> (i32, i32) {
    %c0_i32 = arith.constant 0 : i32
    %c0_i32_0 = arith.constant 0 : i32
    %c0_i32_1 = arith.constant 0 : i32
    return %c0_i32, %c0_i32_0 : i32, i32
  }
  func.func @transform_10(%arg0: i32) -> (i32, i32) {
    %c0_i32 = arith.constant 0 : i32
    %c0_i32_0 = arith.constant 0 : i32
    %c0_i32_1 = arith.constant 0 : i32
    return %c0_i32, %c0_i32_0 : i32, i32
  }
  func.func @transform_11(%arg0: i32) -> (i32, i32) {
    %c0_i32 = arith.constant 0 : i32
    %c0_i32_0 = arith.constant 0 : i32
    %c0_i32_1 = arith.constant 0 : i32
    return %c0_i32, %c0_i32_0 : i32, i32
  }
  func.func @transform_12(%arg0: i32) -> (i32, i32) {
    %c0_i32 = arith.constant 0 : i32
    %c0_i32_0 = arith.constant 0 : i32
    %c0_i32_1 = arith.constant 0 : i32
    return %c0_i32, %c0_i32_0 : i32, i32
  }
  func.func @transform_13(%arg0: i32) -> (i32, i32) {
    %c0_i32 = arith.constant 0 : i32
    %c0_i32_0 = arith.constant 0 : i32
    %c0_i32_1 = arith.constant 0 : i32
    return %c0_i32, %c0_i32_0 : i32, i32
  }
  func.func @transform_14(%arg0: i32) -> (i32, i32) {
    %c0_i32 = arith.constant 0 : i32
    %c0_i32_0 = arith.constant 0 : i32
    %c0_i32_1 = arith.constant 0 : i32
    return %c0_i32, %c0_i32_0 : i32, i32
  }
  func.func @transform_15(%arg0: i32) -> (i32, i32) {
    %c0_i32 = arith.constant 0 : i32
    %c0_i32_0 = arith.constant 0 : i32
    %c0_i32_1 = arith.constant 0 : i32
    return %c0_i32, %c0_i32_0 : i32, i32
  }
  func.func @transform_16(%arg0: i32) -> (i32, i32) {
    %c0_i32 = arith.constant 0 : i32
    %c0_i32_0 = arith.constant 0 : i32
    %c0_i32_1 = arith.constant 0 : i32
    return %c0_i32, %c0_i32_0 : i32, i32
  }
  func.func @transform_17(%arg0: i32) -> (i32, i32) {
    %c0_i32 = arith.constant 0 : i32
    %c0_i32_0 = arith.constant 0 : i32
    %c0_i32_1 = arith.constant 0 : i32
    return %c0_i32, %c0_i32_0 : i32, i32
  }
  func.func @transform_18(%arg0: i32) -> (i32, i32) {
    %c0_i32 = arith.constant 0 : i32
    %c0_i32_0 = arith.constant 0 : i32
    %c0_i32_1 = arith.constant 0 : i32
    return %c0_i32, %c0_i32_0 : i32, i32
  }
  func.func @transform_19(%arg0: i32) -> (i32, i32) {
    %c0_i32 = arith.constant 0 : i32
    %c0_i32_0 = arith.constant 0 : i32
    %c0_i32_1 = arith.constant 0 : i32
    return %c0_i32, %c0_i32_0 : i32, i32
  }
  func.func @transform_20(%arg0: i32) -> (i32, i32, i32) {
    %c0_i32 = arith.constant 0 : i32
    %c0_i32_0 = arith.constant 0 : i32
    %c0_i32_1 = arith.constant 0 : i32
    return %arg0, %c0_i32, %c0_i32_0 : i32, i32, i32
  }
}

module attributes {stable_mosaic.version = 11 : i64} {
  func.func @kernel(%arg0: i32, %arg1: memref<1x14x128xf32, #tpu.memory_space<vmem>>, %arg2: memref<1x1x14xi32, #tpu.memory_space<vmem>>, %arg3: memref<1x5x128xf32, #tpu.memory_space<vmem>>, %arg4: memref<128x384xbf16, #tpu.memory_space<vmem>>, %arg5: memref<1x384xf32, #tpu.memory_space<vmem>>, %arg6: memref<128x128xbf16, #tpu.memory_space<vmem>>, %arg7: memref<1x128xf32, #tpu.memory_space<vmem>>, %arg8: memref<1x128xf32, #tpu.memory_space<vmem>>, %arg9: memref<1x128xf32, #tpu.memory_space<vmem>>, %arg10: memref<128x128xbf16, #tpu.memory_space<vmem>>, %arg11: memref<1x128xf32, #tpu.memory_space<vmem>>, %arg12: memref<128x256xbf16, #tpu.memory_space<vmem>>, %arg13: memref<1x256xf32, #tpu.memory_space<vmem>>, %arg14: memref<128x128xbf16, #tpu.memory_space<vmem>>, %arg15: memref<1x128xf32, #tpu.memory_space<vmem>>, %arg16: memref<1x128xf32, #tpu.memory_space<vmem>>, %arg17: memref<1x128xf32, #tpu.memory_space<vmem>>, %arg18: memref<128x256xbf16, #tpu.memory_space<vmem>>, %arg19: memref<1x256xf32, #tpu.memory_space<vmem>>, %arg20: memref<256x128xbf16, #tpu.memory_space<vmem>>, %arg21: memref<1x128xf32, #tpu.memory_space<vmem>>, %arg22: memref<1x128xf32, #tpu.memory_space<vmem>>, %arg23: memref<1x128xf32, #tpu.memory_space<vmem>>, %arg24: memref<128x256xbf16, #tpu.memory_space<vmem>>, %arg25: memref<1x256xf32, #tpu.memory_space<vmem>>, %arg26: memref<256x128xbf16, #tpu.memory_space<vmem>>, %arg27: memref<1x128xf32, #tpu.memory_space<vmem>>, %arg28: memref<1x128xf32, #tpu.memory_space<vmem>>, %arg29: memref<1x128xf32, #tpu.memory_space<vmem>>, %arg30: memref<1x14x128xf32, #tpu.memory_space<vmem>>) attributes {dimension_semantics = [#tpu.dimension_semantics<parallel>], iteration_bounds = array<i64: 2>, scalar_prefetch = 0 : i64, scratch_operands = 0 : i64, tpu.core_type = #tpu.core_type<tc>, window_params = [{transform_indices = @transform_0, window_bounds = array<i64: 1, 14, 128>}, {transform_indices = @transform_1, window_bounds = array<i64: 1, 1, 14>}, {transform_indices = @transform_2, window_bounds = array<i64: 1, 5, 128>}, {pipeline_mode = #tpu.pipeline_mode<synchronous>, transform_indices = @transform_3, window_bounds = array<i64: 128, 384>}, {pipeline_mode = #tpu.pipeline_mode<synchronous>, transform_indices = @transform_4, window_bounds = array<i64: 1, 384>}, {pipeline_mode = #tpu.pipeline_mode<synchronous>, transform_indices = @transform_5, window_bounds = array<i64: 128, 128>}, {pipeline_mode = #tpu.pipeline_mode<synchronous>, transform_indices = @transform_6, window_bounds = array<i64: 1, 128>}, {pipeline_mode = #tpu.pipeline_mode<synchronous>, transform_indices = @transform_7, window_bounds = array<i64: 1, 128>}, {pipeline_mode = #tpu.pipeline_mode<synchronous>, transform_indices = @transform_8, window_bounds = array<i64: 1, 128>}, {pipeline_mode = #tpu.pipeline_mode<synchronous>, transform_indices = @transform_9, window_bounds = array<i64: 128, 128>}, {pipeline_mode = #tpu.pipeline_mode<synchronous>, transform_indices = @transform_10, window_bounds = array<i64: 1, 128>}, {pipeline_mode = #tpu.pipeline_mode<synchronous>, transform_indices = @transform_11, window_bounds = array<i64: 128, 256>}, {pipeline_mode = #tpu.pipeline_mode<synchronous>, transform_indices = @transform_12, window_bounds = array<i64: 1, 256>}, {pipeline_mode = #tpu.pipeline_mode<synchronous>, transform_indices = @transform_13, window_bounds = array<i64: 128, 128>}, {pipeline_mode = #tpu.pipeline_mode<synchronous>, transform_indices = @transform_14, window_bounds = array<i64: 1, 128>}, {pipeline_mode = #tpu.pipeline_mode<synchronous>, transform_indices = @transform_15, window_bounds = array<i64: 1, 128>}, {pipeline_mode = #tpu.pipeline_mode<synchronous>, transform_indices = @transform_16, window_bounds = array<i64: 1, 128>}, {pipeline_mode = #tpu.pipeline_mode<synchronous>, transform_indices = @transform_17, window_bounds = array<i64: 128, 256>}, {pipeline_mode = #tpu.pipeline_mode<synchronous>, transform_indices = @transform_18, window_bounds = array<i64: 1, 256>}, {pipeline_mode = #tpu.pipeline_mode<synchronous>, transform_indices = @transform_19, window_bounds = array<i64: 256, 128>}, {pipeline_mode = #tpu.pipeline_mode<synchronous>, transform_indices = @transform_20, window_bounds = array<i64: 1, 128>}, {pipeline_mode = #tpu.pipeline_mode<synchronous>, transform_indices = @transform_21, window_bounds = array<i64: 1, 128>}, {pipeline_mode = #tpu.pipeline_mode<synchronous>, transform_indices = @transform_22, window_bounds = array<i64: 1, 128>}, {pipeline_mode = #tpu.pipeline_mode<synchronous>, transform_indices = @transform_23, window_bounds = array<i64: 128, 256>}, {pipeline_mode = #tpu.pipeline_mode<synchronous>, transform_indices = @transform_24, window_bounds = array<i64: 1, 256>}, {pipeline_mode = #tpu.pipeline_mode<synchronous>, transform_indices = @transform_25, window_bounds = array<i64: 256, 128>}, {pipeline_mode = #tpu.pipeline_mode<synchronous>, transform_indices = @transform_26, window_bounds = array<i64: 1, 128>}, {pipeline_mode = #tpu.pipeline_mode<synchronous>, transform_indices = @transform_27, window_bounds = array<i64: 1, 128>}, {pipeline_mode = #tpu.pipeline_mode<synchronous>, transform_indices = @transform_28, window_bounds = array<i64: 1, 128>}, {transform_indices = @transform_29, window_bounds = array<i64: 1, 14, 128>}]} {
    %c0 = arith.constant 0 : index
    %c0_0 = arith.constant 0 : index
    %c0_1 = arith.constant 0 : index
    %0 = vector.load %arg1[%c0, %c0_0, %c0_1] : memref<1x14x128xf32, #tpu.memory_space<vmem>>, vector<1x14x128xf32>
    %1 = vector.shape_cast %0 : vector<1x14x128xf32> to vector<14x128xf32>
    %c0_2 = arith.constant 0 : index
    %c0_3 = arith.constant 0 : index
    %c0_4 = arith.constant 0 : index
    %2 = vector.load %arg2[%c0_2, %c0_3, %c0_4] : memref<1x1x14xi32, #tpu.memory_space<vmem>>, vector<1x1x14xi32>
    %3 = vector.shape_cast %2 : vector<1x1x14xi32> to vector<1x14xi32>
    %c0_i32 = arith.constant 0 : i32
    %4 = vector.broadcast %c0_i32 : i32 to vector<1x14xi32>
    %5 = arith.cmpi sgt, %3, %4 : vector<1x14xi32>
    %cst = arith.constant 0.000000e+00 : f32
    %cst_5 = arith.constant -1.000000e+09 : f32
    %6 = vector.broadcast %cst : f32 to vector<1x14xf32>
    %7 = vector.broadcast %cst_5 : f32 to vector<1x14xf32>
    %8 = arith.select %5, %6, %7 : vector<1x14xi1>, vector<1x14xf32>
    %c0_6 = arith.constant 0 : index
    %c0_7 = arith.constant 0 : index
    %9 = vector.load %arg4[%c0_6, %c0_7] : memref<128x384xbf16, #tpu.memory_space<vmem>>, vector<128x384xbf16>
    %10 = arith.truncf %1 : vector<14x128xf32> to vector<14x128xbf16>
    %cst_8 = arith.constant dense<0.000000e+00> : vector<14x384xf32>
    %11 = tpu.matmul %10, %9, %cst_8 {dimension_numbers = #tpu.dot_dimension_numbers<[1], [0], [0], [1], [0, 0, 1, 1], [], []>} : vector<14x128xbf16>, vector<128x384xbf16>, vector<14x384xf32> -> vector<14x384xf32>
    %c0_9 = arith.constant 0 : index
    %c0_10 = arith.constant 0 : index
    %12 = vector.load %arg5[%c0_9, %c0_10] : memref<1x384xf32, #tpu.memory_space<vmem>>, vector<1x384xf32>
    %13 = vector.broadcast %12 : vector<1x384xf32> to vector<14x384xf32>
    %14 = arith.addf %11, %13 : vector<14x384xf32>
    %15 = vector.extract_strided_slice %14 {offsets = [0, 0], sizes = [14, 128], strides = [1, 1]} : vector<14x384xf32> to vector<14x128xf32>
    %cst_11 = arith.constant 0.176776692 : f32
    %16 = vector.broadcast %cst_11 : f32 to vector<14x128xf32>
    %17 = arith.mulf %15, %16 : vector<14x128xf32>
    %18 = vector.extract_strided_slice %14 {offsets = [0, 128], sizes = [14, 128], strides = [1, 1]} : vector<14x384xf32> to vector<14x128xf32>
    %19 = vector.extract_strided_slice %14 {offsets = [0, 256], sizes = [14, 128], strides = [1, 1]} : vector<14x384xf32> to vector<14x128xf32>
    %20 = vector.extract_strided_slice %17 {offsets = [0, 0], sizes = [14, 32], strides = [1, 1]} : vector<14x128xf32> to vector<14x32xf32>
    %21 = arith.truncf %20 : vector<14x32xf32> to vector<14x32xbf16>
    %22 = vector.extract_strided_slice %18 {offsets = [0, 0], sizes = [14, 32], strides = [1, 1]} : vector<14x128xf32> to vector<14x32xf32>
    %23 = arith.truncf %22 : vector<14x32xf32> to vector<14x32xbf16>
    %24 = vector.extract_strided_slice %19 {offsets = [0, 0], sizes = [14, 32], strides = [1, 1]} : vector<14x128xf32> to vector<14x32xf32>
    %25 = arith.truncf %24 : vector<14x32xf32> to vector<14x32xbf16>
    %cst_12 = arith.constant dense<0.000000e+00> : vector<14x14xf32>
    %26 = tpu.matmul %21, %23, %cst_12 {dimension_numbers = #tpu.dot_dimension_numbers<[1], [1], [0], [0], [0, 0, 1, 0], [], []>} : vector<14x32xbf16>, vector<14x32xbf16>, vector<14x14xf32> -> vector<14x14xf32>
    %27 = vector.broadcast %8 : vector<1x14xf32> to vector<14x14xf32>
    %28 = arith.addf %26, %27 : vector<14x14xf32>
    %cst_13 = arith.constant dense<0xFF800000> : vector<14xf32>
    %29 = vector.multi_reduction <maximumf>, %28, %cst_13 [1] : vector<14x14xf32> to vector<14xf32>
    %30 = vector.shape_cast %29 : vector<14xf32> to vector<14x1xf32>
    %31 = vector.broadcast %30 : vector<14x1xf32> to vector<14x14xf32>
    %32 = arith.subf %28, %31 : vector<14x14xf32>
    %33 = math.exp %32 : vector<14x14xf32>
    %cst_14 = arith.constant dense<0.000000e+00> : vector<14xf32>
    %34 = vector.multi_reduction <add>, %33, %cst_14 [1] : vector<14x14xf32> to vector<14xf32>
    %35 = vector.shape_cast %34 : vector<14xf32> to vector<14x1xf32>
    %36 = tpu.reciprocal %35 {approx = true} : vector<14x1xf32> -> vector<14x1xf32>
    %37 = vector.broadcast %36 : vector<14x1xf32> to vector<14x14xf32>
    %38 = arith.mulf %33, %37 : vector<14x14xf32>
    %39 = arith.truncf %38 : vector<14x14xf32> to vector<14x14xbf16>
    %cst_15 = arith.constant dense<0.000000e+00> : vector<14x32xf32>
    %40 = tpu.matmul %39, %25, %cst_15 {dimension_numbers = #tpu.dot_dimension_numbers<[1], [0], [0], [1], [0, 0, 1, 1], [], []>} : vector<14x14xbf16>, vector<14x32xbf16>, vector<14x32xf32> -> vector<14x32xf32>
    %41 = vector.extract_strided_slice %17 {offsets = [0, 32], sizes = [14, 32], strides = [1, 1]} : vector<14x128xf32> to vector<14x32xf32>
    %42 = arith.truncf %41 : vector<14x32xf32> to vector<14x32xbf16>
    %43 = vector.extract_strided_slice %18 {offsets = [0, 32], sizes = [14, 32], strides = [1, 1]} : vector<14x128xf32> to vector<14x32xf32>
    %44 = arith.truncf %43 : vector<14x32xf32> to vector<14x32xbf16>
    %45 = vector.extract_strided_slice %19 {offsets = [0, 32], sizes = [14, 32], strides = [1, 1]} : vector<14x128xf32> to vector<14x32xf32>
    %46 = arith.truncf %45 : vector<14x32xf32> to vector<14x32xbf16>
    %cst_16 = arith.constant dense<0.000000e+00> : vector<14x14xf32>
    %47 = tpu.matmul %42, %44, %cst_16 {dimension_numbers = #tpu.dot_dimension_numbers<[1], [1], [0], [0], [0, 0, 1, 0], [], []>} : vector<14x32xbf16>, vector<14x32xbf16>, vector<14x14xf32> -> vector<14x14xf32>
    %48 = vector.broadcast %8 : vector<1x14xf32> to vector<14x14xf32>
    %49 = arith.addf %47, %48 : vector<14x14xf32>
    %cst_17 = arith.constant dense<0xFF800000> : vector<14xf32>
    %50 = vector.multi_reduction <maximumf>, %49, %cst_17 [1] : vector<14x14xf32> to vector<14xf32>
    %51 = vector.shape_cast %50 : vector<14xf32> to vector<14x1xf32>
    %52 = vector.broadcast %51 : vector<14x1xf32> to vector<14x14xf32>
    %53 = arith.subf %49, %52 : vector<14x14xf32>
    %54 = math.exp %53 : vector<14x14xf32>
    %cst_18 = arith.constant dense<0.000000e+00> : vector<14xf32>
    %55 = vector.multi_reduction <add>, %54, %cst_18 [1] : vector<14x14xf32> to vector<14xf32>
    %56 = vector.shape_cast %55 : vector<14xf32> to vector<14x1xf32>
    %57 = tpu.reciprocal %56 {approx = true} : vector<14x1xf32> -> vector<14x1xf32>
    %58 = vector.broadcast %57 : vector<14x1xf32> to vector<14x14xf32>
    %59 = arith.mulf %54, %58 : vector<14x14xf32>
    %60 = arith.truncf %59 : vector<14x14xf32> to vector<14x14xbf16>
    %cst_19 = arith.constant dense<0.000000e+00> : vector<14x32xf32>
    %61 = tpu.matmul %60, %46, %cst_19 {dimension_numbers = #tpu.dot_dimension_numbers<[1], [0], [0], [1], [0, 0, 1, 1], [], []>} : vector<14x14xbf16>, vector<14x32xbf16>, vector<14x32xf32> -> vector<14x32xf32>
    %62 = vector.extract_strided_slice %17 {offsets = [0, 64], sizes = [14, 32], strides = [1, 1]} : vector<14x128xf32> to vector<14x32xf32>
    %63 = arith.truncf %62 : vector<14x32xf32> to vector<14x32xbf16>
    %64 = vector.extract_strided_slice %18 {offsets = [0, 64], sizes = [14, 32], strides = [1, 1]} : vector<14x128xf32> to vector<14x32xf32>
    %65 = arith.truncf %64 : vector<14x32xf32> to vector<14x32xbf16>
    %66 = vector.extract_strided_slice %19 {offsets = [0, 64], sizes = [14, 32], strides = [1, 1]} : vector<14x128xf32> to vector<14x32xf32>
    %67 = arith.truncf %66 : vector<14x32xf32> to vector<14x32xbf16>
    %cst_20 = arith.constant dense<0.000000e+00> : vector<14x14xf32>
    %68 = tpu.matmul %63, %65, %cst_20 {dimension_numbers = #tpu.dot_dimension_numbers<[1], [1], [0], [0], [0, 0, 1, 0], [], []>} : vector<14x32xbf16>, vector<14x32xbf16>, vector<14x14xf32> -> vector<14x14xf32>
    %69 = vector.broadcast %8 : vector<1x14xf32> to vector<14x14xf32>
    %70 = arith.addf %68, %69 : vector<14x14xf32>
    %cst_21 = arith.constant dense<0xFF800000> : vector<14xf32>
    %71 = vector.multi_reduction <maximumf>, %70, %cst_21 [1] : vector<14x14xf32> to vector<14xf32>
    %72 = vector.shape_cast %71 : vector<14xf32> to vector<14x1xf32>
    %73 = vector.broadcast %72 : vector<14x1xf32> to vector<14x14xf32>
    %74 = arith.subf %70, %73 : vector<14x14xf32>
    %75 = math.exp %74 : vector<14x14xf32>
    %cst_22 = arith.constant dense<0.000000e+00> : vector<14xf32>
    %76 = vector.multi_reduction <add>, %75, %cst_22 [1] : vector<14x14xf32> to vector<14xf32>
    %77 = vector.shape_cast %76 : vector<14xf32> to vector<14x1xf32>
    %78 = tpu.reciprocal %77 {approx = true} : vector<14x1xf32> -> vector<14x1xf32>
    %79 = vector.broadcast %78 : vector<14x1xf32> to vector<14x14xf32>
    %80 = arith.mulf %75, %79 : vector<14x14xf32>
    %81 = arith.truncf %80 : vector<14x14xf32> to vector<14x14xbf16>
    %cst_23 = arith.constant dense<0.000000e+00> : vector<14x32xf32>
    %82 = tpu.matmul %81, %67, %cst_23 {dimension_numbers = #tpu.dot_dimension_numbers<[1], [0], [0], [1], [0, 0, 1, 1], [], []>} : vector<14x14xbf16>, vector<14x32xbf16>, vector<14x32xf32> -> vector<14x32xf32>
    %83 = vector.extract_strided_slice %17 {offsets = [0, 96], sizes = [14, 32], strides = [1, 1]} : vector<14x128xf32> to vector<14x32xf32>
    %84 = arith.truncf %83 : vector<14x32xf32> to vector<14x32xbf16>
    %85 = vector.extract_strided_slice %18 {offsets = [0, 96], sizes = [14, 32], strides = [1, 1]} : vector<14x128xf32> to vector<14x32xf32>
    %86 = arith.truncf %85 : vector<14x32xf32> to vector<14x32xbf16>
    %87 = vector.extract_strided_slice %19 {offsets = [0, 96], sizes = [14, 32], strides = [1, 1]} : vector<14x128xf32> to vector<14x32xf32>
    %88 = arith.truncf %87 : vector<14x32xf32> to vector<14x32xbf16>
    %cst_24 = arith.constant dense<0.000000e+00> : vector<14x14xf32>
    %89 = tpu.matmul %84, %86, %cst_24 {dimension_numbers = #tpu.dot_dimension_numbers<[1], [1], [0], [0], [0, 0, 1, 0], [], []>} : vector<14x32xbf16>, vector<14x32xbf16>, vector<14x14xf32> -> vector<14x14xf32>
    %90 = vector.broadcast %8 : vector<1x14xf32> to vector<14x14xf32>
    %91 = arith.addf %89, %90 : vector<14x14xf32>
    %cst_25 = arith.constant dense<0xFF800000> : vector<14xf32>
    %92 = vector.multi_reduction <maximumf>, %91, %cst_25 [1] : vector<14x14xf32> to vector<14xf32>
    %93 = vector.shape_cast %92 : vector<14xf32> to vector<14x1xf32>
    %94 = vector.broadcast %93 : vector<14x1xf32> to vector<14x14xf32>
    %95 = arith.subf %91, %94 : vector<14x14xf32>
    %96 = math.exp %95 : vector<14x14xf32>
    %cst_26 = arith.constant dense<0.000000e+00> : vector<14xf32>
    %97 = vector.multi_reduction <add>, %96, %cst_26 [1] : vector<14x14xf32> to vector<14xf32>
    %98 = vector.shape_cast %97 : vector<14xf32> to vector<14x1xf32>
    %99 = tpu.reciprocal %98 {approx = true} : vector<14x1xf32> -> vector<14x1xf32>
    %100 = vector.broadcast %99 : vector<14x1xf32> to vector<14x14xf32>
    %101 = arith.mulf %96, %100 : vector<14x14xf32>
    %102 = arith.truncf %101 : vector<14x14xf32> to vector<14x14xbf16>
    %cst_27 = arith.constant dense<0.000000e+00> : vector<14x32xf32>
    %103 = tpu.matmul %102, %88, %cst_27 {dimension_numbers = #tpu.dot_dimension_numbers<[1], [0], [0], [1], [0, 0, 1, 1], [], []>} : vector<14x14xbf16>, vector<14x32xbf16>, vector<14x32xf32> -> vector<14x32xf32>
    %104 = tpu.concatenate %40, %61, %82, %103 in 1 : vector<14x32xf32>, vector<14x32xf32>, vector<14x32xf32>, vector<14x32xf32> -> vector<14x128xf32>
    %c0_28 = arith.constant 0 : index
    %c0_29 = arith.constant 0 : index
    %105 = vector.load %arg6[%c0_28, %c0_29] : memref<128x128xbf16, #tpu.memory_space<vmem>>, vector<128x128xbf16>
    %106 = arith.truncf %104 : vector<14x128xf32> to vector<14x128xbf16>
    %cst_30 = arith.constant dense<0.000000e+00> : vector<14x128xf32>
    %107 = tpu.matmul %106, %105, %cst_30 {dimension_numbers = #tpu.dot_dimension_numbers<[1], [0], [0], [1], [0, 0, 1, 1], [], []>} : vector<14x128xbf16>, vector<128x128xbf16>, vector<14x128xf32> -> vector<14x128xf32>
    %108 = arith.addf %1, %107 : vector<14x128xf32>
    %c0_31 = arith.constant 0 : index
    %c0_32 = arith.constant 0 : index
    %109 = vector.load %arg7[%c0_31, %c0_32] : memref<1x128xf32, #tpu.memory_space<vmem>>, vector<1x128xf32>
    %110 = vector.broadcast %109 : vector<1x128xf32> to vector<14x128xf32>
    %111 = arith.addf %108, %110 : vector<14x128xf32>
    %c0_33 = arith.constant 0 : index
    %c0_34 = arith.constant 0 : index
    %112 = vector.load %arg8[%c0_33, %c0_34] : memref<1x128xf32, #tpu.memory_space<vmem>>, vector<1x128xf32>
    %c0_35 = arith.constant 0 : index
    %c0_36 = arith.constant 0 : index
    %113 = vector.load %arg9[%c0_35, %c0_36] : memref<1x128xf32, #tpu.memory_space<vmem>>, vector<1x128xf32>
    %cst_37 = arith.constant dense<0.000000e+00> : vector<14xf32>
    %114 = vector.multi_reduction <add>, %111, %cst_37 [1] : vector<14x128xf32> to vector<14xf32>
    %115 = vector.shape_cast %114 : vector<14xf32> to vector<14x1xf32>
    %cst_38 = arith.constant 1.280000e+02 : f32
    %116 = vector.broadcast %cst_38 : f32 to vector<14x1xf32>
    %117 = arith.divf %115, %116 : vector<14x1xf32>
    %118 = vector.broadcast %117 : vector<14x1xf32> to vector<14x128xf32>
    %119 = arith.subf %111, %118 : vector<14x128xf32>
    %120 = arith.mulf %119, %119 : vector<14x128xf32>
    %cst_39 = arith.constant dense<0.000000e+00> : vector<14xf32>
    %121 = vector.multi_reduction <add>, %120, %cst_39 [1] : vector<14x128xf32> to vector<14xf32>
    %122 = vector.shape_cast %121 : vector<14xf32> to vector<14x1xf32>
    %cst_40 = arith.constant 1.280000e+02 : f32
    %123 = vector.broadcast %cst_40 : f32 to vector<14x1xf32>
    %124 = arith.divf %122, %123 : vector<14x1xf32>
    %125 = vector.broadcast %117 : vector<14x1xf32> to vector<14x128xf32>
    %126 = arith.subf %111, %125 : vector<14x128xf32>
    %cst_41 = arith.constant 9.99999974E-6 : f32
    %127 = vector.broadcast %cst_41 : f32 to vector<14x1xf32>
    %128 = arith.addf %124, %127 : vector<14x1xf32>
    %129 = math.rsqrt %128 : vector<14x1xf32>
    %130 = vector.broadcast %129 : vector<14x1xf32> to vector<14x128xf32>
    %131 = arith.mulf %126, %130 : vector<14x128xf32>
    %132 = vector.broadcast %112 : vector<1x128xf32> to vector<14x128xf32>
    %133 = arith.mulf %131, %132 : vector<14x128xf32>
    %134 = vector.broadcast %113 : vector<1x128xf32> to vector<14x128xf32>
    %135 = arith.addf %133, %134 : vector<14x128xf32>
    %136 = vector.extract_strided_slice %135 {offsets = [0, 0], sizes = [8, 128], strides = [1, 1]} : vector<14x128xf32> to vector<8x128xf32>
    %137 = vector.extract_strided_slice %135 {offsets = [8, 0], sizes = [6, 128], strides = [1, 1]} : vector<14x128xf32> to vector<6x128xf32>
    %c0_42 = arith.constant 0 : index
    %c0_43 = arith.constant 0 : index
    %c0_44 = arith.constant 0 : index
    %138 = vector.load %arg3[%c0_42, %c0_43, %c0_44] : memref<1x5x128xf32, #tpu.memory_space<vmem>>, vector<1x5x128xf32>
    %139 = vector.shape_cast %138 : vector<1x5x128xf32> to vector<5x128xf32>
    %c0_45 = arith.constant 0 : index
    %c0_46 = arith.constant 0 : index
    %140 = vector.load %arg10[%c0_45, %c0_46] : memref<128x128xbf16, #tpu.memory_space<vmem>>, vector<128x128xbf16>
    %141 = arith.truncf %136 : vector<8x128xf32> to vector<8x128xbf16>
    %cst_47 = arith.constant dense<0.000000e+00> : vector<8x128xf32>
    %142 = tpu.matmul %141, %140, %cst_47 {dimension_numbers = #tpu.dot_dimension_numbers<[1], [0], [0], [1], [0, 0, 1, 1], [], []>} : vector<8x128xbf16>, vector<128x128xbf16>, vector<8x128xf32> -> vector<8x128xf32>
    %c0_48 = arith.constant 0 : index
    %c0_49 = arith.constant 0 : index
    %143 = vector.load %arg11[%c0_48, %c0_49] : memref<1x128xf32, #tpu.memory_space<vmem>>, vector<1x128xf32>
    %144 = vector.broadcast %143 : vector<1x128xf32> to vector<8x128xf32>
    %145 = arith.addf %142, %144 : vector<8x128xf32>
    %cst_50 = arith.constant 0.176776692 : f32
    %146 = vector.broadcast %cst_50 : f32 to vector<8x128xf32>
    %147 = arith.mulf %145, %146 : vector<8x128xf32>
    %c0_51 = arith.constant 0 : index
    %c0_52 = arith.constant 0 : index
    %148 = vector.load %arg12[%c0_51, %c0_52] : memref<128x256xbf16, #tpu.memory_space<vmem>>, vector<128x256xbf16>
    %149 = arith.truncf %139 : vector<5x128xf32> to vector<5x128xbf16>
    %cst_53 = arith.constant dense<0.000000e+00> : vector<5x256xf32>
    %150 = tpu.matmul %149, %148, %cst_53 {dimension_numbers = #tpu.dot_dimension_numbers<[1], [0], [0], [1], [0, 0, 1, 1], [], []>} : vector<5x128xbf16>, vector<128x256xbf16>, vector<5x256xf32> -> vector<5x256xf32>
    %c0_54 = arith.constant 0 : index
    %c0_55 = arith.constant 0 : index
    %151 = vector.load %arg13[%c0_54, %c0_55] : memref<1x256xf32, #tpu.memory_space<vmem>>, vector<1x256xf32>
    %152 = vector.broadcast %151 : vector<1x256xf32> to vector<5x256xf32>
    %153 = arith.addf %150, %152 : vector<5x256xf32>
    %154 = vector.extract_strided_slice %153 {offsets = [0, 0], sizes = [5, 128], strides = [1, 1]} : vector<5x256xf32> to vector<5x128xf32>
    %155 = vector.extract_strided_slice %153 {offsets = [0, 128], sizes = [5, 128], strides = [1, 1]} : vector<5x256xf32> to vector<5x128xf32>
    %156 = vector.extract_strided_slice %147 {offsets = [0, 0], sizes = [8, 32], strides = [1, 1]} : vector<8x128xf32> to vector<8x32xf32>
    %157 = arith.truncf %156 : vector<8x32xf32> to vector<8x32xbf16>
    %158 = vector.extract_strided_slice %154 {offsets = [0, 0], sizes = [5, 32], strides = [1, 1]} : vector<5x128xf32> to vector<5x32xf32>
    %159 = arith.truncf %158 : vector<5x32xf32> to vector<5x32xbf16>
    %160 = vector.extract_strided_slice %155 {offsets = [0, 0], sizes = [5, 32], strides = [1, 1]} : vector<5x128xf32> to vector<5x32xf32>
    %161 = arith.truncf %160 : vector<5x32xf32> to vector<5x32xbf16>
    %cst_56 = arith.constant dense<0.000000e+00> : vector<8x5xf32>
    %162 = tpu.matmul %157, %159, %cst_56 {dimension_numbers = #tpu.dot_dimension_numbers<[1], [1], [0], [0], [0, 0, 1, 0], [], []>} : vector<8x32xbf16>, vector<5x32xbf16>, vector<8x5xf32> -> vector<8x5xf32>
    %cst_57 = arith.constant dense<0xFF800000> : vector<8xf32>
    %163 = vector.multi_reduction <maximumf>, %162, %cst_57 [1] : vector<8x5xf32> to vector<8xf32>
    %164 = vector.shape_cast %163 : vector<8xf32> to vector<8x1xf32>
    %165 = vector.broadcast %164 : vector<8x1xf32> to vector<8x5xf32>
    %166 = arith.subf %162, %165 : vector<8x5xf32>
    %167 = math.exp %166 : vector<8x5xf32>
    %cst_58 = arith.constant dense<0.000000e+00> : vector<8xf32>
    %168 = vector.multi_reduction <add>, %167, %cst_58 [1] : vector<8x5xf32> to vector<8xf32>
    %169 = vector.shape_cast %168 : vector<8xf32> to vector<8x1xf32>
    %170 = tpu.reciprocal %169 {approx = true} : vector<8x1xf32> -> vector<8x1xf32>
    %171 = vector.broadcast %170 : vector<8x1xf32> to vector<8x5xf32>
    %172 = arith.mulf %167, %171 : vector<8x5xf32>
    %173 = arith.truncf %172 : vector<8x5xf32> to vector<8x5xbf16>
    %cst_59 = arith.constant dense<0.000000e+00> : vector<8x32xf32>
    %174 = tpu.matmul %173, %161, %cst_59 {dimension_numbers = #tpu.dot_dimension_numbers<[1], [0], [0], [1], [0, 0, 1, 1], [], []>} : vector<8x5xbf16>, vector<5x32xbf16>, vector<8x32xf32> -> vector<8x32xf32>
    %175 = vector.extract_strided_slice %147 {offsets = [0, 32], sizes = [8, 32], strides = [1, 1]} : vector<8x128xf32> to vector<8x32xf32>
    %176 = arith.truncf %175 : vector<8x32xf32> to vector<8x32xbf16>
    %177 = vector.extract_strided_slice %154 {offsets = [0, 32], sizes = [5, 32], strides = [1, 1]} : vector<5x128xf32> to vector<5x32xf32>
    %178 = arith.truncf %177 : vector<5x32xf32> to vector<5x32xbf16>
    %179 = vector.extract_strided_slice %155 {offsets = [0, 32], sizes = [5, 32], strides = [1, 1]} : vector<5x128xf32> to vector<5x32xf32>
    %180 = arith.truncf %179 : vector<5x32xf32> to vector<5x32xbf16>
    %cst_60 = arith.constant dense<0.000000e+00> : vector<8x5xf32>
    %181 = tpu.matmul %176, %178, %cst_60 {dimension_numbers = #tpu.dot_dimension_numbers<[1], [1], [0], [0], [0, 0, 1, 0], [], []>} : vector<8x32xbf16>, vector<5x32xbf16>, vector<8x5xf32> -> vector<8x5xf32>
    %cst_61 = arith.constant dense<0xFF800000> : vector<8xf32>
    %182 = vector.multi_reduction <maximumf>, %181, %cst_61 [1] : vector<8x5xf32> to vector<8xf32>
    %183 = vector.shape_cast %182 : vector<8xf32> to vector<8x1xf32>
    %184 = vector.broadcast %183 : vector<8x1xf32> to vector<8x5xf32>
    %185 = arith.subf %181, %184 : vector<8x5xf32>
    %186 = math.exp %185 : vector<8x5xf32>
    %cst_62 = arith.constant dense<0.000000e+00> : vector<8xf32>
    %187 = vector.multi_reduction <add>, %186, %cst_62 [1] : vector<8x5xf32> to vector<8xf32>
    %188 = vector.shape_cast %187 : vector<8xf32> to vector<8x1xf32>
    %189 = tpu.reciprocal %188 {approx = true} : vector<8x1xf32> -> vector<8x1xf32>
    %190 = vector.broadcast %189 : vector<8x1xf32> to vector<8x5xf32>
    %191 = arith.mulf %186, %190 : vector<8x5xf32>
    %192 = arith.truncf %191 : vector<8x5xf32> to vector<8x5xbf16>
    %cst_63 = arith.constant dense<0.000000e+00> : vector<8x32xf32>
    %193 = tpu.matmul %192, %180, %cst_63 {dimension_numbers = #tpu.dot_dimension_numbers<[1], [0], [0], [1], [0, 0, 1, 1], [], []>} : vector<8x5xbf16>, vector<5x32xbf16>, vector<8x32xf32> -> vector<8x32xf32>
    %194 = vector.extract_strided_slice %147 {offsets = [0, 64], sizes = [8, 32], strides = [1, 1]} : vector<8x128xf32> to vector<8x32xf32>
    %195 = arith.truncf %194 : vector<8x32xf32> to vector<8x32xbf16>
    %196 = vector.extract_strided_slice %154 {offsets = [0, 64], sizes = [5, 32], strides = [1, 1]} : vector<5x128xf32> to vector<5x32xf32>
    %197 = arith.truncf %196 : vector<5x32xf32> to vector<5x32xbf16>
    %198 = vector.extract_strided_slice %155 {offsets = [0, 64], sizes = [5, 32], strides = [1, 1]} : vector<5x128xf32> to vector<5x32xf32>
    %199 = arith.truncf %198 : vector<5x32xf32> to vector<5x32xbf16>
    %cst_64 = arith.constant dense<0.000000e+00> : vector<8x5xf32>
    %200 = tpu.matmul %195, %197, %cst_64 {dimension_numbers = #tpu.dot_dimension_numbers<[1], [1], [0], [0], [0, 0, 1, 0], [], []>} : vector<8x32xbf16>, vector<5x32xbf16>, vector<8x5xf32> -> vector<8x5xf32>
    %cst_65 = arith.constant dense<0xFF800000> : vector<8xf32>
    %201 = vector.multi_reduction <maximumf>, %200, %cst_65 [1] : vector<8x5xf32> to vector<8xf32>
    %202 = vector.shape_cast %201 : vector<8xf32> to vector<8x1xf32>
    %203 = vector.broadcast %202 : vector<8x1xf32> to vector<8x5xf32>
    %204 = arith.subf %200, %203 : vector<8x5xf32>
    %205 = math.exp %204 : vector<8x5xf32>
    %cst_66 = arith.constant dense<0.000000e+00> : vector<8xf32>
    %206 = vector.multi_reduction <add>, %205, %cst_66 [1] : vector<8x5xf32> to vector<8xf32>
    %207 = vector.shape_cast %206 : vector<8xf32> to vector<8x1xf32>
    %208 = tpu.reciprocal %207 {approx = true} : vector<8x1xf32> -> vector<8x1xf32>
    %209 = vector.broadcast %208 : vector<8x1xf32> to vector<8x5xf32>
    %210 = arith.mulf %205, %209 : vector<8x5xf32>
    %211 = arith.truncf %210 : vector<8x5xf32> to vector<8x5xbf16>
    %cst_67 = arith.constant dense<0.000000e+00> : vector<8x32xf32>
    %212 = tpu.matmul %211, %199, %cst_67 {dimension_numbers = #tpu.dot_dimension_numbers<[1], [0], [0], [1], [0, 0, 1, 1], [], []>} : vector<8x5xbf16>, vector<5x32xbf16>, vector<8x32xf32> -> vector<8x32xf32>
    %213 = vector.extract_strided_slice %147 {offsets = [0, 96], sizes = [8, 32], strides = [1, 1]} : vector<8x128xf32> to vector<8x32xf32>
    %214 = arith.truncf %213 : vector<8x32xf32> to vector<8x32xbf16>
    %215 = vector.extract_strided_slice %154 {offsets = [0, 96], sizes = [5, 32], strides = [1, 1]} : vector<5x128xf32> to vector<5x32xf32>
    %216 = arith.truncf %215 : vector<5x32xf32> to vector<5x32xbf16>
    %217 = vector.extract_strided_slice %155 {offsets = [0, 96], sizes = [5, 32], strides = [1, 1]} : vector<5x128xf32> to vector<5x32xf32>
    %218 = arith.truncf %217 : vector<5x32xf32> to vector<5x32xbf16>
    %cst_68 = arith.constant dense<0.000000e+00> : vector<8x5xf32>
    %219 = tpu.matmul %214, %216, %cst_68 {dimension_numbers = #tpu.dot_dimension_numbers<[1], [1], [0], [0], [0, 0, 1, 0], [], []>} : vector<8x32xbf16>, vector<5x32xbf16>, vector<8x5xf32> -> vector<8x5xf32>
    %cst_69 = arith.constant dense<0xFF800000> : vector<8xf32>
    %220 = vector.multi_reduction <maximumf>, %219, %cst_69 [1] : vector<8x5xf32> to vector<8xf32>
    %221 = vector.shape_cast %220 : vector<8xf32> to vector<8x1xf32>
    %222 = vector.broadcast %221 : vector<8x1xf32> to vector<8x5xf32>
    %223 = arith.subf %219, %222 : vector<8x5xf32>
    %224 = math.exp %223 : vector<8x5xf32>
    %cst_70 = arith.constant dense<0.000000e+00> : vector<8xf32>
    %225 = vector.multi_reduction <add>, %224, %cst_70 [1] : vector<8x5xf32> to vector<8xf32>
    %226 = vector.shape_cast %225 : vector<8xf32> to vector<8x1xf32>
    %227 = tpu.reciprocal %226 {approx = true} : vector<8x1xf32> -> vector<8x1xf32>
    %228 = vector.broadcast %227 : vector<8x1xf32> to vector<8x5xf32>
    %229 = arith.mulf %224, %228 : vector<8x5xf32>
    %230 = arith.truncf %229 : vector<8x5xf32> to vector<8x5xbf16>
    %cst_71 = arith.constant dense<0.000000e+00> : vector<8x32xf32>
    %231 = tpu.matmul %230, %218, %cst_71 {dimension_numbers = #tpu.dot_dimension_numbers<[1], [0], [0], [1], [0, 0, 1, 1], [], []>} : vector<8x5xbf16>, vector<5x32xbf16>, vector<8x32xf32> -> vector<8x32xf32>
    %232 = tpu.concatenate %174, %193, %212, %231 in 1 : vector<8x32xf32>, vector<8x32xf32>, vector<8x32xf32>, vector<8x32xf32> -> vector<8x128xf32>
    %c0_72 = arith.constant 0 : index
    %c0_73 = arith.constant 0 : index
    %233 = vector.load %arg14[%c0_72, %c0_73] : memref<128x128xbf16, #tpu.memory_space<vmem>>, vector<128x128xbf16>
    %234 = arith.truncf %232 : vector<8x128xf32> to vector<8x128xbf16>
    %cst_74 = arith.constant dense<0.000000e+00> : vector<8x128xf32>
    %235 = tpu.matmul %234, %233, %cst_74 {dimension_numbers = #tpu.dot_dimension_numbers<[1], [0], [0], [1], [0, 0, 1, 1], [], []>} : vector<8x128xbf16>, vector<128x128xbf16>, vector<8x128xf32> -> vector<8x128xf32>
    %236 = arith.addf %136, %235 : vector<8x128xf32>
    %c0_75 = arith.constant 0 : index
    %c0_76 = arith.constant 0 : index
    %237 = vector.load %arg15[%c0_75, %c0_76] : memref<1x128xf32, #tpu.memory_space<vmem>>, vector<1x128xf32>
    %238 = vector.broadcast %237 : vector<1x128xf32> to vector<8x128xf32>
    %239 = arith.addf %236, %238 : vector<8x128xf32>
    %c0_77 = arith.constant 0 : index
    %c0_78 = arith.constant 0 : index
    %240 = vector.load %arg16[%c0_77, %c0_78] : memref<1x128xf32, #tpu.memory_space<vmem>>, vector<1x128xf32>
    %c0_79 = arith.constant 0 : index
    %c0_80 = arith.constant 0 : index
    %241 = vector.load %arg17[%c0_79, %c0_80] : memref<1x128xf32, #tpu.memory_space<vmem>>, vector<1x128xf32>
    %cst_81 = arith.constant dense<0.000000e+00> : vector<8xf32>
    %242 = vector.multi_reduction <add>, %239, %cst_81 [1] : vector<8x128xf32> to vector<8xf32>
    %243 = vector.shape_cast %242 : vector<8xf32> to vector<8x1xf32>
    %cst_82 = arith.constant 1.280000e+02 : f32
    %244 = vector.broadcast %cst_82 : f32 to vector<8x1xf32>
    %245 = arith.divf %243, %244 : vector<8x1xf32>
    %246 = vector.broadcast %245 : vector<8x1xf32> to vector<8x128xf32>
    %247 = arith.subf %239, %246 : vector<8x128xf32>
    %248 = arith.mulf %247, %247 : vector<8x128xf32>
    %cst_83 = arith.constant dense<0.000000e+00> : vector<8xf32>
    %249 = vector.multi_reduction <add>, %248, %cst_83 [1] : vector<8x128xf32> to vector<8xf32>
    %250 = vector.shape_cast %249 : vector<8xf32> to vector<8x1xf32>
    %cst_84 = arith.constant 1.280000e+02 : f32
    %251 = vector.broadcast %cst_84 : f32 to vector<8x1xf32>
    %252 = arith.divf %250, %251 : vector<8x1xf32>
    %253 = vector.broadcast %245 : vector<8x1xf32> to vector<8x128xf32>
    %254 = arith.subf %239, %253 : vector<8x128xf32>
    %cst_85 = arith.constant 9.99999974E-6 : f32
    %255 = vector.broadcast %cst_85 : f32 to vector<8x1xf32>
    %256 = arith.addf %252, %255 : vector<8x1xf32>
    %257 = math.rsqrt %256 : vector<8x1xf32>
    %258 = vector.broadcast %257 : vector<8x1xf32> to vector<8x128xf32>
    %259 = arith.mulf %254, %258 : vector<8x128xf32>
    %260 = vector.broadcast %240 : vector<1x128xf32> to vector<8x128xf32>
    %261 = arith.mulf %259, %260 : vector<8x128xf32>
    %262 = vector.broadcast %241 : vector<1x128xf32> to vector<8x128xf32>
    %263 = arith.addf %261, %262 : vector<8x128xf32>
    %c0_86 = arith.constant 0 : index
    %c0_87 = arith.constant 0 : index
    %264 = vector.load %arg18[%c0_86, %c0_87] : memref<128x256xbf16, #tpu.memory_space<vmem>>, vector<128x256xbf16>
    %265 = arith.truncf %263 : vector<8x128xf32> to vector<8x128xbf16>
    %cst_88 = arith.constant dense<0.000000e+00> : vector<8x256xf32>
    %266 = tpu.matmul %265, %264, %cst_88 {dimension_numbers = #tpu.dot_dimension_numbers<[1], [0], [0], [1], [0, 0, 1, 1], [], []>} : vector<8x128xbf16>, vector<128x256xbf16>, vector<8x256xf32> -> vector<8x256xf32>
    %c0_89 = arith.constant 0 : index
    %c0_90 = arith.constant 0 : index
    %267 = vector.load %arg19[%c0_89, %c0_90] : memref<1x256xf32, #tpu.memory_space<vmem>>, vector<1x256xf32>
    %268 = vector.broadcast %267 : vector<1x256xf32> to vector<8x256xf32>
    %269 = arith.addf %266, %268 : vector<8x256xf32>
    %cst_91 = arith.constant 5.000000e-01 : f32
    %270 = vector.broadcast %cst_91 : f32 to vector<8x256xf32>
    %271 = arith.mulf %270, %269 : vector<8x256xf32>
    %cst_92 = arith.constant 4.471500e-02 : f32
    %272 = vector.broadcast %cst_92 : f32 to vector<8x256xf32>
    %273 = arith.mulf %272, %269 : vector<8x256xf32>
    %274 = arith.mulf %273, %269 : vector<8x256xf32>
    %275 = arith.mulf %274, %269 : vector<8x256xf32>
    %276 = arith.addf %269, %275 : vector<8x256xf32>
    %cst_93 = arith.constant 0.797884583 : f32
    %277 = vector.broadcast %cst_93 : f32 to vector<8x256xf32>
    %278 = arith.mulf %277, %276 : vector<8x256xf32>
    %279 = math.tanh %278 : vector<8x256xf32>
    %cst_94 = arith.constant 1.000000e+00 : f32
    %280 = vector.broadcast %cst_94 : f32 to vector<8x256xf32>
    %281 = arith.addf %280, %279 : vector<8x256xf32>
    %282 = arith.mulf %271, %281 : vector<8x256xf32>
    %c0_95 = arith.constant 0 : index
    %c0_96 = arith.constant 0 : index
    %283 = vector.load %arg20[%c0_95, %c0_96] : memref<256x128xbf16, #tpu.memory_space<vmem>>, vector<256x128xbf16>
    %284 = arith.truncf %282 : vector<8x256xf32> to vector<8x256xbf16>
    %cst_97 = arith.constant dense<0.000000e+00> : vector<8x128xf32>
    %285 = tpu.matmul %284, %283, %cst_97 {dimension_numbers = #tpu.dot_dimension_numbers<[1], [0], [0], [1], [0, 0, 1, 1], [], []>} : vector<8x256xbf16>, vector<256x128xbf16>, vector<8x128xf32> -> vector<8x128xf32>
    %286 = arith.addf %263, %285 : vector<8x128xf32>
    %c0_98 = arith.constant 0 : index
    %c0_99 = arith.constant 0 : index
    %287 = vector.load %arg21[%c0_98, %c0_99] : memref<1x128xf32, #tpu.memory_space<vmem>>, vector<1x128xf32>
    %288 = vector.broadcast %287 : vector<1x128xf32> to vector<8x128xf32>
    %289 = arith.addf %286, %288 : vector<8x128xf32>
    %c0_100 = arith.constant 0 : index
    %c0_101 = arith.constant 0 : index
    %290 = vector.load %arg22[%c0_100, %c0_101] : memref<1x128xf32, #tpu.memory_space<vmem>>, vector<1x128xf32>
    %c0_102 = arith.constant 0 : index
    %c0_103 = arith.constant 0 : index
    %291 = vector.load %arg23[%c0_102, %c0_103] : memref<1x128xf32, #tpu.memory_space<vmem>>, vector<1x128xf32>
    %cst_104 = arith.constant dense<0.000000e+00> : vector<8xf32>
    %292 = vector.multi_reduction <add>, %289, %cst_104 [1] : vector<8x128xf32> to vector<8xf32>
    %293 = vector.shape_cast %292 : vector<8xf32> to vector<8x1xf32>
    %cst_105 = arith.constant 1.280000e+02 : f32
    %294 = vector.broadcast %cst_105 : f32 to vector<8x1xf32>
    %295 = arith.divf %293, %294 : vector<8x1xf32>
    %296 = vector.broadcast %295 : vector<8x1xf32> to vector<8x128xf32>
    %297 = arith.subf %289, %296 : vector<8x128xf32>
    %298 = arith.mulf %297, %297 : vector<8x128xf32>
    %cst_106 = arith.constant dense<0.000000e+00> : vector<8xf32>
    %299 = vector.multi_reduction <add>, %298, %cst_106 [1] : vector<8x128xf32> to vector<8xf32>
    %300 = vector.shape_cast %299 : vector<8xf32> to vector<8x1xf32>
    %cst_107 = arith.constant 1.280000e+02 : f32
    %301 = vector.broadcast %cst_107 : f32 to vector<8x1xf32>
    %302 = arith.divf %300, %301 : vector<8x1xf32>
    %303 = vector.broadcast %295 : vector<8x1xf32> to vector<8x128xf32>
    %304 = arith.subf %289, %303 : vector<8x128xf32>
    %cst_108 = arith.constant 9.99999974E-6 : f32
    %305 = vector.broadcast %cst_108 : f32 to vector<8x1xf32>
    %306 = arith.addf %302, %305 : vector<8x1xf32>
    %307 = math.rsqrt %306 : vector<8x1xf32>
    %308 = vector.broadcast %307 : vector<8x1xf32> to vector<8x128xf32>
    %309 = arith.mulf %304, %308 : vector<8x128xf32>
    %310 = vector.broadcast %290 : vector<1x128xf32> to vector<8x128xf32>
    %311 = arith.mulf %309, %310 : vector<8x128xf32>
    %312 = vector.broadcast %291 : vector<1x128xf32> to vector<8x128xf32>
    %313 = arith.addf %311, %312 : vector<8x128xf32>
    %c0_109 = arith.constant 0 : index
    %c0_110 = arith.constant 0 : index
    %314 = vector.load %arg24[%c0_109, %c0_110] : memref<128x256xbf16, #tpu.memory_space<vmem>>, vector<128x256xbf16>
    %315 = arith.truncf %137 : vector<6x128xf32> to vector<6x128xbf16>
    %cst_111 = arith.constant dense<0.000000e+00> : vector<6x256xf32>
    %316 = tpu.matmul %315, %314, %cst_111 {dimension_numbers = #tpu.dot_dimension_numbers<[1], [0], [0], [1], [0, 0, 1, 1], [], []>} : vector<6x128xbf16>, vector<128x256xbf16>, vector<6x256xf32> -> vector<6x256xf32>
    %c0_112 = arith.constant 0 : index
    %c0_113 = arith.constant 0 : index
    %317 = vector.load %arg25[%c0_112, %c0_113] : memref<1x256xf32, #tpu.memory_space<vmem>>, vector<1x256xf32>
    %318 = vector.broadcast %317 : vector<1x256xf32> to vector<6x256xf32>
    %319 = arith.addf %316, %318 : vector<6x256xf32>
    %cst_114 = arith.constant 5.000000e-01 : f32
    %320 = vector.broadcast %cst_114 : f32 to vector<6x256xf32>
    %321 = arith.mulf %320, %319 : vector<6x256xf32>
    %cst_115 = arith.constant 4.471500e-02 : f32
    %322 = vector.broadcast %cst_115 : f32 to vector<6x256xf32>
    %323 = arith.mulf %322, %319 : vector<6x256xf32>
    %324 = arith.mulf %323, %319 : vector<6x256xf32>
    %325 = arith.mulf %324, %319 : vector<6x256xf32>
    %326 = arith.addf %319, %325 : vector<6x256xf32>
    %cst_116 = arith.constant 0.797884583 : f32
    %327 = vector.broadcast %cst_116 : f32 to vector<6x256xf32>
    %328 = arith.mulf %327, %326 : vector<6x256xf32>
    %329 = math.tanh %328 : vector<6x256xf32>
    %cst_117 = arith.constant 1.000000e+00 : f32
    %330 = vector.broadcast %cst_117 : f32 to vector<6x256xf32>
    %331 = arith.addf %330, %329 : vector<6x256xf32>
    %332 = arith.mulf %321, %331 : vector<6x256xf32>
    %c0_118 = arith.constant 0 : index
    %c0_119 = arith.constant 0 : index
    %333 = vector.load %arg26[%c0_118, %c0_119] : memref<256x128xbf16, #tpu.memory_space<vmem>>, vector<256x128xbf16>
    %334 = arith.truncf %332 : vector<6x256xf32> to vector<6x256xbf16>
    %cst_120 = arith.constant dense<0.000000e+00> : vector<6x128xf32>
    %335 = tpu.matmul %334, %333, %cst_120 {dimension_numbers = #tpu.dot_dimension_numbers<[1], [0], [0], [1], [0, 0, 1, 1], [], []>} : vector<6x256xbf16>, vector<256x128xbf16>, vector<6x128xf32> -> vector<6x128xf32>
    %336 = arith.addf %137, %335 : vector<6x128xf32>
    %c0_121 = arith.constant 0 : index
    %c0_122 = arith.constant 0 : index
    %337 = vector.load %arg27[%c0_121, %c0_122] : memref<1x128xf32, #tpu.memory_space<vmem>>, vector<1x128xf32>
    %338 = vector.broadcast %337 : vector<1x128xf32> to vector<6x128xf32>
    %339 = arith.addf %336, %338 : vector<6x128xf32>
    %c0_123 = arith.constant 0 : index
    %c0_124 = arith.constant 0 : index
    %340 = vector.load %arg28[%c0_123, %c0_124] : memref<1x128xf32, #tpu.memory_space<vmem>>, vector<1x128xf32>
    %c0_125 = arith.constant 0 : index
    %c0_126 = arith.constant 0 : index
    %341 = vector.load %arg29[%c0_125, %c0_126] : memref<1x128xf32, #tpu.memory_space<vmem>>, vector<1x128xf32>
    %cst_127 = arith.constant dense<0.000000e+00> : vector<6xf32>
    %342 = vector.multi_reduction <add>, %339, %cst_127 [1] : vector<6x128xf32> to vector<6xf32>
    %343 = vector.shape_cast %342 : vector<6xf32> to vector<6x1xf32>
    %cst_128 = arith.constant 1.280000e+02 : f32
    %344 = vector.broadcast %cst_128 : f32 to vector<6x1xf32>
    %345 = arith.divf %343, %344 : vector<6x1xf32>
    %346 = vector.broadcast %345 : vector<6x1xf32> to vector<6x128xf32>
    %347 = arith.subf %339, %346 : vector<6x128xf32>
    %348 = arith.mulf %347, %347 : vector<6x128xf32>
    %cst_129 = arith.constant dense<0.000000e+00> : vector<6xf32>
    %349 = vector.multi_reduction <add>, %348, %cst_129 [1] : vector<6x128xf32> to vector<6xf32>
    %350 = vector.shape_cast %349 : vector<6xf32> to vector<6x1xf32>
    %cst_130 = arith.constant 1.280000e+02 : f32
    %351 = vector.broadcast %cst_130 : f32 to vector<6x1xf32>
    %352 = arith.divf %350, %351 : vector<6x1xf32>
    %353 = vector.broadcast %345 : vector<6x1xf32> to vector<6x128xf32>
    %354 = arith.subf %339, %353 : vector<6x128xf32>
    %cst_131 = arith.constant 9.99999974E-6 : f32
    %355 = vector.broadcast %cst_131 : f32 to vector<6x1xf32>
    %356 = arith.addf %352, %355 : vector<6x1xf32>
    %357 = math.rsqrt %356 : vector<6x1xf32>
    %358 = vector.broadcast %357 : vector<6x1xf32> to vector<6x128xf32>
    %359 = arith.mulf %354, %358 : vector<6x128xf32>
    %360 = vector.broadcast %340 : vector<1x128xf32> to vector<6x128xf32>
    %361 = arith.mulf %359, %360 : vector<6x128xf32>
    %362 = vector.broadcast %341 : vector<1x128xf32> to vector<6x128xf32>
    %363 = arith.addf %361, %362 : vector<6x128xf32>
    %364 = tpu.concatenate %313, %363 in 0 : vector<8x128xf32>, vector<6x128xf32> -> vector<14x128xf32>
    %c0_132 = arith.constant 0 : index
    %c0_133 = arith.constant 0 : index
    %c0_134 = arith.constant 0 : index
    %365 = vector.load %arg30[%c0_132, %c0_133, %c0_134] : memref<1x14x128xf32, #tpu.memory_space<vmem>>, vector<1x14x128xf32>
    %366 = vector.shape_cast %365 : vector<1x14x128xf32> to vector<14x128xf32>
    %367 = vector.shape_cast %364 : vector<14x128xf32> to vector<1x14x128xf32>
    tpu.vector_store %arg30[%c0_132, %c0_133, %c0_134], %367 {strides = array<i32>} : memref<1x14x128xf32, #tpu.memory_space<vmem>>, vector<1x14x128xf32>,
    return
  }
  func.func @transform_0(%arg0: i32) -> (i32, i32, i32) {
    %c0_i32 = arith.constant 0 : i32
    %c0_i32_0 = arith.constant 0 : i32
    %c0_i32_1 = arith.constant 0 : i32
    return %arg0, %c0_i32, %c0_i32_0 : i32, i32, i32
  }
  func.func @transform_1(%arg0: i32) -> (i32, i32, i32) {
    %c0_i32 = arith.constant 0 : i32
    %c0_i32_0 = arith.constant 0 : i32
    %c0_i32_1 = arith.constant 0 : i32
    return %arg0, %c0_i32, %c0_i32_0 : i32, i32, i32
  }
  func.func @transform_2(%arg0: i32) -> (i32, i32, i32) {
    %c0_i32 = arith.constant 0 : i32
    %c0_i32_0 = arith.constant 0 : i32
    %c0_i32_1 = arith.constant 0 : i32
    return %arg0, %c0_i32, %c0_i32_0 : i32, i32, i32
  }
  func.func @transform_3(%arg0: i32) -> (i32, i32) {
    %c0_i32 = arith.constant 0 : i32
    %c0_i32_0 = arith.constant 0 : i32
    %c0_i32_1 = arith.constant 0 : i32
    return %c0_i32, %c0_i32_0 : i32, i32
  }
  func.func @transform_4(%arg0: i32) -> (i32, i32) {
    %c0_i32 = arith.constant 0 : i32
    %c0_i32_0 = arith.constant 0 : i32
    %c0_i32_1 = arith.constant 0 : i32
    return %c0_i32, %c0_i32_0 : i32, i32
  }
  func.func @transform_5(%arg0: i32) -> (i32, i32) {
    %c0_i32 = arith.constant 0 : i32
    %c0_i32_0 = arith.constant 0 : i32
    %c0_i32_1 = arith.constant 0 : i32
    return %c0_i32, %c0_i32_0 : i32, i32
  }
  func.func @transform_6(%arg0: i32) -> (i32, i32) {
    %c0_i32 = arith.constant 0 : i32
    %c0_i32_0 = arith.constant 0 : i32
    %c0_i32_1 = arith.constant 0 : i32
    return %c0_i32, %c0_i32_0 : i32, i32
  }
  func.func @transform_7(%arg0: i32) -> (i32, i32) {
    %c0_i32 = arith.constant 0 : i32
    %c0_i32_0 = arith.constant 0 : i32
    %c0_i32_1 = arith.constant 0 : i32
    return %c0_i32, %c0_i32_0 : i32, i32
  }
  func.func @transform_8(%arg0: i32) -> (i32, i32) {
    %c0_i32 = arith.constant 0 : i32
    %c0_i32_0 = arith.constant 0 : i32
    %c0_i32_1 = arith.constant 0 : i32
    return %c0_i32, %c0_i32_0 : i32, i32
  }
  func.func @transform_9(%arg0: i32) -> (i32, i32) {
    %c0_i32 = arith.constant 0 : i32
    %c0_i32_0 = arith.constant 0 : i32
    %c0_i32_1 = arith.constant 0 : i32
    return %c0_i32, %c0_i32_0 : i32, i32
  }
  func.func @transform_10(%arg0: i32) -> (i32, i32) {
    %c0_i32 = arith.constant 0 : i32
    %c0_i32_0 = arith.constant 0 : i32
    %c0_i32_1 = arith.constant 0 : i32
    return %c0_i32, %c0_i32_0 : i32, i32
  }
  func.func @transform_11(%arg0: i32) -> (i32, i32) {
    %c0_i32 = arith.constant 0 : i32
    %c0_i32_0 = arith.constant 0 : i32
    %c0_i32_1 = arith.constant 0 : i32
    return %c0_i32, %c0_i32_0 : i32, i32
  }
  func.func @transform_12(%arg0: i32) -> (i32, i32) {
    %c0_i32 = arith.constant 0 : i32
    %c0_i32_0 = arith.constant 0 : i32
    %c0_i32_1 = arith.constant 0 : i32
    return %c0_i32, %c0_i32_0 : i32, i32
  }
  func.func @transform_13(%arg0: i32) -> (i32, i32) {
    %c0_i32 = arith.constant 0 : i32
    %c0_i32_0 = arith.constant 0 : i32
    %c0_i32_1 = arith.constant 0 : i32
    return %c0_i32, %c0_i32_0 : i32, i32
  }
  func.func @transform_14(%arg0: i32) -> (i32, i32) {
    %c0_i32 = arith.constant 0 : i32
    %c0_i32_0 = arith.constant 0 : i32
    %c0_i32_1 = arith.constant 0 : i32
    return %c0_i32, %c0_i32_0 : i32, i32
  }
  func.func @transform_15(%arg0: i32) -> (i32, i32) {
    %c0_i32 = arith.constant 0 : i32
    %c0_i32_0 = arith.constant 0 : i32
    %c0_i32_1 = arith.constant 0 : i32
    return %c0_i32, %c0_i32_0 : i32, i32
  }
  func.func @transform_16(%arg0: i32) -> (i32, i32) {
    %c0_i32 = arith.constant 0 : i32
    %c0_i32_0 = arith.constant 0 : i32
    %c0_i32_1 = arith.constant 0 : i32
    return %c0_i32, %c0_i32_0 : i32, i32
  }
  func.func @transform_17(%arg0: i32) -> (i32, i32) {
    %c0_i32 = arith.constant 0 : i32
    %c0_i32_0 = arith.constant 0 : i32
    %c0_i32_1 = arith.constant 0 : i32
    return %c0_i32, %c0_i32_0 : i32, i32
  }
  func.func @transform_18(%arg0: i32) -> (i32, i32) {
    %c0_i32 = arith.constant 0 : i32
    %c0_i32_0 = arith.constant 0 : i32
    %c0_i32_1 = arith.constant 0 : i32
    return %c0_i32, %c0_i32_0 : i32, i32
  }
  func.func @transform_19(%arg0: i32) -> (i32, i32) {
    %c0_i32 = arith.constant 0 : i32
    %c0_i32_0 = arith.constant 0 : i32
    %c0_i32_1 = arith.constant 0 : i32
    return %c0_i32, %c0_i32_0 : i32, i32
  }
  func.func @transform_20(%arg0: i32) -> (i32, i32) {
    %c0_i32 = arith.constant 0 : i32
    %c0_i32_0 = arith.constant 0 : i32
    %c0_i32_1 = arith.constant 0 : i32
    return %c0_i32, %c0_i32_0 : i32, i32
  }
  func.func @transform_21(%arg0: i32) -> (i32, i32) {
    %c0_i32 = arith.constant 0 : i32
    %c0_i32_0 = arith.constant 0 : i32
    %c0_i32_1 = arith.constant 0 : i32
    return %c0_i32, %c0_i32_0 : i32, i32
  }
  func.func @transform_22(%arg0: i32) -> (i32, i32) {
    %c0_i32 = arith.constant 0 : i32
    %c0_i32_0 = arith.constant 0 : i32
    %c0_i32_1 = arith.constant 0 : i32
    return %c0_i32, %c0_i32_0 : i32, i32
  }
  func.func @transform_23(%arg0: i32) -> (i32, i32) {
    %c0_i32 = arith.constant 0 : i32
    %c0_i32_0 = arith.constant 0 : i32
    %c0_i32_1 = arith.constant 0 : i32
    return %c0_i32, %c0_i32_0 : i32, i32
  }
  func.func @transform_24(%arg0: i32) -> (i32, i32) {
    %c0_i32 = arith.constant 0 : i32
    %c0_i32_0 = arith.constant 0 : i32
    %c0_i32_1 = arith.constant 0 : i32
    return %c0_i32, %c0_i32_0 : i32, i32
  }
  func.func @transform_25(%arg0: i32) -> (i32, i32) {
    %c0_i32 = arith.constant 0 : i32
    %c0_i32_0 = arith.constant 0 : i32
    %c0_i32_1 = arith.constant 0 : i32
    return %c0_i32, %c0_i32_0 : i32, i32
  }
  func.func @transform_26(%arg0: i32) -> (i32, i32) {
    %c0_i32 = arith.constant 0 : i32
    %c0_i32_0 = arith.constant 0 : i32
    %c0_i32_1 = arith.constant 0 : i32
    return %c0_i32, %c0_i32_0 : i32, i32
  }
  func.func @transform_27(%arg0: i32) -> (i32, i32) {
    %c0_i32 = arith.constant 0 : i32
    %c0_i32_0 = arith.constant 0 : i32
    %c0_i32_1 = arith.constant 0 : i32
    return %c0_i32, %c0_i32_0 : i32, i32
  }
  func.func @transform_28(%arg0: i32) -> (i32, i32) {
    %c0_i32 = arith.constant 0 : i32
    %c0_i32_0 = arith.constant 0 : i32
    %c0_i32_1 = arith.constant 0 : i32
    return %c0_i32, %c0_i32_0 : i32, i32
  }
  func.func @transform_29(%arg0: i32) -> (i32, i32, i32) {
    %c0_i32 = arith.constant 0 : i32
    %c0_i32_0 = arith.constant 0 : i32
    %c0_i32_1 = arith.constant 0 : i32
    return %arg0, %c0_i32, %c0_i32_0 : i32, i32, i32
  }
}

module attributes {stable_mosaic.version = 11 : i64} {
  func.func @kernel(%arg0: i32, %arg1: memref<16x128xf32, #tpu.memory_space<vmem>>, %arg2: memref<128x128xbf16, #tpu.memory_space<vmem>>, %arg3: memref<1x128xf32, #tpu.memory_space<vmem>>, %arg4: memref<16x128xf32, #tpu.memory_space<vmem>>) attributes {dimension_semantics = [#tpu.dimension_semantics<parallel>], iteration_bounds = array<i64: 1>, scalar_prefetch = 0 : i64, scratch_operands = 0 : i64, tpu.core_type = #tpu.core_type<tc>, window_params = [{transform_indices = @transform_0, window_bounds = array<i64: 16, 128>}, {pipeline_mode = #tpu.pipeline_mode<synchronous>, transform_indices = @transform_1, window_bounds = array<i64: 128, 128>}, {pipeline_mode = #tpu.pipeline_mode<synchronous>, transform_indices = @transform_2, window_bounds = array<i64: 1, 128>}, {transform_indices = @transform_3, window_bounds = array<i64: 16, 128>}]} {
    %c0 = arith.constant 0 : index
    %c0_0 = arith.constant 0 : index
    %0 = vector.load %arg1[%c0, %c0_0] : memref<16x128xf32, #tpu.memory_space<vmem>>, vector<16x128xf32>
    %c0_1 = arith.constant 0 : index
    %c0_2 = arith.constant 0 : index
    %1 = vector.load %arg2[%c0_1, %c0_2] : memref<128x128xbf16, #tpu.memory_space<vmem>>, vector<128x128xbf16>
    %2 = arith.truncf %0 : vector<16x128xf32> to vector<16x128xbf16>
    %cst = arith.constant dense<0.000000e+00> : vector<16x128xf32>
    %3 = tpu.matmul %2, %1, %cst {dimension_numbers = #tpu.dot_dimension_numbers<[1], [0], [0], [1], [0, 0, 1, 1], [], []>} : vector<16x128xbf16>, vector<128x128xbf16>, vector<16x128xf32> -> vector<16x128xf32>
    %c0_3 = arith.constant 0 : index
    %c0_4 = arith.constant 0 : index
    %4 = vector.load %arg3[%c0_3, %c0_4] : memref<1x128xf32, #tpu.memory_space<vmem>>, vector<1x128xf32>
    %5 = vector.broadcast %4 : vector<1x128xf32> to vector<16x128xf32>
    %6 = arith.addf %3, %5 : vector<16x128xf32>
    %c0_5 = arith.constant 0 : index
    %c0_6 = arith.constant 0 : index
    %7 = vector.load %arg4[%c0_5, %c0_6] : memref<16x128xf32, #tpu.memory_space<vmem>>, vector<16x128xf32>
    tpu.vector_store %arg4[%c0_5, %c0_6], %6 {strides = array<i32>} : memref<16x128xf32, #tpu.memory_space<vmem>>, vector<16x128xf32>,
    return
  }
  func.func @transform_0(%arg0: i32) -> (i32, i32) {
    %c0_i32 = arith.constant 0 : i32
    %c0_i32_0 = arith.constant 0 : i32
    return %arg0, %c0_i32 : i32, i32
  }
  func.func @transform_1(%arg0: i32) -> (i32, i32) {
    %c0_i32 = arith.constant 0 : i32
    %c0_i32_0 = arith.constant 0 : i32
    %c0_i32_1 = arith.constant 0 : i32
    return %c0_i32, %c0_i32_0 : i32, i32
  }
  func.func @transform_2(%arg0: i32) -> (i32, i32) {
    %c0_i32 = arith.constant 0 : i32
    %c0_i32_0 = arith.constant 0 : i32
    %c0_i32_1 = arith.constant 0 : i32
    return %c0_i32, %c0_i32_0 : i32, i32
  }
  func.func @transform_3(%arg0: i32) -> (i32, i32) {
    %c0_i32 = arith.constant 0 : i32
    %c0_i32_0 = arith.constant 0 : i32
    return %arg0, %c0_i32 : i32, i32
  }
}

module attributes {stable_mosaic.version = 11 : i64} {
  func.func @kernel(%arg0: i32, %arg1: memref<8x128xf32, #tpu.memory_space<vmem>>, %arg2: memref<128x512xbf16, #tpu.memory_space<vmem>>, %arg3: memref<1x512xf32, #tpu.memory_space<vmem>>, %arg4: memref<8x512xf32, #tpu.memory_space<vmem>>) attributes {dimension_semantics = [#tpu.dimension_semantics<parallel>], iteration_bounds = array<i64: 1>, scalar_prefetch = 0 : i64, scratch_operands = 0 : i64, tpu.core_type = #tpu.core_type<tc>, window_params = [{transform_indices = @transform_0, window_bounds = array<i64: 8, 128>}, {pipeline_mode = #tpu.pipeline_mode<synchronous>, transform_indices = @transform_1, window_bounds = array<i64: 128, 512>}, {pipeline_mode = #tpu.pipeline_mode<synchronous>, transform_indices = @transform_2, window_bounds = array<i64: 1, 512>}, {transform_indices = @transform_3, window_bounds = array<i64: 8, 512>}]} {
    %c0 = arith.constant 0 : index
    %c0_0 = arith.constant 0 : index
    %0 = vector.load %arg1[%c0, %c0_0] : memref<8x128xf32, #tpu.memory_space<vmem>>, vector<8x128xf32>
    %c0_1 = arith.constant 0 : index
    %c0_2 = arith.constant 0 : index
    %1 = vector.load %arg2[%c0_1, %c0_2] : memref<128x512xbf16, #tpu.memory_space<vmem>>, vector<128x512xbf16>
    %2 = arith.truncf %0 : vector<8x128xf32> to vector<8x128xbf16>
    %cst = arith.constant dense<0.000000e+00> : vector<8x512xf32>
    %3 = tpu.matmul %2, %1, %cst {dimension_numbers = #tpu.dot_dimension_numbers<[1], [0], [0], [1], [0, 0, 1, 1], [], []>} : vector<8x128xbf16>, vector<128x512xbf16>, vector<8x512xf32> -> vector<8x512xf32>
    %c0_3 = arith.constant 0 : index
    %c0_4 = arith.constant 0 : index
    %4 = vector.load %arg3[%c0_3, %c0_4] : memref<1x512xf32, #tpu.memory_space<vmem>>, vector<1x512xf32>
    %5 = vector.broadcast %4 : vector<1x512xf32> to vector<8x512xf32>
    %6 = arith.addf %3, %5 : vector<8x512xf32>
    %c0_5 = arith.constant 0 : index
    %c0_6 = arith.constant 0 : index
    %7 = vector.load %arg4[%c0_5, %c0_6] : memref<8x512xf32, #tpu.memory_space<vmem>>, vector<8x512xf32>
    tpu.vector_store %arg4[%c0_5, %c0_6], %6 {strides = array<i32>} : memref<8x512xf32, #tpu.memory_space<vmem>>, vector<8x512xf32>,
    return
  }
  func.func @transform_0(%arg0: i32) -> (i32, i32) {
    %c0_i32 = arith.constant 0 : i32
    %c0_i32_0 = arith.constant 0 : i32
    return %arg0, %c0_i32 : i32, i32
  }
  func.func @transform_1(%arg0: i32) -> (i32, i32) {
    %c0_i32 = arith.constant 0 : i32
    %c0_i32_0 = arith.constant 0 : i32
    %c0_i32_1 = arith.constant 0 : i32
    return %c0_i32, %c0_i32_0 : i32, i32
  }
  func.func @transform_2(%arg0: i32) -> (i32, i32) {
    %c0_i32 = arith.constant 0 : i32
    %c0_i32_0 = arith.constant 0 : i32
    %c0_i32_1 = arith.constant 0 : i32
    return %c0_i32, %c0_i32_0 : i32, i32
  }
  func.func @transform_3(%arg0: i32) -> (i32, i32) {
    %c0_i32 = arith.constant 0 : i32
    %c0_i32_0 = arith.constant 0 : i32
    return %arg0, %c0_i32 : i32, i32
  }
}

module attributes {stable_mosaic.version = 11 : i64} {
  func.func @kernel(%arg0: i32, %arg1: memref<1x22x128xf32, #tpu.memory_space<vmem>>, %arg2: memref<1x1x22xi32, #tpu.memory_space<vmem>>, %arg3: memref<22x32xf32, #tpu.memory_space<vmem>>, %arg4: memref<22x32xf32, #tpu.memory_space<vmem>>, %arg5: memref<1x128xf32, #tpu.memory_space<vmem>>, %arg6: memref<128x384xbf16, #tpu.memory_space<vmem>>, %arg7: memref<128x128xbf16, #tpu.memory_space<vmem>>, %arg8: memref<1x128xf32, #tpu.memory_space<vmem>>, %arg9: memref<128x512xbf16, #tpu.memory_space<vmem>>, %arg10: memref<256x128xbf16, #tpu.memory_space<vmem>>, %arg11: memref<1x22x128xf32, #tpu.memory_space<vmem>>) attributes {dimension_semantics = [#tpu.dimension_semantics<parallel>], iteration_bounds = array<i64: 2>, scalar_prefetch = 0 : i64, scratch_operands = 0 : i64, tpu.core_type = #tpu.core_type<tc>, window_params = [{transform_indices = @transform_0, window_bounds = array<i64: 1, 22, 128>}, {transform_indices = @transform_1, window_bounds = array<i64: 1, 1, 22>}, {pipeline_mode = #tpu.pipeline_mode<synchronous>, transform_indices = @transform_2, window_bounds = array<i64: 22, 32>}, {pipeline_mode = #tpu.pipeline_mode<synchronous>, transform_indices = @transform_3, window_bounds = array<i64: 22, 32>}, {pipeline_mode = #tpu.pipeline_mode<synchronous>, transform_indices = @transform_4, window_bounds = array<i64: 1, 128>}, {pipeline_mode = #tpu.pipeline_mode<synchronous>, transform_indices = @transform_5, window_bounds = array<i64: 128, 384>}, {pipeline_mode = #tpu.pipeline_mode<synchronous>, transform_indices = @transform_6, window_bounds = array<i64: 128, 128>}, {pipeline_mode = #tpu.pipeline_mode<synchronous>, transform_indices = @transform_7, window_bounds = array<i64: 1, 128>}, {pipeline_mode = #tpu.pipeline_mode<synchronous>, transform_indices = @transform_8, window_bounds = array<i64: 128, 512>}, {pipeline_mode = #tpu.pipeline_mode<synchronous>, transform_indices = @transform_9, window_bounds = array<i64: 256, 128>}, {transform_indices = @transform_10, window_bounds = array<i64: 1, 22, 128>}]} {
    %c0 = arith.constant 0 : index
    %c0_0 = arith.constant 0 : index
    %c0_1 = arith.constant 0 : index
    %0 = vector.load %arg1[%c0, %c0_0, %c0_1] : memref<1x22x128xf32, #tpu.memory_space<vmem>>, vector<1x22x128xf32>
    %1 = vector.shape_cast %0 : vector<1x22x128xf32> to vector<22x128xf32>
    %c0_2 = arith.constant 0 : index
    %c0_3 = arith.constant 0 : index
    %c0_4 = arith.constant 0 : index
    %2 = vector.load %arg2[%c0_2, %c0_3, %c0_4] : memref<1x1x22xi32, #tpu.memory_space<vmem>>, vector<1x1x22xi32>
    %3 = vector.shape_cast %2 : vector<1x1x22xi32> to vector<1x22xi32>
    %4 = tpu.iota {dimensions = array<i32: 0>} : vector<22x22xi32>
    %5 = tpu.iota {dimensions = array<i32: 1>} : vector<22x22xi32>
    %6 = arith.cmpi sle, %5, %4 : vector<22x22xi32>
    %c0_i32 = arith.constant 0 : i32
    %7 = vector.broadcast %c0_i32 : i32 to vector<1x22xi32>
    %8 = arith.cmpi sgt, %3, %7 : vector<1x22xi32>
    %9 = vector.broadcast %8 : vector<1x22xi1> to vector<22x22xi1>
    %10 = arith.andi %6, %9 : vector<22x22xi1>
    %cst = arith.constant 0.000000e+00 : f32
    %cst_5 = arith.constant -1.000000e+09 : f32
    %11 = vector.broadcast %cst : f32 to vector<22x22xf32>
    %12 = vector.broadcast %cst_5 : f32 to vector<22x22xf32>
    %13 = arith.select %10, %11, %12 : vector<22x22xi1>, vector<22x22xf32>
    %c0_6 = arith.constant 0 : index
    %c0_7 = arith.constant 0 : index
    %14 = vector.load %arg5[%c0_6, %c0_7] : memref<1x128xf32, #tpu.memory_space<vmem>>, vector<1x128xf32>
    %15 = arith.mulf %1, %1 : vector<22x128xf32>
    %cst_8 = arith.constant dense<0.000000e+00> : vector<22xf32>
    %16 = vector.multi_reduction <add>, %15, %cst_8 [1] : vector<22x128xf32> to vector<22xf32>
    %17 = vector.shape_cast %16 : vector<22xf32> to vector<22x1xf32>
    %cst_9 = arith.constant 1.280000e+02 : f32
    %18 = vector.broadcast %cst_9 : f32 to vector<22x1xf32>
    %19 = arith.divf %17, %18 : vector<22x1xf32>
    %cst_10 = arith.constant 9.99999997E-7 : f32
    %20 = vector.broadcast %cst_10 : f32 to vector<22x1xf32>
    %21 = arith.addf %19, %20 : vector<22x1xf32>
    %22 = math.rsqrt %21 : vector<22x1xf32>
    %23 = vector.broadcast %22 : vector<22x1xf32> to vector<22x128xf32>
    %24 = arith.mulf %1, %23 : vector<22x128xf32>
    %25 = vector.broadcast %14 : vector<1x128xf32> to vector<22x128xf32>
    %26 = arith.mulf %24, %25 : vector<22x128xf32>
    %c0_11 = arith.constant 0 : index
    %c0_12 = arith.constant 0 : index
    %27 = vector.load %arg6[%c0_11, %c0_12] : memref<128x384xbf16, #tpu.memory_space<vmem>>, vector<128x384xbf16>
    %28 = arith.truncf %26 : vector<22x128xf32> to vector<22x128xbf16>
    %cst_13 = arith.constant dense<0.000000e+00> : vector<22x384xf32>
    %29 = tpu.matmul %28, %27, %cst_13 {dimension_numbers = #tpu.dot_dimension_numbers<[1], [0], [0], [1], [0, 0, 1, 1], [], []>} : vector<22x128xbf16>, vector<128x384xbf16>, vector<22x384xf32> -> vector<22x384xf32>
    %30 = vector.extract_strided_slice %29 {offsets = [0, 0], sizes = [22, 128], strides = [1, 1]} : vector<22x384xf32> to vector<22x128xf32>
    %cst_14 = arith.constant 0.176776692 : f32
    %31 = vector.broadcast %cst_14 : f32 to vector<22x128xf32>
    %32 = arith.mulf %30, %31 : vector<22x128xf32>
    %33 = vector.extract_strided_slice %29 {offsets = [0, 128], sizes = [22, 128], strides = [1, 1]} : vector<22x384xf32> to vector<22x128xf32>
    %34 = vector.extract_strided_slice %29 {offsets = [0, 256], sizes = [22, 128], strides = [1, 1]} : vector<22x384xf32> to vector<22x128xf32>
    %c0_15 = arith.constant 0 : index
    %c0_16 = arith.constant 0 : index
    %35 = vector.load %arg3[%c0_15, %c0_16] : memref<22x32xf32, #tpu.memory_space<vmem>>, vector<22x32xf32>
    %c0_17 = arith.constant 0 : index
    %c0_18 = arith.constant 0 : index
    %36 = vector.load %arg4[%c0_17, %c0_18] : memref<22x32xf32, #tpu.memory_space<vmem>>, vector<22x32xf32>
    %37 = vector.extract_strided_slice %32 {offsets = [0, 0], sizes = [22, 32], strides = [1, 1]} : vector<22x128xf32> to vector<22x32xf32>
    %38 = vector.extract_strided_slice %37 {offsets = [0, 0], sizes = [22, 16], strides = [1, 1]} : vector<22x32xf32> to vector<22x16xf32>
    %39 = vector.extract_strided_slice %37 {offsets = [0, 16], sizes = [22, 16], strides = [1, 1]} : vector<22x32xf32> to vector<22x16xf32>
    %cst_19 = arith.constant 0.000000e+00 : f32
    %40 = vector.broadcast %cst_19 : f32 to vector<22x16xf32>
    %41 = arith.subf %40, %39 : vector<22x16xf32>
    %42 = tpu.concatenate %41, %38 in 1 : vector<22x16xf32>, vector<22x16xf32> -> vector<22x32xf32>
    %43 = arith.mulf %37, %35 : vector<22x32xf32>
    %44 = arith.mulf %42, %36 : vector<22x32xf32>
    %45 = arith.addf %43, %44 : vector<22x32xf32>
    %46 = arith.truncf %45 : vector<22x32xf32> to vector<22x32xbf16>
    %47 = vector.extract_strided_slice %33 {offsets = [0, 0], sizes = [22, 32], strides = [1, 1]} : vector<22x128xf32> to vector<22x32xf32>
    %48 = vector.extract_strided_slice %47 {offsets = [0, 0], sizes = [22, 16], strides = [1, 1]} : vector<22x32xf32> to vector<22x16xf32>
    %49 = vector.extract_strided_slice %47 {offsets = [0, 16], sizes = [22, 16], strides = [1, 1]} : vector<22x32xf32> to vector<22x16xf32>
    %cst_20 = arith.constant 0.000000e+00 : f32
    %50 = vector.broadcast %cst_20 : f32 to vector<22x16xf32>
    %51 = arith.subf %50, %49 : vector<22x16xf32>
    %52 = tpu.concatenate %51, %48 in 1 : vector<22x16xf32>, vector<22x16xf32> -> vector<22x32xf32>
    %53 = arith.mulf %47, %35 : vector<22x32xf32>
    %54 = arith.mulf %52, %36 : vector<22x32xf32>
    %55 = arith.addf %53, %54 : vector<22x32xf32>
    %56 = arith.truncf %55 : vector<22x32xf32> to vector<22x32xbf16>
    %57 = vector.extract_strided_slice %34 {offsets = [0, 0], sizes = [22, 32], strides = [1, 1]} : vector<22x128xf32> to vector<22x32xf32>
    %58 = arith.truncf %57 : vector<22x32xf32> to vector<22x32xbf16>
    %cst_21 = arith.constant dense<0.000000e+00> : vector<22x22xf32>
    %59 = tpu.matmul %46, %56, %cst_21 {dimension_numbers = #tpu.dot_dimension_numbers<[1], [1], [0], [0], [0, 0, 1, 0], [], []>} : vector<22x32xbf16>, vector<22x32xbf16>, vector<22x22xf32> -> vector<22x22xf32>
    %60 = arith.addf %59, %13 : vector<22x22xf32>
    %cst_22 = arith.constant dense<0xFF800000> : vector<22xf32>
    %61 = vector.multi_reduction <maximumf>, %60, %cst_22 [1] : vector<22x22xf32> to vector<22xf32>
    %62 = vector.shape_cast %61 : vector<22xf32> to vector<22x1xf32>
    %63 = vector.broadcast %62 : vector<22x1xf32> to vector<22x22xf32>
    %64 = arith.subf %60, %63 : vector<22x22xf32>
    %65 = math.exp %64 : vector<22x22xf32>
    %cst_23 = arith.constant dense<0.000000e+00> : vector<22xf32>
    %66 = vector.multi_reduction <add>, %65, %cst_23 [1] : vector<22x22xf32> to vector<22xf32>
    %67 = vector.shape_cast %66 : vector<22xf32> to vector<22x1xf32>
    %68 = tpu.reciprocal %67 {approx = true} : vector<22x1xf32> -> vector<22x1xf32>
    %69 = vector.broadcast %68 : vector<22x1xf32> to vector<22x22xf32>
    %70 = arith.mulf %65, %69 : vector<22x22xf32>
    %71 = arith.truncf %70 : vector<22x22xf32> to vector<22x22xbf16>
    %cst_24 = arith.constant dense<0.000000e+00> : vector<22x32xf32>
    %72 = tpu.matmul %71, %58, %cst_24 {dimension_numbers = #tpu.dot_dimension_numbers<[1], [0], [0], [1], [0, 0, 1, 1], [], []>} : vector<22x22xbf16>, vector<22x32xbf16>, vector<22x32xf32> -> vector<22x32xf32>
    %73 = vector.extract_strided_slice %32 {offsets = [0, 32], sizes = [22, 32], strides = [1, 1]} : vector<22x128xf32> to vector<22x32xf32>
    %74 = vector.extract_strided_slice %73 {offsets = [0, 0], sizes = [22, 16], strides = [1, 1]} : vector<22x32xf32> to vector<22x16xf32>
    %75 = vector.extract_strided_slice %73 {offsets = [0, 16], sizes = [22, 16], strides = [1, 1]} : vector<22x32xf32> to vector<22x16xf32>
    %cst_25 = arith.constant 0.000000e+00 : f32
    %76 = vector.broadcast %cst_25 : f32 to vector<22x16xf32>
    %77 = arith.subf %76, %75 : vector<22x16xf32>
    %78 = tpu.concatenate %77, %74 in 1 : vector<22x16xf32>, vector<22x16xf32> -> vector<22x32xf32>
    %79 = arith.mulf %73, %35 : vector<22x32xf32>
    %80 = arith.mulf %78, %36 : vector<22x32xf32>
    %81 = arith.addf %79, %80 : vector<22x32xf32>
    %82 = arith.truncf %81 : vector<22x32xf32> to vector<22x32xbf16>
    %83 = vector.extract_strided_slice %33 {offsets = [0, 32], sizes = [22, 32], strides = [1, 1]} : vector<22x128xf32> to vector<22x32xf32>
    %84 = vector.extract_strided_slice %83 {offsets = [0, 0], sizes = [22, 16], strides = [1, 1]} : vector<22x32xf32> to vector<22x16xf32>
    %85 = vector.extract_strided_slice %83 {offsets = [0, 16], sizes = [22, 16], strides = [1, 1]} : vector<22x32xf32> to vector<22x16xf32>
    %cst_26 = arith.constant 0.000000e+00 : f32
    %86 = vector.broadcast %cst_26 : f32 to vector<22x16xf32>
    %87 = arith.subf %86, %85 : vector<22x16xf32>
    %88 = tpu.concatenate %87, %84 in 1 : vector<22x16xf32>, vector<22x16xf32> -> vector<22x32xf32>
    %89 = arith.mulf %83, %35 : vector<22x32xf32>
    %90 = arith.mulf %88, %36 : vector<22x32xf32>
    %91 = arith.addf %89, %90 : vector<22x32xf32>
    %92 = arith.truncf %91 : vector<22x32xf32> to vector<22x32xbf16>
    %93 = vector.extract_strided_slice %34 {offsets = [0, 32], sizes = [22, 32], strides = [1, 1]} : vector<22x128xf32> to vector<22x32xf32>
    %94 = arith.truncf %93 : vector<22x32xf32> to vector<22x32xbf16>
    %cst_27 = arith.constant dense<0.000000e+00> : vector<22x22xf32>
    %95 = tpu.matmul %82, %92, %cst_27 {dimension_numbers = #tpu.dot_dimension_numbers<[1], [1], [0], [0], [0, 0, 1, 0], [], []>} : vector<22x32xbf16>, vector<22x32xbf16>, vector<22x22xf32> -> vector<22x22xf32>
    %96 = arith.addf %95, %13 : vector<22x22xf32>
    %cst_28 = arith.constant dense<0xFF800000> : vector<22xf32>
    %97 = vector.multi_reduction <maximumf>, %96, %cst_28 [1] : vector<22x22xf32> to vector<22xf32>
    %98 = vector.shape_cast %97 : vector<22xf32> to vector<22x1xf32>
    %99 = vector.broadcast %98 : vector<22x1xf32> to vector<22x22xf32>
    %100 = arith.subf %96, %99 : vector<22x22xf32>
    %101 = math.exp %100 : vector<22x22xf32>
    %cst_29 = arith.constant dense<0.000000e+00> : vector<22xf32>
    %102 = vector.multi_reduction <add>, %101, %cst_29 [1] : vector<22x22xf32> to vector<22xf32>
    %103 = vector.shape_cast %102 : vector<22xf32> to vector<22x1xf32>
    %104 = tpu.reciprocal %103 {approx = true} : vector<22x1xf32> -> vector<22x1xf32>
    %105 = vector.broadcast %104 : vector<22x1xf32> to vector<22x22xf32>
    %106 = arith.mulf %101, %105 : vector<22x22xf32>
    %107 = arith.truncf %106 : vector<22x22xf32> to vector<22x22xbf16>
    %cst_30 = arith.constant dense<0.000000e+00> : vector<22x32xf32>
    %108 = tpu.matmul %107, %94, %cst_30 {dimension_numbers = #tpu.dot_dimension_numbers<[1], [0], [0], [1], [0, 0, 1, 1], [], []>} : vector<22x22xbf16>, vector<22x32xbf16>, vector<22x32xf32> -> vector<22x32xf32>
    %109 = vector.extract_strided_slice %32 {offsets = [0, 64], sizes = [22, 32], strides = [1, 1]} : vector<22x128xf32> to vector<22x32xf32>
    %110 = vector.extract_strided_slice %109 {offsets = [0, 0], sizes = [22, 16], strides = [1, 1]} : vector<22x32xf32> to vector<22x16xf32>
    %111 = vector.extract_strided_slice %109 {offsets = [0, 16], sizes = [22, 16], strides = [1, 1]} : vector<22x32xf32> to vector<22x16xf32>
    %cst_31 = arith.constant 0.000000e+00 : f32
    %112 = vector.broadcast %cst_31 : f32 to vector<22x16xf32>
    %113 = arith.subf %112, %111 : vector<22x16xf32>
    %114 = tpu.concatenate %113, %110 in 1 : vector<22x16xf32>, vector<22x16xf32> -> vector<22x32xf32>
    %115 = arith.mulf %109, %35 : vector<22x32xf32>
    %116 = arith.mulf %114, %36 : vector<22x32xf32>
    %117 = arith.addf %115, %116 : vector<22x32xf32>
    %118 = arith.truncf %117 : vector<22x32xf32> to vector<22x32xbf16>
    %119 = vector.extract_strided_slice %33 {offsets = [0, 64], sizes = [22, 32], strides = [1, 1]} : vector<22x128xf32> to vector<22x32xf32>
    %120 = vector.extract_strided_slice %119 {offsets = [0, 0], sizes = [22, 16], strides = [1, 1]} : vector<22x32xf32> to vector<22x16xf32>
    %121 = vector.extract_strided_slice %119 {offsets = [0, 16], sizes = [22, 16], strides = [1, 1]} : vector<22x32xf32> to vector<22x16xf32>
    %cst_32 = arith.constant 0.000000e+00 : f32
    %122 = vector.broadcast %cst_32 : f32 to vector<22x16xf32>
    %123 = arith.subf %122, %121 : vector<22x16xf32>
    %124 = tpu.concatenate %123, %120 in 1 : vector<22x16xf32>, vector<22x16xf32> -> vector<22x32xf32>
    %125 = arith.mulf %119, %35 : vector<22x32xf32>
    %126 = arith.mulf %124, %36 : vector<22x32xf32>
    %127 = arith.addf %125, %126 : vector<22x32xf32>
    %128 = arith.truncf %127 : vector<22x32xf32> to vector<22x32xbf16>
    %129 = vector.extract_strided_slice %34 {offsets = [0, 64], sizes = [22, 32], strides = [1, 1]} : vector<22x128xf32> to vector<22x32xf32>
    %130 = arith.truncf %129 : vector<22x32xf32> to vector<22x32xbf16>
    %cst_33 = arith.constant dense<0.000000e+00> : vector<22x22xf32>
    %131 = tpu.matmul %118, %128, %cst_33 {dimension_numbers = #tpu.dot_dimension_numbers<[1], [1], [0], [0], [0, 0, 1, 0], [], []>} : vector<22x32xbf16>, vector<22x32xbf16>, vector<22x22xf32> -> vector<22x22xf32>
    %132 = arith.addf %131, %13 : vector<22x22xf32>
    %cst_34 = arith.constant dense<0xFF800000> : vector<22xf32>
    %133 = vector.multi_reduction <maximumf>, %132, %cst_34 [1] : vector<22x22xf32> to vector<22xf32>
    %134 = vector.shape_cast %133 : vector<22xf32> to vector<22x1xf32>
    %135 = vector.broadcast %134 : vector<22x1xf32> to vector<22x22xf32>
    %136 = arith.subf %132, %135 : vector<22x22xf32>
    %137 = math.exp %136 : vector<22x22xf32>
    %cst_35 = arith.constant dense<0.000000e+00> : vector<22xf32>
    %138 = vector.multi_reduction <add>, %137, %cst_35 [1] : vector<22x22xf32> to vector<22xf32>
    %139 = vector.shape_cast %138 : vector<22xf32> to vector<22x1xf32>
    %140 = tpu.reciprocal %139 {approx = true} : vector<22x1xf32> -> vector<22x1xf32>
    %141 = vector.broadcast %140 : vector<22x1xf32> to vector<22x22xf32>
    %142 = arith.mulf %137, %141 : vector<22x22xf32>
    %143 = arith.truncf %142 : vector<22x22xf32> to vector<22x22xbf16>
    %cst_36 = arith.constant dense<0.000000e+00> : vector<22x32xf32>
    %144 = tpu.matmul %143, %130, %cst_36 {dimension_numbers = #tpu.dot_dimension_numbers<[1], [0], [0], [1], [0, 0, 1, 1], [], []>} : vector<22x22xbf16>, vector<22x32xbf16>, vector<22x32xf32> -> vector<22x32xf32>
    %145 = vector.extract_strided_slice %32 {offsets = [0, 96], sizes = [22, 32], strides = [1, 1]} : vector<22x128xf32> to vector<22x32xf32>
    %146 = vector.extract_strided_slice %145 {offsets = [0, 0], sizes = [22, 16], strides = [1, 1]} : vector<22x32xf32> to vector<22x16xf32>
    %147 = vector.extract_strided_slice %145 {offsets = [0, 16], sizes = [22, 16], strides = [1, 1]} : vector<22x32xf32> to vector<22x16xf32>
    %cst_37 = arith.constant 0.000000e+00 : f32
    %148 = vector.broadcast %cst_37 : f32 to vector<22x16xf32>
    %149 = arith.subf %148, %147 : vector<22x16xf32>
    %150 = tpu.concatenate %149, %146 in 1 : vector<22x16xf32>, vector<22x16xf32> -> vector<22x32xf32>
    %151 = arith.mulf %145, %35 : vector<22x32xf32>
    %152 = arith.mulf %150, %36 : vector<22x32xf32>
    %153 = arith.addf %151, %152 : vector<22x32xf32>
    %154 = arith.truncf %153 : vector<22x32xf32> to vector<22x32xbf16>
    %155 = vector.extract_strided_slice %33 {offsets = [0, 96], sizes = [22, 32], strides = [1, 1]} : vector<22x128xf32> to vector<22x32xf32>
    %156 = vector.extract_strided_slice %155 {offsets = [0, 0], sizes = [22, 16], strides = [1, 1]} : vector<22x32xf32> to vector<22x16xf32>
    %157 = vector.extract_strided_slice %155 {offsets = [0, 16], sizes = [22, 16], strides = [1, 1]} : vector<22x32xf32> to vector<22x16xf32>
    %cst_38 = arith.constant 0.000000e+00 : f32
    %158 = vector.broadcast %cst_38 : f32 to vector<22x16xf32>
    %159 = arith.subf %158, %157 : vector<22x16xf32>
    %160 = tpu.concatenate %159, %156 in 1 : vector<22x16xf32>, vector<22x16xf32> -> vector<22x32xf32>
    %161 = arith.mulf %155, %35 : vector<22x32xf32>
    %162 = arith.mulf %160, %36 : vector<22x32xf32>
    %163 = arith.addf %161, %162 : vector<22x32xf32>
    %164 = arith.truncf %163 : vector<22x32xf32> to vector<22x32xbf16>
    %165 = vector.extract_strided_slice %34 {offsets = [0, 96], sizes = [22, 32], strides = [1, 1]} : vector<22x128xf32> to vector<22x32xf32>
    %166 = arith.truncf %165 : vector<22x32xf32> to vector<22x32xbf16>
    %cst_39 = arith.constant dense<0.000000e+00> : vector<22x22xf32>
    %167 = tpu.matmul %154, %164, %cst_39 {dimension_numbers = #tpu.dot_dimension_numbers<[1], [1], [0], [0], [0, 0, 1, 0], [], []>} : vector<22x32xbf16>, vector<22x32xbf16>, vector<22x22xf32> -> vector<22x22xf32>
    %168 = arith.addf %167, %13 : vector<22x22xf32>
    %cst_40 = arith.constant dense<0xFF800000> : vector<22xf32>
    %169 = vector.multi_reduction <maximumf>, %168, %cst_40 [1] : vector<22x22xf32> to vector<22xf32>
    %170 = vector.shape_cast %169 : vector<22xf32> to vector<22x1xf32>
    %171 = vector.broadcast %170 : vector<22x1xf32> to vector<22x22xf32>
    %172 = arith.subf %168, %171 : vector<22x22xf32>
    %173 = math.exp %172 : vector<22x22xf32>
    %cst_41 = arith.constant dense<0.000000e+00> : vector<22xf32>
    %174 = vector.multi_reduction <add>, %173, %cst_41 [1] : vector<22x22xf32> to vector<22xf32>
    %175 = vector.shape_cast %174 : vector<22xf32> to vector<22x1xf32>
    %176 = tpu.reciprocal %175 {approx = true} : vector<22x1xf32> -> vector<22x1xf32>
    %177 = vector.broadcast %176 : vector<22x1xf32> to vector<22x22xf32>
    %178 = arith.mulf %173, %177 : vector<22x22xf32>
    %179 = arith.truncf %178 : vector<22x22xf32> to vector<22x22xbf16>
    %cst_42 = arith.constant dense<0.000000e+00> : vector<22x32xf32>
    %180 = tpu.matmul %179, %166, %cst_42 {dimension_numbers = #tpu.dot_dimension_numbers<[1], [0], [0], [1], [0, 0, 1, 1], [], []>} : vector<22x22xbf16>, vector<22x32xbf16>, vector<22x32xf32> -> vector<22x32xf32>
    %181 = tpu.concatenate %72, %108, %144, %180 in 1 : vector<22x32xf32>, vector<22x32xf32>, vector<22x32xf32>, vector<22x32xf32> -> vector<22x128xf32>
    %c0_43 = arith.constant 0 : index
    %c0_44 = arith.constant 0 : index
    %182 = vector.load %arg7[%c0_43, %c0_44] : memref<128x128xbf16, #tpu.memory_space<vmem>>, vector<128x128xbf16>
    %183 = arith.truncf %181 : vector<22x128xf32> to vector<22x128xbf16>
    %cst_45 = arith.constant dense<0.000000e+00> : vector<22x128xf32>
    %184 = tpu.matmul %183, %182, %cst_45 {dimension_numbers = #tpu.dot_dimension_numbers<[1], [0], [0], [1], [0, 0, 1, 1], [], []>} : vector<22x128xbf16>, vector<128x128xbf16>, vector<22x128xf32> -> vector<22x128xf32>
    %185 = arith.addf %1, %184 : vector<22x128xf32>
    %c0_46 = arith.constant 0 : index
    %c0_47 = arith.constant 0 : index
    %186 = vector.load %arg8[%c0_46, %c0_47] : memref<1x128xf32, #tpu.memory_space<vmem>>, vector<1x128xf32>
    %187 = arith.mulf %185, %185 : vector<22x128xf32>
    %cst_48 = arith.constant dense<0.000000e+00> : vector<22xf32>
    %188 = vector.multi_reduction <add>, %187, %cst_48 [1] : vector<22x128xf32> to vector<22xf32>
    %189 = vector.shape_cast %188 : vector<22xf32> to vector<22x1xf32>
    %cst_49 = arith.constant 1.280000e+02 : f32
    %190 = vector.broadcast %cst_49 : f32 to vector<22x1xf32>
    %191 = arith.divf %189, %190 : vector<22x1xf32>
    %cst_50 = arith.constant 9.99999997E-7 : f32
    %192 = vector.broadcast %cst_50 : f32 to vector<22x1xf32>
    %193 = arith.addf %191, %192 : vector<22x1xf32>
    %194 = math.rsqrt %193 : vector<22x1xf32>
    %195 = vector.broadcast %194 : vector<22x1xf32> to vector<22x128xf32>
    %196 = arith.mulf %185, %195 : vector<22x128xf32>
    %197 = vector.broadcast %186 : vector<1x128xf32> to vector<22x128xf32>
    %198 = arith.mulf %196, %197 : vector<22x128xf32>
    %c0_51 = arith.constant 0 : index
    %c0_52 = arith.constant 0 : index
    %199 = vector.load %arg9[%c0_51, %c0_52] : memref<128x512xbf16, #tpu.memory_space<vmem>>, vector<128x512xbf16>
    %200 = arith.truncf %198 : vector<22x128xf32> to vector<22x128xbf16>
    %cst_53 = arith.constant dense<0.000000e+00> : vector<22x512xf32>
    %201 = tpu.matmul %200, %199, %cst_53 {dimension_numbers = #tpu.dot_dimension_numbers<[1], [0], [0], [1], [0, 0, 1, 1], [], []>} : vector<22x128xbf16>, vector<128x512xbf16>, vector<22x512xf32> -> vector<22x512xf32>
    %202 = vector.extract_strided_slice %201 {offsets = [0, 0], sizes = [22, 256], strides = [1, 1]} : vector<22x512xf32> to vector<22x256xf32>
    %203 = vector.extract_strided_slice %201 {offsets = [0, 256], sizes = [22, 256], strides = [1, 1]} : vector<22x512xf32> to vector<22x256xf32>
    %cst_54 = arith.constant 0.000000e+00 : f32
    %204 = vector.broadcast %cst_54 : f32 to vector<22x256xf32>
    %205 = arith.subf %204, %202 : vector<22x256xf32>
    %206 = math.exp %205 : vector<22x256xf32>
    %cst_55 = arith.constant 1.000000e+00 : f32
    %207 = vector.broadcast %cst_55 : f32 to vector<22x256xf32>
    %208 = arith.addf %207, %206 : vector<22x256xf32>
    %209 = tpu.reciprocal %208 {approx = true} : vector<22x256xf32> -> vector<22x256xf32>
    %210 = arith.mulf %202, %209 : vector<22x256xf32>
    %211 = arith.mulf %210, %203 : vector<22x256xf32>
    %c0_56 = arith.constant 0 : index
    %c0_57 = arith.constant 0 : index
    %212 = vector.load %arg10[%c0_56, %c0_57] : memref<256x128xbf16, #tpu.memory_space<vmem>>, vector<256x128xbf16>
    %213 = arith.truncf %211 : vector<22x256xf32> to vector<22x256xbf16>
    %cst_58 = arith.constant dense<0.000000e+00> : vector<22x128xf32>
    %214 = tpu.matmul %213, %212, %cst_58 {dimension_numbers = #tpu.dot_dimension_numbers<[1], [0], [0], [1], [0, 0, 1, 1], [], []>} : vector<22x256xbf16>, vector<256x128xbf16>, vector<22x128xf32> -> vector<22x128xf32>
    %215 = arith.addf %185, %214 : vector<22x128xf32>
    %c0_59 = arith.constant 0 : index
    %c0_60 = arith.constant 0 : index
    %c0_61 = arith.constant 0 : index
    %216 = vector.load %arg11[%c0_59, %c0_60, %c0_61] : memref<1x22x128xf32, #tpu.memory_space<vmem>>, vector<1x22x128xf32>
    %217 = vector.shape_cast %216 : vector<1x22x128xf32> to vector<22x128xf32>
    %218 = vector.shape_cast %215 : vector<22x128xf32> to vector<1x22x128xf32>
    tpu.vector_store %arg11[%c0_59, %c0_60, %c0_61], %218 {strides = array<i32>} : memref<1x22x128xf32, #tpu.memory_space<vmem>>, vector<1x22x128xf32>,
    return
  }
  func.func @transform_0(%arg0: i32) -> (i32, i32, i32) {
    %c0_i32 = arith.constant 0 : i32
    %c0_i32_0 = arith.constant 0 : i32
    %c0_i32_1 = arith.constant 0 : i32
    return %arg0, %c0_i32, %c0_i32_0 : i32, i32, i32
  }
  func.func @transform_1(%arg0: i32) -> (i32, i32, i32) {
    %c0_i32 = arith.constant 0 : i32
    %c0_i32_0 = arith.constant 0 : i32
    %c0_i32_1 = arith.constant 0 : i32
    return %arg0, %c0_i32, %c0_i32_0 : i32, i32, i32
  }
  func.func @transform_2(%arg0: i32) -> (i32, i32) {
    %c0_i32 = arith.constant 0 : i32
    %c0_i32_0 = arith.constant 0 : i32
    %c0_i32_1 = arith.constant 0 : i32
    return %c0_i32, %c0_i32_0 : i32, i32
  }
  func.func @transform_3(%arg0: i32) -> (i32, i32) {
    %c0_i32 = arith.constant 0 : i32
    %c0_i32_0 = arith.constant 0 : i32
    %c0_i32_1 = arith.constant 0 : i32
    return %c0_i32, %c0_i32_0 : i32, i32
  }
  func.func @transform_4(%arg0: i32) -> (i32, i32) {
    %c0_i32 = arith.constant 0 : i32
    %c0_i32_0 = arith.constant 0 : i32
    %c0_i32_1 = arith.constant 0 : i32
    return %c0_i32, %c0_i32_0 : i32, i32
  }
  func.func @transform_5(%arg0: i32) -> (i32, i32) {
    %c0_i32 = arith.constant 0 : i32
    %c0_i32_0 = arith.constant 0 : i32
    %c0_i32_1 = arith.constant 0 : i32
    return %c0_i32, %c0_i32_0 : i32, i32
  }
  func.func @transform_6(%arg0: i32) -> (i32, i32) {
    %c0_i32 = arith.constant 0 : i32
    %c0_i32_0 = arith.constant 0 : i32
    %c0_i32_1 = arith.constant 0 : i32
    return %c0_i32, %c0_i32_0 : i32, i32
  }
  func.func @transform_7(%arg0: i32) -> (i32, i32) {
    %c0_i32 = arith.constant 0 : i32
    %c0_i32_0 = arith.constant 0 : i32
    %c0_i32_1 = arith.constant 0 : i32
    return %c0_i32, %c0_i32_0 : i32, i32
  }
  func.func @transform_8(%arg0: i32) -> (i32, i32) {
    %c0_i32 = arith.constant 0 : i32
    %c0_i32_0 = arith.constant 0 : i32
    %c0_i32_1 = arith.constant 0 : i32
    return %c0_i32, %c0_i32_0 : i32, i32
  }
  func.func @transform_9(%arg0: i32) -> (i32, i32) {
    %c0_i32 = arith.constant 0 : i32
    %c0_i32_0 = arith.constant 0 : i32
    %c0_i32_1 = arith.constant 0 : i32
    return %c0_i32, %c0_i32_0 : i32, i32
  }
  func.func @transform_10(%arg0: i32) -> (i32, i32, i32) {
    %c0_i32 = arith.constant 0 : i32
    %c0_i32_0 = arith.constant 0 : i32
    %c0_i32_1 = arith.constant 0 : i32
    return %arg0, %c0_i32, %c0_i32_0 : i32, i32, i32
  }
}

module attributes {stable_mosaic.version = 11 : i64} {
  func.func @kernel(%arg0: i32, %arg1: memref<8x128xf32, #tpu.memory_space<vmem>>, %arg2: memref<8x1xi32, #tpu.memory_space<vmem>>, %arg3: memref<1x128xf32, #tpu.memory_space<vmem>>, %arg4: memref<128x256xbf16, #tpu.memory_space<vmem>>, %arg5: memref<1x1x128xf32, #tpu.memory_space<vmem>>) attributes {dimension_semantics = [#tpu.dimension_semantics<parallel>], iteration_bounds = array<i64: 6>, scalar_prefetch = 0 : i64, scratch_operands = 0 : i64, tpu.core_type = #tpu.core_type<tc>, window_params = [{transform_indices = @transform_0, window_bounds = array<i64: 8, 128>}, {transform_indices = @transform_1, window_bounds = array<i64: 8, 1>}, {pipeline_mode = #tpu.pipeline_mode<synchronous>, transform_indices = @transform_2, window_bounds = array<i64: 1, 128>}, {pipeline_mode = #tpu.pipeline_mode<synchronous>, transform_indices = @transform_3, window_bounds = array<i64: 128, 256>}, {transform_indices = @transform_4, window_bounds = array<i64: 1, 1, 128>}]} {
    %c0 = arith.constant 0 : index
    %c0_0 = arith.constant 0 : index
    %0 = vector.load %arg1[%c0, %c0_0] : memref<8x128xf32, #tpu.memory_space<vmem>>, vector<8x128xf32>
    %c0_1 = arith.constant 0 : index
    %c0_2 = arith.constant 0 : index
    %1 = vector.load %arg3[%c0_1, %c0_2] : memref<1x128xf32, #tpu.memory_space<vmem>>, vector<1x128xf32>
    %2 = arith.mulf %0, %0 : vector<8x128xf32>
    %cst = arith.constant dense<0.000000e+00> : vector<8xf32>
    %3 = vector.multi_reduction <add>, %2, %cst [1] : vector<8x128xf32> to vector<8xf32>
    %4 = vector.shape_cast %3 : vector<8xf32> to vector<8x1xf32>
    %cst_3 = arith.constant 1.280000e+02 : f32
    %5 = vector.broadcast %cst_3 : f32 to vector<8x1xf32>
    %6 = arith.divf %4, %5 : vector<8x1xf32>
    %cst_4 = arith.constant 9.99999997E-7 : f32
    %7 = vector.broadcast %cst_4 : f32 to vector<8x1xf32>
    %8 = arith.addf %6, %7 : vector<8x1xf32>
    %9 = math.rsqrt %8 : vector<8x1xf32>
    %10 = vector.broadcast %9 : vector<8x1xf32> to vector<8x128xf32>
    %11 = arith.mulf %0, %10 : vector<8x128xf32>
    %12 = vector.broadcast %1 : vector<1x128xf32> to vector<8x128xf32>
    %13 = arith.mulf %11, %12 : vector<8x128xf32>
    %c0_5 = arith.constant 0 : index
    %c0_6 = arith.constant 0 : index
    %14 = vector.load %arg4[%c0_5, %c0_6] : memref<128x256xbf16, #tpu.memory_space<vmem>>, vector<128x256xbf16>
    %15 = arith.truncf %13 : vector<8x128xf32> to vector<8x128xbf16>
    %cst_7 = arith.constant dense<0.000000e+00> : vector<8x256xf32>
    %16 = tpu.matmul %15, %14, %cst_7 {dimension_numbers = #tpu.dot_dimension_numbers<[1], [0], [0], [1], [0, 0, 1, 1], [], []>} : vector<8x128xbf16>, vector<128x256xbf16>, vector<8x256xf32> -> vector<8x256xf32>
    %c0_8 = arith.constant 0 : index
    %c0_9 = arith.constant 0 : index
    %17 = vector.load %arg2[%c0_8, %c0_9] : memref<8x1xi32, #tpu.memory_space<vmem>>, vector<8x1xi32>
    %cst_10 = arith.constant dense<0xFF800000> : vector<8xf32>
    %18 = vector.multi_reduction <maximumf>, %16, %cst_10 [1] : vector<8x256xf32> to vector<8xf32>
    %19 = vector.shape_cast %18 : vector<8xf32> to vector<8x1xf32>
    %20 = vector.broadcast %19 : vector<8x1xf32> to vector<8x256xf32>
    %21 = arith.subf %16, %20 : vector<8x256xf32>
    %22 = math.exp %21 : vector<8x256xf32>
    %cst_11 = arith.constant dense<0.000000e+00> : vector<8xf32>
    %23 = vector.multi_reduction <add>, %22, %cst_11 [1] : vector<8x256xf32> to vector<8xf32>
    %24 = vector.shape_cast %23 : vector<8xf32> to vector<8x1xf32>
    %25 = math.log %24 : vector<8x1xf32>
    %26 = arith.addf %19, %25 : vector<8x1xf32>
    %27 = tpu.iota {dimensions = array<i32: 1>} : vector<8x256xi32>
    %28 = vector.broadcast %17 : vector<8x1xi32> to vector<8x256xi32>
    %29 = arith.cmpi eq, %27, %28 : vector<8x256xi32>
    %cst_12 = arith.constant 0.000000e+00 : f32
    %30 = vector.broadcast %cst_12 : f32 to vector<8x256xf32>
    %31 = arith.select %29, %16, %30 : vector<8x256xi1>, vector<8x256xf32>
    %cst_13 = arith.constant dense<0.000000e+00> : vector<8xf32>
    %32 = vector.multi_reduction <add>, %31, %cst_13 [1] : vector<8x256xf32> to vector<8xf32>
    %33 = vector.shape_cast %32 : vector<8xf32> to vector<8x1xf32>
    %c-100_i32 = arith.constant -100 : i32
    %34 = vector.broadcast %c-100_i32 : i32 to vector<8x1xi32>
    %35 = arith.cmpi ne, %17, %34 : vector<8x1xi32>
    %36 = arith.subf %26, %33 : vector<8x1xf32>
    %cst_14 = arith.constant 0.000000e+00 : f32
    %37 = vector.broadcast %cst_14 : f32 to vector<8x1xf32>
    %38 = arith.select %35, %36, %37 : vector<8x1xi1>, vector<8x1xf32>
    %39 = vector.shape_cast %38 : vector<8x1xf32> to vector<1x8x1xf32>
    %cst_15 = arith.constant dense<0.000000e+00> : vector<1xf32>
    %40 = vector.multi_reduction <add>, %39, %cst_15 [1, 2] : vector<1x8x1xf32> to vector<1xf32>
    %41 = vector.shape_cast %40 : vector<1xf32> to vector<1x1x1xf32>
    %42 = vector.extract %41[0, 0, 0] : f32 from vector<1x1x1xf32>
    %43 = arith.extui %35 : vector<8x1xi1> to vector<8x1xi32>
    %44 = arith.sitofp %43 : vector<8x1xi32> to vector<8x1xf32>
    %45 = vector.shape_cast %44 : vector<8x1xf32> to vector<1x8x1xf32>
    %cst_16 = arith.constant dense<0.000000e+00> : vector<1xf32>
    %46 = vector.multi_reduction <add>, %45, %cst_16 [1, 2] : vector<1x8x1xf32> to vector<1xf32>
    %47 = vector.shape_cast %46 : vector<1xf32> to vector<1x1x1xf32>
    %48 = vector.extract %47[0, 0, 0] : f32 from vector<1x1x1xf32>
    %49 = tpu.iota {dimensions = array<i32: 1>} : vector<1x128xi32>
    %c0_i32 = arith.constant 0 : i32
    %50 = vector.broadcast %c0_i32 : i32 to vector<1x128xi32>
    %51 = arith.cmpi eq, %49, %50 : vector<1x128xi32>
    %c1_i32 = arith.constant 1 : i32
    %52 = vector.broadcast %c1_i32 : i32 to vector<1x128xi32>
    %53 = arith.cmpi eq, %49, %52 : vector<1x128xi32>
    %cst_17 = arith.constant 0.000000e+00 : f32
    %54 = vector.broadcast %48 : f32 to vector<1x128xf32>
    %55 = vector.broadcast %cst_17 : f32 to vector<1x128xf32>
    %56 = arith.select %53, %54, %55 : vector<1x128xi1>, vector<1x128xf32>
    %57 = vector.broadcast %42 : f32 to vector<1x128xf32>
    %58 = arith.select %51, %57, %56 : vector<1x128xi1>, vector<1x128xf32>
    %c0_18 = arith.constant 0 : index
    %c0_19 = arith.constant 0 : index
    %c0_20 = arith.constant 0 : index
    %59 = vector.load %arg5[%c0_18, %c0_19, %c0_20] : memref<1x1x128xf32, #tpu.memory_space<vmem>>, vector<1x1x128xf32>
    %60 = vector.shape_cast %59 : vector<1x1x128xf32> to vector<1x128xf32>
    %61 = vector.shape_cast %58 : vector<1x128xf32> to vector<1x1x128xf32>
    tpu.vector_store %arg5[%c0_18, %c0_19, %c0_20], %61 {strides = array<i32>} : memref<1x1x128xf32, #tpu.memory_space<vmem>>, vector<1x1x128xf32>,
    return
  }
  func.func @transform_0(%arg0: i32) -> (i32, i32) {
    %c0_i32 = arith.constant 0 : i32
    %c0_i32_0 = arith.constant 0 : i32
    return %arg0, %c0_i32 : i32, i32
  }
  func.func @transform_1(%arg0: i32) -> (i32, i32) {
    %c0_i32 = arith.constant 0 : i32
    %c0_i32_0 = arith.constant 0 : i32
    return %arg0, %c0_i32 : i32, i32
  }
  func.func @transform_2(%arg0: i32) -> (i32, i32) {
    %c0_i32 = arith.constant 0 : i32
    %c0_i32_0 = arith.constant 0 : i32
    %c0_i32_1 = arith.constant 0 : i32
    return %c0_i32, %c0_i32_0 : i32, i32
  }
  func.func @transform_3(%arg0: i32) -> (i32, i32) {
    %c0_i32 = arith.constant 0 : i32
    %c0_i32_0 = arith.constant 0 : i32
    %c0_i32_1 = arith.constant 0 : i32
    return %c0_i32, %c0_i32_0 : i32, i32
  }
  func.func @transform_4(%arg0: i32) -> (i32, i32, i32) {
    %c0_i32 = arith.constant 0 : i32
    %c0_i32_0 = arith.constant 0 : i32
    %c0_i32_1 = arith.constant 0 : i32
    return %arg0, %c0_i32, %c0_i32_0 : i32, i32, i32
  }
}

</mosaic_0001>

<bundles_post_ra>
// kernel: blip2_forward.12
= control target key start
LH: loop header
LB: loop body
LE: loop exit
PB: predicated region body
PF: predicated region fallthrough
CT: control target
= control target key end

     0   :  { %v198_v0 = vmov 0   ;;  %vm122_vm0 = vcmask 523264   ;;  %s267_s1 = inlined_call_operand.vmem [shape: bf16[192,128], index: 1, kind: input, shape index: {}]   ;;  %s268_s0 = inlined_call_operand.vmem [shape: f32[8,192], index: 0, kind: input, shape index: {}]   ;;  %s269_s2 = inlined_call_operand.vmem [shape: f32[1,128], index: 2, kind: input, shape index: {}]   ;;  %s270_s3 = inlined_call_operand.vmem [shape: f32[8,128], index: 3, kind: output, shape index: {}]  }
   0x1   :  { %126 = vmatprep.subr.bf16.mxu0 %v198_v0  ;;  %v186_v1 = vld [vmem:[%s267_s1 + $0x38] sm:$0xff]   ;;  %v187_v2 = vld [vmem:[%s267_s1 + $0x30] sm:$0xff]   ;;  %v188_v3 = vld [vmem:[%s267_s1 + $0x28] sm:$0xff]  }
   0x2   :  { %127 = vmatpush1.bf16.msra.mxu0 %v186_v1  ;;  %v189_v4 = vld [vmem:[%s267_s1 + $0x20] sm:$0xff]   ;;  %v16_v5 = vld [vmem:[%s268_s0 + $0x8] sm:$0xff]  ;;  %v190_v7 = vld [vmem:[%s267_s1 + $0x18] sm:$0xff]  }
   0x3   :  { %128 = vmatprep.subr.bf16.mxu0 %v198_v0  ;;  %v42_v6 = vpack.c.bf16 %v16_v5, %v16_v5  ;;  %v191_v8 = vld [vmem:[%s267_s1 + $0x10] sm:$0xff]   ;;  %v192_v9 = vld [vmem:[%s267_s1 + $0x8] sm:$0xff]   ;;  %v193_v10 = vld [vmem:[%s267_s1] sm:$0xff]  }
   0x4   :  { %v194_v11 = vld [vmem:[%s267_s1 + $0x58] sm:$0xff]   ;;  %v195_v12 = vld [vmem:[%s267_s1 + $0x50] sm:$0xff]   ;;  %v196_v13 = vld [vmem:[%s267_s1 + $0x48] sm:$0xff]  }
   0x5   :  { %184 = vmatprep.mubr.msk.bf16.mxu0 %vm122_vm0, %v42_v6  ;;  %v197_v14 = vld [vmem:[%s267_s1 + $0x40] sm:$0xff]  }
   0x6   :  { %129 = vmatpush1.bf16.msra.mxu0 %v187_v2  ;;  %v15_v15 = vld [vmem:[%s268_s0] sm:$0xff] }
   0x7   :  { %130 = vmatprep.subr.bf16.mxu0 %v198_v0  ;;  %v41_v16 = vpack.c.bf16 %v15_v15, %v15_v15  ;;  %v171_v17 = vld [vmem:[%s269_s2] ss:$0 sm:$0xff] }
   0xa   :  { %131 = vmatpush1.bf16.msra.mxu0 %v188_v3 }
   0xb   :  { %132 = vmatprep.subr.bf16.mxu0 %v198_v0 }
   0xe   :  { %133 = vmatpush1.bf16.msra.mxu0 %v189_v4 }
   0xf   :  { %134 = vmatprep.subr.bf16.mxu0 %v198_v0 }
  0x12   :  { %135 = vmatpush1.bf16.msra.mxu0 %v190_v7 }
  0x13   :  { %136 = vmatprep.subr.bf16.mxu0 %v198_v0 }
  0x16   :  { %137 = vmatpush1.bf16.msra.mxu0 %v191_v8 }
  0x17   :  { %138 = vmatprep.subr.bf16.mxu0 %v198_v0 }
  0x1a   :  { %139 = vmatpush1.bf16.msra.mxu0 %v192_v9 }
  0x1b   :  { %140 = vmatprep.subr.bf16.mxu0 %v198_v0 }
  0x1e   :  { %141 = vmatpush1.bf16.msra.mxu0 %v193_v10 }
  0x1f   :  { %150 = vmatprep.subr.bf16.mxu0 %v198_v0 }
  0x22   :  { %151 = vmatpush2.bf16.msra.mxu0 %v194_v11 }
  0x23   :  { %152 = vmatprep.subr.bf16.mxu0 %v198_v0 }
  0x26   :  { %153 = vmatpush2.bf16.msra.mxu0 %v195_v12 }
  0x27   :  { %154 = vmatprep.subr.bf16.mxu0 %v198_v0 }
  0x2a   :  { %155 = vmatpush2.bf16.msra.mxu0 %v196_v13 }
  0x2b   :  { %156 = vmatprep.subr.bf16.mxu0 %v198_v0 }
  0x2e   :  { %157 = vmatpush2.bf16.msra.mxu0 %v197_v14 }
  0x31   :  { %159 = vmatmul.mubr.bf16.vlgmr.msra.gmra.mxu0 %v41_v16 }
  0xf1   :  { %v160_v18 = vpop.f32.mrf.mxu0 }
  0xf2   :  { %v161_v19 = vadd.f32 %v171_v17, %v160_v18 }
  0xf3   :  { %v162_v20 = vpop.f32.mrf.mxu0 }
  0xf4   :  { %166 = vst [vmem:[%s270_s3] sm:$0xff] %v161_v19 }
  0xf5   :  { %v163_v21 = vpop.f32.mrf.mxu0 }
  0xf7   :  { %v164_v22 = vpop.f32.mrf.mxu0 }

// kernel: blip2_forward.15
= control target key start
LH: loop header
LB: loop body
LE: loop exit
PB: predicated region body
PF: predicated region fallthrough
CT: control target
= control target key end

     0   :  { %s107_s0 = inlined_call_operand.vmem [shape: f32[16,128], index: 0, kind: input, shape index: {}]   ;;  %s108_s1 = inlined_call_operand.vmem [shape: f32[1,128], index: 1, kind: input, shape index: {}]   ;;  %s109_s2 = inlined_call_operand.vmem [shape: f32[1,128], index: 2, kind: input, shape index: {}]   ;;  %s110_s3 = inlined_call_operand.vmem [shape: f32[16,128], index: 3, kind: output, shape index: {}]  }
   0x1   :  { %v14_v0 = vld [vmem:[%s107_s0] sm:$0xff]  ;;  %v15_v1 = vld [vmem:[%s107_s0 + $0x8] sm:$0xff] }
   0x2   :  { %18 = vadd.xlane.f32.xlu0 %v14_v0  ;;  %v63_v17 = vld [vmem:[%s108_s1] ss:$0 sm:$0xff] }
   0x3   :  { %v64_v19 = vld [vmem:[%s109_s2] ss:$0 sm:$0xff] }
   0x6   :  { %20 = vadd.xlane.f32.xlu0 %v15_v1 }
  0x8b   :  { %v19_v2 = vpop.xlane.xlu0 %18 }
  0x8c   :  { %v23_v3 = vmul.f32 0.0078125, %v19_v2 }
  0x8e   :  { %v25_v4 = vsub.f32 %v14_v0, %v23_v3 }
  0x8f   :  { %v21_v5 = vpop.xlane.xlu0 %20 }
  0x90   :  { %v24_v6 = vmul.f32 0.0078125, %v21_v5  ;;  %v27_v7 = vmul.f32 %v25_v4, %v25_v4 }
  0x92   :  { %v26_v8 = vsub.f32 %v15_v1, %v24_v6  ;;  %29 = vadd.xlane.f32.xlu1 %v27_v7 }
  0x94   :  { %v28_v9 = vmul.f32 %v26_v8, %v26_v8 }
  0x96   :  { %31 = vadd.xlane.f32.xlu1 %v28_v9 }
 0x11b   :  { %v30_v10 = vpop.xlane.xlu1 %29 }
 0x11c   :  { %v33_v11 = vmul.f32 0.0078125, %v30_v10 }
 0x11e   :  { %v35_v12 = vadd.f32 1e-05, %v33_v11 }
 0x11f   :  { %v32_v13 = vpop.xlane.xlu1 %31 }
 0x120   :  { %65 = vrsqrt.f32 %v35_v12  ;;  %v34_v14 = vmul.f32 0.0078125, %v32_v13 }
 0x122   :  { %v36_v15 = vadd.f32 1e-05, %v34_v14 }
 0x124   :  { %67 = vrsqrt.f32 %v36_v15 }
 0x12d   :  { %v66_v16 = vpop.eup %65 }
 0x12e   :  { %v39_v18 = vmul.f32 %v66_v16, %v25_v4 }
 0x130   :  { %v47_v20 = vmul.f32 %v63_v17, %v39_v18 }
 0x131   :  { %v68_v21 = vpop.eup %67 }
 0x132   :  { %v55_v22 = vadd.f32 %v64_v19, %v47_v20  ;;  %v40_v23 = vmul.f32 %v68_v21, %v26_v8 }
 0x134   :  { %57 = vst [vmem:[%s110_s3] sm:$0xff] %v55_v22  ;;  %v48_v24 = vmul.f32 %v63_v17, %v40_v23 }
 0x136   :  { %v56_v25 = vadd.f32 %v64_v19, %v48_v24 }
 0x138   :  { %58 = vst [vmem:[%s110_s3 + $0x8] sm:$0xff] %v56_v25 }

// kernel: blip2_forward.16
= control target key start
LH: loop header
LB: loop body
LE: loop exit
PB: predicated region body
PF: predicated region fallthrough
CT: control target
= control target key end

     0   :  { %s153_s0 = inlined_call_operand.vmem [shape: f32[32,128], index: 0, kind: input, shape index: {}]   ;;  %s154_s1 = inlined_call_operand.vmem [shape: f32[1,128], index: 1, kind: input, shape index: {}]   ;;  %s155_s2 = inlined_call_operand.vmem [shape: f32[1,128], index: 2, kind: input, shape index: {}]   ;;  %s156_s3 = inlined_call_operand.vmem [shape: f32[32,128], index: 3, kind: output, shape index: {}]  }
   0x1   :  { %v14_v0 = vld [vmem:[%s153_s0] sm:$0xff]  ;;  %v16_v1 = vld [vmem:[%s153_s0 + $0x10] sm:$0xff]  ;;  %v15_v2 = vld [vmem:[%s153_s0 + $0x8] sm:$0xff] }
   0x2   :  { %20 = vadd.xlane.f32.xlu0 %v14_v0  ;;  %24 = vadd.xlane.f32.xlu1 %v16_v1  ;;  %v17_v3 = vld [vmem:[%s153_s0 + $0x18] sm:$0xff]  ;;  %v93_v33 = vld [vmem:[%s154_s1] ss:$0 sm:$0xff] }
   0x3   :  { %v94_v35 = vld [vmem:[%s155_s2] ss:$0 sm:$0xff] }
   0x6   :  { %22 = vadd.xlane.f32.xlu0 %v15_v2  ;;  %26 = vadd.xlane.f32.xlu1 %v17_v3 }
  0x8b   :  { %v21_v4 = vpop.xlane.xlu0 %20  ;;  %v25_v5 = vpop.xlane.xlu1 %24 }
  0x8c   :  { %v29_v6 = vmul.f32 0.0078125, %v21_v4  ;;  %v31_v7 = vmul.f32 0.0078125, %v25_v5 }
  0x8e   :  { %v33_v8 = vsub.f32 %v14_v0, %v29_v6  ;;  %v35_v9 = vsub.f32 %v16_v1, %v31_v7 }
  0x8f   :  { %v23_v10 = vpop.xlane.xlu0 %22  ;;  %v27_v11 = vpop.xlane.xlu1 %26 }
  0x90   :  { %v30_v12 = vmul.f32 0.0078125, %v23_v10  ;;  %v37_v13 = vmul.f32 %v33_v8, %v33_v8  ;;  %v32_v14 = vmul.f32 0.0078125, %v27_v11  ;;  %v39_v17 = vmul.f32 %v35_v9, %v35_v9 }
  0x92   :  { %v34_v15 = vsub.f32 %v15_v2, %v30_v12  ;;  %41 = vadd.xlane.f32.xlu0 %v37_v13  ;;  %v36_v16 = vsub.f32 %v17_v3, %v32_v14 }
  0x94   :  { %v38_v18 = vmul.f32 %v34_v15, %v34_v15  ;;  %v40_v19 = vmul.f32 %v36_v16, %v36_v16 }
  0x96   :  { %45 = vadd.xlane.f32.xlu0 %v39_v17  ;;  %43 = vadd.xlane.f32.xlu1 %v38_v18 }
  0x9a   :  { %47 = vadd.xlane.f32.xlu1 %v40_v19 }
 0x11b   :  { %v42_v20 = vpop.xlane.xlu0 %41 }
 0x11c   :  { %v49_v21 = vmul.f32 0.0078125, %v42_v20 }
 0x11e   :  { %v53_v22 = vadd.f32 1e-05, %v49_v21 }
 0x11f   :  { %v44_v23 = vpop.xlane.xlu1 %43  ;;  %v46_v24 = vpop.xlane.xlu0 %45 }
 0x120   :  { %95 = vrsqrt.f32 %v53_v22  ;;  %v50_v25 = vmul.f32 0.0078125, %v44_v23  ;;  %v51_v26 = vmul.f32 0.0078125, %v46_v24 }
 0x122   :  { %v54_v27 = vadd.f32 1e-05, %v50_v25  ;;  %v55_v28 = vadd.f32 1e-05, %v51_v26 }
 0x123   :  { %v48_v29 = vpop.xlane.xlu1 %47 }
 0x124   :  { %97 = vrsqrt.f32 %v54_v27  ;;  %v52_v30 = vmul.f32 0.0078125, %v48_v29 }
 0x125   :  { %99 = vrsqrt.f32 %v55_v28 }
 0x126   :  { %v56_v31 = vadd.f32 1e-05, %v52_v30 }
 0x128   :  { %101 = vrsqrt.f32 %v56_v31 }
 0x12d   :  { %v96_v32 = vpop.eup %95 }
 0x12e   :  { %v61_v34 = vmul.f32 %v96_v32, %v33_v8 }
 0x130   :  { %v71_v36 = vmul.f32 %v93_v33, %v61_v34 }
 0x131   :  { %v98_v37 = vpop.eup %97 }
 0x132   :  { %v100_v38 = vpop.eup %99  ;;  %v81_v39 = vadd.f32 %v94_v35, %v71_v36  ;;  %v62_v40 = vmul.f32 %v98_v37, %v34_v15 }
 0x133   :  { %v63_v41 = vmul.f32 %v100_v38, %v35_v9 }
 0x134   :  { %85 = vst [vmem:[%s156_s3] sm:$0xff] %v81_v39  ;;  %v72_v42 = vmul.f32 %v93_v33, %v62_v40 }
 0x135   :  { %v102_v43 = vpop.eup %101  ;;  %v73_v44 = vmul.f32 %v93_v33, %v63_v41 }
 0x136   :  { %v82_v45 = vadd.f32 %v94_v35, %v72_v42  ;;  %v64_v46 = vmul.f32 %v102_v43, %v36_v16 }
 0x137   :  { %v83_v47 = vadd.f32 %v94_v35, %v73_v44 }
 0x138   :  { %86 = vst [vmem:[%s156_s3 + $0x8] sm:$0xff] %v82_v45  ;;  %v74_v48 = vmul.f32 %v93_v33, %v64_v46 }
 0x139   :  { %87 = vst [vmem:[%s156_s3 + $0x10] sm:$0xff] %v83_v47 }
 0x13a   :  { %v84_v49 = vadd.f32 %v94_v35, %v74_v48 }
 0x13c   :  { %88 = vst [vmem:[%s156_s3 + $0x18] sm:$0xff] %v84_v49 }

// kernel: blip2_forward.13
= control target key start
LH: loop header
LB: loop body
LE: loop exit
PB: predicated region body
PF: predicated region fallthrough
CT: control target
= control target key end

     0   :  { %s2172_s25 = smov 0   ;;  %s2533_s0 = inlined_call_operand.vmem [shape: f32[2,5,128], index: 0, kind: input, shape index: {}]   ;;  %s2534_s1 = inlined_call_operand.vmem [shape: f32[1,128], index: 1, kind: input, shape index: {}]   ;;  %s2535_s2 = inlined_call_operand.vmem [shape: f32[1,128], index: 2, kind: input, shape index: {}]   ;;  %s2536_s3 = inlined_call_operand.vmem [shape: bf16[128,384], index: 3, kind: input, shape index: {}]   ;;  %s2537_s4 = inlined_call_operand.vmem [shape: f32[1,384], index: 4, kind: input, shape index: {}]   ;;  %s2538_s5 = inlined_call_operand.vmem [shape: bf16[128,128], index: 5, kind: input, shape index: {}]   ;;  %s2539_s6 = inlined_call_operand.vmem [shape: f32[1,128], index: 6, kind: input, shape index: {}]   ;;  %s2540_s7 = inlined_call_operand.vmem [shape: f32[1,128], index: 7, kind: input, shape index: {}]   ;;  %s2541_s8 = inlined_call_operand.vmem [shape: f32[1,128], index: 8, kind: input, shape index: {}]   ;;  %s2542_s9 = inlined_call_operand.vmem [shape: bf16[128,256], index: 9, kind: input, shape index: {}]   ;;  %s2543_s10 = inlined_call_operand.vmem [shape: f32[1,256], index: 10, kind: input, shape index: {}]   ;;  %s2544_s11 = inlined_call_operand.vmem [shape: bf16[256,128], index: 11, kind: input, shape index: {}]   ;;  %s2545_s12 = inlined_call_operand.vmem [shape: f32[1,128], index: 12, kind: input, shape index: {}]   ;;  %s2546_s13 = inlined_call_operand.vmem [shape: f32[2,5,128], index: 13, kind: output, shape index: {}]  }
   0x1 LB: > { %s1737_s26 = sadd.s32 4294967295, %s2093_s25   ;;  %p1741_p0 = scmp.ge.s32.totalorder %s2093_s25, 1  ;;  %s2093_s25 = sphi %s2172_s25, %s23_s25  }
   0x2   : > { %p386_p1 = scmp.lt.s32.totalorder %s2093_s25, 3 }
   0x4   : > { %p387_p2 = pnand %p1741_p0, %p386_p1 }
   0x5   : > { %p428_p3 = scmp.lt.s32.totalorder (!%p387_p2), %s1737_s26, 1  ;;  %s2098_s29 = smov (!%p387_p2), 96  }
   0x6   : > { %390 = sbr.rel (%p387_p2) target bundleno = 2818 (0xb02), region = 72  ;;  %s2101_s14 = smov (!%p387_p2), 64  }
   0xb   : > { %s2548_s26 = smov (!%p428_p3, %s1737_s26), 1  ;;  %vm440_vm0 = vcmask 1044480   ;;  %v1983_v2 = vld [vmem:[%s2536_s3 + $0xac] ss:$12 sps:$4 sm:$0xff]   ;;  %v1985_v3 = vld [vmem:[%s2536_s3 + $0xa8] ss:$12 sps:$4 sm:$0xff]   ;;  %v504_v43 = vlaneseq }
   0xc   : > { %s1742_s27 = sshll.u32 %s2548_s26, 3  ;;  %v2095_v4 = vmov 0.0   ;;  %v1986_v5 = vld [vmem:[%s2536_s3 + $0xb0] ss:$12 sps:$4 sm:$0xff]   ;;  %v1987_v6 = vld [vmem:[%s2536_s3 + $0x94] ss:$12 sps:$4 sm:$0xff]   ;;  %647 = vmatprep.subr.bf16.mxu0 %v1983_v2 }
   0xd   : > { %s431_s30 = scalar_lea.vmem %s2533_s0, %s1742_s27  ;;  %1880 = vmatprep.subr.bf16.mxu1 %v2095_v4  ;;  %v1989_v7 = vld [vmem:[%s2536_s3 + $0x90] ss:$12 sps:$4 sm:$0xff]   ;;  %v1990_v8 = vld [vmem:[%s2536_s3 + $0x98] ss:$12 sps:$4 sm:$0xff]   ;;  %648 = vmatpush1.bf16.msra.mxu0 %v1985_v3  ;;  %v1994_v16 = vld [vmem:[%s2536_s3 + $0x80] ss:$12 sps:$4 sm:$0xff]   ;;  %s435_s23 = scalar_lea.vmem %s2546_s13, %s1742_s27 }
   0xe   : > { %v2188_v0 = vld [vmem:[%s431_s30] sm:$0x1f]  ;;  %1881 = vmatpush3.bf16.msra.mxu1 %v1986_v5  ;;  %649 = vmatprep.subr.bf16.mxu0 %v1987_v6  ;;  %v1991_v14 = vld [vmem:[%s2536_s3 + $0x7c] ss:$12 sps:$4 sm:$0xff]   ;;  %v1999_v20 = vld [vmem:[%s2536_s3 + $0x4c] ss:$12 sps:$4 sm:$0xff]  }
   0xf   : > { %v441_v1 = vsel %vm440_vm0, %v2188_v0, 0.0  ;;  %1882 = vmatprep.subr.bf16.mxu1 %v2095_v4  ;;  %v1993_v15 = vld [vmem:[%s2536_s3 + $0x78] ss:$12 sps:$4 sm:$0xff]   ;;  %v1997_v18 = vld [vmem:[%s2536_s3 + $0x60] ss:$12 sps:$4 sm:$0xff]   ;;  %v2096_v24 = vmov 0  }
  0x10   : > { %442 = vadd.xlane.f32.xlu0 %v441_v1  ;;  %v1995_v17 = vld [vmem:[%s2536_s3 + $0x64] ss:$12 sps:$4 sm:$0xff]   ;;  %v1998_v19 = vld [vmem:[%s2536_s3 + $0x68] ss:$12 sps:$4 sm:$0xff]   ;;  %679 = vmatprep.mubr.bf16.mxu0 %v2096_v24  ;;  %vm2097_vm1 = vmmov 0   ;;  %v2289_v44 = vshrl.u32 %v504_v43, 7 }
  0x11   : > { %650 = vmatpush1.bf16.msra.mxu0 %v1989_v7  ;;  %v2001_v21 = vld [vmem:[%s2536_s3 + $0x48] ss:$12 sps:$4 sm:$0xff]   ;;  %v2002_v22 = vld [vmem:[%s2536_s3 + $0x50] ss:$12 sps:$4 sm:$0xff]   ;;  %1896 = vmatprep.mubr.msk.bf16.mxu1 %vm2097_vm1, %v2095_v4  ;;  %v2006_v26 = vld [vmem:[%s2536_s3 + $0x38] ss:$12 sps:$4 sm:$0xff]  }
  0x12   : > { %1883 = vmatpush3.bf16.msra.mxu1 %v1990_v8  ;;  %651 = vmatprep.subr.bf16.mxu0 %v1991_v14  ;;  %v2003_v23 = vld [vmem:[%s2536_s3 + $0x34] ss:$12 sps:$4 sm:$0xff]   ;;  %v2005_v25 = vld [vmem:[%s2536_s3 + $0x30] ss:$12 sps:$4 sm:$0xff]   ;;  %v2009_v28 = vld [vmem:[%s2536_s3 + $0x18] ss:$12 sps:$4 sm:$0xff]  }
  0x13   : > { %1884 = vmatprep.subr.bf16.mxu1 %v2095_v4  ;;  %v2007_v27 = vld [vmem:[%s2536_s3 + $0x1c] ss:$12 sps:$4 sm:$0xff]   ;;  %v2010_v29 = vld [vmem:[%s2536_s3 + $0x20] ss:$12 sps:$4 sm:$0xff]   ;;  %v2011_v30 = vld [vmem:[%s2536_s3 + $0x4] ss:$12 sps:$4 sm:$0xff]  }
  0x14   : > { %v2013_v31 = vld [vmem:[%s2536_s3] ss:$12 sps:$4 sm:$0xff]   ;;  %v2014_v32 = vld [vmem:[%s2536_s3 + $0x8] ss:$12 sps:$4 sm:$0xff]   ;;  %v510_v45 = vsub.s32 1, %v2289_v44  ;;  %v506_v46 = vsub.s32 0, %v2289_v44 }
  0x15   : > { %652 = vmatpush1.bf16.msra.mxu0 %v1993_v15  ;;  %v1744_v37 = vld [vmem:[%s2534_s1] ss:$0 sm:$0xff]  ;;  %v514_v48 = vsub.s32 2, %v2289_v44  ;;  %vm732_vm2 = vcmask 261120   ;;  %vm796_vm3 = vcmask 1041408   ;;  %vm797_vm4 = vcmask 1042432  }
  0x16   : > { %1885 = vmatpush3.bf16.msra.mxu1 %v1994_v16  ;;  %653 = vmatprep.subr.bf16.mxu0 %v1995_v17  ;;  %v1745_v39 = vld [vmem:[%s2535_s2] ss:$0 sm:$0xff]  ;;  %v2099_v2 = vmov 65535   ;;  %s2100_s30 = smov 32   ;;  %vm779_vm5 = vcmask 36864   ;;  %vm792_vm6 = vcmask 39936  }
  0x17   : > { %1886 = vmatprep.subr.bf16.mxu1 %v2095_v4  ;;  %v502_v47 = vld [vmem:[%s2537_s4] sm:$0x7]  ;;  %v798_v3 = vsel %vm796_vm3, 4294967295, %v2099_v2  ;;  %vm1189_vm7 = vcmask 523264   ;;  %vm1191_vm8 = vcmask 785408  }
  0x18   : > { %v511_v49 = vrot.slane %v502_v47, %v510_v45  ;;  %v507_v52 = vrot.slane %v502_v47, %v506_v46  ;;  %v515_v53 = vrot.slane %v502_v47, %v514_v48  ;;  %v2307_v7 = vsel %vm797_vm4, %v798_v3, 0 }
  0x19   : > { %654 = vmatpush1.bf16.msra.mxu0 %v1997_v18 }
  0x1a   : > { %1887 = vmatpush3.bf16.msra.mxu1 %v1998_v19  ;;  %655 = vmatprep.subr.bf16.mxu0 %v1999_v20 }
  0x1b   : > { %1888 = vmatprep.subr.bf16.mxu1 %v2095_v4 }
  0x1d   : > { %656 = vmatpush1.bf16.msra.mxu0 %v2001_v21 }
  0x1e   : > { %1889 = vmatpush3.bf16.msra.mxu1 %v2002_v22  ;;  %657 = vmatprep.subr.bf16.mxu0 %v2003_v23 }
  0x1f   : > { %1890 = vmatprep.subr.bf16.mxu1 %v2095_v4 }
  0x21   : > { %658 = vmatpush1.bf16.msra.mxu0 %v2005_v25 }
  0x22   : > { %1891 = vmatpush3.bf16.msra.mxu1 %v2006_v26  ;;  %659 = vmatprep.subr.bf16.mxu0 %v2007_v27 }
  0x23   : > { %1892 = vmatprep.subr.bf16.mxu1 %v2095_v4 }
  0x25   : > { %660 = vmatpush1.bf16.msra.mxu0 %v2009_v28 }
  0x26   : > { %1893 = vmatpush3.bf16.msra.mxu1 %v2010_v29  ;;  %661 = vmatprep.subr.bf16.mxu0 %v2011_v30 }
  0x27   : > { %1894 = vmatprep.subr.bf16.mxu1 %v2095_v4 }
  0x29   : > { %662 = vmatpush1.bf16.msra.mxu0 %v2013_v31 }
  0x2a   : > { %1895 = vmatpush3.bf16.msra.mxu1 %v2014_v32  ;;  %1924 = vmatprep.subr.bf16.mxu0 %v2095_v4 }
  0x2b   : > { %1900 = vmatprep.subr.bf16.mxu1 %v2095_v4 }
  0x99   : > { %v443_v9 = vpop.xlane.xlu0 %442 }
  0x9a   : > { %v445_v10 = vmul.f32 0.0078125, %v443_v9 }
  0x9c   : > { %v446_v11 = vsub.f32 %v2188_v0, %v445_v10 }
  0x9e   : > { %v447_v12 = vmul.f32 %v446_v11, %v446_v11 }
  0xa0   : > { %v448_v13 = vsel %vm440_vm0, %v447_v12, 0.0 }
  0xa1   : > { %449 = vadd.xlane.f32.xlu0 %v448_v13 }
 0x12a   : > { %v450_v33 = vpop.xlane.xlu0 %449 }
 0x12b   : > { %v451_v34 = vmul.f32 0.0078125, %v450_v33 }
 0x12d   : > { %v452_v35 = vadd.f32 1e-05, %v451_v34 }
 0x12f   : > { %2063 = vrsqrt.f32 %v452_v35 }
 0x13c   : > { %v2064_v36 = vpop.eup %2063 }
 0x13d   : > { %v454_v38 = vmul.f32 %v2064_v36, %v446_v11 }
 0x13f   : > { %v461_v40 = vmul.f32 %v1744_v37, %v454_v38 }
 0x141   : > { %v468_v41 = vadd.f32 %v1745_v39, %v461_v40 }
 0x143   : > { %v501_v42 = vpack.c.bf16 %v468_v41, %v468_v41 }
 0x145   : > { %680 = vmatmul.mubr.bf16.vlgmr.msra.gmra.mxu0 %v501_v42  ;;  %1897 = vmatmul.mubr.bf16.vlgmr.msra.gmra.mxu1 %v501_v42 }
 0x146   : > { %1902 = vmatprep.mubr.msk.bf16.mxu1 %vm2097_vm1, %v2095_v4  ;;  %1926 = vmatprep.mubr.msk.bf16.mxu0 %vm2097_vm1, %v2095_v4 }
 0x205   : > { %v681_v50 = vpop.f32.mrf.mxu0  ;;  %v722_v51 = vpop.f32.mrf.mxu1 }
 0x206   : > { %v682_v59 = vadd.f32 %v681_v50, %v507_v52  ;;  %v723_v61 = vadd.f32 %v722_v51, %v515_v53 }
 0x207   : > { %v683_v54 = vpop.f32.mrf.mxu0  ;;  %v1898_v55 = vpop.f32.mrf.mxu1 }
 0x208   : > { %v684_v56 = vadd.f32 %v683_v54, %v511_v49  ;;  %v728_v5 = vmul.f32 0.17677669, %v682_v59  ;;  %v2304_v6 = vpack.c.bf16 %v723_v61, %v723_v61 }
 0x209   : > { %v685_v57 = vpop.f32.mrf.mxu0  ;;  %v725_v58 = vpop.f32.mrf.mxu1 }
 0x20a   : > { %v730_v60 = vpack.c.bf16 %v684_v56, %v684_v56  ;;  %v729_v8 = vpack.c.bf16 %v728_v5, %v728_v5  ;;  %v801_v9 = vand.u32 %v2307_v7, %v2304_v6 }
 0x20b   : > { %v686_v62 = vpop.f32.mrf.mxu0  ;;  %v1899_v63 = vpop.f32.mrf.mxu1 }
 0x20c   : > { %847 = vrot.lane.b32.xlu0 %v730_v60, %s2098_s29  ;;  %v737_v1 = vsel %vm732_vm2, %v730_v60, 0 }
 0x20d   : > { %1901 = vmatpush3.bf16.xpose.msra.mxu1 %v737_v1 }
 0x20e   : > { %1906 = vmatprep.subr.bf16.mxu1 %v2095_v4 }
 0x210   : > { %1068 = vrot.lane.b32.xlu0 %v730_v60, %s2100_s30 }
 0x214   : > { %1903 = vmatmul.mubr.msk.bf16.vlgmr.msra.gmra.mxu1 %vm732_vm2, %v729_v8 }
 0x215   : > { %1907 = vmatpush3.bf16.msra.mxu1 %v801_v9  ;;  %1908 = vmatprep.mubr.msk.bf16.mxu1 %vm2097_vm1, %v2095_v4 }
 0x216   : > { %1912 = vmatprep.subr.bf16.mxu1 %v2095_v4 }
 0x27e   : > { %v848_v22 = vpop.permute.xlu0 %847 }
 0x27f   : > { %v853_v32 = vsel %vm732_vm2, %v848_v22, 0 }
 0x282   : > { %v1069_v27 = vpop.permute.xlu0 %1068 }
 0x283   : > { %v1074_v30 = vsel %vm732_vm2, %v1069_v27, 0 }
 0x2d4   : > { %v773_v10 = vpop.f32.mrf.mxu1 }
 0x2d5   : > { %v780_v11 = vsel %vm779_vm5, %v773_v10, -inf }
 0x2d6   : > { %781 = vmax.xlane.f32.xlu1 %v780_v11  ;;  %v1904_v12 = vpop.f32.mrf.mxu1 }
 0x2d8   : > { %v776_v13 = vpop.f32.mrf.mxu1 }
 0x2da   : > { %v1905_v14 = vpop.f32.mrf.mxu1 }
 0x35f   : > { %v782_v15 = vpop.xlane.xlu1 %781 }
 0x360   : > { %v783_v16 = vsub.f32 %v773_v10, %v782_v15 }
 0x362   : > { %v784_v17 = vmul.f32 1.442695, %v783_v16 }
 0x364   : > { %2065 = vpow2.f32 %v784_v17 }
 0x371   : > { %v2066_v18 = vpop.eup %2065 }
 0x372   : > { %v786_v19 = vsel %vm779_vm5, %v2066_v18, 0.0 }
 0x373   : > { %787 = vadd.xlane.f32.xlu1 %v786_v19 }
 0x384   : > { %844 = vrot.lane.b32.xlu1 %v729_v8, %s2098_s29 }
 0x388   : > { %958 = vrot.lane.b32.xlu1 %v730_v60, %s2101_s14 }
 0x38c   : > { %956 = vrot.lane.b32.xlu1 %v729_v8, %s2101_s14 }
 0x390   : > { %1066 = vrot.lane.b32.xlu1 %v729_v8, %s2100_s30 }
 0x3fc   : > { %v788_v20 = vpop.xlane.xlu1 %787 }
 0x3fd   : > { %2067 = vrcp.f32 %v788_v20 }
 0x400   : > { %v845_v21 = vpop.permute.xlu1 %844 }
 0x404   : > { %v959_v23 = vpop.permute.xlu1 %958 }
 0x405   : > { %v964_v25 = vsel %vm732_vm2, %v959_v23, 0 }
 0x406   : > { %1925 = vmatpush3.bf16.xpose.msra.mxu0 %v964_v25 }
 0x407   : > { %1936 = vmatprep.subr.bf16.mxu0 %v2095_v4 }
 0x408   : > { %v957_v29 = vpop.permute.xlu1 %956 }
 0x40a   : > { %v2068_v26 = vpop.eup %2067 }
 0x40b   : > { %v790_v28 = vmul.f32 %v2068_v26, %v2066_v18 }
 0x40c   : > { %v1067_v33 = vpop.permute.xlu1 %1066 }
 0x40d   : > { %1927 = vmatmul.mubr.msk.bf16.vlgmr.msra.gmra.mxu0 %vm732_vm2, %v957_v29  ;;  %v791_v31 = vpack.c.bf16 %v790_v28, %v790_v28  ;;  %v2015_v29 = vld [vmem:[%s2538_s5 + $0x38] sm:$0xff]  }
 0x40e   : > { %1937 = vmatpush3.bf16.xpose.msra.mxu0 %v1074_v30  ;;  %1938 = vmatprep.mubr.msk.bf16.mxu0 %vm2097_vm1, %v2095_v4  ;;  %v2017_v30 = vld [vmem:[%s2538_s5 + $0x28] sm:$0xff]  }
 0x40f   : > { %1909 = vmatmul.mubr.msk.bf16.vlgmr.msra.gmra.mxu1 %vm792_vm6, %v791_v31  ;;  %1948 = vmatprep.subr.bf16.mxu0 %v2095_v4  ;;  %v2019_v31 = vld [vmem:[%s2538_s5 + $0x18] sm:$0xff]  }
 0x410   : > { %1913 = vmatpush3.bf16.xpose.msra.mxu1 %v853_v32  ;;  %1914 = vmatprep.mubr.msk.bf16.mxu1 %vm2097_vm1, %v2095_v4  ;;  %v2020_v32 = vld [vmem:[%s2538_s5 + $0x10] sm:$0xff]  }
 0x411   : > { %1918 = vmatprep.subr.bf16.mxu1 %v2095_v4 }
 0x415   : > { %1939 = vmatmul.mubr.msk.bf16.vlgmr.msra.gmra.mxu0 %vm732_vm2, %v1067_v33  ;;  %v2021_v33 = vld [vmem:[%s2538_s5 + $0x8] sm:$0xff]  }
 0x416   : > { %1964 = vmatprep.mubr.msk.bf16.mxu0 %vm2097_vm1, %v2095_v4  ;;  %1949 = vmatpush3.bf16.msra.mxu0 %v2015_v29 }
 0x417   : > { %1915 = vmatmul.mubr.msk.bf16.vlgmr.msra.gmra.mxu1 %vm732_vm2, %v845_v21  ;;  %1950 = vmatprep.subr.bf16.mxu0 %v2095_v4 }
 0x418   : > { %1920 = vmatprep.mubr.msk.bf16.mxu1 %vm2097_vm1, %v2095_v4 }
 0x4cd   : > { %v1000_v34 = vpop.f32.mrf.mxu0 }
 0x4ce   : > { %v1006_v35 = vsel %vm779_vm5, %v1000_v34, -inf }
 0x4cf   : > { %1007 = vmax.xlane.f32.xlu1 %v1006_v35  ;;  %v2340_v36 = vpop.f32.mrf.mxu1  ;;  %v1928_v37 = vpop.f32.mrf.mxu0 }
 0x4d0   : > { %v2022_v37 = vld [vmem:[%s2538_s5] sm:$0xff]  }
 0x4d1   : > { %v1910_v38 = vpop.f32.mrf.mxu1  ;;  %v1003_v39 = vpop.f32.mrf.mxu0 }
 0x4d3   : > { %v840_v40 = vpop.f32.mrf.mxu1  ;;  %v1929_v41 = vpop.f32.mrf.mxu0 }
 0x4d5   : > { %v1911_v42 = vpop.f32.mrf.mxu1  ;;  %v1110_v43 = vpop.f32.mrf.mxu0 }
 0x4d6   : > { %v1116_v54 = vsel %vm779_vm5, %v1110_v43, -inf }
 0x4d7   : > { %v889_v47 = vpop.f32.mrf.mxu1  ;;  %v1940_v48 = vpop.f32.mrf.mxu0 }
 0x4d8   : > { %v895_v49 = vsel %vm779_vm5, %v889_v47, -inf }
 0x4d9   : > { %v1113_v50 = vpop.f32.mrf.mxu0  ;;  %896 = vmax.xlane.f32.xlu0 %v895_v49  ;;  %v1916_v51 = vpop.f32.mrf.mxu1 }
 0x4db   : > { %v892_v52 = vpop.f32.mrf.mxu1  ;;  %v1941_v53 = vpop.f32.mrf.mxu0 }
 0x4dd   : > { %1117 = vmax.xlane.f32.xlu0 %v1116_v54  ;;  %v1917_v55 = vpop.f32.mrf.mxu1 }
 0x558   : > { %v1008_v56 = vpop.xlane.xlu1 %1007 }
 0x559   : > { %v1009_v57 = vsub.f32 %v1000_v34, %v1008_v56 }
 0x55b   : > { %v1010_v58 = vmul.f32 1.442695, %v1009_v57 }
 0x55d   : > { %2069 = vpow2.f32 %v1010_v58  ;;  %v1786_v58 = vld [vmem:[%s2539_s6] ss:$0 sm:$0xff] }
 0x562   : > { %v897_v59 = vpop.xlane.xlu0 %896 }
 0x563   : > { %v898_v60 = vsub.f32 %v889_v47, %v897_v59 }
 0x565   : > { %v899_v61 = vmul.f32 1.442695, %v898_v60 }
 0x566   : > { %v1118_v62 = vpop.xlane.xlu0 %1117 }
 0x567   : > { %2071 = vpow2.f32 %v899_v61  ;;  %v1119_v63 = vsub.f32 %v1110_v43, %v1118_v62 }
 0x569   : > { %v1120_v1 = vmul.f32 1.442695, %v1119_v63 }
 0x56a   : > { %v2070_v2 = vpop.eup %2069 }
 0x56b   : > { %2073 = vpow2.f32 %v1120_v1  ;;  %v1012_v3 = vsel %vm779_vm5, %v2070_v2, 0.0  ;;  %v2023_v1 = vld [vmem:[%s2542_s9 + $0x70] ss:$8 sps:$4 sm:$0xff]  }
 0x56c   : > { %1013 = vadd.xlane.f32.xlu0 %v1012_v3  ;;  %v2026_v3 = vld [vmem:[%s2542_s9 + $0x60] ss:$8 sps:$4 sm:$0xff]  }
 0x574   : > { %v2072_v5 = vpop.eup %2071 }
 0x575   : > { %v901_v8 = vsel %vm779_vm5, %v2072_v5, 0.0 }
 0x576   : > { %902 = vadd.xlane.f32.xlu0 %v901_v8 }
 0x578   : > { %v2074_v9 = vpop.eup %2073 }
 0x579   : > { %v1122_v10 = vsel %vm779_vm5, %v2074_v9, 0.0 }
 0x57a   : > { %1123 = vadd.xlane.f32.xlu1 %v1122_v10 }
 0x58b   : > { %1018 = vrot.lane.b32.xlu1 %v2304_v6, %s2101_s14 }
 0x58c   : > { %908 = vrot.lane.b32.xlu0 %v2304_v6, %s2098_s29 }
 0x58f   : > { %1128 = vrot.lane.b32.xlu1 %v2304_v6, %s2100_s30 }
 0x5f5   : > { %v1014_v11 = vpop.xlane.xlu0 %1013 }
 0x5ff   : > { %v903_v12 = vpop.xlane.xlu0 %902 }
 0x600   : > { %2075 = vrcp.f32 %v903_v12  ;;  %v2031_v12 = vld [vmem:[%s2542_s9 + $0x54] ss:$8 sps:$4 sm:$0xff]  }
 0x601   : > { %2077 = vrcp.f32 %v1014_v11 }
 0x603   : > { %v909_v13 = vpop.permute.xlu0 %908  ;;  %v1124_v15 = vpop.xlane.xlu1 %1123 }
 0x604   : > { %v914_v14 = vand.u32 %v909_v13, %v2307_v7  ;;  %2079 = vrcp.f32 %v1124_v15  ;;  %v2029_v13 = vld [vmem:[%s2542_s9 + $0x50] ss:$8 sps:$4 sm:$0xff]   ;;  %v2034_v15 = vld [vmem:[%s2542_s9 + $0x44] ss:$8 sps:$4 sm:$0xff]  }
 0x606   : > { %1919 = vmatpush3.bf16.msra.mxu1 %v914_v14  ;;  %v2032_v14 = vld [vmem:[%s2542_s9 + $0x40] ss:$8 sps:$4 sm:$0xff]  }
 0x607   : > { %1930 = vmatprep.subr.bf16.mxu1 %v2095_v4  ;;  %v1019_v17 = vpop.permute.xlu1 %1018 }
 0x608   : > { %v1024_v21 = vand.u32 %v1019_v17, %v2307_v7  ;;  %v2035_v17 = vld [vmem:[%s2542_s9 + $0x30] ss:$8 sps:$4 sm:$0xff]  }
 0x60b   : > { %v1129_v22 = vpop.permute.xlu1 %1128 }
 0x60c   : > { %v1134_v26 = vand.u32 %v1129_v22, %v2307_v7  ;;  %v2016_v7 = vld [vmem:[%s2538_s5 + $0x30] sm:$0xff]   ;;  %v2044_v22 = vld [vmem:[%s2542_s9] ss:$8 sps:$4 sm:$0xff]  }
 0x60d   : > { %v2076_v16 = vpop.eup %2075  ;;  %1951 = vmatpush3.bf16.msra.mxu0 %v2016_v7  ;;  %v1788_v7 = vld [vmem:[%s2541_s8] ss:$0 sm:$0xff] }
 0x60e   : > { %v905_v18 = vmul.f32 %v2076_v16, %v2072_v5  ;;  %v2078_v20 = vpop.eup %2077  ;;  %1952 = vmatprep.subr.bf16.mxu0 %v2095_v4  ;;  %v2037_v16 = vld [vmem:[%s2542_s9 + $0x34] ss:$8 sps:$4 sm:$0xff]  }
 0x60f   : > { %v1016_v6 = vmul.f32 %v2078_v20, %v2070_v2  ;;  %v2025_v2 = vld [vmem:[%s2542_s9 + $0x74] ss:$8 sps:$4 sm:$0xff]  }
 0x610   : > { %v906_v19 = vpack.c.bf16 %v905_v18, %v905_v18  ;;  %v2040_v18 = vld [vmem:[%s2542_s9 + $0x24] ss:$8 sps:$4 sm:$0xff]   ;;  %v2043_v20 = vld [vmem:[%s2542_s9 + $0x14] ss:$8 sps:$4 sm:$0xff]  }
 0x611   : > { %v1017_v23 = vpack.c.bf16 %v1016_v6, %v1016_v6  ;;  %v2080_v25 = vpop.eup %2079  ;;  %1953 = vmatpush3.bf16.msra.mxu0 %v2017_v30  ;;  %v2046_v6 = vld [vmem:[%s2542_s9 + $0x4] ss:$8 sps:$4 sm:$0xff]  }
 0x612   : > { %1921 = vmatmul.mubr.msk.bf16.vlgmr.msra.gmra.mxu1 %vm792_vm6, %v906_v19  ;;  %v1126_v27 = vmul.f32 %v2080_v25, %v2074_v9  ;;  %1954 = vmatprep.subr.bf16.mxu0 %v2095_v4  ;;  %v2038_v19 = vld [vmem:[%s2542_s9 + $0x20] ss:$8 sps:$4 sm:$0xff]  }
 0x613   : > { %1931 = vmatpush3.bf16.msra.mxu1 %v1024_v21  ;;  %1932 = vmatprep.mubr.msk.bf16.mxu1 %vm2097_vm1, %v2095_v4  ;;  %v2041_v21 = vld [vmem:[%s2542_s9 + $0x10] ss:$8 sps:$4 sm:$0xff]  }
 0x614   : > { %1942 = vmatprep.subr.bf16.mxu1 %v2095_v4  ;;  %v1127_v28 = vpack.c.bf16 %v1126_v27, %v1126_v27 }
 0x61a   : > { %1933 = vmatmul.mubr.msk.bf16.vlgmr.msra.gmra.mxu1 %vm792_vm6, %v1017_v23 }
 0x61b   : > { %1943 = vmatpush3.bf16.msra.mxu1 %v1134_v26  ;;  %1944 = vmatprep.mubr.msk.bf16.mxu1 %vm2097_vm1, %v2095_v4 }
 0x61c   : > { %1445 = vmatprep.subr.bf16.mxu1 %v2025_v2 }
 0x622   : > { %1945 = vmatmul.mubr.msk.bf16.vlgmr.msra.gmra.mxu1 %vm792_vm6, %v1127_v28  ;;  %v1787_v28 = vld [vmem:[%s2540_s7] ss:$0 sm:$0xff] }
 0x623   : > { %1477 = vmatprep.mubr.bf16.mxu1 %v2096_v24  ;;  %v2018_v24 = vld [vmem:[%s2538_s5 + $0x20] sm:$0xff]   ;;  %1446 = vmatpush1.bf16.msra.mxu1 %v2023_v1 }
 0x624   : > { %1955 = vmatpush3.bf16.msra.mxu0 %v2018_v24 }
 0x625   : > { %1956 = vmatprep.subr.bf16.mxu0 %v2095_v4 }
 0x628   : > { %1957 = vmatpush3.bf16.msra.mxu0 %v2019_v31 }
 0x629   : > { %1958 = vmatprep.subr.bf16.mxu0 %v2095_v4 }
 0x62c   : > { %1959 = vmatpush3.bf16.msra.mxu0 %v2020_v32  ;;  %v2047_v32 = vld [vmem:[%s2544_s11 + $0x78] sm:$0xff]  }
 0x62d   : > { %1960 = vmatprep.subr.bf16.mxu0 %v2095_v4 }
 0x630   : > { %1961 = vmatpush3.bf16.msra.mxu0 %v2021_v33  ;;  %v2048_v33 = vld [vmem:[%s2544_s11 + $0x38] sm:$0xff]  }
 0x631   : > { %1962 = vmatprep.subr.bf16.mxu0 %v2095_v4 }
 0x634   : > { %1963 = vmatpush3.bf16.msra.mxu0 %v2022_v37  ;;  %v2051_v37 = vld [vmem:[%s2544_s11 + $0x68] sm:$0xff]  }
 0x635   : > { %1858 = vmatprep.subr.bf16.mxu0 %v2047_v32 }
 0x6d2   : > { %v950_v34 = vpop.f32.mrf.mxu1 }
 0x6d3   : > { %1177 = vrot.lane.b32.xlu1 %v950_v34, %s2100_s30  ;;  %v2049_v34 = vld [vmem:[%s2544_s11 + $0x70] sm:$0xff]  }
 0x6d4   : > { %v1922_v35 = vpop.f32.mrf.mxu1 }
 0x6d5   : > { %v2050_v35 = vld [vmem:[%s2544_s11 + $0x30] sm:$0xff]  }
 0x6d6   : > { %v953_v38 = vpop.f32.mrf.mxu1 }
 0x6d7   : > { %v2052_v38 = vld [vmem:[%s2544_s11 + $0x28] sm:$0xff]  }
 0x6d8   : > { %v1923_v39 = vpop.f32.mrf.mxu1 }
 0x6d9   : > { %v2053_v39 = vld [vmem:[%s2544_s11 + $0x60] sm:$0xff]  }
 0x6da   : > { %v1060_v40 = vpop.f32.mrf.mxu1 }
 0x6db   : > { %1181 = vrot.lane.b32.xlu0 %v1060_v40, %s2101_s14  ;;  %v2054_v40 = vld [vmem:[%s2544_s11 + $0x20] sm:$0xff]  }
 0x6dc   : > { %v1934_v41 = vpop.f32.mrf.mxu1 }
 0x6dd   : > { %v2055_v41 = vld [vmem:[%s2544_s11 + $0x58] sm:$0xff]  }
 0x6de   : > { %v1063_v42 = vpop.f32.mrf.mxu1 }
 0x6df   : > { %v2056_v42 = vld [vmem:[%s2544_s11 + $0x18] sm:$0xff]  }
 0x6e0   : > { %v1935_v43 = vpop.f32.mrf.mxu1 }
 0x6e1   : > { %v2057_v43 = vld [vmem:[%s2544_s11 + $0x50] sm:$0xff]  }
 0x6e2   : > { %v1170_v47 = vpop.f32.mrf.mxu1 }
 0x6e3   : > { %1185 = vrot.lane.b32.xlu1 %v1170_v47, %s2098_s29  ;;  %v2058_v47 = vld [vmem:[%s2544_s11 + $0x10] sm:$0xff]  }
 0x6e4   : > { %v1946_v48 = vpop.f32.mrf.mxu1 }
 0x6e5   : > { %v2059_v48 = vld [vmem:[%s2544_s11 + $0x48] sm:$0xff]  }
 0x6e6   : > { %v1173_v49 = vpop.f32.mrf.mxu1 }
 0x6e7   : > { %v2060_v49 = vld [vmem:[%s2544_s11 + $0x8] sm:$0xff]  }
 0x6e8   : > { %v1947_v50 = vpop.f32.mrf.mxu1 }
 0x6e9   : > { %v2061_v50 = vld [vmem:[%s2544_s11 + $0x40] sm:$0xff]  }
 0x745   : > { %v1178_v4 = vpop.permute.xlu1 %1177 }
 0x746   : > { %v1188_v52 = vsel %vm732_vm2, %v2340_v36, %v1178_v4  ;;  %v2062_v4 = vld [vmem:[%s2544_s11] sm:$0xff]  }
 0x74d   : > { %v1182_v51 = vpop.permute.xlu0 %1181 }
 0x74e   : > { %v1190_v53 = vsel %vm1189_vm7, %v1188_v52, %v1182_v51  ;;  %v1353_v51 = vld [vmem:[%s2543_s10] sm:$0x3] }
 0x74f   : > { %v1358_v52 = vrot.slane %v1353_v51, %v506_v46 }
 0x755   : > { %v1186_v54 = vpop.permute.xlu1 %1185 }
 0x756   : > { %v1192_v55 = vsel %vm1191_vm8, %v1190_v53, %v1186_v54  ;;  %v1362_v53 = vrot.slane %v1353_v51, %v510_v45 }
 0x757   : > { %v1209_v56 = vpack.c.bf16 %v1192_v55, %v1192_v55 }
 0x759   : > { %1965 = vmatmul.mubr.bf16.vlgmr.msra.gmra.mxu0 %v1209_v56 }
 0x75a   : > { %1859 = vmatpush3.bf16.msra.mxu0 %v2048_v33 }
 0x75b   : > { %1860 = vmatprep.subr.bf16.mxu0 %v2049_v34 }
 0x75e   : > { %1861 = vmatpush3.bf16.msra.mxu0 %v2050_v35 }
 0x75f   : > { %1862 = vmatprep.subr.bf16.mxu0 %v2051_v37 }
 0x762   : > { %1863 = vmatpush3.bf16.msra.mxu0 %v2052_v38 }
 0x763   : > { %1864 = vmatprep.subr.bf16.mxu0 %v2053_v39 }
 0x766   : > { %1865 = vmatpush3.bf16.msra.mxu0 %v2054_v40 }
 0x767   : > { %1866 = vmatprep.subr.bf16.mxu0 %v2055_v41 }
 0x76a   : > { %1867 = vmatpush3.bf16.msra.mxu0 %v2056_v42 }
 0x76b   : > { %1868 = vmatprep.subr.bf16.mxu0 %v2057_v43 }
 0x76e   : > { %1869 = vmatpush3.bf16.msra.mxu0 %v2058_v47 }
 0x76f   : > { %1870 = vmatprep.subr.bf16.mxu0 %v2059_v48 }
 0x772   : > { %1871 = vmatpush3.bf16.msra.mxu0 %v2060_v49 }
 0x773   : > { %1872 = vmatprep.subr.bf16.mxu0 %v2061_v50 }
 0x776   : > { %1873 = vmatpush3.bf16.msra.mxu0 %v2062_v4 }
 0x819   : > { %v1292_v57 = vpop.f32.mrf.mxu0 }
 0x81a   : > { %v1298_v59 = vadd.f32 %v1292_v57, %v2188_v0  ;;  %v2028_v0 = vld [vmem:[%s2542_s9 + $0x64] ss:$8 sps:$4 sm:$0xff]  }
 0x81b   : > { %v1966_v60 = vpop.f32.mrf.mxu0  ;;  %1447 = vmatprep.subr.bf16.mxu1 %v2028_v0 }
 0x81c   : > { %v2406_v61 = vadd.f32 %v1786_v58, %v1298_v59  ;;  %1448 = vmatpush1.bf16.msra.mxu1 %v2026_v3 }
 0x81d   : > { %v1295_v62 = vpop.f32.mrf.mxu0  ;;  %1449 = vmatprep.subr.bf16.mxu1 %v2031_v12 }
 0x81e   : > { %v1309_v63 = vsel %vm440_vm0, %v2406_v61, 0.0 }
 0x81f   : > { %1310 = vadd.xlane.f32.xlu0 %v1309_v63  ;;  %v1967_v36 = vpop.f32.mrf.mxu0 }
 0x820   : > { %1450 = vmatpush1.bf16.msra.mxu1 %v2029_v13 }
 0x821   : > { %1451 = vmatprep.subr.bf16.mxu1 %v2034_v15 }
 0x824   : > { %1452 = vmatpush1.bf16.msra.mxu1 %v2032_v14 }
 0x825   : > { %1453 = vmatprep.subr.bf16.mxu1 %v2037_v16 }
 0x828   : > { %1454 = vmatpush1.bf16.msra.mxu1 %v2035_v17 }
 0x829   : > { %1455 = vmatprep.subr.bf16.mxu1 %v2040_v18 }
 0x82c   : > { %1456 = vmatpush1.bf16.msra.mxu1 %v2038_v19  ;;  %v1821_v19 = vld [vmem:[%s2545_s12] ss:$0 sm:$0xff] }
 0x82d   : > { %1457 = vmatprep.subr.bf16.mxu1 %v2043_v20 }
 0x830   : > { %1458 = vmatpush1.bf16.msra.mxu1 %v2041_v21 }
 0x831   : > { %1459 = vmatprep.subr.bf16.mxu1 %v2046_v6 }
 0x834   : > { %1460 = vmatpush1.bf16.msra.mxu1 %v2044_v22 }
 0x8a8   : > { %v1311_v5 = vpop.xlane.xlu0 %1310 }
 0x8a9   : > { %v1312_v8 = vmul.f32 0.0078125, %v1311_v5 }
 0x8ab   : > { %v1313_v9 = vsub.f32 %v2406_v61, %v1312_v8 }
 0x8ad   : > { %v1314_v10 = vmul.f32 %v1313_v9, %v1313_v9 }
 0x8af   : > { %v1315_v11 = vsel %vm440_vm0, %v1314_v10, 0.0 }
 0x8b0   : > { %1316 = vadd.xlane.f32.xlu1 %v1315_v11 }
 0x939   : > { %v1317_v23 = vpop.xlane.xlu1 %1316 }
 0x93a   : > { %v1318_v25 = vmul.f32 0.0078125, %v1317_v23 }
 0x93c   : > { %v1319_v26 = vadd.f32 1e-05, %v1318_v25 }
 0x93e   : > { %2081 = vrsqrt.f32 %v1319_v26 }
 0x94b   : > { %v2082_v27 = vpop.eup %2081 }
 0x94c   : > { %v1321_v29 = vmul.f32 %v2082_v27, %v1313_v9 }
 0x94e   : > { %v1328_v30 = vmul.f32 %v1787_v28, %v1321_v29 }
 0x950   : > { %v1335_v24 = vadd.f32 %v1788_v7, %v1328_v30 }
 0x952   : > { %v1352_v31 = vpack.c.bf16 %v1335_v24, %v1335_v24 }
 0x954   : > { %1478 = vmatmul.mubr.bf16.vlgmr.msra.gmra.mxu1 %v1352_v31 }
 0xa14   : > { %v1479_v54 = vpop.f32.mrf.mxu1 }
 0xa15   : > { %v1480_v55 = vadd.f32 %v1479_v54, %v1358_v52 }
 0xa16   : > { %v1481_v56 = vpop.f32.mrf.mxu1 }
 0xa17   : > { %v1488_v57 = vmul.f32 0.044715, %v1480_v55  ;;  %v1482_v58 = vadd.f32 %v1481_v56, %v1362_v53  ;;  %v1486_v9 = vmul.f32 0.5, %v1480_v55 }
 0xa18   : > { %v1483_v59 = vpop.f32.mrf.mxu1 }
 0xa19   : > { %v1490_v60 = vmul.f32 %v1488_v57, %v1480_v55  ;;  %v1489_v62 = vmul.f32 0.044715, %v1482_v58  ;;  %v1487_v10 = vmul.f32 0.5, %v1482_v58 }
 0xa1a   : > { %v1484_v63 = vpop.f32.mrf.mxu1 }
 0xa1b   : > { %v1492_v36 = vmul.f32 %v1490_v60, %v1480_v55  ;;  %v1491_v1 = vmul.f32 %v1489_v62, %v1482_v58 }
 0xa1d   : > { %v1494_v2 = vadd.f32 %v1492_v36, %v1480_v55  ;;  %v1493_v0 = vmul.f32 %v1491_v1, %v1482_v58 }
 0xa1f   : > { %v1496_v3 = vmul.f32 0.7978846, %v1494_v2  ;;  %v1495_v5 = vadd.f32 %v1493_v0, %v1482_v58 }
 0xa21   : > { %v1497_v8 = vmul.f32 0.7978846, %v1495_v5  ;;  %2083 = vtanh.f32 %v1496_v3 }
 0xa23   : > { %2085 = vtanh.f32 %v1497_v8 }
 0xa2e   : > { %v2084_v44 = vpop.eup %2083 }
 0xa2f   : > { %v1500_v45 = vadd.f32 1.0, %v2084_v44 }
 0xa30   : > { %v2086_v46 = vpop.eup %2085 }
 0xa31   : > { %v1501_v11 = vadd.f32 1.0, %v2086_v46  ;;  %v1502_v12 = vmul.f32 %v1500_v45, %v1486_v9 }
 0xa33   : > { %v1503_v13 = vmul.f32 %v1501_v11, %v1487_v10  ;;  %v1536_v15 = vpack.c.bf16 %v1502_v12, %v1502_v12 }
 0xa35   : > { %v1537_v14 = vpack.c.bf16 %v1503_v13, %v1503_v13 }
 0xa37   : > { %1666 = vmatprep.mubr.bf16.mxu0 %v1537_v14 }
 0xa38   : > { %1667 = vmatmul.mubr.bf16.vlgmr.msra.gmra.mxu0 %v1536_v15 }
 0xaf8   : > { %v1874_v16 = vpop.f32.mrf.mxu0 }
 0xafa   : > { %v1875_v17 = vpop.f32.mrf.mxu0 }
 0xafb   : > { %v1876_v18 = vadd.f32 %v1875_v17, %v1874_v16 }
 0xafc   : > { %v1877_v20 = vpop.f32.mrf.mxu0 }
 0xafd   : > { %v1674_v21 = vadd.f32 %v1876_v18, %v2406_v61 }
 0xafe   : > { %v1878_v6 = vpop.f32.mrf.mxu0 }
 0xaff   : > { %v1682_v22 = vadd.f32 %v1821_v19, %v1674_v21 }
 0xb01   : > { %1683 = vst [vmem:[%s435_s23] sm:$0x1f] %v1682_v22 }
 0xb02 PF: > { %s23_s25 = sadd.s32 1, %s2093_s25  }
 0xb03   : > { %p20_p4 = scmp.ge.s32.totalorder %s23_s25, 4  }
 0xb05   :  { %22 = sbr.rel (!%p20_p4) target bundleno = 1 (0x1), region = 102 }

// kernel: blip2_forward.19
= control target key start
LH: loop header
LB: loop body
LE: loop exit
PB: predicated region body
PF: predicated region fallthrough
CT: control target
= control target key end

     0   :  { %v184_v0 = vmov 0.0   ;;  %vm185_vm0 = vmmov 0   ;;  %s245_s1 = inlined_call_operand.vmem [shape: bf16[128,128], index: 1, kind: input, shape index: {}]   ;;  %s246_s0 = inlined_call_operand.vmem [shape: f32[16,128], index: 0, kind: input, shape index: {}]   ;;  %s247_s2 = inlined_call_operand.vmem [shape: f32[1,128], index: 2, kind: input, shape index: {}]   ;;  %s248_s3 = inlined_call_operand.vmem [shape: f32[16,128], index: 3, kind: output, shape index: {}]  }
   0x1   :  { %154 = vmatprep.subr.bf16.mxu0 %v184_v0  ;;  %v176_v1 = vld [vmem:[%s245_s1 + $0x38] sm:$0xff]   ;;  %170 = vmatprep.mubr.msk.bf16.mxu0 %vm185_vm0, %v184_v0  ;;  %v177_v2 = vld [vmem:[%s245_s1 + $0x30] sm:$0xff]   ;;  %v178_v3 = vld [vmem:[%s245_s1 + $0x28] sm:$0xff]  }
   0x2   :  { %155 = vmatpush3.bf16.msra.mxu0 %v176_v1  ;;  %v179_v4 = vld [vmem:[%s245_s1 + $0x20] sm:$0xff]   ;;  %v180_v5 = vld [vmem:[%s245_s1 + $0x18] sm:$0xff]   ;;  %v181_v6 = vld [vmem:[%s245_s1 + $0x10] sm:$0xff]  }
   0x3   :  { %156 = vmatprep.subr.bf16.mxu0 %v184_v0  ;;  %v182_v7 = vld [vmem:[%s245_s1 + $0x8] sm:$0xff]   ;;  %v183_v8 = vld [vmem:[%s245_s1] sm:$0xff]  }
   0x4   :  { %v15_v9 = vld [vmem:[%s246_s0] sm:$0xff]  ;;  %v16_v10 = vld [vmem:[%s246_s0 + $0x8] sm:$0xff] }
   0x5   :  { %v33_v11 = vpack.c.bf16 %v16_v10, %v15_v9  ;;  %v136_v12 = vld [vmem:[%s247_s2] ss:$0 sm:$0xff] }
   0x6   :  { %157 = vmatpush3.bf16.msra.mxu0 %v177_v2 }
   0x7   :  { %158 = vmatprep.subr.bf16.mxu0 %v184_v0 }
   0xa   :  { %159 = vmatpush3.bf16.msra.mxu0 %v178_v3 }
   0xb   :  { %160 = vmatprep.subr.bf16.mxu0 %v184_v0 }
   0xe   :  { %161 = vmatpush3.bf16.msra.mxu0 %v179_v4 }
   0xf   :  { %162 = vmatprep.subr.bf16.mxu0 %v184_v0 }
  0x12   :  { %163 = vmatpush3.bf16.msra.mxu0 %v180_v5 }
  0x13   :  { %164 = vmatprep.subr.bf16.mxu0 %v184_v0 }
  0x16   :  { %165 = vmatpush3.bf16.msra.mxu0 %v181_v6 }
  0x17   :  { %166 = vmatprep.subr.bf16.mxu0 %v184_v0 }
  0x1a   :  { %167 = vmatpush3.bf16.msra.mxu0 %v182_v7 }
  0x1b   :  { %168 = vmatprep.subr.bf16.mxu0 %v184_v0 }
  0x1e   :  { %169 = vmatpush3.bf16.msra.mxu0 %v183_v8 }
  0x21   :  { %171 = vmatmul.mubr.bf16.vlgmr.msra.gmra.mxu0 %v33_v11 }
  0xe1   :  { %v123_v13 = vpop.f32.mrf.mxu0 }
  0xe2   :  { %v124_v14 = vadd.f32 %v136_v12, %v123_v13 }
  0xe3   :  { %v172_v15 = vpop.f32.mrf.mxu0 }
  0xe4   :  { %130 = vst [vmem:[%s248_s3] sm:$0xff] %v124_v14 }
  0xe5   :  { %v126_v16 = vpop.f32.mrf.mxu0 }
  0xe6   :  { %v127_v17 = vadd.f32 %v136_v12, %v126_v16 }
  0xe7   :  { %v173_v18 = vpop.f32.mrf.mxu0 }
  0xe8   :  { %131 = vst [vmem:[%s248_s3 + $0x8] sm:$0xff] %v127_v17 }

// kernel: blip2_forward.18
= control target key start
LH: loop header
LB: loop body
LE: loop exit
PB: predicated region body
PF: predicated region fallthrough
CT: control target
= control target key end

     0   :  { %s3540_s0 = inlined_call_operand.vmem [shape: f32[2,14,128], index: 0, kind: input, shape index: {}]   ;;  %s3541_s1 = inlined_call_operand.vmem [shape: s32[2,1,14], index: 1, kind: input, shape index: {}]   ;;  %s3542_s2 = inlined_call_operand.vmem [shape: bf16[128,384], index: 2, kind: input, shape index: {}]   ;;  %s3543_s3 = inlined_call_operand.vmem [shape: f32[1,384], index: 3, kind: input, shape index: {}]   ;;  %s3544_s4 = inlined_call_operand.vmem [shape: bf16[128,128], index: 4, kind: input, shape index: {}]   ;;  %s3545_s5 = inlined_call_operand.vmem [shape: f32[1,128], index: 5, kind: input, shape index: {}]   ;;  %s3546_s6 = inlined_call_operand.vmem [shape: f32[1,128], index: 6, kind: input, shape index: {}]   ;;  %s3547_s7 = inlined_call_operand.vmem [shape: f32[1,128], index: 7, kind: input, shape index: {}]   ;;  %s3548_s8 = inlined_call_operand.vmem [shape: bf16[128,256], index: 8, kind: input, shape index: {}]   ;;  %s3549_s9 = inlined_call_operand.vmem [shape: f32[1,256], index: 9, kind: input, shape index: {}]   ;;  %s3550_s10 = inlined_call_operand.vmem [shape: bf16[256,128], index: 10, kind: input, shape index: {}]   ;;  %s3551_s11 = inlined_call_operand.vmem [shape: f32[1,128], index: 11, kind: input, shape index: {}]   ;;  %s3552_s12 = inlined_call_operand.vmem [shape: f32[1,128], index: 12, kind: input, shape index: {}]   ;;  %s3553_s13 = inlined_call_operand.vmem [shape: f32[1,128], index: 13, kind: input, shape index: {}]   ;;  %s3554_s14 = inlined_call_operand.vmem [shape: bf16[128,256], index: 14, kind: input, shape index: {}]   ;;  %s3555_s15 = inlined_call_operand.vmem [shape: f32[1,256], index: 15, kind: input, shape index: {}]   ;;  %s3556_s16 = inlined_call_operand.vmem [shape: bf16[256,128], index: 16, kind: input, shape index: {}]   ;;  %s3557_s17 = inlined_call_operand.vmem [shape: f32[1,128], index: 17, kind: input, shape index: {}]   ;;  %s3558_s18 = inlined_call_operand.vmem [shape: f32[1,128], index: 18, kind: input, shape index: {}]   ;;  %s3559_s19 = inlined_call_operand.vmem [shape: f32[1,128], index: 19, kind: input, shape index: {}]   ;;  %s3560_s20 = inlined_call_operand.vmem [shape: f32[2,14,128], index: 20, kind: output, shape index: {}]  }
   0x1   :  { %3563 = sst [smem:[#allocation2_spill]] %s3540_s0 }
   0x2   :  { %3564 = sst [smem:[#allocation3_spill]] %s3541_s1  ;;  %s3035_s1 = smov 0  }
   0x3   :  { %3565 = sst [smem:[#allocation4_spill]] %s3542_s2 }
   0x4   :  { %3566 = sst [smem:[#allocation5_spill]] %s3543_s3 }
   0x5   :  { %3567 = sst [smem:[#allocation6_spill]] %s3544_s4 }
   0x6 LB: > { %s2425_s22 = sadd.s32 4294967295, %s2921_s1   ;;  %p2429_p0 = scmp.ge.s32.totalorder %s2921_s1, 1  ;;  %s2921_s1 = sphi %s3035_s1, %s30_s1  }
   0x7   : > { %p570_p1 = scmp.lt.s32.totalorder %s2921_s1, 3 }
   0x9   : > { %p571_p2 = pnand %p2429_p0, %p570_p1 }
   0xa   : > { %s3568_s2 = sld [smem:[#allocation4_spill]] (!%p571_p2)  ;;  %p631_p3 = scmp.lt.s32.totalorder (!%p571_p2), %s2425_s22, 1 }
   0xb   : > { %574 = sbr.rel (%p571_p2) target bundleno = 2917 (0xb65), region = 100  ;;  %s3569_s28 = sld [smem:[#allocation2_spill]] (!%p571_p2) }
   0xc   : > { %s3570_s30 = sld [smem:[#allocation5_spill]] (!%p571_p2)  ;;  %s2927_s3 = smov (!%p571_p2), 96  }
   0xd   : > { %s3571_s23 = sld [smem:[#allocation3_spill]] (!%p571_p2)  ;;  %s2928_s26 = smov (!%p571_p2), 32  }
   0xe   : > { %s2929_s27 = smov (!%p571_p2), 64   ;;  %s3572_s29 = sld [smem:[#allocation6_spill]] (!%p571_p2) }
  0x10   : > { %v2747_v0 = vld [vmem:[%s3568_s2 + $0xac] ss:$12 sps:$4 sm:$0xff]   ;;  %v2749_v1 = vld [vmem:[%s3568_s2 + $0xa8] ss:$12 sps:$4 sm:$0xff]   ;;  %v2923_v2 = vmov 0   ;;  %v2924_v6 = vmov 0.0   ;;  %v685_v29 = vlaneseq }
  0x11   : > { %860 = vmatprep.mubr.bf16.mxu0 %v2923_v2  ;;  %828 = vmatprep.subr.bf16.mxu0 %v2747_v0  ;;  %v2750_v3 = vld [vmem:[%s3568_s2 + $0x94] ss:$12 sps:$4 sm:$0xff]   ;;  %v2752_v4 = vld [vmem:[%s3568_s2 + $0x90] ss:$12 sps:$4 sm:$0xff]   ;;  %v2755_v7 = vld [vmem:[%s3568_s2 + $0x78] ss:$12 sps:$4 sm:$0xff]  }
  0x12   : > { %829 = vmatpush1.bf16.msra.mxu0 %v2749_v1  ;;  %v2753_v5 = vld [vmem:[%s3568_s2 + $0x7c] ss:$12 sps:$4 sm:$0xff]   ;;  %2629 = vmatprep.subr.bf16.mxu1 %v2924_v6  ;;  %v2756_v8 = vld [vmem:[%s3568_s2 + $0x64] ss:$12 sps:$4 sm:$0xff]   ;;  %v2758_v9 = vld [vmem:[%s3568_s2 + $0x60] ss:$12 sps:$4 sm:$0xff]  }
  0x13   : > { %830 = vmatprep.subr.bf16.mxu0 %v2750_v3  ;;  %v2759_v10 = vld [vmem:[%s3568_s2 + $0x4c] ss:$12 sps:$4 sm:$0xff]   ;;  %v2771_v11 = vld [vmem:[%s3568_s2 + $0xb0] ss:$12 sps:$4 sm:$0xff]   ;;  %s3574_s22 = smov (!%p631_p3, %s2425_s22), 1  ;;  %vm2925_vm0 = vmmov 0  }
  0x14   : > { %2630 = vmatpush3.bf16.msra.mxu1 %v2771_v11  ;;  %v2772_v12 = vld [vmem:[%s3568_s2 + $0x98] ss:$12 sps:$4 sm:$0xff]   ;;  %v2761_v13 = vld [vmem:[%s3568_s2 + $0x48] ss:$12 sps:$4 sm:$0xff]   ;;  %s2549_s25 = sshll.u32 %s3574_s22, 4  ;;  %2645 = vmatprep.mubr.msk.bf16.mxu1 %vm2925_vm0, %v2924_v6  ;;  %v686_v30 = vshrl.u32 %v685_v29, 7  ;;  %s638_s24 = scalar_lea.vmem %s3571_s23, %s3574_s22 }
  0x15   : > { %2631 = vmatprep.subr.bf16.mxu1 %v2924_v6  ;;  %v2762_v14 = vld [vmem:[%s3568_s2 + $0x34] ss:$12 sps:$4 sm:$0xff]   ;;  %v2764_v16 = vld [vmem:[%s3568_s2 + $0x30] ss:$12 sps:$4 sm:$0xff]   ;;  %v2767_v19 = vld [vmem:[%s3568_s2 + $0x18] ss:$12 sps:$4 sm:$0xff]   ;;  %s635_s4 = scalar_lea.vmem %s3569_s28, %s2549_s25  ;;  %s643_s28 = scalar_lea.vmem %s3560_s20, %s2549_s25 }
  0x16   : > { %831 = vmatpush1.bf16.msra.mxu0 %v2752_v4  ;;  %v2773_v15 = vld [vmem:[%s3568_s2 + $0x80] ss:$12 sps:$4 sm:$0xff]   ;;  %v2765_v17 = vld [vmem:[%s3568_s2 + $0x1c] ss:$12 sps:$4 sm:$0xff]   ;;  %v2768_v20 = vld [vmem:[%s3568_s2 + $0x4] ss:$12 sps:$4 sm:$0xff]  }
  0x17   : > { %832 = vmatprep.subr.bf16.mxu0 %v2753_v5  ;;  %v2774_v18 = vld [vmem:[%s3568_s2 + $0x68] ss:$12 sps:$4 sm:$0xff]   ;;  %v2775_v21 = vld [vmem:[%s3568_s2 + $0x50] ss:$12 sps:$4 sm:$0xff]   ;;  %v2770_v22 = vld [vmem:[%s3568_s2] ss:$12 sps:$4 sm:$0xff]  }
  0x18   : > { %2632 = vmatpush3.bf16.msra.mxu1 %v2772_v12  ;;  %v3119_v23 = vld [vmem:[%s635_s4] sm:$0xff]  ;;  %v3121_v24 = vld [vmem:[%s635_s4 + $0x8] sm:$0x3f]  ;;  %v3146_v31 = vsub.s32 1, %v686_v30  ;;  %v3151_v35 = vsub.s32 0, %v686_v30  ;;  %vm923_vm1 = vcmask 261120  }
  0x19   : > { %2633 = vmatprep.subr.bf16.mxu1 %v2924_v6  ;;  %v2776_v25 = vld [vmem:[%s3568_s2 + $0x38] ss:$12 sps:$4 sm:$0xff]   ;;  %v682_v26 = vpack.c.bf16 %v3121_v24, %v3119_v23  ;;  %v2777_v27 = vld [vmem:[%s3568_s2 + $0x20] ss:$12 sps:$4 sm:$0xff]   ;;  %v2778_v28 = vld [vmem:[%s3568_s2 + $0x8] ss:$12 sps:$4 sm:$0xff]  }
  0x1a   : > { %833 = vmatpush1.bf16.msra.mxu0 %v2755_v7  ;;  %v683_v33 = vld [vmem:[%s3570_s30] sm:$0x7]  ;;  %v695_v49 = vsub.s32 2, %v686_v30  ;;  %vm999_vm2 = vcmask 1046528   ;;  %v2926_v60 = vmov -1e+09  }
  0x1b   : > { %834 = vmatprep.subr.bf16.mxu0 %v2756_v8  ;;  %v692_v36 = vrot.slane %v683_v33, %v3146_v31  ;;  %v688_v39 = vrot.slane %v683_v33, %v3151_v35  ;;  %v647_v59 = vld [vmem:[%s638_s24] sm:$0x1]  ;;  %vm971_vm4 = vcmask 113664   ;;  %vm975_vm5 = vcmask 111616  }
  0x1c   : > { %2634 = vmatpush3.bf16.msra.mxu1 %v2773_v15  ;;  %v696_v50 = vrot.slane %v683_v33, %v695_v49  ;;  %vm648_vm3 = vcmp.gt.s32.totalorder %v647_v59, 0  ;;  %vm1442_vm6 = vcmask 523264   ;;  %vm1445_vm7 = vcmask 785408  }
  0x1d   : > { %2635 = vmatprep.subr.bf16.mxu1 %v2924_v6  ;;  %v649_v61 = vsel %vm648_vm3, 0.0, %v2926_v60  ;;  %vm1569_vm8 = vcmask 1045504  }
  0x1e   : > { %835 = vmatpush1.bf16.msra.mxu0 %v2758_v9  ;;  %v3170_v62 = vrot.slane %v649_v61, %v3151_v35 }
  0x1f   : > { %836 = vmatprep.subr.bf16.mxu0 %v2759_v10 }
  0x20   : > { %2636 = vmatpush3.bf16.msra.mxu1 %v2774_v18 }
  0x21   : > { %2637 = vmatprep.subr.bf16.mxu1 %v2924_v6 }
  0x22   : > { %837 = vmatpush1.bf16.msra.mxu0 %v2761_v13 }
  0x23   : > { %838 = vmatprep.subr.bf16.mxu0 %v2762_v14 }
  0x24   : > { %2638 = vmatpush3.bf16.msra.mxu1 %v2775_v21 }
  0x25   : > { %2639 = vmatprep.subr.bf16.mxu1 %v2924_v6 }
  0x26   : > { %839 = vmatpush1.bf16.msra.mxu0 %v2764_v16 }
  0x27   : > { %840 = vmatprep.subr.bf16.mxu0 %v2765_v17 }
  0x28   : > { %2640 = vmatpush3.bf16.msra.mxu1 %v2776_v25 }
  0x29   : > { %2641 = vmatprep.subr.bf16.mxu1 %v2924_v6 }
  0x2a   : > { %841 = vmatpush1.bf16.msra.mxu0 %v2767_v19 }
  0x2b   : > { %842 = vmatprep.subr.bf16.mxu0 %v2768_v20 }
  0x2c   : > { %2642 = vmatpush3.bf16.msra.mxu1 %v2777_v27 }
  0x2d   : > { %2643 = vmatprep.subr.bf16.mxu1 %v2924_v6 }
  0x2e   : > { %843 = vmatpush1.bf16.msra.mxu0 %v2770_v22 }
  0x2f   : > { %2673 = vmatprep.subr.bf16.mxu0 %v2924_v6 }
  0x30   : > { %2644 = vmatpush3.bf16.msra.mxu1 %v2778_v28 }
  0x31   : > { %861 = vmatmul.mubr.bf16.vlgmr.msra.gmra.mxu0 %v682_v26  ;;  %2649 = vmatprep.subr.bf16.mxu1 %v2924_v6 }
  0x32   : > { %2675 = vmatprep.mubr.msk.bf16.mxu0 %vm2925_vm0, %v2924_v6 }
  0x33   : > { %2646 = vmatmul.mubr.bf16.vlgmr.msra.gmra.mxu1 %v682_v26 }
  0x34   : > { %2651 = vmatprep.mubr.msk.bf16.mxu1 %vm2925_vm0, %v2924_v6 }
  0xf1   : > { %v862_v32 = vpop.f32.mrf.mxu0 }
  0xf2   : > { %v863_v44 = vadd.f32 %v862_v32, %v688_v39 }
  0xf3   : > { %v864_v34 = vpop.f32.mrf.mxu0  ;;  %v905_v51 = vpop.f32.mrf.mxu1 }
  0xf4   : > { %v865_v40 = vadd.f32 %v864_v34, %v692_v36  ;;  %v912_v47 = vmul.f32 0.17677669, %v863_v44  ;;  %v906_v53 = vadd.f32 %v905_v51, %v696_v50 }
  0xf5   : > { %v866_v37 = vpop.f32.mrf.mxu0  ;;  %v2647_v52 = vpop.f32.mrf.mxu1 }
  0xf6   : > { %v867_v42 = vadd.f32 %v866_v37, %v688_v39 }
  0xf7   : > { %v868_v38 = vpop.f32.mrf.mxu0  ;;  %v908_v54 = vpop.f32.mrf.mxu1 }
  0xf8   : > { %v869_v41 = vadd.f32 %v868_v38, %v692_v36  ;;  %v913_v46 = vmul.f32 0.17677669, %v867_v42  ;;  %v909_v55 = vadd.f32 %v908_v54, %v696_v50 }
  0xf9   : > { %v2648_v56 = vpop.f32.mrf.mxu1 }
  0xfa   : > { %v915_v43 = vpack.c.bf16 %v869_v41, %v865_v40  ;;  %v914_v48 = vpack.c.bf16 %v913_v46, %v912_v47  ;;  %v3160_v57 = vpack.c.bf16 %v909_v55, %v906_v53 }
  0xfc   : > { %v928_v45 = vsel %vm923_vm1, %v915_v43, 0  ;;  %v1001_v58 = vsel %vm999_vm2, %v3160_v57, 0 }
  0xfd   : > { %2650 = vmatpush3.bf16.xpose.msra.mxu1 %v928_v45 }
  0xfe   : > { %2655 = vmatprep.subr.bf16.mxu1 %v2924_v6 }
 0x104   : > { %2652 = vmatmul.mubr.msk.bf16.vlgmr.msra.gmra.mxu1 %vm923_vm1, %v914_v48 }
 0x105   : > { %2657 = vmatprep.mubr.msk.bf16.mxu1 %vm2925_vm0, %v2924_v6  ;;  %2656 = vmatpush3.bf16.msra.mxu1 %v1001_v58 }
 0x106   : > { %2661 = vmatprep.subr.bf16.mxu1 %v2924_v6 }
 0x1c4   : > { %v964_v63 = vpop.f32.mrf.mxu1 }
 0x1c5   : > { %v965_v0 = vadd.f32 %v964_v63, %v3170_v62 }
 0x1c6   : > { %v2653_v1 = vpop.f32.mrf.mxu1 }
 0x1c7   : > { %v972_v3 = vsel %vm971_vm4, %v965_v0, -inf }
 0x1c8   : > { %973 = vmax.xlane.f32.xlu0 %v972_v3  ;;  %v967_v4 = vpop.f32.mrf.mxu1 }
 0x1c9   : > { %v968_v5 = vadd.f32 %v967_v4, %v3170_v62 }
 0x1ca   : > { %v2654_v7 = vpop.f32.mrf.mxu1 }
 0x1cb   : > { %v976_v8 = vsel %vm975_vm5, %v968_v5, -inf }
 0x1cc   : > { %977 = vmax.xlane.f32.xlu0 %v976_v8 }
 0x1e2   : > { %1048 = vrot.lane.b32.xlu0 %v915_v43, %s2927_s3 }
 0x1e6   : > { %1295 = vrot.lane.b32.xlu0 %v915_v43, %s2928_s26 }
 0x251   : > { %v974_v9 = vpop.xlane.xlu0 %973 }
 0x252   : > { %v979_v10 = vsub.f32 %v965_v0, %v974_v9 }
 0x254   : > { %v981_v11 = vmul.f32 1.442695, %v979_v10 }
 0x255   : > { %v978_v12 = vpop.xlane.xlu0 %977 }
 0x256   : > { %2867 = vpow2.f32 %v981_v11  ;;  %v980_v13 = vsub.f32 %v968_v5, %v978_v12 }
 0x258   : > { %v983_v14 = vmul.f32 1.442695, %v980_v13 }
 0x259   : > { %v1049_v22 = vpop.permute.xlu0 %1048 }
 0x25a   : > { %2869 = vpow2.f32 %v983_v14  ;;  %v1054_v37 = vsel %vm923_vm1, %v1049_v22, 0 }
 0x25d   : > { %v1296_v29 = vpop.permute.xlu0 %1295 }
 0x25e   : > { %v1301_v34 = vsel %vm923_vm1, %v1296_v29, 0 }
 0x263   : > { %v2868_v15 = vpop.eup %2867 }
 0x264   : > { %v985_v16 = vsel %vm971_vm4, %v2868_v15, 0.0 }
 0x265   : > { %986 = vadd.xlane.f32.xlu1 %v985_v16 }
 0x267   : > { %v2870_v17 = vpop.eup %2869 }
 0x268   : > { %v988_v18 = vsel %vm975_vm5, %v2870_v17, 0.0 }
 0x269   : > { %989 = vadd.xlane.f32.xlu1 %v988_v18 }
 0x27a   : > { %1045 = vrot.lane.b32.xlu1 %v914_v48, %s2927_s3 }
 0x27e   : > { %1172 = vrot.lane.b32.xlu1 %v915_v43, %s2929_s27 }
 0x282   : > { %1170 = vrot.lane.b32.xlu1 %v914_v48, %s2929_s27 }
 0x286   : > { %1293 = vrot.lane.b32.xlu1 %v914_v48, %s2928_s26 }
 0x2ee   : > { %v987_v19 = vpop.xlane.xlu1 %986 }
 0x2ef   : > { %2871 = vrcp.f32 %v987_v19 }
 0x2f2   : > { %v990_v20 = vpop.xlane.xlu1 %989 }
 0x2f3   : > { %2873 = vrcp.f32 %v990_v20 }
 0x2f6   : > { %v1046_v21 = vpop.permute.xlu1 %1045 }
 0x2fa   : > { %v1173_v25 = vpop.permute.xlu1 %1172 }
 0x2fb   : > { %v1178_v26 = vsel %vm923_vm1, %v1173_v25, 0 }
 0x2fc   : > { %2674 = vmatpush3.bf16.xpose.msra.mxu0 %v1178_v26  ;;  %v2872_v27 = vpop.eup %2871 }
 0x2fd   : > { %2685 = vmatprep.subr.bf16.mxu0 %v2924_v6  ;;  %v993_v30 = vmul.f32 %v2872_v27, %v2868_v15 }
 0x2fe   : > { %v1171_v33 = vpop.permute.xlu1 %1170 }
 0x300   : > { %v2874_v28 = vpop.eup %2873 }
 0x301   : > { %v994_v32 = vmul.f32 %v2874_v28, %v2870_v17 }
 0x302   : > { %v1294_v38 = vpop.permute.xlu1 %1293 }
 0x303   : > { %2676 = vmatmul.mubr.msk.bf16.vlgmr.msra.gmra.mxu0 %vm923_vm1, %v1171_v33  ;;  %v995_v36 = vpack.c.bf16 %v994_v32, %v993_v30 }
 0x304   : > { %2686 = vmatpush3.bf16.xpose.msra.mxu0 %v1301_v34  ;;  %2687 = vmatprep.mubr.msk.bf16.mxu0 %vm2925_vm0, %v2924_v6 }
 0x305   : > { %2658 = vmatmul.mubr.msk.bf16.vlgmr.msra.gmra.mxu1 %vm971_vm4, %v995_v36  ;;  %2697 = vmatprep.subr.bf16.mxu0 %v2924_v6 }
 0x306   : > { %2662 = vmatpush3.bf16.xpose.msra.mxu1 %v1054_v37  ;;  %2663 = vmatprep.mubr.msk.bf16.mxu1 %vm2925_vm0, %v2924_v6 }
 0x307   : > { %2667 = vmatprep.subr.bf16.mxu1 %v2924_v6 }
 0x30b   : > { %2688 = vmatmul.mubr.msk.bf16.vlgmr.msra.gmra.mxu0 %vm923_vm1, %v1294_v38 }
 0x30c   : > { %2713 = vmatprep.mubr.msk.bf16.mxu0 %vm2925_vm0, %v2924_v6 }
 0x30d   : > { %2664 = vmatmul.mubr.msk.bf16.vlgmr.msra.gmra.mxu1 %vm923_vm1, %v1046_v21 }
 0x30e   : > { %2669 = vmatprep.mubr.msk.bf16.mxu1 %vm2925_vm0, %v2924_v6 }
 0x3c3   : > { %v1214_v39 = vpop.f32.mrf.mxu0 }
 0x3c4   : > { %v1215_v53 = vadd.f32 %v1214_v39, %v3170_v62 }
 0x3c5   : > { %v3202_v40 = vpop.f32.mrf.mxu1  ;;  %v2677_v41 = vpop.f32.mrf.mxu0 }
 0x3c6   : > { %v1221_v63 = vsel %vm971_vm4, %v1215_v53, -inf }
 0x3c7   : > { %v2659_v42 = vpop.f32.mrf.mxu1  ;;  %v1217_v43 = vpop.f32.mrf.mxu0 }
 0x3c8   : > { %v1218_v60 = vadd.f32 %v1217_v43, %v3170_v62 }
 0x3c9   : > { %v3204_v44 = vpop.f32.mrf.mxu1  ;;  %v2678_v45 = vpop.f32.mrf.mxu0 }
 0x3ca   : > { %v1224_v3 = vsel %vm975_vm5, %v1218_v60, -inf }
 0x3cb   : > { %v2660_v46 = vpop.f32.mrf.mxu1  ;;  %v1337_v47 = vpop.f32.mrf.mxu0 }
 0x3cc   : > { %v1338_v1 = vadd.f32 %v1337_v47, %v3170_v62 }
 0x3cd   : > { %v1090_v48 = vpop.f32.mrf.mxu1  ;;  %v2689_v49 = vpop.f32.mrf.mxu0 }
 0x3ce   : > { %v1091_v50 = vadd.f32 %v1090_v48, %v3170_v62  ;;  %v1344_v5 = vsel %vm971_vm4, %v1338_v1, -inf }
 0x3cf   : > { %v2665_v51 = vpop.f32.mrf.mxu1  ;;  %v1340_v52 = vpop.f32.mrf.mxu0 }
 0x3d0   : > { %v1097_v54 = vsel %vm971_vm4, %v1091_v50, -inf  ;;  %v1341_v61 = vadd.f32 %v1340_v52, %v3170_v62 }
 0x3d1   : > { %v2690_v55 = vpop.f32.mrf.mxu0  ;;  %1098 = vmax.xlane.f32.xlu0 %v1097_v54  ;;  %v1093_v56 = vpop.f32.mrf.mxu1 }
 0x3d2   : > { %v1094_v58 = vadd.f32 %v1093_v56, %v3170_v62  ;;  %v1347_v4 = vsel %vm975_vm5, %v1341_v61, -inf }
 0x3d3   : > { %v2666_v59 = vpop.f32.mrf.mxu1 }
 0x3d4   : > { %v1100_v0 = vsel %vm975_vm5, %v1094_v58, -inf }
 0x3d5   : > { %1222 = vmax.xlane.f32.xlu0 %v1221_v63  ;;  %1101 = vmax.xlane.f32.xlu1 %v1100_v0 }
 0x3d9   : > { %1225 = vmax.xlane.f32.xlu0 %v1224_v3  ;;  %1348 = vmax.xlane.f32.xlu1 %v1347_v4 }
 0x3dd   : > { %1345 = vmax.xlane.f32.xlu0 %v1344_v5 }
 0x45a   : > { %v1099_v7 = vpop.xlane.xlu0 %1098 }
 0x45b   : > { %v1103_v62 = vsub.f32 %v1091_v50, %v1099_v7 }
 0x45d   : > { %v1105_v21 = vmul.f32 1.442695, %v1103_v62 }
 0x45e   : > { %v1223_v8 = vpop.xlane.xlu0 %1222  ;;  %v1102_v9 = vpop.xlane.xlu1 %1101 }
 0x45f   : > { %v1227_v10 = vsub.f32 %v1215_v53, %v1223_v8  ;;  %v1104_v16 = vsub.f32 %v1094_v58, %v1102_v9  ;;  %v2779_v8 = vld [vmem:[%s3572_s29 + $0x38] sm:$0xff]   ;;  %v2780_v9 = vld [vmem:[%s3572_s29 + $0x30] sm:$0xff]  }
 0x460   : > { %2698 = vmatpush3.bf16.msra.mxu0 %v2779_v8 }
 0x461   : > { %v1229_v11 = vmul.f32 1.442695, %v1227_v10  ;;  %v1107_v22 = vmul.f32 1.442695, %v1104_v16  ;;  %2699 = vmatprep.subr.bf16.mxu0 %v2924_v6  ;;  %v2781_v10 = vld [vmem:[%s3572_s29 + $0x28] sm:$0xff]  }
 0x462   : > { %v1226_v12 = vpop.xlane.xlu0 %1225  ;;  %v1349_v13 = vpop.xlane.xlu1 %1348 }
 0x463   : > { %2875 = vpow2.f32 %v1229_v11  ;;  %v1228_v14 = vsub.f32 %v1218_v60, %v1226_v12  ;;  %v1351_v15 = vsub.f32 %v1341_v61, %v1349_v13  ;;  %v2782_v11 = vld [vmem:[%s3572_s29 + $0x20] sm:$0xff]   ;;  %v2783_v12 = vld [vmem:[%s3572_s29 + $0x18] sm:$0xff]  }
 0x464   : > { %2700 = vmatpush3.bf16.msra.mxu0 %v2780_v9  ;;  %v2795_v9 = vld [vmem:[%s3548_s8 + $0x54] ss:$8 sps:$4 sm:$0xff]  }
 0x465   : > { %v1231_v17 = vmul.f32 1.442695, %v1228_v14  ;;  %v1354_v18 = vmul.f32 1.442695, %v1351_v15  ;;  %2701 = vmatprep.subr.bf16.mxu0 %v2924_v6  ;;  %v2784_v15 = vld [vmem:[%s3572_s29 + $0x10] sm:$0xff]  }
 0x466   : > { %v1346_v19 = vpop.xlane.xlu0 %1345 }
 0x467   : > { %2877 = vpow2.f32 %v1231_v17  ;;  %v1350_v20 = vsub.f32 %v1338_v1, %v1346_v19  ;;  %v2785_v17 = vld [vmem:[%s3572_s29 + $0x8] sm:$0xff]  }
 0x468   : > { %2879 = vpow2.f32 %v1354_v18  ;;  %2702 = vmatpush3.bf16.msra.mxu0 %v2781_v10  ;;  %v2793_v10 = vld [vmem:[%s3548_s8 + $0x50] ss:$8 sps:$4 sm:$0xff]  }
 0x469   : > { %v1352_v25 = vmul.f32 1.442695, %v1350_v20  ;;  %2703 = vmatprep.subr.bf16.mxu0 %v2924_v6 }
 0x46b   : > { %2881 = vpow2.f32 %v1352_v25 }
 0x46c   : > { %2883 = vpow2.f32 %v1105_v21  ;;  %2704 = vmatpush3.bf16.msra.mxu0 %v2782_v11  ;;  %v2786_v21 = vld [vmem:[%s3572_s29] sm:$0xff]  }
 0x46d   : > { %2885 = vpow2.f32 %v1107_v22  ;;  %2705 = vmatprep.subr.bf16.mxu0 %v2924_v6  ;;  %v2796_v11 = vld [vmem:[%s3548_s8 + $0x40] ss:$8 sps:$4 sm:$0xff]  }
 0x470   : > { %v2876_v26 = vpop.eup %2875  ;;  %2706 = vmatpush3.bf16.msra.mxu0 %v2783_v12  ;;  %v2798_v12 = vld [vmem:[%s3548_s8 + $0x44] ss:$8 sps:$4 sm:$0xff]  }
 0x471   : > { %v1233_v27 = vsel %vm971_vm4, %v2876_v26, 0.0  ;;  %2707 = vmatprep.subr.bf16.mxu0 %v2924_v6 }
 0x472   : > { %1234 = vadd.xlane.f32.xlu0 %v1233_v27 }
 0x474   : > { %v2878_v28 = vpop.eup %2877  ;;  %2708 = vmatpush3.bf16.msra.mxu0 %v2784_v15  ;;  %v2804_v15 = vld [vmem:[%s3548_s8 + $0x24] ss:$8 sps:$4 sm:$0xff]  }
 0x475   : > { %v1236_v29 = vsel %vm975_vm5, %v2878_v28, 0.0  ;;  %v2880_v30 = vpop.eup %2879  ;;  %2709 = vmatprep.subr.bf16.mxu0 %v2924_v6 }
 0x476   : > { %1237 = vadd.xlane.f32.xlu1 %v1236_v29  ;;  %v1359_v36 = vsel %vm975_vm5, %v2880_v30, 0.0 }
 0x478   : > { %v2882_v32 = vpop.eup %2881  ;;  %2710 = vmatpush3.bf16.msra.mxu0 %v2785_v17  ;;  %v2805_v17 = vld [vmem:[%s3548_s8 + $0x10] ss:$8 sps:$4 sm:$0xff]  }
 0x479   : > { %v2884_v33 = vpop.eup %2883  ;;  %v1356_v34 = vsel %vm971_vm4, %v2882_v32, 0.0  ;;  %2711 = vmatprep.subr.bf16.mxu0 %v2924_v6 }
 0x47a   : > { %v2886_v37 = vpop.eup %2885  ;;  %1357 = vadd.xlane.f32.xlu0 %v1356_v34  ;;  %1360 = vadd.xlane.f32.xlu1 %v1359_v36  ;;  %v1109_v38 = vsel %vm971_vm4, %v2884_v33, 0.0 }
 0x47b   : > { %v1112_v39 = vsel %vm975_vm5, %v2886_v37, 0.0 }
 0x47c   : > { %2712 = vmatpush3.bf16.msra.mxu0 %v2786_v21 }
 0x47e   : > { %1110 = vadd.xlane.f32.xlu0 %v1109_v38  ;;  %1113 = vadd.xlane.f32.xlu1 %v1112_v39 }
 0x48f   : > { %1244 = vrot.lane.b32.xlu1 %v3160_v57, %s2929_s27 }
 0x493   : > { %1367 = vrot.lane.b32.xlu1 %v3160_v57, %s2928_s26 }
 0x494   : > { %1121 = vrot.lane.b32.xlu0 %v3160_v57, %s2927_s3 }
 0x4fb   : > { %v1235_v41 = vpop.xlane.xlu0 %1234 }
 0x4ff   : > { %v1238_v42 = vpop.xlane.xlu1 %1237 }
 0x503   : > { %v1358_v43 = vpop.xlane.xlu0 %1357  ;;  %v1361_v45 = vpop.xlane.xlu1 %1360 }
 0x507   : > { %v1111_v46 = vpop.xlane.xlu0 %1110  ;;  %v1114_v47 = vpop.xlane.xlu1 %1113 }
 0x508   : > { %2887 = vrcp.f32 %v1111_v46 }
 0x509   : > { %2889 = vrcp.f32 %v1114_v47 }
 0x50a   : > { %2891 = vrcp.f32 %v1238_v42 }
 0x50b   : > { %v1122_v48 = vpop.permute.xlu0 %1121  ;;  %2893 = vrcp.f32 %v1235_v41  ;;  %v1245_v53 = vpop.permute.xlu1 %1244 }
 0x50c   : > { %v1127_v49 = vsel %vm999_vm2, %v1122_v48, 0  ;;  %2895 = vrcp.f32 %v1358_v43  ;;  %v1250_v56 = vsel %vm999_vm2, %v1245_v53, 0 }
 0x50d   : > { %2668 = vmatpush3.bf16.msra.mxu1 %v1127_v49  ;;  %2897 = vrcp.f32 %v1361_v45 }
 0x50e   : > { %2679 = vmatprep.subr.bf16.mxu1 %v2924_v6 }
 0x50f   : > { %v1368_v61 = vpop.permute.xlu1 %1367 }
 0x510   : > { %v1373_v3 = vsel %vm999_vm2, %v1368_v61, 0 }
 0x515   : > { %v2888_v50 = vpop.eup %2887 }
 0x516   : > { %v2890_v57 = vpop.eup %2889  ;;  %v1117_v51 = vmul.f32 %v2888_v50, %v2884_v33 }
 0x517   : > { %v1118_v52 = vmul.f32 %v2890_v57, %v2886_v37  ;;  %v2892_v55 = vpop.eup %2891 }
 0x518   : > { %v2894_v58 = vpop.eup %2893  ;;  %v1242_v59 = vmul.f32 %v2892_v55, %v2878_v28 }
 0x519   : > { %v1119_v54 = vpack.c.bf16 %v1118_v52, %v1117_v51  ;;  %v1241_v60 = vmul.f32 %v2894_v58, %v2876_v26  ;;  %v2896_v63 = vpop.eup %2895  ;;  %v2474_v51 = vld [vmem:[%s3545_s5] ss:$0 sm:$0xff] }
 0x51a   : > { %v2898_v1 = vpop.eup %2897  ;;  %v1364_v4 = vmul.f32 %v2896_v63, %v2882_v32 }
 0x51b   : > { %2670 = vmatmul.mubr.msk.bf16.vlgmr.msra.gmra.mxu1 %vm971_vm4, %v1119_v54  ;;  %v1243_v0 = vpack.c.bf16 %v1242_v59, %v1241_v60  ;;  %v1365_v5 = vmul.f32 %v2898_v1, %v2880_v30  ;;  %v2787_v59 = vld [vmem:[%s3548_s8 + $0x70] ss:$8 sps:$4 sm:$0xff]   ;;  %v2792_v60 = vld [vmem:[%s3548_s8 + $0x64] ss:$8 sps:$4 sm:$0xff]  }
 0x51c   : > { %2680 = vmatpush3.bf16.msra.mxu1 %v1250_v56  ;;  %2681 = vmatprep.mubr.msk.bf16.mxu1 %vm2925_vm0, %v2924_v6 }
 0x51d   : > { %2691 = vmatprep.subr.bf16.mxu1 %v2924_v6  ;;  %v1366_v7 = vpack.c.bf16 %v1365_v5, %v1364_v4 }
 0x523   : > { %2682 = vmatmul.mubr.msk.bf16.vlgmr.msra.gmra.mxu1 %vm971_vm4, %v1243_v0 }
 0x524   : > { %2692 = vmatpush3.bf16.msra.mxu1 %v1373_v3  ;;  %2693 = vmatprep.mubr.msk.bf16.mxu1 %vm2925_vm0, %v2924_v6 }
 0x52b   : > { %2694 = vmatmul.mubr.msk.bf16.vlgmr.msra.gmra.mxu1 %vm971_vm4, %v1366_v7 }
 0x52c   : > { %1750 = vmatprep.mubr.bf16.mxu1 %v2923_v2 }
 0x5db   : > { %v1163_v13 = vpop.f32.mrf.mxu1 }
 0x5dd   : > { %v2671_v14 = vpop.f32.mrf.mxu1 }
 0x5de   : > { %v2799_v14 = vld [vmem:[%s3548_s8 + $0x30] ss:$8 sps:$4 sm:$0xff]  }
 0x5df   : > { %v1166_v62 = vpop.f32.mrf.mxu1 }
 0x5e0   : > { %v2732_v16 = vpack.i.bf16 %v1166_v62, %v1163_v13  ;;  %v2801_v13 = vld [vmem:[%s3548_s8 + $0x34] ss:$8 sps:$4 sm:$0xff]   ;;  %v2802_v62 = vld [vmem:[%s3548_s8 + $0x20] ss:$8 sps:$4 sm:$0xff]  }
 0x5e1   : > { %v2672_v18 = vpop.f32.mrf.mxu1 }
 0x5e2   : > { %2733 = vrot.lane.b32.xlu1 %v2732_v16, %s2928_s26  ;;  %v2807_v16 = vld [vmem:[%s3548_s8 + $0x14] ss:$8 sps:$4 sm:$0xff]   ;;  %v2810_v18 = vld [vmem:[%s3548_s8 + $0x4] ss:$8 sps:$4 sm:$0xff]  }
 0x5e3   : > { %v1286_v19 = vpop.f32.mrf.mxu1 }
 0x5e5   : > { %v2683_v20 = vpop.f32.mrf.mxu1 }
 0x5e6   : > { %v2813_v20 = vld [vmem:[%s3554_s14 + $0x74] ss:$8 sps:$4 sm:$0xff]  }
 0x5e7   : > { %v1289_v22 = vpop.f32.mrf.mxu1 }
 0x5e8   : > { %v2737_v25 = vpack.i.bf16 %v1289_v22, %v1286_v19  ;;  %v2808_v19 = vld [vmem:[%s3548_s8] ss:$8 sps:$4 sm:$0xff]  }
 0x5e9   : > { %v2684_v26 = vpop.f32.mrf.mxu1 }
 0x5ea   : > { %2738 = vrot.lane.b32.xlu0 %v2737_v25, %s2929_s27 }
 0x5eb   : > { %v1409_v27 = vpop.f32.mrf.mxu1 }
 0x5ed   : > { %v2695_v28 = vpop.f32.mrf.mxu1 }
 0x5ee   : > { %v2475_v28 = vld [vmem:[%s3546_s6] ss:$0 sm:$0xff] }
 0x5ef   : > { %v1412_v29 = vpop.f32.mrf.mxu1 }
 0x5f0   : > { %v2742_v30 = vpack.i.bf16 %v1412_v29, %v1409_v27 }
 0x5f1   : > { %v2696_v32 = vpop.f32.mrf.mxu1 }
 0x5f2   : > { %2743 = vrot.lane.b32.xlu1 %v2742_v30, %s2927_s3  ;;  %v2476_v30 = vld [vmem:[%s3547_s7] ss:$0 sm:$0xff] }
 0x654   : > { %v2734_v33 = vpop.permute.xlu1 %2733 }
 0x655   : > { %v2736_v6 = vunpack.i.h.bf16 %v2734_v33  ;;  %v2735_v36 = vunpack.i.l.bf16 %v2734_v33 }
 0x657   : > { %v1441_v41 = vsel %vm923_vm1, %v3204_v44, %v2736_v6  ;;  %v1440_v42 = vsel %vm923_vm1, %v3202_v40, %v2735_v36  ;;  %v2811_v6 = vld [vmem:[%s3554_s14 + $0x70] ss:$8 sps:$4 sm:$0xff]  }
 0x65c   : > { %v2739_v34 = vpop.permute.xlu0 %2738 }
 0x65d   : > { %v2741_v37 = vunpack.i.h.bf16 %v2739_v34  ;;  %v2740_v38 = vunpack.i.l.bf16 %v2739_v34 }
 0x65f   : > { %v1444_v46 = vsel %vm1442_vm6, %v1441_v41, %v2741_v37  ;;  %v1443_v47 = vsel %vm1442_vm6, %v1440_v42, %v2740_v38  ;;  %v2816_v38 = vld [vmem:[%s3554_s14 + $0x64] ss:$8 sps:$4 sm:$0xff]   ;;  %v2819_v41 = vld [vmem:[%s3554_s14 + $0x54] ss:$8 sps:$4 sm:$0xff]   ;;  %v2817_v42 = vld [vmem:[%s3554_s14 + $0x50] ss:$8 sps:$4 sm:$0xff]  }
 0x664   : > { %v2744_v39 = vpop.permute.xlu1 %2743 }
 0x665   : > { %v2746_v43 = vunpack.i.h.bf16 %v2744_v39  ;;  %v2745_v45 = vunpack.i.l.bf16 %v2744_v39  ;;  %v2814_v39 = vld [vmem:[%s3554_s14 + $0x60] ss:$8 sps:$4 sm:$0xff]  }
 0x667   : > { %v1447_v48 = vsel %vm1445_vm7, %v1444_v46, %v2746_v43  ;;  %v1446_v49 = vsel %vm1445_vm7, %v1443_v47, %v2745_v45  ;;  %v2822_v43 = vld [vmem:[%s3554_s14 + $0x44] ss:$8 sps:$4 sm:$0xff]   ;;  %v2825_v45 = vld [vmem:[%s3554_s14 + $0x34] ss:$8 sps:$4 sm:$0xff]   ;;  %v2823_v46 = vld [vmem:[%s3554_s14 + $0x30] ss:$8 sps:$4 sm:$0xff]  }
 0x668   : > { %v1464_v50 = vpack.c.bf16 %v1447_v48, %v1446_v49  ;;  %v2828_v47 = vld [vmem:[%s3554_s14 + $0x24] ss:$8 sps:$4 sm:$0xff]   ;;  %v2826_v49 = vld [vmem:[%s3554_s14 + $0x20] ss:$8 sps:$4 sm:$0xff]  }
 0x66a   : > { %2714 = vmatmul.mubr.bf16.vlgmr.msra.gmra.mxu0 %v1464_v50  ;;  %v2831_v50 = vld [vmem:[%s3554_s14 + $0x14] ss:$8 sps:$4 sm:$0xff]  }
 0x72a   : > { %v1547_v57 = vpop.f32.mrf.mxu0 }
 0x72b   : > { %v1554_v52 = vadd.f32 %v1547_v57, %v3119_v23  ;;  %v2789_v23 = vld [vmem:[%s3548_s8 + $0x74] ss:$8 sps:$4 sm:$0xff]  }
 0x72c   : > { %v2715_v53 = vpop.f32.mrf.mxu0  ;;  %1718 = vmatprep.subr.bf16.mxu1 %v2789_v23  ;;  %v2839_v23 = vld [vmem:[%s3550_s10 + $0x68] sm:$0xff]  }
 0x72d   : > { %v1563_v44 = vadd.f32 %v2474_v51, %v1554_v52  ;;  %1719 = vmatpush1.bf16.msra.mxu1 %v2787_v59  ;;  %v2834_v52 = vld [vmem:[%s3554_s14 + $0x4] ss:$8 sps:$4 sm:$0xff]   ;;  %v2838_v59 = vld [vmem:[%s3550_s10 + $0x30] sm:$0xff]  }
 0x72e   : > { %v1550_v54 = vpop.f32.mrf.mxu0  ;;  %1720 = vmatprep.subr.bf16.mxu1 %v2792_v60  ;;  %v2840_v60 = vld [vmem:[%s3550_s10 + $0x28] sm:$0xff]  }
 0x72f   : > { %v1555_v40 = vadd.f32 %v1550_v54, %v3121_v24  ;;  %1567 = vadd.xlane.f32.xlu0 %v1563_v44  ;;  %v2790_v24 = vld [vmem:[%s3548_s8 + $0x60] ss:$8 sps:$4 sm:$0xff]  }
 0x730   : > { %v2716_v55 = vpop.f32.mrf.mxu0 }
 0x731   : > { %v1564_v56 = vadd.f32 %v2474_v51, %v1555_v40  ;;  %1721 = vmatpush1.bf16.msra.mxu1 %v2790_v24  ;;  %v2829_v51 = vld [vmem:[%s3554_s14 + $0x10] ss:$8 sps:$4 sm:$0xff]   ;;  %v2841_v24 = vld [vmem:[%s3550_s10 + $0x60] sm:$0xff]  }
 0x732   : > { %1722 = vmatprep.subr.bf16.mxu1 %v2795_v9  ;;  %v2835_v55 = vld [vmem:[%s3550_s10 + $0x78] sm:$0xff]  }
 0x733   : > { %v1570_v58 = vsel %vm1569_vm8, %v1564_v56, 0.0  ;;  %2585 = vmatprep.subr.bf16.mxu0 %v2835_v55  ;;  %v2851_v9 = vld [vmem:[%s3556_s16 + $0x78] sm:$0xff]  }
 0x734   : > { %1571 = vadd.xlane.f32.xlu1 %v1570_v58  ;;  %v2837_v58 = vld [vmem:[%s3550_s10 + $0x70] sm:$0xff]  }
 0x735   : > { %1723 = vmatpush1.bf16.msra.mxu1 %v2793_v10  ;;  %v1626_v10 = vld [vmem:[%s3549_s9] sm:$0x3] }
 0x736   : > { %1724 = vmatprep.subr.bf16.mxu1 %v2798_v12  ;;  %v1635_v12 = vrot.slane %v1626_v10, %v3146_v31 }
 0x739   : > { %1725 = vmatpush1.bf16.msra.mxu1 %v2796_v11  ;;  %v1631_v11 = vrot.slane %v1626_v10, %v3151_v35  ;;  %v2865_v10 = vld [vmem:[%s3556_s16 + $0x40] sm:$0xff]  }
 0x73a   : > { %1726 = vmatprep.subr.bf16.mxu1 %v2801_v13 }
 0x73d   : > { %1727 = vmatpush1.bf16.msra.mxu1 %v2799_v14 }
 0x73e   : > { %1728 = vmatprep.subr.bf16.mxu1 %v2804_v15 }
 0x741   : > { %1729 = vmatpush1.bf16.msra.mxu1 %v2802_v62 }
 0x742   : > { %1730 = vmatprep.subr.bf16.mxu1 %v2807_v16 }
 0x745   : > { %1731 = vmatpush1.bf16.msra.mxu1 %v2805_v17 }
 0x746   : > { %1732 = vmatprep.subr.bf16.mxu1 %v2810_v18 }
 0x749   : > { %1733 = vmatpush1.bf16.msra.mxu1 %v2808_v19 }
 0x74a   : > { %2092 = vmatprep.subr.bf16.mxu1 %v2813_v20 }
 0x7b8   : > { %v1568_v61 = vpop.xlane.xlu0 %1567 }
 0x7b9   : > { %v1574_v63 = vmul.f32 0.0078125, %v1568_v61  ;;  %v2842_v61 = vld [vmem:[%s3550_s10 + $0x20] sm:$0xff]  }
 0x7bb   : > { %v1576_v0 = vsub.f32 %v1563_v44, %v1574_v63  ;;  %v2832_v44 = vld [vmem:[%s3554_s14] ss:$8 sps:$4 sm:$0xff]   ;;  %v2843_v63 = vld [vmem:[%s3550_s10 + $0x58] sm:$0xff]  }
 0x7bd   : > { %v1572_v1 = vpop.xlane.xlu1 %1571  ;;  %v1578_v3 = vmul.f32 %v1576_v0, %v1576_v0 }
 0x7be   : > { %v1575_v4 = vmul.f32 0.0078125, %v1572_v1  ;;  %v2845_v1 = vld [vmem:[%s3550_s10 + $0x50] sm:$0xff]  }
 0x7bf   : > { %1580 = vadd.xlane.f32.xlu0 %v1578_v3  ;;  %v2846_v3 = vld [vmem:[%s3550_s10 + $0x10] sm:$0xff]  }
 0x7c0   : > { %v3299_v5 = vsub.f32 %v1564_v56, %v1575_v4  ;;  %v2836_v56 = vld [vmem:[%s3550_s10 + $0x38] sm:$0xff]   ;;  %v2847_v4 = vld [vmem:[%s3550_s10 + $0x48] sm:$0xff]  }
 0x7c1   : > { %2586 = vmatpush3.bf16.msra.mxu0 %v2836_v56 }
 0x7c2   : > { %v1579_v7 = vmul.f32 %v3299_v5, %v3299_v5  ;;  %2587 = vmatprep.subr.bf16.mxu0 %v2837_v58 }
 0x7c4   : > { %v1582_v8 = vsel %vm1569_vm8, %v1579_v7, 0.0  ;;  %v2849_v7 = vld [vmem:[%s3550_s10 + $0x40] sm:$0xff]  }
 0x7c5   : > { %1583 = vadd.xlane.f32.xlu0 %v1582_v8  ;;  %2588 = vmatpush3.bf16.msra.mxu0 %v2838_v59  ;;  %v2850_v8 = vld [vmem:[%s3550_s10] sm:$0xff]   ;;  %v2856_v59 = vld [vmem:[%s3556_s16 + $0x28] sm:$0xff]  }
 0x7c6   : > { %2589 = vmatprep.subr.bf16.mxu0 %v2839_v23 }
 0x7c9   : > { %2590 = vmatpush3.bf16.msra.mxu0 %v2840_v60  ;;  %v2857_v60 = vld [vmem:[%s3556_s16 + $0x60] sm:$0xff]  }
 0x7ca   : > { %2591 = vmatprep.subr.bf16.mxu0 %v2841_v24 }
 0x7cd   : > { %2592 = vmatpush3.bf16.msra.mxu0 %v2842_v61 }
 0x7ce   : > { %2593 = vmatprep.subr.bf16.mxu0 %v2843_v63  ;;  %v2858_v63 = vld [vmem:[%s3556_s16 + $0x20] sm:$0xff]  }
 0x848   : > { %v1581_v21 = vpop.xlane.xlu0 %1580 }
 0x849   : > { %v1585_v22 = vmul.f32 0.0078125, %v1581_v21 }
 0x84b   : > { %v1587_v25 = vadd.f32 1e-05, %v1585_v22 }
 0x84d   : > { %2899 = vrsqrt.f32 %v1587_v25 }
 0x84e   : > { %v1584_v27 = vpop.xlane.xlu0 %1583 }
 0x84f   : > { %v1586_v32 = vmul.f32 0.0078125, %v1584_v27 }
 0x851   : > { %v1588_v36 = vadd.f32 1e-05, %v1586_v32  ;;  %v2000_v32 = vld [vmem:[%s3555_s15] sm:$0x3] }
 0x853   : > { %2901 = vrsqrt.f32 %v1588_v36 }
 0x85a   : > { %v2900_v26 = vpop.eup %2899 }
 0x85b   : > { %v1591_v29 = vmul.f32 %v2900_v26, %v1576_v0  ;;  %v2844_v0 = vld [vmem:[%s3550_s10 + $0x18] sm:$0xff]  }
 0x85c   : > { %2594 = vmatpush3.bf16.msra.mxu0 %v2844_v0 }
 0x85d   : > { %v1599_v33 = vmul.f32 %v2475_v28, %v1591_v29  ;;  %2595 = vmatprep.subr.bf16.mxu0 %v2845_v1  ;;  %v2859_v1 = vld [vmem:[%s3556_s16 + $0x58] sm:$0xff]  }
 0x85f   : > { %v3349_v34 = vadd.f32 %v2476_v30, %v1599_v33 }
 0x860   : > { %v2902_v48 = vpop.eup %2901  ;;  %2596 = vmatpush3.bf16.msra.mxu0 %v2846_v3  ;;  %v2860_v3 = vld [vmem:[%s3556_s16 + $0x18] sm:$0xff]  }
 0x861   : > { %v1625_v37 = vpack.c.bf16 %v3349_v34, %v3349_v34  ;;  %v1592_v57 = vmul.f32 %v2902_v48, %v3299_v5  ;;  %v2848_v5 = vld [vmem:[%s3550_s10 + $0x8] sm:$0xff]   ;;  %2597 = vmatprep.subr.bf16.mxu0 %v2847_v4  ;;  %v2861_v4 = vld [vmem:[%s3556_s16 + $0x50] sm:$0xff]  }
 0x863   : > { %1751 = vmatmul.mubr.bf16.vlgmr.msra.gmra.mxu1 %v1625_v37  ;;  %v1600_v53 = vmul.f32 %v2475_v28, %v1592_v57  ;;  %v2005_v37 = vrot.slane %v2000_v32, %v3151_v35 }
 0x864   : > { %2093 = vmatpush1.bf16.msra.mxu1 %v2811_v6  ;;  %2124 = vmatprep.mubr.bf16.mxu1 %v2923_v2  ;;  %v2820_v2 = vld [vmem:[%s3554_s14 + $0x40] ss:$8 sps:$4 sm:$0xff]  }
 0x865   : > { %2094 = vmatprep.subr.bf16.mxu1 %v2816_v38  ;;  %v3400_v54 = vadd.f32 %v2476_v30, %v1600_v53  ;;  %2598 = vmatpush3.bf16.msra.mxu0 %v2848_v5  ;;  %v2854_v53 = vld [vmem:[%s3556_s16 + $0x30] sm:$0xff]  }
 0x866   : > { %2599 = vmatprep.subr.bf16.mxu0 %v2849_v7  ;;  %v2862_v5 = vld [vmem:[%s3556_s16 + $0x10] sm:$0xff]   ;;  %v2863_v7 = vld [vmem:[%s3556_s16 + $0x48] sm:$0xff]  }
 0x867   : > { %v1999_v40 = vpack.c.bf16 %v3400_v54, %v3400_v54 }
 0x868   : > { %2095 = vmatpush1.bf16.msra.mxu1 %v2814_v39 }
 0x869   : > { %2096 = vmatprep.subr.bf16.mxu1 %v2819_v41  ;;  %2600 = vmatpush3.bf16.msra.mxu0 %v2850_v8  ;;  %v2864_v8 = vld [vmem:[%s3556_s16 + $0x8] sm:$0xff]  }
 0x86a   : > { %2607 = vmatprep.subr.bf16.mxu0 %v2851_v9 }
 0x86c   : > { %2097 = vmatpush1.bf16.msra.mxu1 %v2817_v42  ;;  %v2009_v42 = vrot.slane %v2000_v32, %v3146_v31 }
 0x86d   : > { %2098 = vmatprep.subr.bf16.mxu1 %v2822_v43 }
 0x870   : > { %2099 = vmatpush1.bf16.msra.mxu1 %v2820_v2 }
 0x871   : > { %2100 = vmatprep.subr.bf16.mxu1 %v2825_v45 }
 0x874   : > { %2101 = vmatpush1.bf16.msra.mxu1 %v2823_v46 }
 0x875   : > { %2102 = vmatprep.subr.bf16.mxu1 %v2828_v47  ;;  %v2852_v47 = vld [vmem:[%s3556_s16 + $0x38] sm:$0xff]  }
 0x878   : > { %2103 = vmatpush1.bf16.msra.mxu1 %v2826_v49 }
 0x879   : > { %2104 = vmatprep.subr.bf16.mxu1 %v2831_v50  ;;  %v2853_v50 = vld [vmem:[%s3556_s16 + $0x70] sm:$0xff]  }
 0x87c   : > { %2105 = vmatpush1.bf16.msra.mxu1 %v2829_v51 }
 0x87d   : > { %2106 = vmatprep.subr.bf16.mxu1 %v2834_v52 }
 0x880   : > { %2107 = vmatpush1.bf16.msra.mxu1 %v2832_v44 }
 0x883   : > { %2125 = vmatmul.mubr.bf16.vlgmr.msra.gmra.mxu1 %v1999_v40  ;;  %v2855_v40 = vld [vmem:[%s3556_s16 + $0x68] sm:$0xff]  }
 0x923   : > { %v1752_v13 = vpop.f32.mrf.mxu1 }
 0x924   : > { %v1753_v14 = vadd.f32 %v1752_v13, %v1631_v11 }
 0x925   : > { %v1754_v15 = vpop.f32.mrf.mxu1 }
 0x926   : > { %v1761_v62 = vmul.f32 0.044715, %v1753_v14  ;;  %v1755_v16 = vadd.f32 %v1754_v15, %v1635_v12  ;;  %v1759_v36 = vmul.f32 0.5, %v1753_v14 }
 0x927   : > { %v1756_v17 = vpop.f32.mrf.mxu1 }
 0x928   : > { %v1763_v18 = vmul.f32 %v1761_v62, %v1753_v14  ;;  %v1762_v19 = vmul.f32 0.044715, %v1755_v16  ;;  %v1760_v38 = vmul.f32 0.5, %v1755_v16 }
 0x929   : > { %v1757_v20 = vpop.f32.mrf.mxu1 }
 0x92a   : > { %v1765_v21 = vmul.f32 %v1763_v18, %v1753_v14  ;;  %v1764_v22 = vmul.f32 %v1762_v19, %v1755_v16 }
 0x92c   : > { %v1767_v25 = vadd.f32 %v1765_v21, %v1753_v14  ;;  %v1766_v26 = vmul.f32 %v1764_v22, %v1755_v16  ;;  %v2866_v14 = vld [vmem:[%s3556_s16] sm:$0xff]  }
 0x92e   : > { %v1769_v27 = vmul.f32 0.7978846, %v1767_v25  ;;  %v1768_v28 = vadd.f32 %v1766_v26, %v1755_v16  ;;  %v2509_v26 = vld [vmem:[%s3551_s11] ss:$0 sm:$0xff] }
 0x930   : > { %v1770_v29 = vmul.f32 0.7978846, %v1768_v28  ;;  %2903 = vtanh.f32 %v1769_v27 }
 0x932   : > { %2905 = vtanh.f32 %v1770_v29 }
 0x93d   : > { %v2904_v30 = vpop.eup %2903 }
 0x93e   : > { %v1773_v33 = vadd.f32 1.0, %v2904_v30 }
 0x93f   : > { %v2906_v6 = vpop.eup %2905 }
 0x940   : > { %v1774_v39 = vadd.f32 1.0, %v2906_v6  ;;  %v1775_v41 = vmul.f32 %v1773_v33, %v1759_v36  ;;  %v2544_v36 = vld [vmem:[%s3557_s17] ss:$0 sm:$0xff] }
 0x942   : > { %v1776_v43 = vmul.f32 %v1774_v39, %v1760_v38  ;;  %v1809_v49 = vpack.c.bf16 %v1775_v41, %v1775_v41 }
 0x943   : > { %v2126_v2 = vpop.f32.mrf.mxu1 }
 0x944   : > { %v2127_v45 = vadd.f32 %v2126_v2, %v2005_v37  ;;  %v1810_v46 = vpack.c.bf16 %v1776_v43, %v1776_v43 }
 0x945   : > { %v2128_v48 = vpop.f32.mrf.mxu1 }
 0x946   : > { %v2135_v35 = vmul.f32 0.044715, %v2127_v45  ;;  %v2129_v57 = vadd.f32 %v2128_v48, %v2009_v42  ;;  %1939 = vmatprep.mubr.bf16.mxu0 %v1810_v46  ;;  %v2133_v13 = vmul.f32 0.5, %v2127_v45 }
 0x947   : > { %v2130_v51 = vpop.f32.mrf.mxu1  ;;  %1940 = vmatmul.mubr.bf16.vlgmr.msra.gmra.mxu0 %v1809_v49 }
 0x948   : > { %v2137_v31 = vmul.f32 %v2135_v35, %v2127_v45  ;;  %v2136_v52 = vmul.f32 0.044715, %v2129_v57  ;;  %2608 = vmatpush3.bf16.msra.mxu0 %v2852_v47  ;;  %v2134_v15 = vmul.f32 0.5, %v2129_v57  ;;  %v2510_v51 = vld [vmem:[%s3552_s12] ss:$0 sm:$0xff] }
 0x949   : > { %v2131_v44 = vpop.f32.mrf.mxu1  ;;  %2609 = vmatprep.subr.bf16.mxu0 %v2853_v50 }
 0x94a   : > { %v2139_v55 = vmul.f32 %v2137_v31, %v2127_v45  ;;  %v2138_v56 = vmul.f32 %v2136_v52, %v2129_v57  ;;  %v2511_v52 = vld [vmem:[%s3553_s13] ss:$0 sm:$0xff] }
 0x94c   : > { %v2141_v58 = vadd.f32 %v2139_v55, %v2127_v45  ;;  %2610 = vmatpush3.bf16.msra.mxu0 %v2854_v53  ;;  %v2140_v23 = vmul.f32 %v2138_v56, %v2129_v57 }
 0x94d   : > { %2611 = vmatprep.subr.bf16.mxu0 %v2855_v40 }
 0x94e   : > { %v2143_v24 = vmul.f32 0.7978846, %v2141_v58  ;;  %v2142_v61 = vadd.f32 %v2140_v23, %v2129_v57 }
 0x950   : > { %2612 = vmatpush3.bf16.msra.mxu0 %v2856_v59  ;;  %v2144_v0 = vmul.f32 0.7978846, %v2142_v61  ;;  %2907 = vtanh.f32 %v2143_v24  ;;  %v2545_v59 = vld [vmem:[%s3558_s18] ss:$0 sm:$0xff] }
 0x951   : > { %2613 = vmatprep.subr.bf16.mxu0 %v2857_v60  ;;  %v2546_v60 = vld [vmem:[%s3559_s19] ss:$0 sm:$0xff] }
 0x952   : > { %2909 = vtanh.f32 %v2144_v0 }
 0x954   : > { %2614 = vmatpush3.bf16.msra.mxu0 %v2858_v63 }
 0x955   : > { %2615 = vmatprep.subr.bf16.mxu0 %v2859_v1 }
 0x958   : > { %2616 = vmatpush3.bf16.msra.mxu0 %v2860_v3 }
 0x959   : > { %2617 = vmatprep.subr.bf16.mxu0 %v2861_v4 }
 0x95c   : > { %2618 = vmatpush3.bf16.msra.mxu0 %v2862_v5 }
 0x95d   : > { %v2908_v9 = vpop.eup %2907  ;;  %2619 = vmatprep.subr.bf16.mxu0 %v2863_v7 }
 0x95e   : > { %v2147_v11 = vadd.f32 1.0, %v2908_v9 }
 0x95f   : > { %v2910_v12 = vpop.eup %2909 }
 0x960   : > { %2620 = vmatpush3.bf16.msra.mxu0 %v2864_v8  ;;  %v2148_v62 = vadd.f32 1.0, %v2910_v12  ;;  %v2149_v16 = vmul.f32 %v2147_v11, %v2133_v13 }
 0x961   : > { %2621 = vmatprep.subr.bf16.mxu0 %v2865_v10 }
 0x962   : > { %v2150_v17 = vmul.f32 %v2148_v62, %v2134_v15  ;;  %v2183_v19 = vpack.c.bf16 %v2149_v16, %v2149_v16 }
 0x964   : > { %2622 = vmatpush3.bf16.msra.mxu0 %v2866_v14  ;;  %v2184_v18 = vpack.c.bf16 %v2150_v17, %v2150_v17 }
 0x966   : > { %2313 = vmatprep.mubr.bf16.mxu0 %v2184_v18 }
 0x967   : > { %2314 = vmatmul.mubr.bf16.vlgmr.msra.gmra.mxu0 %v2183_v19 }
 0xa07   : > { %v2601_v20 = vpop.f32.mrf.mxu0 }
 0xa09   : > { %v2602_v21 = vpop.f32.mrf.mxu0 }
 0xa0a   : > { %v2603_v22 = vadd.f32 %v2602_v21, %v2601_v20 }
 0xa0b   : > { %v2604_v25 = vpop.f32.mrf.mxu0 }
 0xa0c   : > { %v1947_v27 = vadd.f32 %v2603_v22, %v3349_v34 }
 0xa0d   : > { %v2605_v28 = vpop.f32.mrf.mxu0 }
 0xa0e   : > { %v1955_v29 = vadd.f32 %v2509_v26, %v1947_v27 }
 0xa10   : > { %1958 = vadd.xlane.f32.xlu1 %v1955_v29 }
 0xa27   : > { %v2623_v30 = vpop.f32.mrf.mxu0 }
 0xa29   : > { %v2624_v32 = vpop.f32.mrf.mxu0 }
 0xa2a   : > { %v2625_v33 = vadd.f32 %v2624_v32, %v2623_v30 }
 0xa2b   : > { %v2626_v6 = vpop.f32.mrf.mxu0 }
 0xa2c   : > { %v2321_v37 = vadd.f32 %v2625_v33, %v3400_v54 }
 0xa2d   : > { %v2627_v38 = vpop.f32.mrf.mxu0 }
 0xa2e   : > { %v2329_v39 = vadd.f32 %v2544_v36, %v2321_v37 }
 0xa30   : > { %v2332_v41 = vsel %vm1569_vm8, %v2329_v39, 0.0 }
 0xa31   : > { %2333 = vadd.xlane.f32.xlu0 %v2332_v41 }
 0xa99   : > { %v1959_v42 = vpop.xlane.xlu1 %1958 }
 0xa9a   : > { %v1960_v34 = vmul.f32 0.0078125, %v1959_v42 }
 0xa9c   : > { %v1961_v43 = vsub.f32 %v1955_v29, %v1960_v34 }
 0xa9e   : > { %v1962_v2 = vmul.f32 %v1961_v43, %v1961_v43 }
 0xaa0   : > { %1963 = vadd.xlane.f32.xlu0 %v1962_v2 }
 0xaba   : > { %v2334_v45 = vpop.xlane.xlu0 %2333 }
 0xabb   : > { %v2335_v46 = vmul.f32 0.0078125, %v2334_v45 }
 0xabd   : > { %v2336_v47 = vsub.f32 %v2329_v39, %v2335_v46 }
 0xabf   : > { %v2337_v48 = vmul.f32 %v2336_v47, %v2336_v47 }
 0xac1   : > { %v2338_v49 = vsel %vm1569_vm8, %v2337_v48, 0.0 }
 0xac2   : > { %2339 = vadd.xlane.f32.xlu1 %v2338_v49 }
 0xb29   : > { %v1964_v50 = vpop.xlane.xlu0 %1963 }
 0xb2a   : > { %v1965_v54 = vmul.f32 0.0078125, %v1964_v50 }
 0xb2c   : > { %v1966_v35 = vadd.f32 1e-05, %v1965_v54 }
 0xb2e   : > { %2911 = vrsqrt.f32 %v1966_v35 }
 0xb3b   : > { %v2912_v57 = vpop.eup %2911 }
 0xb3c   : > { %v1968_v31 = vmul.f32 %v2912_v57, %v1961_v43 }
 0xb3e   : > { %v1975_v53 = vmul.f32 %v2510_v51, %v1968_v31 }
 0xb40   : > { %v1982_v44 = vadd.f32 %v2511_v52, %v1975_v53 }
 0xb42   : > { %2359 = vst [vmem:[%s643_s28] sm:$0xff] %v1982_v44 }
 0xb4b   : > { %v2340_v40 = vpop.xlane.xlu1 %2339 }
 0xb4c   : > { %v2341_v55 = vmul.f32 0.0078125, %v2340_v40 }
 0xb4e   : > { %v2342_v56 = vadd.f32 1e-05, %v2341_v55 }
 0xb50   : > { %2913 = vrsqrt.f32 %v2342_v56 }
 0xb5d   : > { %v2914_v58 = vpop.eup %2913 }
 0xb5e   : > { %v2344_v23 = vmul.f32 %v2914_v58, %v2336_v47 }
 0xb60   : > { %v2351_v24 = vmul.f32 %v2545_v59, %v2344_v23 }
 0xb62   : > { %v2358_v61 = vadd.f32 %v2546_v60, %v2351_v24 }
 0xb64   : > { %2360 = vst [vmem:[%s643_s28 + $0x8] sm:$0x3f] %v2358_v61 }
 0xb65 PF: > { %s30_s1 = sadd.s32 1, %s2921_s1  }
 0xb66   : > { %p27_p4 = scmp.ge.s32.totalorder %s30_s1, 4  }
 0xb68   :  { %29 = sbr.rel (!%p27_p4) target bundleno = 6 (0x6), region = 133 }

// kernel: blip2_forward.20
= control target key start
LH: loop header
LB: loop body
LE: loop exit
PB: predicated region body
PF: predicated region fallthrough
CT: control target
= control target key end

     0   :  { %v402_v1 = vmov 0   ;;  %v51_v35 = vlaneseq  ;;  %s537_s1 = inlined_call_operand.vmem [shape: bf16[128,512], index: 1, kind: input, shape index: {}]   ;;  %s538_s0 = inlined_call_operand.vmem [shape: f32[8,128], index: 0, kind: input, shape index: {}]   ;;  %s539_s2 = inlined_call_operand.vmem [shape: f32[1,512], index: 2, kind: input, shape index: {}]   ;;  %s540_s3 = inlined_call_operand.vmem [shape: f32[8,512], index: 3, kind: output, shape index: {}]  }
   0x1   :  { %v354_v0 = vld [vmem:[%s537_s1 + $0xe4] ss:$16 sps:$4 sm:$0xff]   ;;  %263 = vmatprep.mubr.bf16.mxu0 %v402_v1  ;;  %304 = vmatprep.mubr.bf16.mxu1 %v402_v1  ;;  %v356_v2 = vld [vmem:[%s537_s1 + $0xec] ss:$16 sps:$4 sm:$0xff]   ;;  %v358_v3 = vld [vmem:[%s537_s1 + $0xe0] ss:$16 sps:$4 sm:$0xff]  }
   0x2   :  { %231 = vmatprep.subr.bf16.mxu0 %v354_v0  ;;  %v359_v4 = vld [vmem:[%s537_s1 + $0xe8] ss:$16 sps:$4 sm:$0xff]   ;;  %272 = vmatprep.subr.bf16.mxu1 %v356_v2  ;;  %v360_v5 = vld [vmem:[%s537_s1 + $0xc4] ss:$16 sps:$4 sm:$0xff]   ;;  %v362_v6 = vld [vmem:[%s537_s1 + $0xcc] ss:$16 sps:$4 sm:$0xff]  }
   0x3   :  { %232 = vmatpush1.bf16.msra.mxu0 %v358_v3  ;;  %273 = vmatpush1.bf16.msra.mxu1 %v359_v4  ;;  %v364_v7 = vld [vmem:[%s537_s1 + $0xc0] ss:$16 sps:$4 sm:$0xff]   ;;  %v365_v8 = vld [vmem:[%s537_s1 + $0xc8] ss:$16 sps:$4 sm:$0xff]   ;;  %v366_v9 = vld [vmem:[%s537_s1 + $0xa4] ss:$16 sps:$4 sm:$0xff]  }
   0x4   :  { %233 = vmatprep.subr.bf16.mxu0 %v360_v5  ;;  %274 = vmatprep.subr.bf16.mxu1 %v362_v6  ;;  %v368_v10 = vld [vmem:[%s537_s1 + $0xac] ss:$16 sps:$4 sm:$0xff]   ;;  %v370_v11 = vld [vmem:[%s537_s1 + $0xa0] ss:$16 sps:$4 sm:$0xff]   ;;  %v371_v12 = vld [vmem:[%s537_s1 + $0xa8] ss:$16 sps:$4 sm:$0xff]  }
   0x5   :  { %v372_v13 = vld [vmem:[%s537_s1 + $0x84] ss:$16 sps:$4 sm:$0xff]   ;;  %v374_v14 = vld [vmem:[%s537_s1 + $0x8c] ss:$16 sps:$4 sm:$0xff]   ;;  %v376_v15 = vld [vmem:[%s537_s1 + $0x80] ss:$16 sps:$4 sm:$0xff]  }
   0x6   :  { %v377_v16 = vld [vmem:[%s537_s1 + $0x88] ss:$16 sps:$4 sm:$0xff]   ;;  %v378_v17 = vld [vmem:[%s537_s1 + $0x64] ss:$16 sps:$4 sm:$0xff]   ;;  %v380_v18 = vld [vmem:[%s537_s1 + $0x6c] ss:$16 sps:$4 sm:$0xff]  }
   0x7   :  { %234 = vmatpush1.bf16.msra.mxu0 %v364_v7  ;;  %275 = vmatpush1.bf16.msra.mxu1 %v365_v8  ;;  %v382_v19 = vld [vmem:[%s537_s1 + $0x60] ss:$16 sps:$4 sm:$0xff]   ;;  %v383_v20 = vld [vmem:[%s537_s1 + $0x68] ss:$16 sps:$4 sm:$0xff]   ;;  %v384_v21 = vld [vmem:[%s537_s1 + $0x44] ss:$16 sps:$4 sm:$0xff]  }
   0x8   :  { %235 = vmatprep.subr.bf16.mxu0 %v366_v9  ;;  %276 = vmatprep.subr.bf16.mxu1 %v368_v10  ;;  %v386_v22 = vld [vmem:[%s537_s1 + $0x4c] ss:$16 sps:$4 sm:$0xff]   ;;  %v388_v23 = vld [vmem:[%s537_s1 + $0x40] ss:$16 sps:$4 sm:$0xff]   ;;  %v389_v24 = vld [vmem:[%s537_s1 + $0x48] ss:$16 sps:$4 sm:$0xff]  }
   0x9   :  { %v390_v25 = vld [vmem:[%s537_s1 + $0x24] ss:$16 sps:$4 sm:$0xff]   ;;  %v392_v26 = vld [vmem:[%s537_s1 + $0x2c] ss:$16 sps:$4 sm:$0xff]   ;;  %v394_v27 = vld [vmem:[%s537_s1 + $0x20] ss:$16 sps:$4 sm:$0xff]  }
   0xa   :  { %v395_v28 = vld [vmem:[%s537_s1 + $0x28] ss:$16 sps:$4 sm:$0xff]   ;;  %v396_v29 = vld [vmem:[%s537_s1 + $0x4] ss:$16 sps:$4 sm:$0xff]   ;;  %v398_v30 = vld [vmem:[%s537_s1 + $0xc] ss:$16 sps:$4 sm:$0xff]  }
   0xb   :  { %236 = vmatpush1.bf16.msra.mxu0 %v370_v11  ;;  %277 = vmatpush1.bf16.msra.mxu1 %v371_v12  ;;  %v400_v31 = vld [vmem:[%s537_s1] ss:$16 sps:$4 sm:$0xff]   ;;  %v401_v32 = vld [vmem:[%s537_s1 + $0x8] ss:$16 sps:$4 sm:$0xff]   ;;  %v52_v36 = vshrl.u32 %v51_v35, 7 }
   0xc   :  { %237 = vmatprep.subr.bf16.mxu0 %v372_v13  ;;  %278 = vmatprep.subr.bf16.mxu1 %v374_v14  ;;  %v15_v33 = vld [vmem:[%s538_s0] sm:$0xff] }
   0xd   :  { %v48_v34 = vpack.c.bf16 %v15_v33, %v15_v33  ;;  %v53_v37 = vsub.s32 0, %v52_v36  ;;  %v61_v38 = vsub.s32 2, %v52_v36  ;;  %v49_v39 = vld [vmem:[%s539_s2] sm:$0xf]  ;;  %v57_v40 = vsub.s32 1, %v52_v36 }
   0xe   :  { %v65_v41 = vsub.s32 3, %v52_v36 }
   0xf   :  { %238 = vmatpush1.bf16.msra.mxu0 %v376_v15  ;;  %279 = vmatpush1.bf16.msra.mxu1 %v377_v16  ;;  %v54_v42 = vrot.slane %v49_v39, %v53_v37  ;;  %v62_v43 = vrot.slane %v49_v39, %v61_v38  ;;  %v58_v44 = vrot.slane %v49_v39, %v57_v40 }
  0x10   :  { %239 = vmatprep.subr.bf16.mxu0 %v378_v17  ;;  %280 = vmatprep.subr.bf16.mxu1 %v380_v18  ;;  %v66_v45 = vrot.slane %v49_v39, %v65_v41 }
  0x13   :  { %240 = vmatpush1.bf16.msra.mxu0 %v382_v19  ;;  %281 = vmatpush1.bf16.msra.mxu1 %v383_v20 }
  0x14   :  { %241 = vmatprep.subr.bf16.mxu0 %v384_v21  ;;  %282 = vmatprep.subr.bf16.mxu1 %v386_v22 }
  0x17   :  { %242 = vmatpush1.bf16.msra.mxu0 %v388_v23  ;;  %283 = vmatpush1.bf16.msra.mxu1 %v389_v24 }
  0x18   :  { %243 = vmatprep.subr.bf16.mxu0 %v390_v25  ;;  %284 = vmatprep.subr.bf16.mxu1 %v392_v26 }
  0x1b   :  { %244 = vmatpush1.bf16.msra.mxu0 %v394_v27  ;;  %285 = vmatpush1.bf16.msra.mxu1 %v395_v28 }
  0x1c   :  { %245 = vmatprep.subr.bf16.mxu0 %v396_v29  ;;  %286 = vmatprep.subr.bf16.mxu1 %v398_v30 }
  0x1f   :  { %246 = vmatpush1.bf16.msra.mxu0 %v400_v31  ;;  %287 = vmatpush1.bf16.msra.mxu1 %v401_v32 }
  0x22   :  { %264 = vmatmul.mubr.bf16.vlgmr.msra.gmra.mxu0 %v48_v34  ;;  %305 = vmatmul.mubr.bf16.vlgmr.msra.gmra.mxu1 %v48_v34 }
  0xe2   :  { %v265_v46 = vpop.f32.mrf.mxu0  ;;  %v306_v47 = vpop.f32.mrf.mxu1 }
  0xe3   :  { %v266_v48 = vadd.f32 %v265_v46, %v54_v42  ;;  %v307_v49 = vadd.f32 %v306_v47, %v62_v43 }
  0xe4   :  { %v267_v50 = vpop.f32.mrf.mxu0  ;;  %v308_v51 = vpop.f32.mrf.mxu1 }
  0xe5   :  { %313 = vst [vmem:[%s540_s3] sm:$0xff] %v266_v48  ;;  %315 = vst [vmem:[%s540_s3 + $0x10] sm:$0xff] %v307_v49  ;;  %v268_v52 = vadd.f32 %v267_v50, %v58_v44  ;;  %v309_v53 = vadd.f32 %v308_v51, %v66_v45 }
  0xe6   :  { %v269_v54 = vpop.f32.mrf.mxu0  ;;  %v310_v55 = vpop.f32.mrf.mxu1 }
  0xe7   :  { %314 = vst [vmem:[%s540_s3 + $0x8] sm:$0xff] %v268_v52  ;;  %316 = vst [vmem:[%s540_s3 + $0x18] sm:$0xff] %v309_v53 }
  0xe8   :  { %v270_v56 = vpop.f32.mrf.mxu0  ;;  %v311_v57 = vpop.f32.mrf.mxu1 }

// kernel: blip2_forward.17
= control target key start
LH: loop header
LB: loop body
LE: loop exit
PB: predicated region body
PF: predicated region fallthrough
CT: control target
= control target key end

     0   :  { %s4814_s6 = smov 1   ;;  %s4815_s10 = smov 2   ;;  %s5546_s0 = inlined_call_operand.smem [shape: u32[30], index: -1, kind: input, shape index: {}] }
   0x1   :  { %s4866_s5 = sld [smem:[%s5546_s0]]   ;;  %s4816_s14 = smov 3  }
   0x2   :  { %s4871_s9 = sld [smem:[%s5546_s0 + %s4814_s6]]   ;;  %s4817_s18 = smov 4  }
   0x3   :  { %s4876_s13 = sld [smem:[%s5546_s0 + %s4815_s10]]   ;;  %s4818_s22 = smov 5  }
   0x4   :  { %s4881_s17 = sld [smem:[%s5546_s0 + %s4816_s14]]   ;;  %s4819_s26 = smov 6  }
   0x5   :  { %s4886_s21 = sld [smem:[%s5546_s0 + %s4817_s18]]   ;;  %s4820_s30 = smov 7  }
   0x6   :  { %s4891_s25 = sld [smem:[%s5546_s0 + %s4818_s22]]   ;;  %s4821_s4 = smov 8  }
   0x7   :  { %s4896_s29 = sld [smem:[%s5546_s0 + %s4819_s26]]   ;;  %s4822_s10 = smov 9  }
   0x8   :  { %s4901_s3 = sld [smem:[%s5546_s0 + %s4820_s30]]   ;;  %s4823_s15 = smov 10  }
   0x9   :  { %s4906_s8 = sld [smem:[%s5546_s0 + %s4821_s4]]   ;;  %s4824_s20 = smov 11  }
   0xa   :  { %s4911_s14 = sld [smem:[%s5546_s0 + %s4822_s10]]   ;;  %s4825_s26 = smov 12  }
   0xb   :  { %s4916_s19 = sld [smem:[%s5546_s0 + %s4823_s15]]   ;;  %s4826_s1 = smov 13  }
   0xc   :  { %s4921_s24 = sld [smem:[%s5546_s0 + %s4824_s20]]   ;;  %s4827_s7 = smov 14  }
   0xd   :  { %s4926_s30 = sld [smem:[%s5546_s0 + %s4825_s26]]   ;;  %s4828_s15 = smov 15  }
   0xe   :  { %s4931_s6 = sld [smem:[%s5546_s0 + %s4826_s1]]   ;;  %s4829_s22 = smov 16  }
   0xf   :  { %5554 = sst [smem:[#allocation17_spill]] %s4906_s8  ;;  %s4830_s28 = smov 17  }
  0x10   :  { %s4936_s12 = sld [smem:[%s5546_s0 + %s4827_s7]]   ;;  %s4831_s7 = smov 18  }
  0x11   :  { %5555 = sst [smem:[#allocation18_spill]] %s4916_s19 }
  0x12   :  { %s4941_s20 = sld [smem:[%s5546_s0 + %s4828_s15]]   ;;  %s4832_s15 = smov 19  }
  0x13   :  { %5556 = sst [smem:[#allocation19_spill]] %s4926_s30 }
  0x14   :  { %5557 = sst [smem:[#allocation20_spill]] %s4931_s6 }
  0x15   :  { %s4946_s27 = sld [smem:[%s5546_s0 + %s4829_s22]]   ;;  %s4833_s22 = smov 20  }
  0x16   :  { %5558 = sst [smem:[#allocation21_spill]] %s4936_s12 }
  0x17   :  { %s4951_s4 = sld [smem:[%s5546_s0 + %s4830_s28]]   ;;  %s4834_s28 = smov 21  }
  0x18   :  { %5559 = sst [smem:[#allocation22_spill]] %s4941_s20 }
  0x19   :  { %s4956_s12 = sld [smem:[%s5546_s0 + %s4831_s7]]   ;;  %s4835_s7 = smov 22  }
  0x1a   :  { %s4961_s20 = sld [smem:[%s5546_s0 + %s4832_s15]]   ;;  %s4836_s15 = smov 23  }
  0x1b   :  { %s4966_s6 = sld [smem:[%s5546_s0 + %s4833_s22]]   ;;  %s4837_s22 = smov 24  }
  0x1c   :  { %s4986_s19 = sld [smem:[%s5546_s0 + %s4837_s22]]   ;;  %s4841_s22 = smov 28  }
  0x1d   :  { %5560 = sst [smem:[#allocation23_spill]] %s4951_s4 }
  0x1e   :  { %s4971_s4 = sld [smem:[%s5546_s0 + %s4834_s28]]   ;;  %s4838_s28 = smov 25  }
  0x1f   :  { %5561 = sst [smem:[#allocation24_spill]] %s4956_s12 }
  0x20   :  { %5562 = sst [smem:[#allocation25_spill]] %s4961_s20 }
  0x21   :  { %s4976_s12 = sld [smem:[%s5546_s0 + %s4835_s7]]   ;;  %s4839_s7 = smov 26  }
  0x22   :  { %s4981_s20 = sld [smem:[%s5546_s0 + %s4836_s15]]   ;;  %s4840_s15 = smov 27  }
  0x23   :  { %5564 = sst [smem:[#allocation27_spill]] %s4986_s19 }
  0x24   :  { %s4991_s30 = sld [smem:[%s5546_s0 + %s4838_s28]]   ;;  %s4842_s28 = smov 29  }
  0x25   :  { %s4996_s8 = sld [smem:[%s5546_s0 + %s4839_s7]]  }
  0x26   :  { %s5006_s19 = sld [smem:[%s5546_s0 + %s4841_s22]]  }
  0x28   :  { %5563 = sst [smem:[#allocation26_spill]] %s4981_s20 }
  0x29   :  { %s5001_s20 = sld [smem:[%s5546_s0 + %s4840_s15]]  }
  0x2a   :  { %5565 = sst [smem:[#allocation28_spill]] %s4991_s30 }
  0x2b   :  { %s5011_s30 = sld [smem:[%s5546_s0 + %s4842_s28]]  }
  0x2c   :  { %64 = vsyncpa [#allocation3], 0 }
  0x2d   :  { %65 = vsyncpa [#allocation5], 0 }
  0x2e   :  { %66 = vsyncpa [#allocation8], 0 }
  0x2f   :  { %67 = vsyncpa [#allocation11], 0  ;;  %s5013_s7 = smov 0  }
  0x30 LB: > { %s4843_s10 = smov [#allocation4]   ;;  %s5019_s15 = sadd.s32 4294967295, %s4812_s7   ;;  %s4812_s7 = sphi %s5013_s7, %s73_s7  }
  0x31   : > { %s800_s11 = sshll.u32 %s4843_s10, 4  ;;  %p3780_p0 = scmp.ge.s32.totalorder %s4812_s7, 1  ;;  %s801_s11 = int_to_ptr.vmem [resolvable:$true] %s800_s11 }
  0x32   : > { %p728_p1 = scmp.lt.s32.totalorder %s4812_s7, 3  ;;  %p5552_p2 = scmp.eq.s32.totalorder %s5019_s15, 0 }
  0x33   : > { %s4844_s16 = smov [#allocation7]   ;;  %s4845_s22 = smov [#allocation10]  }
  0x34   : > { %p5024_p3 = pnand %p3780_p0, %p728_p1  ;;  %s822_s18 = sshll.u32 %s4844_s16, 4  ;;  %s5030_s18 = int_to_ptr.vmem [resolvable:$true] %s822_s18 }
  0x35   : > { %s853_s23 = sshll.u32 %s4845_s22, 4  ;;  %s4846_s28 = smov [#allocation2]   ;;  %s5038_s23 = int_to_ptr.vmem [resolvable:$true] %s853_s23 }
  0x36   : > { %s5566_s0 = scalar_select %p5024_p3, 1, 0 }
  0x37   : > { %p4279_p4 = pneg %p5024_p3  ;;  %s780_s1 = sshll.u32 %s4846_s28, 4  ;;  %s5040_s1 = int_to_ptr.vmem [resolvable:$true] %s780_s1 }
  0x38   : > { %s4619_s10 = scalar_lea.vmem %s801_s11, 16  ;;  %s4626_s16 = scalar_lea.vmem %s801_s11, 32 }
  0x39   : > { %p5034_p5 = pnand %p5552_p2, %p4279_p4  ;;  %p4620_p7 = scmp.ne.s32.totalorder %s801_s11, %s4619_s10 }
  0x3a   : > { %p4627_p10 = scmp.lt.s32.totalorder %s801_s11, %s801_s11  ;;  %p4628_p11 = scmp.lt.s32.totalorder %s4626_s16, %s4619_s10 }
  0x3b   : > { %p5044_p6 = pneg %p5034_p5 }
  0x3c   : > { %p4629_p12 = por %p4628_p11, %p4627_p10 }
  0x3d   : > { %p4622_p8 = pnand %p4620_p7, %p5044_p6 }
  0x3f   : > { %p4623_p9 = pneg %p4622_p8 }
  0x41   : > { %p4630_p13 = pnand %p4629_p12, %p4623_p9 }
  0x43   : > { %4633 = shalt.err (!%p4630_p13)
}
  0x44   : > { %4285 = dma.hbm_to_vmem [thread:$0]  (!%p5034_p5), %s4966_s6, 16, %s801_s11, [#allocation5]  }
  0x45   : > { %s4645_s22 = scalar_lea.vmem %s5030_s18, 16  ;;  %s4652_s28 = scalar_lea.vmem %s5030_s18, 32 }
  0x46   : > { %p4646_p0 = scmp.ne.s32.totalorder %s5030_s18, %s4645_s22  ;;  %p4653_p7 = scmp.lt.s32.totalorder %s5030_s18, %s5030_s18 }
  0x47   : > { %p4654_p8 = scmp.lt.s32.totalorder %s4652_s28, %s4645_s22 }
  0x48   : > { %p4648_p1 = pnand %p4646_p0, %p5044_p6 }
  0x49   : > { %p4655_p9 = por %p4654_p8, %p4653_p7 }
  0x4a   : > { %p4649_p4 = pneg %p4648_p1 }
  0x4c   : > { %p4656_p10 = pnand %p4655_p9, %p4649_p4 }
  0x4e   : > { %4659 = shalt.err (!%p4656_p10)
}
  0x4f   : > { %4291 = dma.hbm_to_vmem [thread:$0]  (!%p5034_p5), %s4976_s12, 16, %s5030_s18, [#allocation8]  }
  0x50   : > { %s4671_s11 = scalar_lea.vmem %s5038_s23, 16  ;;  %s4678_s10 = scalar_lea.vmem %s5038_s23, 32 }
  0x51   : > { %p4672_p11 = scmp.ne.s32.totalorder %s5038_s23, %s4671_s11  ;;  %p4679_p0 = scmp.lt.s32.totalorder %s5038_s23, %s5038_s23 }
  0x52   : > { %p4680_p1 = scmp.lt.s32.totalorder %s4678_s10, %s4671_s11 }
  0x53   : > { %p4674_p12 = pnand %p4672_p11, %p5044_p6 }
  0x54   : > { %p4681_p4 = por %p4680_p1, %p4679_p0 }
  0x55   : > { %p4675_p13 = pneg %p4674_p12 }
  0x57   : > { %p4682_p7 = pnand %p4681_p4, %p4675_p13 }
  0x59   : > { %4685 = shalt.err (!%p4682_p7)
}
  0x5a   : > { %4297 = dma.hbm_to_vmem [thread:$0]  (!%p5034_p5), %s5001_s20, 16, %s5038_s23, [#allocation11]  }
  0x5b   : > { %s4697_s18 = scalar_lea.vmem %s5040_s1, 16  ;;  %s4704_s16 = scalar_lea.vmem %s5040_s1, 32 }
  0x5c   : > { %p4698_p8 = scmp.ne.s32.totalorder %s5040_s1, %s4697_s18  ;;  %p4705_p11 = scmp.lt.s32.totalorder %s5040_s1, %s5040_s1 }
  0x5d   : > { %p4706_p12 = scmp.lt.s32.totalorder %s4704_s16, %s4697_s18 }
  0x5e   : > { %p4700_p9 = pnand %p4698_p8, %p5044_p6 }
  0x5f   : > { %p4707_p13 = por %p4706_p12, %p4705_p11 }
  0x60   : > { %p4701_p10 = pneg %p4700_p9 }
  0x62   : > { %p4708_p0 = pnand %p4707_p13, %p4701_p10 }
  0x64   : > { %4711 = shalt.err (!%p4708_p0)
}
  0x65   : > { %4282 = dma.hbm_to_vmem [thread:$0]  (!%p5034_p5), %s4946_s27, 16, %s5040_s1, [#allocation3]  }
  0x66   : > { %s4847_s22 = smov [#allocation6]   ;;  %s4848_s28 = smov [#allocation9]  }
  0x67   : > { %s811_s23 = sshll.u32 %s4847_s22, 4  ;;  %s842_s11 = sshll.u32 %s4848_s28, 4  ;;  %s812_s23 = int_to_ptr.vmem [resolvable:$true] %s811_s23  ;;  %s843_s11 = int_to_ptr.vmem [resolvable:$true] %s842_s11 }
  0x68   : > { %s4723_s10 = scalar_lea.vmem %s812_s23, 16  ;;  %s4730_s18 = scalar_lea.vmem %s812_s23, 32 }
  0x69   : > { %p4724_p1 = scmp.ne.s32.totalorder %s812_s23, %s4723_s10  ;;  %p4731_p8 = scmp.lt.s32.totalorder %s812_s23, %s812_s23 }
  0x6a   : > { %p4732_p9 = scmp.lt.s32.totalorder %s4730_s18, %s4723_s10 }
  0x6b   : > { %p4726_p4 = pnand %p4724_p1, %p5044_p6 }
  0x6c   : > { %p4733_p10 = por %p4732_p9, %p4731_p8 }
  0x6d   : > { %p4727_p7 = pneg %p4726_p4 }
  0x6f   : > { %p4734_p11 = pnand %p4733_p10, %p4727_p7 }
  0x71   : > { %4737 = shalt.err (!%p4734_p11)
}
  0x72   : > { %4288 = dma.hbm_to_vmem [thread:$0]  (!%p5034_p5), %s4971_s4, 16, %s812_s23, [#allocation5]  }
  0x73   : > { %s4749_s1 = scalar_lea.vmem %s843_s11, 16  ;;  %s4756_s16 = scalar_lea.vmem %s843_s11, 32 }
  0x74   : > { %p4750_p12 = scmp.ne.s32.totalorder %s843_s11, %s4749_s1  ;;  %p4757_p1 = scmp.lt.s32.totalorder %s843_s11, %s843_s11 }
  0x75   : > { %p4758_p4 = scmp.lt.s32.totalorder %s4756_s16, %s4749_s1 }
  0x76   : > { %p4752_p13 = pnand %p4750_p12, %p5044_p6 }
  0x77   : > { %p4759_p2 = por %p4758_p4, %p4757_p1 }
  0x78   : > { %p4753_p0 = pneg %p4752_p13 }
  0x7a   : > { %p4760_p3 = pnand %p4759_p2, %p4753_p0 }
  0x7c   : > { %4763 = shalt.err (!%p4760_p3)
}
  0x7d   : > { %4294 = dma.hbm_to_vmem [thread:$0]  (!%p5034_p5), %s4996_s8, 16, %s843_s11, [#allocation8]  }
  0x7e   : > { %s4849_s22 = smov [#allocation12]  }
  0x7f   : > { %s864_s28 = sshll.u32 %s4849_s22, 4  ;;  %s865_s28 = int_to_ptr.vmem [resolvable:$true] %s864_s28 }
  0x80   : > { %s4775_s23 = scalar_lea.vmem %s865_s28, 16  ;;  %s4782_s10 = scalar_lea.vmem %s865_s28, 32 }
  0x81   : > { %p4776_p7 = scmp.ne.s32.totalorder %s865_s28, %s4775_s23  ;;  %p4783_p10 = scmp.lt.s32.totalorder %s865_s28, %s865_s28 }
  0x82   : > { %p4784_p11 = scmp.lt.s32.totalorder %s4782_s10, %s4775_s23 }
  0x83   : > { %p4778_p8 = pnand %p4776_p7, %p5044_p6 }
  0x84   : > { %p4785_p12 = por %p4784_p11, %p4783_p10 }
  0x85   : > { %p4779_p9 = pneg %p4778_p8 }
  0x87   : > { %p4786_p13 = pnand %p4785_p12, %p4779_p9 }
  0x89   : > { %4789 = shalt.err (!%p4786_p13)
}
  0x8a   : > { %4300 = dma.hbm_to_vmem [thread:$0]  (!%p5034_p5), %s5006_s19, 16, %s865_s28, [#allocation11]  }
  0x8b   : > { %p5569_p2 = scmp.ne.s32.totalorder %s5566_s0, 0 }
  0x8c   : > { %p5570_p3 = scmp.eq.s32.totalorder (!%p5569_p2), %s5019_s15, 0 }
  0x8d   : > { %898 = sbr.rel (%p5569_p2) target bundleno = 5112 (0x13f8), region = 136 }
  0x92   : > { %4795 = dma.done.wait (%p5570_p3), [#allocation3], 16   ;;  %p5571_p0 = pmov %p5570_p3 }
  0x94   : > { %4797 = vsyncadd (%p5571_p0), [#allocation3], 4294967280  ;;  %p5572_p6 = pmov %p5571_p0 }
  0x95   : > { %p5573_p1 = pmov %p5571_p0 }
  0x96   : > { %4799 = dma.done.wait (%p5572_p6), [#allocation5], 32  }
  0x97   : > { %4801 = vsyncadd (%p5573_p1), [#allocation5], 4294967264  ;;  %p5574_p4 = pmov %p5571_p0 }
  0x98   : > { %p5575_p5 = pmov %p5571_p0 }
  0x99   : > { %4803 = dma.done.wait (%p5574_p4), [#allocation8], 32  }
  0x9a   : > { %4805 = vsyncadd (%p5575_p5), [#allocation8], 4294967264  ;;  %p5576_p7 = pmov %p5571_p0 }
  0x9b   : > { %p5577_p8 = pmov %p5571_p0 }
  0x9c   : > { %4807 = dma.done.wait (%p5576_p7), [#allocation11], 32  }
  0x9d   : > { %4809 = vsyncadd (%p5577_p8), [#allocation11], 4294967264  ;;  %v4850_v0 = vmov 0   ;;  %v4851_v1 = vmov 0.0   ;;  %v4382_v2 = vld [vmem:[%s4881_s17 + $0xac] ss:$12 sps:$4 sm:$0xff]   ;;  %v1063_v29 = vlaneseq }
  0x9e   : > { %1238 = vmatprep.mubr.bf16.mxu0 %v4850_v0  ;;  %4075 = vmatprep.subr.bf16.mxu1 %v4851_v1  ;;  %v4384_v3 = vld [vmem:[%s4881_s17 + $0xa8] ss:$12 sps:$4 sm:$0xff]   ;;  %v4387_v5 = vld [vmem:[%s4881_s17 + $0x90] ss:$12 sps:$4 sm:$0xff]   ;;  %v4390_v7 = vld [vmem:[%s4881_s17 + $0x78] ss:$12 sps:$4 sm:$0xff]  }
  0x9f   : > { %1206 = vmatprep.subr.bf16.mxu0 %v4382_v2  ;;  %v4385_v4 = vld [vmem:[%s4881_s17 + $0x94] ss:$12 sps:$4 sm:$0xff]   ;;  %v4388_v6 = vld [vmem:[%s4881_s17 + $0x7c] ss:$12 sps:$4 sm:$0xff]   ;;  %v4391_v8 = vld [vmem:[%s4881_s17 + $0x64] ss:$12 sps:$4 sm:$0xff]  }
  0xa0   : > { %1207 = vmatpush1.bf16.msra.mxu0 %v4384_v3  ;;  %p1005_p9 = scmp.lt.s32.totalorder %s5019_s15, 1  ;;  %v4393_v9 = vld [vmem:[%s4881_s17 + $0x60] ss:$12 sps:$4 sm:$0xff]   ;;  %v4406_v11 = vld [vmem:[%s4881_s17 + $0xb0] ss:$12 sps:$4 sm:$0xff]   ;;  %vm4852_vm0 = vmmov 0  }
  0xa1   : > { %1208 = vmatprep.subr.bf16.mxu0 %v4385_v4  ;;  %v4394_v10 = vld [vmem:[%s4881_s17 + $0x4c] ss:$12 sps:$4 sm:$0xff]   ;;  %4076 = vmatpush3.bf16.msra.mxu1 %v4406_v11  ;;  %v4396_v13 = vld [vmem:[%s4881_s17 + $0x48] ss:$12 sps:$4 sm:$0xff]   ;;  %v4399_v16 = vld [vmem:[%s4881_s17 + $0x30] ss:$12 sps:$4 sm:$0xff]  }
  0xa2   : > { %s5591_s15 = smov (!%p1005_p9, %s5019_s15), 1  ;;  %v4407_v12 = vld [vmem:[%s4881_s17 + $0x98] ss:$12 sps:$4 sm:$0xff]   ;;  %4077 = vmatprep.subr.bf16.mxu1 %v4851_v1  ;;  %v4397_v14 = vld [vmem:[%s4881_s17 + $0x34] ss:$12 sps:$4 sm:$0xff]   ;;  %4091 = vmatprep.mubr.msk.bf16.mxu1 %vm4852_vm0, %v4851_v1  ;;  %v1064_v30 = vshrl.u32 %v1063_v29, 7 }
  0xa3   : > { %s3961_s0 = sshll.u32 %s5591_s15, 4  ;;  %v4408_v15 = vld [vmem:[%s4881_s17 + $0x80] ss:$12 sps:$4 sm:$0xff]   ;;  %v4400_v17 = vld [vmem:[%s4881_s17 + $0x1c] ss:$12 sps:$4 sm:$0xff]   ;;  %vm1301_vm1 = vcmask 261120   ;;  %s1012_s2 = scalar_lea.vmem %s4871_s9, %s5591_s15 }
  0xa4   : > { %1209 = vmatpush1.bf16.msra.mxu0 %v4387_v5  ;;  %v4409_v18 = vld [vmem:[%s4881_s17 + $0x68] ss:$12 sps:$4 sm:$0xff]   ;;  %v4402_v19 = vld [vmem:[%s4881_s17 + $0x18] ss:$12 sps:$4 sm:$0xff]   ;;  %s1009_s26 = scalar_lea.vmem %s4866_s5, %s3961_s0  ;;  %v4410_v21 = vld [vmem:[%s4881_s17 + $0x50] ss:$12 sps:$4 sm:$0xff]  }
  0xa5   : > { %1210 = vmatprep.subr.bf16.mxu0 %v4388_v6  ;;  %4078 = vmatpush3.bf16.msra.mxu1 %v4407_v12  ;;  %v4403_v20 = vld [vmem:[%s4881_s17 + $0x4] ss:$12 sps:$4 sm:$0xff]   ;;  %v4405_v22 = vld [vmem:[%s4881_s17] ss:$12 sps:$4 sm:$0xff]   ;;  %v4413_v28 = vld [vmem:[%s4881_s17 + $0x8] ss:$12 sps:$4 sm:$0xff]  }
  0xa6   : > { %4079 = vmatprep.subr.bf16.mxu1 %v4851_v1  ;;  %v5153_v23 = vld [vmem:[%s1009_s26] sm:$0xff]  ;;  %v5155_v24 = vld [vmem:[%s1009_s26 + $0x8] sm:$0x3f]  ;;  %v5174_v31 = vsub.s32 1, %v1064_v30  ;;  %v5177_v35 = vsub.s32 0, %v1064_v30  ;;  %v1073_v49 = vsub.s32 2, %v1064_v30 }
  0xa7   : > { %v4411_v25 = vld [vmem:[%s4881_s17 + $0x38] ss:$12 sps:$4 sm:$0xff]   ;;  %v1060_v26 = vpack.c.bf16 %v5155_v24, %v5153_v23  ;;  %v4412_v27 = vld [vmem:[%s4881_s17 + $0x20] ss:$12 sps:$4 sm:$0xff]   ;;  %vm1377_vm2 = vcmask 1046528   ;;  %vm1349_vm4 = vcmask 113664  }
  0xa8   : > { %1211 = vmatpush1.bf16.msra.mxu0 %v4390_v7  ;;  %v1061_v33 = vld [vmem:[%s4886_s21] sm:$0x7]  ;;  %v4853_v60 = vmov -1e+09   ;;  %vm1353_vm5 = vcmask 111616   ;;  %s4854_s11 = smov 96  }
  0xa9   : > { %1212 = vmatprep.subr.bf16.mxu0 %v4391_v8  ;;  %4080 = vmatpush3.bf16.msra.mxu1 %v4408_v15  ;;  %v1070_v36 = vrot.slane %v1061_v33, %v5174_v31  ;;  %v1066_v39 = vrot.slane %v1061_v33, %v5177_v35  ;;  %v1074_v50 = vrot.slane %v1061_v33, %v1073_v49  ;;  %v1025_v59 = vld [vmem:[%s1012_s2] sm:$0x1]  ;;  %s4855_s18 = smov 32   ;;  %s4856_s1 = smov 64   ;;  %vm1820_vm6 = vcmask 523264  }
  0xaa   : > { %4081 = vmatprep.subr.bf16.mxu1 %v4851_v1  ;;  %vm1026_vm3 = vcmp.gt.s32.totalorder %v1025_v59, 0  ;;  %vm1823_vm7 = vcmask 785408   ;;  %s3799_s16 = sshll.u32 %s5591_s15, 3  ;;  %s5578_s28 = sld [smem:[#allocation17_spill]]  ;;  %vm2316_vm8 = vcmask 1041408   ;;  %vm2317_vm9 = vcmask 1042432  }
  0xab   : > { %v1027_v61 = vsel %vm1026_vm3, 0.0, %v4853_v60  ;;  %s1016_s22 = scalar_lea.vmem %s4876_s13, %s3799_s16  ;;  %s5579_s23 = sld [smem:[#allocation19_spill]]  ;;  %vm2300_vm10 = vcmask 39936   ;;  %vm1947_vm11 = vcmask 1045504  }
  0xac   : > { %1213 = vmatpush1.bf16.msra.mxu0 %v4393_v9  ;;  %v5194_v62 = vrot.slane %v1027_v61, %v5177_v35  ;;  %s5580_s10 = sld [smem:[#allocation18_spill]] }
  0xad   : > { %1214 = vmatprep.subr.bf16.mxu0 %v4394_v10  ;;  %4082 = vmatpush3.bf16.msra.mxu1 %v4409_v18  ;;  %s5581_s26 = sld [smem:[#allocation20_spill]] }
  0xae   : > { %4083 = vmatprep.subr.bf16.mxu1 %v4851_v1  ;;  %s5582_s2 = sld [smem:[#allocation21_spill]] }
  0xaf   : > { %s5586_s16 = sld [smem:[#allocation25_spill]] }
  0xb0   : > { %1215 = vmatpush1.bf16.msra.mxu0 %v4396_v13 }
  0xb1   : > { %1216 = vmatprep.subr.bf16.mxu0 %v4397_v14  ;;  %4084 = vmatpush3.bf16.msra.mxu1 %v4410_v21 }
  0xb2   : > { %4085 = vmatprep.subr.bf16.mxu1 %v4851_v1 }
  0xb4   : > { %1217 = vmatpush1.bf16.msra.mxu0 %v4399_v16 }
  0xb5   : > { %1218 = vmatprep.subr.bf16.mxu0 %v4400_v17  ;;  %4086 = vmatpush3.bf16.msra.mxu1 %v4411_v25 }
  0xb6   : > { %4087 = vmatprep.subr.bf16.mxu1 %v4851_v1 }
  0xb8   : > { %1219 = vmatpush1.bf16.msra.mxu0 %v4402_v19 }
  0xb9   : > { %1220 = vmatprep.subr.bf16.mxu0 %v4403_v20  ;;  %4088 = vmatpush3.bf16.msra.mxu1 %v4412_v27 }
  0xba   : > { %4089 = vmatprep.subr.bf16.mxu1 %v4851_v1 }
  0xbc   : > { %1221 = vmatpush1.bf16.msra.mxu0 %v4405_v22 }
  0xbd   : > { %4119 = vmatprep.subr.bf16.mxu0 %v4851_v1  ;;  %4090 = vmatpush3.bf16.msra.mxu1 %v4413_v28 }
  0xbe   : > { %4095 = vmatprep.subr.bf16.mxu1 %v4851_v1 }
  0xbf   : > { %1239 = vmatmul.mubr.bf16.vlgmr.msra.gmra.mxu0 %v1060_v26 }
  0xc0   : > { %4121 = vmatprep.mubr.msk.bf16.mxu0 %vm4852_vm0, %v4851_v1  ;;  %4092 = vmatmul.mubr.bf16.vlgmr.msra.gmra.mxu1 %v1060_v26 }
  0xc1   : > { %4097 = vmatprep.mubr.msk.bf16.mxu1 %vm4852_vm0, %v4851_v1 }
 0x17f   : > { %v1240_v32 = vpop.f32.mrf.mxu0 }
 0x180   : > { %v1241_v44 = vadd.f32 %v1240_v32, %v1066_v39  ;;  %v1283_v51 = vpop.f32.mrf.mxu1 }
 0x181   : > { %v1242_v34 = vpop.f32.mrf.mxu0  ;;  %v1284_v53 = vadd.f32 %v1283_v51, %v1074_v50 }
 0x182   : > { %v1243_v40 = vadd.f32 %v1242_v34, %v1070_v36  ;;  %v1290_v47 = vmul.f32 0.17677669, %v1241_v44  ;;  %v4093_v52 = vpop.f32.mrf.mxu1 }
 0x183   : > { %v1244_v37 = vpop.f32.mrf.mxu0 }
 0x184   : > { %v1245_v42 = vadd.f32 %v1244_v37, %v1066_v39  ;;  %v1286_v54 = vpop.f32.mrf.mxu1 }
 0x185   : > { %v1246_v38 = vpop.f32.mrf.mxu0  ;;  %v1287_v55 = vadd.f32 %v1286_v54, %v1074_v50 }
 0x186   : > { %v1247_v41 = vadd.f32 %v1246_v38, %v1070_v36  ;;  %v1291_v46 = vmul.f32 0.17677669, %v1245_v42  ;;  %v4094_v56 = vpop.f32.mrf.mxu1 }
 0x187   : > { %v5186_v57 = vpack.c.bf16 %v1287_v55, %v1284_v53 }
 0x188   : > { %v1293_v43 = vpack.c.bf16 %v1247_v41, %v1243_v40  ;;  %v1292_v48 = vpack.c.bf16 %v1291_v46, %v1290_v47 }
 0x189   : > { %v1379_v58 = vsel %vm1377_vm2, %v5186_v57, 0 }
 0x18a   : > { %v1306_v45 = vsel %vm1301_vm1, %v1293_v43, 0 }
 0x18b   : > { %4096 = vmatpush3.bf16.xpose.msra.mxu1 %v1306_v45 }
 0x18c   : > { %4101 = vmatprep.subr.bf16.mxu1 %v4851_v1 }
 0x192   : > { %4098 = vmatmul.mubr.msk.bf16.vlgmr.msra.gmra.mxu1 %vm1301_vm1, %v1292_v48 }
 0x193   : > { %4103 = vmatprep.mubr.msk.bf16.mxu1 %vm4852_vm0, %v4851_v1  ;;  %4102 = vmatpush3.bf16.msra.mxu1 %v1379_v58 }
 0x194   : > { %4107 = vmatprep.subr.bf16.mxu1 %v4851_v1 }
 0x252   : > { %v1342_v63 = vpop.f32.mrf.mxu1 }
 0x253   : > { %v1343_v2 = vadd.f32 %v1342_v63, %v5194_v62 }
 0x254   : > { %v4099_v3 = vpop.f32.mrf.mxu1 }
 0x255   : > { %v1350_v4 = vsel %vm1349_vm4, %v1343_v2, -inf }
 0x256   : > { %1351 = vmax.xlane.f32.xlu0 %v1350_v4  ;;  %v1345_v5 = vpop.f32.mrf.mxu1 }
 0x257   : > { %v1346_v6 = vadd.f32 %v1345_v5, %v5194_v62 }
 0x258   : > { %v4100_v7 = vpop.f32.mrf.mxu1 }
 0x259   : > { %v1354_v8 = vsel %vm1353_vm5, %v1346_v6, -inf }
 0x25a   : > { %1355 = vmax.xlane.f32.xlu0 %v1354_v8 }
 0x270   : > { %1426 = vrot.lane.b32.xlu0 %v1293_v43, %s4854_s11 }
 0x274   : > { %1673 = vrot.lane.b32.xlu0 %v1293_v43, %s4855_s18 }
 0x2df   : > { %v1352_v9 = vpop.xlane.xlu0 %1351 }
 0x2e0   : > { %v1357_v10 = vsub.f32 %v1343_v2, %v1352_v9 }
 0x2e2   : > { %v1359_v11 = vmul.f32 1.442695, %v1357_v10 }
 0x2e3   : > { %v1356_v12 = vpop.xlane.xlu0 %1355 }
 0x2e4   : > { %4542 = vpow2.f32 %v1359_v11  ;;  %v1358_v13 = vsub.f32 %v1346_v6, %v1356_v12 }
 0x2e6   : > { %v1361_v14 = vmul.f32 1.442695, %v1358_v13 }
 0x2e7   : > { %v1427_v22 = vpop.permute.xlu0 %1426 }
 0x2e8   : > { %4544 = vpow2.f32 %v1361_v14  ;;  %v1432_v37 = vsel %vm1301_vm1, %v1427_v22, 0 }
 0x2eb   : > { %v1674_v29 = vpop.permute.xlu0 %1673 }
 0x2ec   : > { %v1679_v34 = vsel %vm1301_vm1, %v1674_v29, 0 }
 0x2f1   : > { %v4543_v15 = vpop.eup %4542 }
 0x2f2   : > { %v1363_v16 = vsel %vm1349_vm4, %v4543_v15, 0.0 }
 0x2f3   : > { %1364 = vadd.xlane.f32.xlu1 %v1363_v16 }
 0x2f5   : > { %v4545_v17 = vpop.eup %4544 }
 0x2f6   : > { %v1366_v18 = vsel %vm1353_vm5, %v4545_v17, 0.0 }
 0x2f7   : > { %1367 = vadd.xlane.f32.xlu1 %v1366_v18 }
 0x308   : > { %1423 = vrot.lane.b32.xlu1 %v1292_v48, %s4854_s11 }
 0x30c   : > { %1550 = vrot.lane.b32.xlu1 %v1293_v43, %s4856_s1 }
 0x310   : > { %1548 = vrot.lane.b32.xlu1 %v1292_v48, %s4856_s1 }
 0x314   : > { %1671 = vrot.lane.b32.xlu1 %v1292_v48, %s4855_s18 }
 0x37c   : > { %v1365_v19 = vpop.xlane.xlu1 %1364 }
 0x37d   : > { %4546 = vrcp.f32 %v1365_v19 }
 0x380   : > { %v1368_v20 = vpop.xlane.xlu1 %1367 }
 0x381   : > { %4548 = vrcp.f32 %v1368_v20 }
 0x384   : > { %v1424_v21 = vpop.permute.xlu1 %1423 }
 0x388   : > { %v1551_v25 = vpop.permute.xlu1 %1550 }
 0x389   : > { %v1556_v26 = vsel %vm1301_vm1, %v1551_v25, 0 }
 0x38a   : > { %4120 = vmatpush3.bf16.xpose.msra.mxu0 %v1556_v26  ;;  %v4547_v27 = vpop.eup %4546 }
 0x38b   : > { %4131 = vmatprep.subr.bf16.mxu0 %v4851_v1  ;;  %v1371_v30 = vmul.f32 %v4547_v27, %v4543_v15 }
 0x38c   : > { %v1549_v33 = vpop.permute.xlu1 %1548 }
 0x38e   : > { %v4549_v28 = vpop.eup %4548 }
 0x38f   : > { %v1372_v32 = vmul.f32 %v4549_v28, %v4545_v17 }
 0x390   : > { %v1672_v38 = vpop.permute.xlu1 %1671 }
 0x391   : > { %4122 = vmatmul.mubr.msk.bf16.vlgmr.msra.gmra.mxu0 %vm1301_vm1, %v1549_v33  ;;  %v1373_v36 = vpack.c.bf16 %v1372_v32, %v1371_v30 }
 0x392   : > { %4132 = vmatpush3.bf16.xpose.msra.mxu0 %v1679_v34  ;;  %4133 = vmatprep.mubr.msk.bf16.mxu0 %vm4852_vm0, %v4851_v1 }
 0x393   : > { %4104 = vmatmul.mubr.msk.bf16.vlgmr.msra.gmra.mxu1 %vm1349_vm4, %v1373_v36  ;;  %4143 = vmatprep.subr.bf16.mxu0 %v4851_v1 }
 0x394   : > { %4108 = vmatpush3.bf16.xpose.msra.mxu1 %v1432_v37  ;;  %4109 = vmatprep.mubr.msk.bf16.mxu1 %vm4852_vm0, %v4851_v1 }
 0x395   : > { %4113 = vmatprep.subr.bf16.mxu1 %v4851_v1 }
 0x399   : > { %4134 = vmatmul.mubr.msk.bf16.vlgmr.msra.gmra.mxu0 %vm1301_vm1, %v1672_v38 }
 0x39a   : > { %4159 = vmatprep.mubr.msk.bf16.mxu0 %vm4852_vm0, %v4851_v1 }
 0x39b   : > { %4110 = vmatmul.mubr.msk.bf16.vlgmr.msra.gmra.mxu1 %vm1301_vm1, %v1424_v21 }
 0x39c   : > { %4115 = vmatprep.mubr.msk.bf16.mxu1 %vm4852_vm0, %v4851_v1 }
 0x451   : > { %v1592_v39 = vpop.f32.mrf.mxu0 }
 0x452   : > { %v1593_v53 = vadd.f32 %v1592_v39, %v5194_v62 }
 0x453   : > { %v5226_v40 = vpop.f32.mrf.mxu1  ;;  %v4123_v41 = vpop.f32.mrf.mxu0 }
 0x454   : > { %v1599_v63 = vsel %vm1349_vm4, %v1593_v53, -inf }
 0x455   : > { %v4105_v42 = vpop.f32.mrf.mxu1  ;;  %v1595_v43 = vpop.f32.mrf.mxu0 }
 0x456   : > { %v1596_v60 = vadd.f32 %v1595_v43, %v5194_v62 }
 0x457   : > { %v5228_v44 = vpop.f32.mrf.mxu1  ;;  %v4124_v45 = vpop.f32.mrf.mxu0 }
 0x458   : > { %v1602_v4 = vsel %vm1353_vm5, %v1596_v60, -inf }
 0x459   : > { %v4106_v46 = vpop.f32.mrf.mxu1  ;;  %v1715_v47 = vpop.f32.mrf.mxu0 }
 0x45a   : > { %v1716_v3 = vadd.f32 %v1715_v47, %v5194_v62 }
 0x45b   : > { %v1468_v48 = vpop.f32.mrf.mxu1  ;;  %v4135_v49 = vpop.f32.mrf.mxu0 }
 0x45c   : > { %v1469_v50 = vadd.f32 %v1468_v48, %v5194_v62  ;;  %v1722_v6 = vsel %vm1349_vm4, %v1716_v3, -inf }
 0x45d   : > { %v4111_v51 = vpop.f32.mrf.mxu1  ;;  %v1718_v52 = vpop.f32.mrf.mxu0 }
 0x45e   : > { %v1475_v54 = vsel %vm1349_vm4, %v1469_v50, -inf  ;;  %v1719_v61 = vadd.f32 %v1718_v52, %v5194_v62 }
 0x45f   : > { %v4136_v55 = vpop.f32.mrf.mxu0  ;;  %1476 = vmax.xlane.f32.xlu0 %v1475_v54  ;;  %v1471_v56 = vpop.f32.mrf.mxu1 }
 0x460   : > { %v1472_v58 = vadd.f32 %v1471_v56, %v5194_v62  ;;  %v1725_v5 = vsel %vm1353_vm5, %v1719_v61, -inf }
 0x461   : > { %v4112_v59 = vpop.f32.mrf.mxu1 }
 0x462   : > { %v1478_v2 = vsel %vm1353_vm5, %v1472_v58, -inf }
 0x463   : > { %1600 = vmax.xlane.f32.xlu0 %v1599_v63  ;;  %1479 = vmax.xlane.f32.xlu1 %v1478_v2 }
 0x467   : > { %1603 = vmax.xlane.f32.xlu0 %v1602_v4  ;;  %1726 = vmax.xlane.f32.xlu1 %v1725_v5 }
 0x46b   : > { %1723 = vmax.xlane.f32.xlu0 %v1722_v6 }
 0x4e8   : > { %v1477_v7 = vpop.xlane.xlu0 %1476 }
 0x4e9   : > { %v1481_v62 = vsub.f32 %v1469_v50, %v1477_v7 }
 0x4eb   : > { %v1483_v21 = vmul.f32 1.442695, %v1481_v62 }
 0x4ec   : > { %v1601_v8 = vpop.xlane.xlu0 %1600  ;;  %v1480_v9 = vpop.xlane.xlu1 %1479 }
 0x4ed   : > { %v1605_v10 = vsub.f32 %v1593_v53, %v1601_v8  ;;  %v1482_v16 = vsub.f32 %v1472_v58, %v1480_v9  ;;  %v4414_v8 = vld [vmem:[%s4891_s25 + $0x38] sm:$0xff]   ;;  %v4415_v9 = vld [vmem:[%s4891_s25 + $0x30] sm:$0xff]  }
 0x4ee   : > { %4144 = vmatpush3.bf16.msra.mxu0 %v4414_v8 }
 0x4ef   : > { %v1607_v11 = vmul.f32 1.442695, %v1605_v10  ;;  %v1485_v22 = vmul.f32 1.442695, %v1482_v16  ;;  %4145 = vmatprep.subr.bf16.mxu0 %v4851_v1  ;;  %v4416_v10 = vld [vmem:[%s4891_s25 + $0x28] sm:$0xff]  }
 0x4f0   : > { %v1604_v12 = vpop.xlane.xlu0 %1603  ;;  %v1727_v13 = vpop.xlane.xlu1 %1726 }
 0x4f1   : > { %4550 = vpow2.f32 %v1607_v11  ;;  %v1606_v14 = vsub.f32 %v1596_v60, %v1604_v12  ;;  %v1729_v15 = vsub.f32 %v1719_v61, %v1727_v13  ;;  %v4417_v11 = vld [vmem:[%s4891_s25 + $0x20] sm:$0xff]   ;;  %v4418_v12 = vld [vmem:[%s4891_s25 + $0x18] sm:$0xff]  }
 0x4f2   : > { %4146 = vmatpush3.bf16.msra.mxu0 %v4415_v9 }
 0x4f3   : > { %v1609_v17 = vmul.f32 1.442695, %v1606_v14  ;;  %v1732_v18 = vmul.f32 1.442695, %v1729_v15  ;;  %4147 = vmatprep.subr.bf16.mxu0 %v4851_v1  ;;  %v4419_v15 = vld [vmem:[%s4891_s25 + $0x10] sm:$0xff]  }
 0x4f4   : > { %v1724_v19 = vpop.xlane.xlu0 %1723 }
 0x4f5   : > { %4552 = vpow2.f32 %v1609_v17  ;;  %v1728_v20 = vsub.f32 %v1716_v3, %v1724_v19  ;;  %v4420_v17 = vld [vmem:[%s4891_s25 + $0x8] sm:$0xff]  }
 0x4f6   : > { %4554 = vpow2.f32 %v1732_v18  ;;  %4148 = vmatpush3.bf16.msra.mxu0 %v4416_v10 }
 0x4f7   : > { %v1730_v25 = vmul.f32 1.442695, %v1728_v20  ;;  %4149 = vmatprep.subr.bf16.mxu0 %v4851_v1 }
 0x4f9   : > { %4556 = vpow2.f32 %v1730_v25 }
 0x4fa   : > { %4558 = vpow2.f32 %v1483_v21  ;;  %4150 = vmatpush3.bf16.msra.mxu0 %v4417_v11  ;;  %v4421_v21 = vld [vmem:[%s4891_s25] sm:$0xff]  }
 0x4fb   : > { %4560 = vpow2.f32 %v1485_v22  ;;  %4151 = vmatprep.subr.bf16.mxu0 %v4851_v1 }
 0x4fe   : > { %v4551_v26 = vpop.eup %4550  ;;  %4152 = vmatpush3.bf16.msra.mxu0 %v4418_v12  ;;  %v4441_v12 = vld [vmem:[%s4921_s24 + $0x24] ss:$8 sps:$4 sm:$0xff]  }
 0x4ff   : > { %v1611_v27 = vsel %vm1349_vm4, %v4551_v26, 0.0  ;;  %4153 = vmatprep.subr.bf16.mxu0 %v4851_v1 }
 0x500   : > { %1612 = vadd.xlane.f32.xlu0 %v1611_v27 }
 0x502   : > { %v4553_v28 = vpop.eup %4552  ;;  %4154 = vmatpush3.bf16.msra.mxu0 %v4419_v15  ;;  %v4443_v15 = vld [vmem:[%s4921_s24 + $0x10] ss:$8 sps:$4 sm:$0xff]  }
 0x503   : > { %v1614_v29 = vsel %vm1353_vm5, %v4553_v28, 0.0  ;;  %v4555_v30 = vpop.eup %4554  ;;  %4155 = vmatprep.subr.bf16.mxu0 %v4851_v1 }
 0x504   : > { %1615 = vadd.xlane.f32.xlu1 %v1614_v29  ;;  %v1737_v36 = vsel %vm1353_vm5, %v4555_v30, 0.0 }
 0x506   : > { %v4557_v32 = vpop.eup %4556  ;;  %4156 = vmatpush3.bf16.msra.mxu0 %v4420_v17  ;;  %v4449_v17 = vld [vmem:[%s4921_s24 + $0x4] ss:$8 sps:$4 sm:$0xff]  }
 0x507   : > { %v4559_v33 = vpop.eup %4558  ;;  %v1734_v34 = vsel %vm1349_vm4, %v4557_v32, 0.0  ;;  %4157 = vmatprep.subr.bf16.mxu0 %v4851_v1 }
 0x508   : > { %v4561_v37 = vpop.eup %4560  ;;  %1735 = vadd.xlane.f32.xlu0 %v1734_v34  ;;  %1738 = vadd.xlane.f32.xlu1 %v1737_v36  ;;  %v1487_v38 = vsel %vm1349_vm4, %v4559_v33, 0.0 }
 0x509   : > { %v1490_v39 = vsel %vm1353_vm5, %v4561_v37, 0.0 }
 0x50a   : > { %4158 = vmatpush3.bf16.msra.mxu0 %v4421_v21 }
 0x50c   : > { %1488 = vadd.xlane.f32.xlu0 %v1487_v38  ;;  %1491 = vadd.xlane.f32.xlu1 %v1490_v39 }
 0x51d   : > { %1622 = vrot.lane.b32.xlu1 %v5186_v57, %s4856_s1 }
 0x521   : > { %1745 = vrot.lane.b32.xlu1 %v5186_v57, %s4855_s18 }
 0x522   : > { %1499 = vrot.lane.b32.xlu0 %v5186_v57, %s4854_s11 }
 0x589   : > { %v1613_v41 = vpop.xlane.xlu0 %1612 }
 0x58d   : > { %v1616_v42 = vpop.xlane.xlu1 %1615 }
 0x591   : > { %v1736_v43 = vpop.xlane.xlu0 %1735  ;;  %v1739_v45 = vpop.xlane.xlu1 %1738 }
 0x595   : > { %v1489_v46 = vpop.xlane.xlu0 %1488  ;;  %v1492_v47 = vpop.xlane.xlu1 %1491 }
 0x596   : > { %4562 = vrcp.f32 %v1489_v46 }
 0x597   : > { %4564 = vrcp.f32 %v1492_v47 }
 0x598   : > { %4566 = vrcp.f32 %v1616_v42 }
 0x599   : > { %v1500_v48 = vpop.permute.xlu0 %1499  ;;  %4568 = vrcp.f32 %v1613_v41  ;;  %v1623_v53 = vpop.permute.xlu1 %1622 }
 0x59a   : > { %v1505_v49 = vsel %vm1377_vm2, %v1500_v48, 0  ;;  %4570 = vrcp.f32 %v1736_v43  ;;  %v1628_v56 = vsel %vm1377_vm2, %v1623_v53, 0 }
 0x59b   : > { %4114 = vmatpush3.bf16.msra.mxu1 %v1505_v49  ;;  %4572 = vrcp.f32 %v1739_v45 }
 0x59c   : > { %4125 = vmatprep.subr.bf16.mxu1 %v4851_v1 }
 0x59d   : > { %v1746_v61 = vpop.permute.xlu1 %1745 }
 0x59e   : > { %v1751_v4 = vsel %vm1377_vm2, %v1746_v61, 0  ;;  %v4427_v61 = vld [vmem:[%s4921_s24 + $0x64] ss:$8 sps:$4 sm:$0xff]  }
 0x5a3   : > { %v4563_v50 = vpop.eup %4562 }
 0x5a4   : > { %v4565_v57 = vpop.eup %4564  ;;  %v1495_v51 = vmul.f32 %v4563_v50, %v4559_v33 }
 0x5a5   : > { %v1496_v52 = vmul.f32 %v4565_v57, %v4561_v37  ;;  %v4567_v55 = vpop.eup %4566 }
 0x5a6   : > { %v4569_v58 = vpop.eup %4568  ;;  %v1620_v59 = vmul.f32 %v4567_v55, %v4553_v28 }
 0x5a7   : > { %v1497_v54 = vpack.c.bf16 %v1496_v52, %v1495_v51  ;;  %v1619_v60 = vmul.f32 %v4569_v58, %v4551_v26  ;;  %v4571_v63 = vpop.eup %4570 }
 0x5a8   : > { %v4573_v3 = vpop.eup %4572  ;;  %v1742_v5 = vmul.f32 %v4571_v63, %v4557_v32  ;;  %v4434_v63 = vld [vmem:[%s4911_s14 + $0x38] sm:$0xff]  }
 0x5a9   : > { %4116 = vmatmul.mubr.msk.bf16.vlgmr.msra.gmra.mxu1 %vm1349_vm4, %v1497_v54  ;;  %v1621_v2 = vpack.c.bf16 %v1620_v59, %v1619_v60  ;;  %v1743_v6 = vmul.f32 %v4573_v3, %v4555_v30  ;;  %v4422_v59 = vld [vmem:[%s4921_s24 + $0x70] ss:$8 sps:$4 sm:$0xff]   ;;  %v4424_v60 = vld [vmem:[%s4921_s24 + $0x74] ss:$8 sps:$4 sm:$0xff]  }
 0x5aa   : > { %4126 = vmatpush3.bf16.msra.mxu1 %v1628_v56  ;;  %4127 = vmatprep.mubr.msk.bf16.mxu1 %vm4852_vm0, %v4851_v1  ;;  %v4428_v3 = vld [vmem:[%s4921_s24 + $0x50] ss:$8 sps:$4 sm:$0xff]  }
 0x5ab   : > { %4137 = vmatprep.subr.bf16.mxu1 %v4851_v1  ;;  %v1744_v7 = vpack.c.bf16 %v1743_v6, %v1742_v5  ;;  %2210 = vmatprep.subr.bf16.mxu0 %v4424_v60  ;;  %v4431_v5 = vld [vmem:[%s4921_s24 + $0x40] ss:$8 sps:$4 sm:$0xff]   ;;  %v4437_v6 = vld [vmem:[%s4921_s24 + $0x34] ss:$8 sps:$4 sm:$0xff]  }
 0x5b1   : > { %4128 = vmatmul.mubr.msk.bf16.vlgmr.msra.gmra.mxu1 %vm1349_vm4, %v1621_v2  ;;  %v4430_v2 = vld [vmem:[%s4921_s24 + $0x54] ss:$8 sps:$4 sm:$0xff]  }
 0x5b2   : > { %4138 = vmatpush3.bf16.msra.mxu1 %v1751_v4  ;;  %4139 = vmatprep.mubr.msk.bf16.mxu1 %vm4852_vm0, %v4851_v1  ;;  %v4433_v4 = vld [vmem:[%s4921_s24 + $0x44] ss:$8 sps:$4 sm:$0xff]  }
 0x5b3   : > { %4163 = vmatprep.subr.bf16.mxu1 %v4851_v1 }
 0x5b9   : > { %4140 = vmatmul.mubr.msk.bf16.vlgmr.msra.gmra.mxu1 %vm1349_vm4, %v1744_v7  ;;  %v4435_v7 = vld [vmem:[%s4921_s24 + $0x30] ss:$8 sps:$4 sm:$0xff]  }
 0x5ba   : > { %4179 = vmatprep.mubr.msk.bf16.mxu1 %vm4852_vm0, %v4851_v1  ;;  %4164 = vmatpush3.bf16.msra.mxu1 %v4434_v63 }
 0x5bb   : > { %4165 = vmatprep.subr.bf16.mxu1 %v4851_v1 }
 0x669   : > { %v1541_v13 = vpop.f32.mrf.mxu1 }
 0x66b   : > { %v4117_v14 = vpop.f32.mrf.mxu1 }
 0x66c   : > { %v4442_v14 = vld [vmem:[%s4911_s14 + $0x28] sm:$0xff]  }
 0x66d   : > { %v1544_v62 = vpop.f32.mrf.mxu1 }
 0x66e   : > { %v4367_v16 = vpack.i.bf16 %v1544_v62, %v1541_v13  ;;  %v4439_v13 = vld [vmem:[%s4921_s24 + $0x20] ss:$8 sps:$4 sm:$0xff]   ;;  %v4445_v62 = vld [vmem:[%s4921_s24 + $0x14] ss:$8 sps:$4 sm:$0xff]  }
 0x66f   : > { %v4118_v18 = vpop.f32.mrf.mxu1 }
 0x670   : > { %4368 = vrot.lane.b32.xlu1 %v4367_v16, %s4855_s18  ;;  %v4446_v16 = vld [vmem:[%s4911_s14 + $0x20] sm:$0xff]  }
 0x671   : > { %v1664_v19 = vpop.f32.mrf.mxu1  ;;  %v4447_v18 = vld [vmem:[%s4921_s24] ss:$8 sps:$4 sm:$0xff]  }
 0x673   : > { %v4129_v20 = vpop.f32.mrf.mxu1 }
 0x674   : > { %v1987_v20 = vld [vmem:[%s1016_s22] sm:$0x1f]  ;;  %s5587_s22 = sld [smem:[#allocation28_spill]] }
 0x675   : > { %v1667_v22 = vpop.f32.mrf.mxu1  ;;  %v2117_v21 = vpack.c.bf16 %v1987_v20, %v1987_v20 }
 0x676   : > { %v4372_v25 = vpack.i.bf16 %v1667_v22, %v1664_v19  ;;  %v4450_v19 = vld [vmem:[%s4911_s14 + $0x18] sm:$0xff]   ;;  %v4451_v22 = vld [vmem:[%s4911_s14 + $0x10] sm:$0xff]  }
 0x677   : > { %v4130_v26 = vpop.f32.mrf.mxu1 }
 0x678   : > { %4373 = vrot.lane.b32.xlu0 %v4372_v25, %s4856_s1  ;;  %v4452_v25 = vld [vmem:[%s4911_s14 + $0x8] sm:$0xff]   ;;  %v4453_v26 = vld [vmem:[%s4911_s14] sm:$0xff]  }
 0x679   : > { %v1787_v27 = vpop.f32.mrf.mxu1 }
 0x67b   : > { %v4141_v28 = vpop.f32.mrf.mxu1 }
 0x67d   : > { %v1790_v29 = vpop.f32.mrf.mxu1 }
 0x67e   : > { %v4377_v30 = vpack.i.bf16 %v1790_v29, %v1787_v27 }
 0x67f   : > { %v4142_v32 = vpop.f32.mrf.mxu1 }
 0x680   : > { %4378 = vrot.lane.b32.xlu1 %v4377_v30, %s4854_s11  ;;  %v5339_v32 = vld [vmem:[%s4901_s3] ss:$0 sm:$0xff] }
 0x6e2   : > { %v4369_v33 = vpop.permute.xlu1 %4368 }
 0x6e3   : > { %v4371_v36 = vunpack.i.h.bf16 %v4369_v33  ;;  %v4370_v37 = vunpack.i.l.bf16 %v4369_v33 }
 0x6e5   : > { %v1819_v42 = vsel %vm1301_vm1, %v5228_v44, %v4371_v36  ;;  %v1818_v43 = vsel %vm1301_vm1, %v5226_v40, %v4370_v37  ;;  %v3842_v40 = vld [vmem:[%s4896_s29] ss:$0 sm:$0xff] }
 0x6ea   : > { %v4374_v34 = vpop.permute.xlu0 %4373 }
 0x6eb   : > { %v4376_v38 = vunpack.i.h.bf16 %v4374_v34  ;;  %v4375_v39 = vunpack.i.l.bf16 %v4374_v34  ;;  %v5342_v34 = vld [vmem:[%s5578_s28] ss:$0 sm:$0xff]  ;;  %s5588_s28 = sld [smem:[#allocation24_spill]] }
 0x6ed   : > { %v1822_v47 = vsel %vm1820_vm6, %v1819_v42, %v4376_v38  ;;  %v1821_v48 = vsel %vm1820_vm6, %v1818_v43, %v4375_v39  ;;  %v2118_v39 = vld [vmem:[%s5579_s23] sm:$0x3]  ;;  %s5589_s23 = sld [smem:[#allocation27_spill]] }
 0x6ee   : > { %v2127_v42 = vrot.slane %v2118_v39, %v5174_v31 }
 0x6f2   : > { %v4379_v41 = vpop.permute.xlu1 %4378 }
 0x6f3   : > { %v4381_v45 = vunpack.i.h.bf16 %v4379_v41  ;;  %v4380_v46 = vunpack.i.l.bf16 %v4379_v41  ;;  %v2123_v41 = vrot.slane %v2118_v39, %v5177_v35 }
 0x6f5   : > { %v1825_v49 = vsel %vm1823_vm7, %v1822_v47, %v4381_v45  ;;  %v1824_v50 = vsel %vm1823_vm7, %v1821_v48, %v4380_v46 }
 0x6f6   : > { %v1842_v57 = vpack.c.bf16 %v1825_v49, %v1824_v50 }
 0x6f8   : > { %4160 = vmatmul.mubr.bf16.vlgmr.msra.gmra.mxu0 %v1842_v57 }
 0x6f9   : > { %2242 = vmatprep.mubr.bf16.mxu0 %v4850_v0  ;;  %2211 = vmatpush1.bf16.msra.mxu0 %v4422_v59 }
 0x6fa   : > { %2212 = vmatprep.subr.bf16.mxu0 %v4427_v61 }
 0x7b8   : > { %v1925_v44 = vpop.f32.mrf.mxu0 }
 0x7b9   : > { %v1932_v51 = vadd.f32 %v1925_v44, %v5153_v23  ;;  %v4425_v23 = vld [vmem:[%s4921_s24 + $0x60] ss:$8 sps:$4 sm:$0xff]  }
 0x7ba   : > { %v4161_v52 = vpop.f32.mrf.mxu0  ;;  %2213 = vmatpush1.bf16.msra.mxu0 %v4425_v23  ;;  %v3845_v44 = vld [vmem:[%s5580_s10] ss:$0 sm:$0xff]  ;;  %s1021_s10 = scalar_lea.vmem %s5011_s30, %s3961_s0 }
 0x7bb   : > { %v1941_v53 = vadd.f32 %v3842_v40, %v1932_v51  ;;  %2214 = vmatprep.subr.bf16.mxu0 %v4430_v2  ;;  %v4857_v51 = vmov 65535  }
 0x7bc   : > { %v1928_v54 = vpop.f32.mrf.mxu0  ;;  %v2318_v52 = vsel %vm2316_vm8, 4294967295, %v4857_v51 }
 0x7bd   : > { %v1933_v55 = vadd.f32 %v1928_v54, %v5155_v24  ;;  %1945 = vadd.xlane.f32.xlu0 %v1941_v53  ;;  %v4438_v24 = vld [vmem:[%s4911_s14 + $0x30] sm:$0xff]   ;;  %v5360_v59 = vsel %vm2317_vm9, %v2318_v52, 0 }
 0x7be   : > { %v4162_v56 = vpop.f32.mrf.mxu0  ;;  %4166 = vmatpush3.bf16.msra.mxu1 %v4438_v24  ;;  %2215 = vmatpush1.bf16.msra.mxu0 %v4428_v3 }
 0x7bf   : > { %v5299_v58 = vadd.f32 %v3842_v40, %v1933_v55  ;;  %4167 = vmatprep.subr.bf16.mxu1 %v4851_v1  ;;  %2216 = vmatprep.subr.bf16.mxu0 %v4433_v4 }
 0x7c2   : > { %2217 = vmatpush1.bf16.msra.mxu0 %v4431_v5  ;;  %4168 = vmatpush3.bf16.msra.mxu1 %v4442_v14 }
 0x7c3   : > { %2218 = vmatprep.subr.bf16.mxu0 %v4437_v6  ;;  %4169 = vmatprep.subr.bf16.mxu1 %v4851_v1 }
 0x7c6   : > { %2219 = vmatpush1.bf16.msra.mxu0 %v4435_v7  ;;  %4170 = vmatpush3.bf16.msra.mxu1 %v4446_v16 }
 0x7c7   : > { %2220 = vmatprep.subr.bf16.mxu0 %v4441_v12  ;;  %4171 = vmatprep.subr.bf16.mxu1 %v4851_v1 }
 0x7ca   : > { %2221 = vmatpush1.bf16.msra.mxu0 %v4439_v13  ;;  %4172 = vmatpush3.bf16.msra.mxu1 %v4450_v19 }
 0x7cb   : > { %2222 = vmatprep.subr.bf16.mxu0 %v4445_v62  ;;  %4173 = vmatprep.subr.bf16.mxu1 %v4851_v1 }
 0x7ce   : > { %2223 = vmatpush1.bf16.msra.mxu0 %v4443_v15  ;;  %4174 = vmatpush3.bf16.msra.mxu1 %v4451_v22 }
 0x7cf   : > { %2224 = vmatprep.subr.bf16.mxu0 %v4449_v17  ;;  %4175 = vmatprep.subr.bf16.mxu1 %v4851_v1 }
 0x7d2   : > { %2225 = vmatpush1.bf16.msra.mxu0 %v4447_v18  ;;  %4176 = vmatpush3.bf16.msra.mxu1 %v4452_v25 }
 0x7d3   : > { %4207 = vmatprep.subr.bf16.mxu0 %v4851_v1  ;;  %4177 = vmatprep.subr.bf16.mxu1 %v4851_v1 }
 0x7d5   : > { %2243 = vmatmul.mubr.bf16.vlgmr.msra.gmra.mxu0 %v2117_v21 }
 0x7d6   : > { %4209 = vmatprep.mubr.msk.bf16.mxu0 %vm4852_vm0, %v4851_v1  ;;  %4178 = vmatpush3.bf16.msra.mxu1 %v4453_v26 }
 0x7d7   : > { %4183 = vmatprep.subr.bf16.mxu1 %v4851_v1 }
 0x846   : > { %v1946_v8 = vpop.xlane.xlu0 %1945 }
 0x847   : > { %v1952_v9 = vmul.f32 0.0078125, %v1946_v8 }
 0x849   : > { %v1954_v10 = vsub.f32 %v1941_v53, %v1952_v9 }
 0x84b   : > { %v1956_v11 = vmul.f32 %v1954_v10, %v1954_v10 }
 0x84d   : > { %1958 = vadd.xlane.f32.xlu1 %v1956_v11 }
 0x895   : > { %v2244_v43 = vpop.f32.mrf.mxu0 }
 0x896   : > { %v2245_v45 = vadd.f32 %v2244_v43, %v2123_v41 }
 0x897   : > { %v2246_v46 = vpop.f32.mrf.mxu0 }
 0x898   : > { %v2252_v47 = vpack.c.bf16 %v2245_v45, %v2245_v45  ;;  %v2247_v48 = vadd.f32 %v2246_v46, %v2127_v42 }
 0x899   : > { %v2248_v49 = vpop.f32.mrf.mxu0 }
 0x89a   : > { %v2258_v50 = vsel %vm1301_vm1, %v2252_v47, 0  ;;  %v5358_v54 = vpack.c.bf16 %v2247_v48, %v2247_v48 }
 0x89b   : > { %v2249_v57 = vpop.f32.mrf.mxu0 }
 0x89c   : > { %v2321_v23 = vand.u32 %v5360_v59, %v5358_v54 }
 0x8d6   : > { %v1959_v27 = vpop.xlane.xlu1 %1958 }
 0x8d7   : > { %v1963_v28 = vmul.f32 0.0078125, %v1959_v27 }
 0x8d9   : > { %v1965_v29 = vadd.f32 1e-05, %v1963_v28 }
 0x8db   : > { %4574 = vrsqrt.f32 %v1965_v29 }
 0x8e8   : > { %v4575_v30 = vpop.eup %4574 }
 0x8e9   : > { %v1969_v33 = vmul.f32 %v4575_v30, %v1954_v10 }
 0x8eb   : > { %v1977_v36 = vmul.f32 %v5339_v32, %v1969_v33 }
 0x8ed   : > { %v5346_v37 = vadd.f32 %v5342_v34, %v1977_v36 }
 0x8ef   : > { %v2004_v38 = vpack.c.bf16 %v5346_v37, %v5346_v37 }
 0x8f1   : > { %4180 = vmatmul.mubr.bf16.vlgmr.msra.gmra.mxu1 %v2004_v38 }
 0x8f2   : > { %4185 = vmatprep.mubr.msk.bf16.mxu1 %vm4852_vm0, %v4851_v1  ;;  %4184 = vmatpush3.bf16.xpose.msra.mxu1 %v2258_v50 }
 0x8f3   : > { %4189 = vmatprep.subr.bf16.mxu1 %v4851_v1 }
 0x9b1   : > { %v2094_v40 = vpop.f32.mrf.mxu1 }
 0x9b2   : > { %v2095_v53 = vadd.f32 %v3845_v44, %v2094_v40 }
 0x9b3   : > { %v4181_v55 = vpop.f32.mrf.mxu1 }
 0x9b4   : > { %v2100_v56 = vmul.f32 0.17677669, %v2095_v53 }
 0x9b5   : > { %v2097_v60 = vpop.f32.mrf.mxu1 }
 0x9b6   : > { %v2251_v61 = vpack.c.bf16 %v2100_v56, %v2100_v56 }
 0x9b7   : > { %v4182_v63 = vpop.f32.mrf.mxu1 }
 0x9b8   : > { %2364 = vrot.lane.b32.xlu1 %v2251_v61, %s4854_s11  ;;  %4186 = vmatmul.mubr.msk.bf16.vlgmr.msra.gmra.mxu1 %vm1301_vm1, %v2251_v61 }
 0x9b9   : > { %4190 = vmatpush3.bf16.msra.mxu1 %v2321_v23  ;;  %4191 = vmatprep.mubr.msk.bf16.mxu1 %vm4852_vm0, %v4851_v1 }
 0x9ba   : > { %4195 = vmatprep.subr.bf16.mxu1 %v4851_v1 }
 0x9bc   : > { %2478 = vrot.lane.b32.xlu1 %v2252_v47, %s4856_s1 }
 0x9c0   : > { %2476 = vrot.lane.b32.xlu1 %v2251_v61, %s4856_s1 }
 0x9c4   : > { %2586 = vrot.lane.b32.xlu1 %v2251_v61, %s4855_s18 }
 0xa2a   : > { %v2365_v2 = vpop.permute.xlu1 %2364 }
 0xa2e   : > { %v2479_v24 = vpop.permute.xlu1 %2478 }
 0xa2f   : > { %v2484_v3 = vsel %vm1301_vm1, %v2479_v24, 0 }
 0xa30   : > { %4208 = vmatpush3.bf16.xpose.msra.mxu0 %v2484_v3 }
 0xa31   : > { %4219 = vmatprep.subr.bf16.mxu0 %v4851_v1 }
 0xa32   : > { %v2477_v4 = vpop.permute.xlu1 %2476 }
 0xa36   : > { %v2587_v27 = vpop.permute.xlu1 %2586 }
 0xa37   : > { %4210 = vmatmul.mubr.msk.bf16.vlgmr.msra.gmra.mxu0 %vm1301_vm1, %v2477_v4 }
 0xa38   : > { %4221 = vmatprep.mubr.msk.bf16.mxu0 %vm4852_vm0, %v4851_v1 }
 0xa78   : > { %v2294_v5 = vpop.f32.mrf.mxu1 }
 0xa79   : > { %v2301_v6 = vsel %vm2300_vm10, %v2294_v5, -inf }
 0xa7a   : > { %2302 = vmax.xlane.f32.xlu0 %v2301_v6  ;;  %v4187_v7 = vpop.f32.mrf.mxu1 }
 0xa7c   : > { %v2297_v8 = vpop.f32.mrf.mxu1 }
 0xa7e   : > { %v4188_v9 = vpop.f32.mrf.mxu1 }
 0xaf7   : > { %v2520_v10 = vpop.f32.mrf.mxu0 }
 0xaf8   : > { %v2526_v11 = vsel %vm2300_vm10, %v2520_v10, -inf }
 0xaf9   : > { %2527 = vmax.xlane.f32.xlu1 %v2526_v11  ;;  %v4211_v12 = vpop.f32.mrf.mxu0 }
 0xafb   : > { %v2523_v13 = vpop.f32.mrf.mxu0 }
 0xafd   : > { %v4212_v14 = vpop.f32.mrf.mxu0 }
 0xb03   : > { %v2303_v15 = vpop.xlane.xlu0 %2302 }
 0xb04   : > { %v2304_v62 = vsub.f32 %v2294_v5, %v2303_v15 }
 0xb06   : > { %v2305_v16 = vmul.f32 1.442695, %v2304_v62 }
 0xb08   : > { %4576 = vpow2.f32 %v2305_v16 }
 0xb15   : > { %v4577_v17 = vpop.eup %4576 }
 0xb16   : > { %v2307_v18 = vsel %vm2300_vm10, %v4577_v17, 0.0 }
 0xb17   : > { %2308 = vadd.xlane.f32.xlu0 %v2307_v18 }
 0xb2d   : > { %2367 = vrot.lane.b32.xlu0 %v2252_v47, %s4854_s11 }
 0xb31   : > { %2588 = vrot.lane.b32.xlu0 %v2252_v47, %s4855_s18 }
 0xb82   : > { %v2528_v30 = vpop.xlane.xlu1 %2527 }
 0xb83   : > { %v2529_v33 = vsub.f32 %v2520_v10, %v2528_v30  ;;  %v4461_v30 = vld [vmem:[%s5581_s26] sm:$0xff]  }
 0xb85   : > { %v2530_v36 = vmul.f32 1.442695, %v2529_v33 }
 0xba0   : > { %v2309_v19 = vpop.xlane.xlu0 %2308 }
 0xba1   : > { %4578 = vrcp.f32 %v2309_v19 }
 0xba2   : > { %4580 = vpow2.f32 %v2530_v36 }
 0xba4   : > { %v2368_v20 = vpop.permute.xlu0 %2367 }
 0xba5   : > { %v2373_v29 = vsel %vm1301_vm1, %v2368_v20, 0  ;;  %v4454_v20 = vld [vmem:[%s5581_s26 + $0x38] sm:$0xff]  }
 0xba8   : > { %v2589_v21 = vpop.permute.xlu0 %2588 }
 0xba9   : > { %v2594_v22 = vsel %vm1301_vm1, %v2589_v21, 0  ;;  %v4455_v21 = vld [vmem:[%s5581_s26 + $0x30] sm:$0xff]  }
 0xbaa   : > { %4220 = vmatpush3.bf16.xpose.msra.mxu0 %v2594_v22  ;;  %v4457_v22 = vld [vmem:[%s5581_s26 + $0x20] sm:$0xff]  }
 0xbab   : > { %4231 = vmatprep.subr.bf16.mxu0 %v4851_v1 }
 0xbae   : > { %v4579_v25 = vpop.eup %4578 }
 0xbaf   : > { %v2311_v26 = vmul.f32 %v4579_v25, %v4577_v17  ;;  %v4581_v40 = vpop.eup %4580  ;;  %v4458_v25 = vld [vmem:[%s5581_s26 + $0x18] sm:$0xff]  }
 0xbb0   : > { %v2532_v52 = vsel %vm2300_vm10, %v4581_v40, 0.0 }
 0xbb1   : > { %4222 = vmatmul.mubr.msk.bf16.vlgmr.msra.gmra.mxu0 %vm1301_vm1, %v2587_v27  ;;  %v2312_v28 = vpack.c.bf16 %v2311_v26, %v2311_v26  ;;  %v4459_v26 = vld [vmem:[%s5581_s26 + $0x10] sm:$0xff]   ;;  %v4460_v27 = vld [vmem:[%s5581_s26 + $0x8] sm:$0xff]  }
 0xbb2   : > { %4247 = vmatprep.mubr.msk.bf16.mxu0 %vm4852_vm0, %v4851_v1  ;;  %4232 = vmatpush3.bf16.msra.mxu0 %v4454_v20 }
 0xbb3   : > { %4192 = vmatmul.mubr.msk.bf16.vlgmr.msra.gmra.mxu1 %vm2300_vm10, %v2312_v28  ;;  %4233 = vmatprep.subr.bf16.mxu0 %v4851_v1 }
 0xbb4   : > { %4196 = vmatpush3.bf16.xpose.msra.mxu1 %v2373_v29  ;;  %4197 = vmatprep.mubr.msk.bf16.mxu1 %vm4852_vm0, %v4851_v1 }
 0xbb5   : > { %4201 = vmatprep.subr.bf16.mxu1 %v4851_v1 }
 0xbb6   : > { %4234 = vmatpush3.bf16.msra.mxu0 %v4455_v21 }
 0xbb7   : > { %4235 = vmatprep.subr.bf16.mxu0 %v4851_v1 }
 0xbbb   : > { %4198 = vmatmul.mubr.msk.bf16.vlgmr.msra.gmra.mxu1 %vm1301_vm1, %v2365_v2 }
 0xbbc   : > { %4203 = vmatprep.mubr.msk.bf16.mxu1 %vm4852_vm0, %v4851_v1 }
 0xc71   : > { %v2630_v38 = vpop.f32.mrf.mxu0 }
 0xc72   : > { %v2636_v44 = vsel %vm2300_vm10, %v2630_v38, -inf }
 0xc73   : > { %v5395_v39 = vpop.f32.mrf.mxu1  ;;  %v4223_v41 = vpop.f32.mrf.mxu0 }
 0xc75   : > { %v4193_v42 = vpop.f32.mrf.mxu1  ;;  %v2633_v43 = vpop.f32.mrf.mxu0 }
 0xc77   : > { %v2360_v45 = vpop.f32.mrf.mxu1  ;;  %v4224_v46 = vpop.f32.mrf.mxu0 }
 0xc79   : > { %v4194_v47 = vpop.f32.mrf.mxu1 }
 0xc7b   : > { %v2409_v48 = vpop.f32.mrf.mxu1 }
 0xc7c   : > { %v2415_v49 = vsel %vm2300_vm10, %v2409_v48, -inf }
 0xc7d   : > { %2416 = vmax.xlane.f32.xlu0 %v2415_v49  ;;  %v4199_v50 = vpop.f32.mrf.mxu1 }
 0xc7f   : > { %v2412_v57 = vpop.f32.mrf.mxu1 }
 0xc81   : > { %2637 = vmax.xlane.f32.xlu0 %v2636_v44  ;;  %v4200_v51 = vpop.f32.mrf.mxu1 }
 0xc85   : > { %2533 = vadd.xlane.f32.xlu0 %v2532_v52 }
 0xd06   : > { %v2417_v53 = vpop.xlane.xlu0 %2416 }
 0xd07   : > { %v2418_v55 = vsub.f32 %v2409_v48, %v2417_v53 }
 0xd09   : > { %v2419_v56 = vmul.f32 1.442695, %v2418_v55  ;;  %v3886_v55 = vld [vmem:[%s5582_s2] ss:$0 sm:$0xff] }
 0xd0a   : > { %v2638_v60 = vpop.xlane.xlu0 %2637 }
 0xd0b   : > { %4582 = vpow2.f32 %v2419_v56  ;;  %v2639_v61 = vsub.f32 %v2630_v38, %v2638_v60 }
 0xd0d   : > { %v2640_v63 = vmul.f32 1.442695, %v2639_v61 }
 0xd0e   : > { %v2534_v4 = vpop.xlane.xlu0 %2533 }
 0xd0f   : > { %4584 = vpow2.f32 %v2640_v63 }
 0xd18   : > { %v4583_v23 = vpop.eup %4582 }
 0xd19   : > { %v2421_v2 = vsel %vm2300_vm10, %v4583_v23, 0.0 }
 0xd1a   : > { %2422 = vadd.xlane.f32.xlu0 %v2421_v2 }
 0xd1c   : > { %v4585_v24 = vpop.eup %4584 }
 0xd1d   : > { %v2642_v3 = vsel %vm2300_vm10, %v4585_v24, 0.0 }
 0xd1e   : > { %2643 = vadd.xlane.f32.xlu1 %v2642_v3 }
 0xd2f   : > { %2538 = vrot.lane.b32.xlu1 %v5358_v54, %s4856_s1 }
 0xd30   : > { %2428 = vrot.lane.b32.xlu0 %v5358_v54, %s4854_s11 }
 0xd33   : > { %2648 = vrot.lane.b32.xlu1 %v5358_v54, %s4855_s18 }
 0xda3   : > { %v2423_v5 = vpop.xlane.xlu0 %2422 }
 0xda4   : > { %4586 = vrcp.f32 %v2423_v5 }
 0xda5   : > { %4588 = vrcp.f32 %v2534_v4 }
 0xda7   : > { %v2429_v6 = vpop.permute.xlu0 %2428  ;;  %v2644_v8 = vpop.xlane.xlu1 %2643 }
 0xda8   : > { %v2434_v7 = vand.u32 %v2429_v6, %v5360_v59  ;;  %4590 = vrcp.f32 %v2644_v8 }
 0xdaa   : > { %4202 = vmatpush3.bf16.msra.mxu1 %v2434_v7 }
 0xdab   : > { %4213 = vmatprep.subr.bf16.mxu1 %v4851_v1  ;;  %v2539_v10 = vpop.permute.xlu1 %2538 }
 0xdac   : > { %v2544_v14 = vand.u32 %v2539_v10, %v5360_v59 }
 0xdaf   : > { %v2649_v15 = vpop.permute.xlu1 %2648 }
 0xdb0   : > { %v2654_v17 = vand.u32 %v2649_v15, %v5360_v59  ;;  %v4456_v59 = vld [vmem:[%s5581_s26 + $0x28] sm:$0xff]  }
 0xdb1   : > { %v4587_v9 = vpop.eup %4586  ;;  %4236 = vmatpush3.bf16.msra.mxu0 %v4456_v59 }
 0xdb2   : > { %v2425_v11 = vmul.f32 %v4587_v9, %v4583_v23  ;;  %v4589_v13 = vpop.eup %4588  ;;  %4237 = vmatprep.subr.bf16.mxu0 %v4851_v1 }
 0xdb3   : > { %v2536_v54 = vmul.f32 %v4589_v13, %v4581_v40 }
 0xdb4   : > { %v2426_v12 = vpack.c.bf16 %v2425_v11, %v2425_v11 }
 0xdb5   : > { %v2537_v62 = vpack.c.bf16 %v2536_v54, %v2536_v54  ;;  %v4591_v16 = vpop.eup %4590  ;;  %4238 = vmatpush3.bf16.msra.mxu0 %v4457_v22 }
 0xdb6   : > { %4204 = vmatmul.mubr.msk.bf16.vlgmr.msra.gmra.mxu1 %vm2300_vm10, %v2426_v12  ;;  %v2646_v18 = vmul.f32 %v4591_v16, %v4585_v24  ;;  %4239 = vmatprep.subr.bf16.mxu0 %v4851_v1 }
 0xdb7   : > { %4214 = vmatpush3.bf16.msra.mxu1 %v2544_v14  ;;  %4215 = vmatprep.mubr.msk.bf16.mxu1 %vm4852_vm0, %v4851_v1 }
 0xdb8   : > { %4225 = vmatprep.subr.bf16.mxu1 %v4851_v1  ;;  %v2647_v19 = vpack.c.bf16 %v2646_v18, %v2646_v18 }
 0xdb9   : > { %4240 = vmatpush3.bf16.msra.mxu0 %v4458_v25 }
 0xdba   : > { %4241 = vmatprep.subr.bf16.mxu0 %v4851_v1 }
 0xdbd   : > { %4242 = vmatpush3.bf16.msra.mxu0 %v4459_v26 }
 0xdbe   : > { %4216 = vmatmul.mubr.msk.bf16.vlgmr.msra.gmra.mxu1 %vm2300_vm10, %v2537_v62  ;;  %4243 = vmatprep.subr.bf16.mxu0 %v4851_v1 }
 0xdbf   : > { %4226 = vmatpush3.bf16.msra.mxu1 %v2654_v17  ;;  %4227 = vmatprep.mubr.msk.bf16.mxu1 %vm4852_vm0, %v4851_v1 }
 0xdc1   : > { %4244 = vmatpush3.bf16.msra.mxu0 %v4460_v27 }
 0xdc2   : > { %4245 = vmatprep.subr.bf16.mxu0 %v4851_v1  ;;  %v1948_v1 = vsel %vm1947_vm11, %v5299_v58, 0.0 }
 0xdc5   : > { %4246 = vmatpush3.bf16.msra.mxu0 %v4461_v30  ;;  %v3888_v30 = vld [vmem:[#allocation2] ss:$0 sm:$0xff] }
 0xdc6   : > { %4228 = vmatmul.mubr.msk.bf16.vlgmr.msra.gmra.mxu1 %vm2300_vm10, %v2647_v19 }
 0xdc7   : > { %2993 = vmatprep.mubr.bf16.mxu1 %v4850_v0 }
 0xe76   : > { %v2470_v28 = vpop.f32.mrf.mxu1 }
 0xe77   : > { %2697 = vrot.lane.b32.xlu1 %v2470_v28, %s4855_s18  ;;  %s5583_s18 = sld [smem:[#allocation23_spill]] }
 0xe78   : > { %v4205_v29 = vpop.f32.mrf.mxu1 }
 0xe7a   : > { %v2473_v33 = vpop.f32.mrf.mxu1 }
 0xe7c   : > { %v4206_v36 = vpop.f32.mrf.mxu1 }
 0xe7d   : > { %v4462_v2 = vld [vmem:[%s5583_s18 + $0x70] ss:$8 sps:$4 sm:$0xff]   ;;  %v4467_v24 = vld [vmem:[%s5583_s18 + $0x64] ss:$8 sps:$4 sm:$0xff]   ;;  %v4465_v3 = vld [vmem:[%s5583_s18 + $0x60] ss:$8 sps:$4 sm:$0xff]  }
 0xe7e   : > { %v2580_v38 = vpop.f32.mrf.mxu1  ;;  %v4470_v12 = vld [vmem:[%s5583_s18 + $0x54] ss:$8 sps:$4 sm:$0xff]   ;;  %v4468_v13 = vld [vmem:[%s5583_s18 + $0x50] ss:$8 sps:$4 sm:$0xff]   ;;  %v4471_v14 = vld [vmem:[%s5583_s18 + $0x40] ss:$8 sps:$4 sm:$0xff]  }
 0xe7f   : > { %2701 = vrot.lane.b32.xlu0 %v2580_v38, %s4856_s1  ;;  %v4474_v54 = vld [vmem:[%s5583_s18 + $0x30] ss:$8 sps:$4 sm:$0xff]   ;;  %v4476_v15 = vld [vmem:[%s5583_s18 + $0x34] ss:$8 sps:$4 sm:$0xff]   ;;  %v4479_v62 = vld [vmem:[%s5583_s18 + $0x24] ss:$8 sps:$4 sm:$0xff]  }
 0xe80   : > { %v4217_v41 = vpop.f32.mrf.mxu1  ;;  %v4477_v16 = vld [vmem:[%s5583_s18 + $0x20] ss:$8 sps:$4 sm:$0xff]   ;;  %v4482_v17 = vld [vmem:[%s5583_s18 + $0x14] ss:$8 sps:$4 sm:$0xff]   ;;  %s5585_s1 = sld [smem:[#allocation22_spill]] }
 0xe81   : > { %v4480_v18 = vld [vmem:[%s5583_s18 + $0x10] ss:$8 sps:$4 sm:$0xff]   ;;  %v4485_v19 = vld [vmem:[%s5583_s18 + $0x4] ss:$8 sps:$4 sm:$0xff]   ;;  %v4483_v20 = vld [vmem:[%s5583_s18] ss:$8 sps:$4 sm:$0xff]  }
 0xe82   : > { %v2583_v42 = vpop.f32.mrf.mxu1 }
 0xe84   : > { %v4218_v43 = vpop.f32.mrf.mxu1 }
 0xe86   : > { %v2690_v45 = vpop.f32.mrf.mxu1  ;;  %v3887_v28 = vld [vmem:[%s5585_s1] ss:$0 sm:$0xff] }
 0xe87   : > { %2705 = vrot.lane.b32.xlu1 %v2690_v45, %s4854_s11  ;;  %s5584_s11 = sld [smem:[#allocation26_spill]] }
 0xe88   : > { %v4229_v46 = vpop.f32.mrf.mxu1 }
 0xe8a   : > { %v2693_v47 = vpop.f32.mrf.mxu1 }
 0xe8c   : > { %v4230_v48 = vpop.f32.mrf.mxu1 }
 0xe8d   : > { %v4488_v21 = vld [vmem:[%s5584_s11 + $0x74] ss:$8 sps:$4 sm:$0xff]   ;;  %v4486_v41 = vld [vmem:[%s5584_s11 + $0x70] ss:$8 sps:$4 sm:$0xff]   ;;  %v4491_v45 = vld [vmem:[%s5584_s11 + $0x64] ss:$8 sps:$4 sm:$0xff]  }
 0xe8e   : > { %v4489_v46 = vld [vmem:[%s5584_s11 + $0x60] ss:$8 sps:$4 sm:$0xff]   ;;  %v4494_v47 = vld [vmem:[%s5584_s11 + $0x54] ss:$8 sps:$4 sm:$0xff]   ;;  %v4492_v48 = vld [vmem:[%s5584_s11 + $0x50] ss:$8 sps:$4 sm:$0xff]  }
 0xeab   : > { %1949 = vadd.xlane.f32.xlu1 %v1948_v1  ;;  %v4497_v1 = vld [vmem:[%s5584_s11 + $0x44] ss:$8 sps:$4 sm:$0xff]  }
 0xee9   : > { %v2698_v49 = vpop.permute.xlu1 %2697 }
 0xeea   : > { %v2708_v57 = vsel %vm1301_vm1, %v5395_v39, %v2698_v49  ;;  %v4464_v39 = vld [vmem:[%s5583_s18 + $0x74] ss:$8 sps:$4 sm:$0xff]   ;;  %v4495_v49 = vld [vmem:[%s5584_s11 + $0x40] ss:$8 sps:$4 sm:$0xff]  }
 0xeeb   : > { %2961 = vmatprep.subr.bf16.mxu1 %v4464_v39  ;;  %v4513_v39 = vld [vmem:[%s5586_s16 + $0x30] sm:$0xff]  }
 0xeec   : > { %2962 = vmatpush1.bf16.msra.mxu1 %v4462_v2  ;;  %v4511_v2 = vld [vmem:[%s5586_s16 + $0x38] sm:$0xff]  }
 0xeed   : > { %2963 = vmatprep.subr.bf16.mxu1 %v4467_v24  ;;  %v4515_v24 = vld [vmem:[%s5586_s16 + $0x28] sm:$0xff]  }
 0xef0   : > { %2964 = vmatpush1.bf16.msra.mxu1 %v4465_v3  ;;  %v4516_v3 = vld [vmem:[%s5586_s16 + $0x60] sm:$0xff]  }
 0xef1   : > { %v2702_v50 = vpop.permute.xlu0 %2701  ;;  %2965 = vmatprep.subr.bf16.mxu1 %v4470_v12  ;;  %v4526_v12 = vld [vmem:[%s5587_s22 + $0x78] sm:$0xff]  }
 0xef2   : > { %v2709_v44 = vsel %vm1820_vm6, %v2708_v57, %v2702_v50  ;;  %v4500_v50 = vld [vmem:[%s5584_s11 + $0x34] ss:$8 sps:$4 sm:$0xff]   ;;  %v4498_v57 = vld [vmem:[%s5584_s11 + $0x30] ss:$8 sps:$4 sm:$0xff]  }
 0xef4   : > { %2966 = vmatpush1.bf16.msra.mxu1 %v4468_v13  ;;  %v2869_v13 = vld [vmem:[%s5588_s28] sm:$0x3] }
 0xef9   : > { %v2706_v40 = vpop.permute.xlu1 %2705 }
 0xefa   : > { %v2710_v51 = vsel %vm1823_vm7, %v2709_v44, %v2706_v40  ;;  %v4501_v40 = vld [vmem:[%s5584_s11 + $0x20] ss:$8 sps:$4 sm:$0xff]  }
 0xefb   : > { %v2727_v52 = vpack.c.bf16 %v2710_v51, %v2710_v51  ;;  %v4506_v51 = vld [vmem:[%s5584_s11 + $0x14] ss:$8 sps:$4 sm:$0xff]  }
 0xefd   : > { %4248 = vmatmul.mubr.bf16.vlgmr.msra.gmra.mxu0 %v2727_v52 }
 0xf34   : > { %v1950_v4 = vpop.xlane.xlu1 %1949 }
 0xf35   : > { %v1953_v5 = vmul.f32 0.0078125, %v1950_v4  ;;  %v4517_v4 = vld [vmem:[%s5586_s16 + $0x20] sm:$0xff]  }
 0xf37   : > { %v5452_v7 = vsub.f32 %v5299_v58, %v1953_v5  ;;  %v4473_v58 = vld [vmem:[%s5583_s18 + $0x44] ss:$8 sps:$4 sm:$0xff]   ;;  %v4518_v5 = vld [vmem:[%s5586_s16 + $0x58] sm:$0xff]  }
 0xf38   : > { %2967 = vmatprep.subr.bf16.mxu1 %v4473_v58  ;;  %v2874_v58 = vrot.slane %v2869_v13, %v5177_v35 }
 0xf39   : > { %v1957_v10 = vmul.f32 %v5452_v7, %v5452_v7  ;;  %2968 = vmatpush1.bf16.msra.mxu1 %v4471_v14  ;;  %v2878_v14 = vrot.slane %v2869_v13, %v5174_v31  ;;  %v4540_v13 = vld [vmem:[%s5587_s22 + $0x40] sm:$0xff]  }
 0xf3a   : > { %2969 = vmatprep.subr.bf16.mxu1 %v4476_v15 }
 0xf3b   : > { %v1960_v11 = vsel %vm1947_vm11, %v1957_v10, 0.0  ;;  %v4524_v10 = vld [vmem:[%s5586_s16 + $0x40] sm:$0xff]  }
 0xf3d   : > { %2970 = vmatpush1.bf16.msra.mxu1 %v4474_v54 }
 0xf3e   : > { %2971 = vmatprep.subr.bf16.mxu1 %v4479_v62 }
 0xf41   : > { %2972 = vmatpush1.bf16.msra.mxu1 %v4477_v16 }
 0xf42   : > { %2973 = vmatprep.subr.bf16.mxu1 %v4482_v17 }
 0xf45   : > { %2974 = vmatpush1.bf16.msra.mxu1 %v4480_v18 }
 0xf46   : > { %2975 = vmatprep.subr.bf16.mxu1 %v4485_v19 }
 0xf49   : > { %2976 = vmatpush1.bf16.msra.mxu1 %v4483_v20 }
 0xf4a   : > { %3335 = vmatprep.subr.bf16.mxu1 %v4488_v21 }
 0xfbd   : > { %v2810_v53 = vpop.f32.mrf.mxu0 }
 0xfbe   : > { %v2816_v56 = vadd.f32 %v2810_v53, %v5346_v37  ;;  %v4504_v53 = vld [vmem:[%s5584_s11 + $0x10] ss:$8 sps:$4 sm:$0xff]  }
 0xfbf   : > { %v4249_v60 = vpop.f32.mrf.mxu0 }
 0xfc0   : > { %v2824_v61 = vadd.f32 %v3886_v55, %v2816_v56  ;;  %v4509_v55 = vld [vmem:[%s5584_s11 + $0x4] ss:$8 sps:$4 sm:$0xff]   ;;  %v4507_v60 = vld [vmem:[%s5584_s11] ss:$8 sps:$4 sm:$0xff]  }
 0xfc1   : > { %v2813_v63 = vpop.f32.mrf.mxu0 }
 0xfc2   : > { %2827 = vadd.xlane.f32.xlu0 %v2824_v61 }
 0xfc3   : > { %v4250_v23 = vpop.f32.mrf.mxu0 }
 0xfc4   : > { %v4510_v23 = vld [vmem:[%s5586_s16 + $0x78] sm:$0xff]  }
 0xfc5   : > { %4031 = vmatprep.subr.bf16.mxu0 %v4510_v23 }
 0xfc6   : > { %4032 = vmatpush3.bf16.msra.mxu0 %v4511_v2 }
0x104b   : > { %v2828_v37 = vpop.xlane.xlu0 %2827 }
0x104c   : > { %v2829_v6 = vmul.f32 0.0078125, %v2828_v37  ;;  %v4519_v37 = vld [vmem:[%s5586_s16 + $0x18] sm:$0xff]  }
0x104e   : > { %v2830_v8 = vsub.f32 %v2824_v61, %v2829_v6  ;;  %v4520_v6 = vld [vmem:[%s5586_s16 + $0x50] sm:$0xff]  }
0x1050   : > { %v2831_v9 = vmul.f32 %v2830_v8, %v2830_v8 }
0x1052   : > { %2832 = vadd.xlane.f32.xlu0 %v2831_v9  ;;  %v4523_v9 = vld [vmem:[%s5586_s16 + $0x8] sm:$0xff]  }
0x1056   : > { %1961 = vadd.xlane.f32.xlu0 %v1960_v11  ;;  %v4525_v11 = vld [vmem:[%s5586_s16] sm:$0xff]  }
0x10db   : > { %v2833_v59 = vpop.xlane.xlu0 %2832 }
0x10dc   : > { %v2834_v22 = vmul.f32 0.0078125, %v2833_v59 }
0x10de   : > { %v2835_v25 = vadd.f32 1e-05, %v2834_v22 }
0x10df   : > { %v1962_v27 = vpop.xlane.xlu0 %1961 }
0x10e0   : > { %4592 = vrsqrt.f32 %v2835_v25  ;;  %v1964_v33 = vmul.f32 0.0078125, %v1962_v27 }
0x10e2   : > { %v1966_v42 = vadd.f32 1e-05, %v1964_v33  ;;  %v3243_v33 = vld [vmem:[%s5589_s23] sm:$0x3] }
0x10e4   : > { %4594 = vrsqrt.f32 %v1966_v42 }
0x10ed   : > { %v4593_v26 = vpop.eup %4592 }
0x10ee   : > { %v2837_v29 = vmul.f32 %v4593_v26, %v2830_v8  ;;  %v4522_v8 = vld [vmem:[%s5586_s16 + $0x48] sm:$0xff]  }
0x10f0   : > { %v2844_v36 = vmul.f32 %v3887_v28, %v2837_v29 }
0x10f1   : > { %v4595_v44 = vpop.eup %4594 }
0x10f2   : > { %v5471_v38 = vadd.f32 %v3888_v30, %v2844_v36  ;;  %v1970_v52 = vmul.f32 %v4595_v44, %v5452_v7  ;;  %v4521_v7 = vld [vmem:[%s5586_s16 + $0x10] sm:$0xff]  }
0x10f4   : > { %v2868_v43 = vpack.c.bf16 %v5471_v38, %v5471_v38  ;;  %v1978_v56 = vmul.f32 %v5339_v32, %v1970_v52  ;;  %v4512_v32 = vld [vmem:[%s5586_s16 + $0x70] sm:$0xff]  }
0x10f5   : > { %4033 = vmatprep.subr.bf16.mxu0 %v4512_v32 }
0x10f6   : > { %2994 = vmatmul.mubr.bf16.vlgmr.msra.gmra.mxu1 %v2868_v43  ;;  %v5494_v61 = vadd.f32 %v5342_v34, %v1978_v56  ;;  %4034 = vmatpush3.bf16.msra.mxu0 %v4513_v39  ;;  %v4514_v34 = vld [vmem:[%s5586_s16 + $0x68] sm:$0xff]   ;;  %v3248_v43 = vrot.slane %v3243_v33, %v5177_v35 }
0x10f7   : > { %3336 = vmatpush1.bf16.msra.mxu1 %v4486_v41  ;;  %3367 = vmatprep.mubr.bf16.mxu1 %v4850_v0  ;;  %v4503_v0 = vld [vmem:[%s5584_s11 + $0x24] ss:$8 sps:$4 sm:$0xff]  }
0x10f8   : > { %3337 = vmatprep.subr.bf16.mxu1 %v4491_v45  ;;  %v3242_v63 = vpack.c.bf16 %v5494_v61, %v5494_v61  ;;  %4035 = vmatprep.subr.bf16.mxu0 %v4514_v34  ;;  %v4531_v39 = vld [vmem:[%s5587_s22 + $0x28] sm:$0xff]  }
0x10fa   : > { %4036 = vmatpush3.bf16.msra.mxu0 %v4515_v24  ;;  %v4532_v24 = vld [vmem:[%s5587_s22 + $0x60] sm:$0xff]  }
0x10fb   : > { %3338 = vmatpush1.bf16.msra.mxu1 %v4489_v46  ;;  %4037 = vmatprep.subr.bf16.mxu0 %v4516_v3 }
0x10fc   : > { %3339 = vmatprep.subr.bf16.mxu1 %v4494_v47 }
0x10fe   : > { %4038 = vmatpush3.bf16.msra.mxu0 %v4517_v4 }
0x10ff   : > { %3340 = vmatpush1.bf16.msra.mxu1 %v4492_v48  ;;  %4039 = vmatprep.subr.bf16.mxu0 %v4518_v5  ;;  %v3252_v48 = vrot.slane %v3243_v33, %v5174_v31  ;;  %v4529_v31 = vld [vmem:[%s5587_s22 + $0x30] sm:$0xff]   ;;  %v4533_v5 = vld [vmem:[%s5587_s22 + $0x20] sm:$0xff]  }
0x1100   : > { %3341 = vmatprep.subr.bf16.mxu1 %v4497_v1 }
0x1102   : > { %4040 = vmatpush3.bf16.msra.mxu0 %v4519_v37 }
0x1103   : > { %3342 = vmatpush1.bf16.msra.mxu1 %v4495_v49  ;;  %4041 = vmatprep.subr.bf16.mxu0 %v4520_v6  ;;  %v4534_v6 = vld [vmem:[%s5587_s22 + $0x58] sm:$0xff]  }
0x1104   : > { %3343 = vmatprep.subr.bf16.mxu1 %v4500_v50 }
0x1106   : > { %4042 = vmatpush3.bf16.msra.mxu0 %v4521_v7  ;;  %v4535_v7 = vld [vmem:[%s5587_s22 + $0x18] sm:$0xff]  }
0x1107   : > { %3344 = vmatpush1.bf16.msra.mxu1 %v4498_v57  ;;  %4043 = vmatprep.subr.bf16.mxu0 %v4522_v8  ;;  %v4536_v8 = vld [vmem:[%s5587_s22 + $0x50] sm:$0xff]  }
0x1108   : > { %3345 = vmatprep.subr.bf16.mxu1 %v4503_v0  ;;  %v4527_v0 = vld [vmem:[%s5587_s22 + $0x38] sm:$0xff]  }
0x110a   : > { %4044 = vmatpush3.bf16.msra.mxu0 %v4523_v9  ;;  %v4537_v9 = vld [vmem:[%s5587_s22 + $0x10] sm:$0xff]  }
0x110b   : > { %3346 = vmatpush1.bf16.msra.mxu1 %v4501_v40  ;;  %4045 = vmatprep.subr.bf16.mxu0 %v4524_v10  ;;  %v4538_v10 = vld [vmem:[%s5587_s22 + $0x48] sm:$0xff]  }
0x110c   : > { %3347 = vmatprep.subr.bf16.mxu1 %v4506_v51  ;;  %v4528_v51 = vld [vmem:[%s5587_s22 + $0x70] sm:$0xff]  }
0x110e   : > { %4046 = vmatpush3.bf16.msra.mxu0 %v4525_v11  ;;  %v4539_v11 = vld [vmem:[%s5587_s22 + $0x8] sm:$0xff]  }
0x110f   : > { %3348 = vmatpush1.bf16.msra.mxu1 %v4504_v53  ;;  %4053 = vmatprep.subr.bf16.mxu0 %v4526_v12 }
0x1110   : > { %3349 = vmatprep.subr.bf16.mxu1 %v4509_v55 }
0x1113   : > { %3350 = vmatpush1.bf16.msra.mxu1 %v4507_v60 }
0x1116   : > { %3368 = vmatmul.mubr.bf16.vlgmr.msra.gmra.mxu1 %v3242_v63  ;;  %v4530_v63 = vld [vmem:[%s5587_s22 + $0x68] sm:$0xff]  }
0x11b6   : > { %v2995_v54 = vpop.f32.mrf.mxu1 }
0x11b7   : > { %v2996_v15 = vadd.f32 %v2995_v54, %v2874_v58 }
0x11b8   : > { %v2997_v62 = vpop.f32.mrf.mxu1 }
0x11b9   : > { %v3004_v16 = vmul.f32 0.044715, %v2996_v15  ;;  %v2998_v17 = vadd.f32 %v2997_v62, %v2878_v14  ;;  %v3002_v42 = vmul.f32 0.5, %v2996_v15 }
0x11ba   : > { %v2999_v18 = vpop.f32.mrf.mxu1 }
0x11bb   : > { %v3006_v19 = vmul.f32 %v3004_v16, %v2996_v15  ;;  %v3005_v20 = vmul.f32 0.044715, %v2998_v17  ;;  %v3003_v45 = vmul.f32 0.5, %v2998_v17 }
0x11bc   : > { %v3000_v21 = vpop.f32.mrf.mxu1 }
0x11bd   : > { %v3008_v59 = vmul.f32 %v3006_v19, %v2996_v15  ;;  %v3007_v22 = vmul.f32 %v3005_v20, %v2998_v17 }
0x11bf   : > { %v3010_v25 = vadd.f32 %v3008_v59, %v2996_v15  ;;  %v3009_v26 = vmul.f32 %v3007_v22, %v2998_v17  ;;  %v4541_v15 = vld [vmem:[%s5587_s22] sm:$0xff]  }
0x11c1   : > { %v3012_v27 = vmul.f32 0.7978846, %v3010_v25  ;;  %v3011_v28 = vadd.f32 %v3009_v26, %v2998_v17  ;;  %v3921_v26 = vld [vmem:[#allocation4] ss:$0 sm:$0xff] }
0x11c3   : > { %v3013_v29 = vmul.f32 0.7978846, %v3011_v28  ;;  %4596 = vtanh.f32 %v3012_v27 }
0x11c5   : > { %4598 = vtanh.f32 %v3013_v29 }
0x11d0   : > { %v4597_v30 = vpop.eup %4596 }
0x11d1   : > { %v3016_v36 = vadd.f32 1.0, %v4597_v30 }
0x11d2   : > { %v4599_v41 = vpop.eup %4598 }
0x11d3   : > { %v3017_v46 = vadd.f32 1.0, %v4599_v41  ;;  %v3018_v47 = vmul.f32 %v3016_v36, %v3002_v42  ;;  %v3956_v42 = vld [vmem:[#allocation9] ss:$0 sm:$0xff] }
0x11d5   : > { %v3019_v1 = vmul.f32 %v3017_v46, %v3003_v45  ;;  %v3052_v40 = vpack.c.bf16 %v3018_v47, %v3018_v47 }
0x11d6   : > { %v3369_v49 = vpop.f32.mrf.mxu1 }
0x11d7   : > { %v3370_v50 = vadd.f32 %v3369_v49, %v3248_v43  ;;  %v3053_v57 = vpack.c.bf16 %v3019_v1, %v3019_v1 }
0x11d8   : > { %v3371_v44 = vpop.f32.mrf.mxu1 }
0x11d9   : > { %v3378_v52 = vmul.f32 0.044715, %v3370_v50  ;;  %v3372_v53 = vadd.f32 %v3371_v44, %v3252_v48  ;;  %3182 = vmatprep.mubr.bf16.mxu0 %v3053_v57  ;;  %v3376_v54 = vmul.f32 0.5, %v3370_v50 }
0x11da   : > { %v3373_v35 = vpop.f32.mrf.mxu1  ;;  %3183 = vmatmul.mubr.bf16.vlgmr.msra.gmra.mxu0 %v3052_v40 }
0x11db   : > { %v3380_v55 = vmul.f32 %v3378_v52, %v3370_v50  ;;  %v3379_v56 = vmul.f32 0.044715, %v3372_v53  ;;  %4054 = vmatpush3.bf16.msra.mxu0 %v4527_v0  ;;  %v3377_v62 = vmul.f32 0.5, %v3372_v53  ;;  %v3922_v35 = vld [vmem:[#allocation6] ss:$0 sm:$0xff] }
0x11dc   : > { %v3374_v60 = vpop.f32.mrf.mxu1  ;;  %4055 = vmatprep.subr.bf16.mxu0 %v4528_v51 }
0x11dd   : > { %v3382_v23 = vmul.f32 %v3380_v55, %v3370_v50  ;;  %v3381_v2 = vmul.f32 %v3379_v56, %v3372_v53  ;;  %v3923_v56 = vld [vmem:[#allocation7] ss:$0 sm:$0xff] }
0x11df   : > { %v3384_v32 = vadd.f32 %v3382_v23, %v3370_v50  ;;  %4056 = vmatpush3.bf16.msra.mxu0 %v4529_v31  ;;  %v3383_v34 = vmul.f32 %v3381_v2, %v3372_v53 }
0x11e0   : > { %4057 = vmatprep.subr.bf16.mxu0 %v4530_v63 }
0x11e1   : > { %v3386_v3 = vmul.f32 0.7978846, %v3384_v32  ;;  %v3385_v4 = vadd.f32 %v3383_v34, %v3372_v53 }
0x11e3   : > { %4058 = vmatpush3.bf16.msra.mxu0 %v4531_v39  ;;  %v3387_v37 = vmul.f32 0.7978846, %v3385_v4  ;;  %4600 = vtanh.f32 %v3386_v3  ;;  %v3957_v39 = vld [vmem:[#allocation10] ss:$0 sm:$0xff] }
0x11e4   : > { %4059 = vmatprep.subr.bf16.mxu0 %v4532_v24  ;;  %v3958_v24 = vld [vmem:[#allocation12] ss:$0 sm:$0xff] }
0x11e5   : > { %4602 = vtanh.f32 %v3387_v37 }
0x11e7   : > { %4060 = vmatpush3.bf16.msra.mxu0 %v4533_v5 }
0x11e8   : > { %4061 = vmatprep.subr.bf16.mxu0 %v4534_v6 }
0x11eb   : > { %4062 = vmatpush3.bf16.msra.mxu0 %v4535_v7 }
0x11ec   : > { %4063 = vmatprep.subr.bf16.mxu0 %v4536_v8 }
0x11ef   : > { %4064 = vmatpush3.bf16.msra.mxu0 %v4537_v9 }
0x11f0   : > { %v4601_v12 = vpop.eup %4600  ;;  %4065 = vmatprep.subr.bf16.mxu0 %v4538_v10 }
0x11f1   : > { %v3390_v58 = vadd.f32 1.0, %v4601_v12 }
0x11f2   : > { %v4603_v14 = vpop.eup %4602 }
0x11f3   : > { %4066 = vmatpush3.bf16.msra.mxu0 %v4539_v11  ;;  %v3391_v16 = vadd.f32 1.0, %v4603_v14  ;;  %v3392_v17 = vmul.f32 %v3390_v58, %v3376_v54 }
0x11f4   : > { %4067 = vmatprep.subr.bf16.mxu0 %v4540_v13 }
0x11f5   : > { %v3393_v18 = vmul.f32 %v3391_v16, %v3377_v62  ;;  %v3426_v20 = vpack.c.bf16 %v3392_v17, %v3392_v17 }
0x11f7   : > { %4068 = vmatpush3.bf16.msra.mxu0 %v4541_v15  ;;  %v3427_v19 = vpack.c.bf16 %v3393_v18, %v3393_v18 }
0x11f9   : > { %3556 = vmatprep.mubr.bf16.mxu0 %v3427_v19 }
0x11fa   : > { %3557 = vmatmul.mubr.bf16.vlgmr.msra.gmra.mxu0 %v3426_v20 }
0x129a   : > { %v4047_v21 = vpop.f32.mrf.mxu0 }
0x129c   : > { %v4048_v59 = vpop.f32.mrf.mxu0 }
0x129d   : > { %v4049_v22 = vadd.f32 %v4048_v59, %v4047_v21 }
0x129e   : > { %v4050_v25 = vpop.f32.mrf.mxu0 }
0x129f   : > { %v3190_v27 = vadd.f32 %v4049_v22, %v5471_v38 }
0x12a0   : > { %v4051_v28 = vpop.f32.mrf.mxu0 }
0x12a1   : > { %v3198_v29 = vadd.f32 %v3921_v26, %v3190_v27 }
0x12a3   : > { %3201 = vadd.xlane.f32.xlu1 %v3198_v29 }
0x12ba   : > { %v4069_v30 = vpop.f32.mrf.mxu0 }
0x12bc   : > { %v4070_v33 = vpop.f32.mrf.mxu0 }
0x12bd   : > { %v4071_v36 = vadd.f32 %v4070_v33, %v4069_v30 }
0x12be   : > { %v4072_v41 = vpop.f32.mrf.mxu0 }
0x12bf   : > { %v3564_v43 = vadd.f32 %v4071_v36, %v5494_v61 }
0x12c0   : > { %v4073_v45 = vpop.f32.mrf.mxu0 }
0x12c1   : > { %v3572_v46 = vadd.f32 %v3956_v42, %v3564_v43 }
0x12c3   : > { %v3575_v47 = vsel %vm1947_vm11, %v3572_v46, 0.0 }
0x12c4   : > { %3576 = vadd.xlane.f32.xlu0 %v3575_v47 }
0x132c   : > { %v3202_v48 = vpop.xlane.xlu1 %3201 }
0x132d   : > { %v3203_v1 = vmul.f32 0.0078125, %v3202_v48 }
0x132f   : > { %v3204_v49 = vsub.f32 %v3198_v29, %v3203_v1 }
0x1331   : > { %v3205_v50 = vmul.f32 %v3204_v49, %v3204_v49 }
0x1333   : > { %3206 = vadd.xlane.f32.xlu0 %v3205_v50 }
0x134d   : > { %v3577_v38 = vpop.xlane.xlu0 %3576 }
0x134e   : > { %v3578_v57 = vmul.f32 0.0078125, %v3577_v38 }
0x1350   : > { %v3579_v0 = vsub.f32 %v3572_v46, %v3578_v57 }
0x1352   : > { %v3580_v44 = vmul.f32 %v3579_v0, %v3579_v0 }
0x1354   : > { %v3581_v40 = vsel %vm1947_vm11, %v3580_v44, 0.0 }
0x1355   : > { %3582 = vadd.xlane.f32.xlu1 %v3581_v40 }
0x13bc   : > { %v3207_v61 = vpop.xlane.xlu0 %3206 }
0x13bd   : > { %v3208_v51 = vmul.f32 0.0078125, %v3207_v61 }
0x13bf   : > { %v3209_v52 = vadd.f32 1e-05, %v3208_v51 }
0x13c1   : > { %4604 = vrsqrt.f32 %v3209_v52 }
0x13ce   : > { %v4605_v53 = vpop.eup %4604 }
0x13cf   : > { %v3211_v55 = vmul.f32 %v4605_v53, %v3204_v49 }
0x13d1   : > { %v3218_v31 = vmul.f32 %v3922_v35, %v3211_v55 }
0x13d3   : > { %v3225_v60 = vadd.f32 %v3923_v56, %v3218_v31 }
0x13d5   : > { %3602 = vst [vmem:[%s1021_s10] sm:$0xff] %v3225_v60 }
0x13de   : > { %v3583_v63 = vpop.xlane.xlu1 %3582 }
0x13df   : > { %v3584_v23 = vmul.f32 0.0078125, %v3583_v63 }
0x13e1   : > { %v3585_v2 = vadd.f32 1e-05, %v3584_v23 }
0x13e3   : > { %4606 = vrsqrt.f32 %v3585_v2 }
0x13f0   : > { %v4607_v32 = vpop.eup %4606 }
0x13f1   : > { %v3587_v34 = vmul.f32 %v4607_v32, %v3579_v0 }
0x13f3   : > { %v3594_v3 = vmul.f32 %v3957_v39, %v3587_v34 }
0x13f5   : > { %v3601_v4 = vadd.f32 %v3958_v24, %v3594_v3 }
0x13f7   : > { %3603 = vst [vmem:[%s1021_s10 + $0x8] sm:$0x3f] %v3601_v4 }
0x13f8 PF: > { %s73_s7 = sadd.s32 1, %s4812_s7  }
0x13f9   : > { %p70_p10 = scmp.ge.s32.totalorder %s73_s7, 4  }
0x13fb   :  { %72 = sbr.rel (!%p70_p10) target bundleno = 48 (0x30), region = 230 }
0x1400   :  { %3625 = vsyncpa [#allocation3], 1 }
0x1401   :  { %3627 = vsyncpa [#allocation3 + $0x1], 1 }
0x1402   :  { %3628 = vsyncpa [#allocation5], 1 }
0x1403   :  { %3629 = vsyncpa [#allocation8], 1 }
0x1404   :  { %3630 = vsyncpa [#allocation11], 1 }

// kernel: blip2_forward.23
= control target key start
LH: loop header
LB: loop body
LE: loop exit
PB: predicated region body
PF: predicated region fallthrough
CT: control target
= control target key end

     0   :  { %s595_s15 = smov 0   ;;  %s680_s0 = inlined_call_operand.vmem [shape: f32[48,128], index: 0, kind: input, shape index: {}]   ;;  %s681_s1 = inlined_call_operand.vmem [shape: s32[48,1], index: 1, kind: input, shape index: {}]   ;;  %s682_s2 = inlined_call_operand.vmem [shape: f32[1,128], index: 2, kind: input, shape index: {}]   ;;  %s683_s3 = inlined_call_operand.vmem [shape: bf16[128,256], index: 3, kind: input, shape index: {}]   ;;  %s684_s4 = inlined_call_operand.vmem [shape: f32[6,1,128], index: 4, kind: output, shape index: {}]  }
   0x1 LB: > { %s485_s16 = sadd.s32 4294967295, %s566_s15   ;;  %p489_p0 = scmp.ge.s32.totalorder %s566_s15, 1  ;;  %s566_s15 = sphi %s595_s15, %s14_s15  }
   0x2   : > { %p170_p1 = scmp.lt.s32.totalorder %s566_s15, 7 }
   0x4   : > { %p171_p2 = pnand %p489_p0, %p170_p1 }
   0x5   : > { %p197_p3 = scmp.lt.s32.totalorder (!%p171_p2), %s485_s16, 5 }
   0x6   : > { %174 = sbr.rel (%p171_p2) target bundleno = 903 (0x387), region = 36 }
   0xb   : > { %v528_v0 = vld [vmem:[%s683_s3 + $0x74] ss:$8 sps:$4 sm:$0xff]   ;;  %v530_v1 = vld [vmem:[%s683_s3 + $0x70] ss:$8 sps:$4 sm:$0xff]   ;;  %s686_s16 = smov (!%p197_p3, %s485_s16), 5  ;;  %v568_v13 = vmov 0   ;;  %v380_v28 = vlaneseq }
   0xc   : > { %323 = vmatprep.subr.bf16.mxu0 %v528_v0  ;;  %v531_v2 = vld [vmem:[%s683_s3 + $0x64] ss:$8 sps:$4 sm:$0xff]   ;;  %v533_v3 = vld [vmem:[%s683_s3 + $0x60] ss:$8 sps:$4 sm:$0xff]   ;;  %s490_s25 = sshll.u32 %s686_s16, 3  ;;  %355 = vmatprep.mubr.bf16.mxu0 %v568_v13  ;;  %vm396_vm3 = vcmask 7168   ;;  %s207_s12 = scalar_lea.vmem %s684_s4, %s686_s16 }
   0xd   : > { %324 = vmatpush1.bf16.msra.mxu0 %v530_v1  ;;  %s200_s28 = scalar_lea.vmem %s680_s0, %s490_s25  ;;  %v534_v6 = vld [vmem:[%s683_s3 + $0x54] ss:$8 sps:$4 sm:$0xff]   ;;  %v536_v7 = vld [vmem:[%s683_s3 + $0x50] ss:$8 sps:$4 sm:$0xff]   ;;  %v537_v8 = vld [vmem:[%s683_s3 + $0x44] ss:$8 sps:$4 sm:$0xff]   ;;  %526 = vset.pattern.permute.xlu1 %v568_v13  ;;  %s204_s6 = scalar_lea.vmem %s681_s1, %s490_s25 }
   0xe   : > { %325 = vmatprep.subr.bf16.mxu0 %v531_v2  ;;  %v209_v4 = vld [vmem:[%s200_s28] sm:$0xff]  ;;  %v540_v10 = vld [vmem:[%s683_s3 + $0x34] ss:$8 sps:$4 sm:$0xff]   ;;  %v542_v11 = vld [vmem:[%s683_s3 + $0x30] ss:$8 sps:$4 sm:$0xff]   ;;  %527 = vset.pattern.permute.xlu0 %v568_v13  ;;  %v667_v29 = vand.u32 127, %v380_v28 }
   0xf   : > { %v211_v5 = vmul.f32 %v209_v4, %v209_v4  ;;  %v539_v9 = vld [vmem:[%s683_s3 + $0x40] ss:$8 sps:$4 sm:$0xff]   ;;  %v543_v12 = vld [vmem:[%s683_s3 + $0x24] ss:$8 sps:$4 sm:$0xff]   ;;  %v546_v15 = vld [vmem:[%s683_s3 + $0x14] ss:$8 sps:$4 sm:$0xff]  }
  0x10   : > { %v545_v14 = vld [vmem:[%s683_s3 + $0x20] ss:$8 sps:$4 sm:$0xff]   ;;  %v548_v16 = vld [vmem:[%s683_s3 + $0x10] ss:$8 sps:$4 sm:$0xff]   ;;  %v549_v17 = vld [vmem:[%s683_s3 + $0x4] ss:$8 sps:$4 sm:$0xff]  }
  0x11   : > { %326 = vmatpush1.bf16.msra.mxu0 %v533_v3  ;;  %212 = vadd.xlane.f32.xlu0 %v211_v5  ;;  %v551_v18 = vld [vmem:[%s683_s3] ss:$8 sps:$4 sm:$0xff]   ;;  %v382_v30 = vadd.s32 128, %v667_v29  ;;  %v569_v55 = vmov 0.0   ;;  %vm420_vm4 = vcmp.eq.s32.totalorder %v667_v29, 1  ;;  %vm419_vm5 = vcmp.eq.s32.totalorder %v667_v29, 0 }
  0x12   : > { %327 = vmatprep.subr.bf16.mxu0 %v534_v6  ;;  %v364_v19 = vld [vmem:[%s204_s6] sm:$0xff] }
  0x13   : > { %384 = vperm.xlu1 %526, %v364_v19   ;;  %v492_v24 = vld [vmem:[%s682_s2] ss:$0 sm:$0xff]  ;;  %vm393_vm2 = vcmp.ne.s32.totalorder %v364_v19, 4294967196 }
  0x14   : > { %v509_v56 = vsel %vm393_vm2, 1.0, %v569_v55 }
  0x15   : > { %328 = vmatpush1.bf16.msra.mxu0 %v536_v7  ;;  %v409_v58 = vsel %vm396_vm3, %v509_v56, 0.0 }
  0x16   : > { %329 = vmatprep.subr.bf16.mxu0 %v537_v8 }
  0x19   : > { %330 = vmatpush1.bf16.msra.mxu0 %v539_v9 }
  0x1a   : > { %331 = vmatprep.subr.bf16.mxu0 %v540_v10 }
  0x1d   : > { %332 = vmatpush1.bf16.msra.mxu0 %v542_v11 }
  0x1e   : > { %333 = vmatprep.subr.bf16.mxu0 %v543_v12 }
  0x21   : > { %334 = vmatpush1.bf16.msra.mxu0 %v545_v14 }
  0x22   : > { %335 = vmatprep.subr.bf16.mxu0 %v546_v15 }
  0x25   : > { %336 = vmatpush1.bf16.msra.mxu0 %v548_v16 }
  0x26   : > { %337 = vmatprep.subr.bf16.mxu0 %v549_v17 }
  0x29   : > { %338 = vmatpush1.bf16.msra.mxu0 %v551_v18 }
  0x8e   : > { %v385_v31 = vpop.permute.xlu1 %384 }
  0x8f   : > { %vm387_vm0 = vcmp.eq.s32.totalorder %v382_v30, %v385_v31  ;;  %vm386_vm1 = vcmp.eq.s32.totalorder %v667_v29, %v385_v31 }
  0x9a   : > { %v213_v20 = vpop.xlane.xlu0 %212 }
  0x9b   : > { %v215_v21 = vmul.f32 0.0078125, %v213_v20 }
  0x9d   : > { %v216_v22 = vadd.f32 1e-06, %v215_v21 }
  0x9f   : > { %552 = vrsqrt.f32 %v216_v22 }
  0xac   : > { %v553_v23 = vpop.eup %552 }
  0xad   : > { %v218_v25 = vmul.f32 %v553_v23, %v209_v4 }
  0xaf   : > { %v225_v26 = vmul.f32 %v492_v24, %v218_v25 }
  0xb1   : > { %v242_v27 = vpack.c.bf16 %v225_v26, %v225_v26 }
  0xb3   : > { %356 = vmatmul.mubr.bf16.vlgmr.msra.gmra.mxu0 %v242_v27 }
 0x173   : > { %v357_v32 = vpop.f32.mrf.mxu0 }
 0x174   : > { %v388_v38 = vsel %vm386_vm1, %v357_v32, 0.0 }
 0x175   : > { %v359_v33 = vpop.f32.mrf.mxu0 }
 0x176   : > { %v365_v34 = vmax.f32 %v357_v32, %v359_v33  ;;  %v389_v36 = vsel %vm387_vm0, %v359_v33, 0.0 }
 0x177   : > { %v361_v35 = vpop.f32.mrf.mxu0  ;;  %v390_v39 = vadd.f32 %v389_v36, %v388_v38 }
 0x178   : > { %366 = vmax.xlane.f32.xlu0 %v365_v34 }
 0x179   : > { %v362_v37 = vpop.f32.mrf.mxu0 }
 0x17c   : > { %391 = vadd.xlane.f32.xlu0 %v390_v39 }
 0x201   : > { %v367_v40 = vpop.xlane.xlu0 %366 }
 0x202   : > { %v368_v41 = vsub.f32 %v357_v32, %v367_v40  ;;  %v369_v42 = vsub.f32 %v359_v33, %v367_v40 }
 0x204   : > { %v370_v43 = vmul.f32 1.442695, %v368_v41  ;;  %v372_v44 = vmul.f32 1.442695, %v369_v42 }
 0x205   : > { %v392_v52 = vpop.xlane.xlu0 %391 }
 0x206   : > { %554 = vpow2.f32 %v370_v43 }
 0x207   : > { %556 = vpow2.f32 %v372_v44 }
 0x213   : > { %v555_v45 = vpop.eup %554 }
 0x214   : > { %v557_v46 = vpop.eup %556 }
 0x215   : > { %v374_v47 = vadd.f32 %v557_v46, %v555_v45 }
 0x217   : > { %375 = vadd.xlane.f32.xlu1 %v374_v47 }
 0x2a0   : > { %v376_v48 = vpop.xlane.xlu1 %375 }
 0x2a1   : > { %558 = vlog2.f32 %v376_v48 }
 0x2ae   : > { %v559_v49 = vpop.eup %558 }
 0x2af   : > { %v378_v50 = vmul.f32 0.6931472, %v559_v49 }
 0x2b1   : > { %v379_v51 = vadd.f32 %v378_v50, %v367_v40 }
 0x2b3   : > { %v394_v53 = vsub.f32 %v379_v51, %v392_v52 }
 0x2b5   : > { %v395_v54 = vsel %vm393_vm2, %v394_v53, 0.0 }
 0x2b6   : > { %v397_v57 = vsel %vm396_vm3, %v395_v54, 0.0 }
 0x2b7   : > { %398 = vadd.xlane.f32.xlu0 %v397_v57 }
 0x2bb   : > { %410 = vadd.xlane.f32.xlu0 %v409_v58 }
 0x340   : > { %v399_v59 = vpop.xlane.xlu0 %398 }
 0x341   : > { %v400_v60 = vrot.slane %v399_v59, 4 }
 0x343   : > { %v401_v61 = vadd.f32 %v400_v60, %v399_v59 }
 0x344   : > { %v411_v62 = vpop.xlane.xlu0 %410 }
 0x345   : > { %v402_v63 = vrot.slane %v401_v61, 2  ;;  %v412_v0 = vrot.slane %v411_v62, 4 }
 0x347   : > { %v413_v1 = vadd.f32 %v412_v0, %v411_v62  ;;  %v403_v2 = vadd.f32 %v402_v63, %v401_v61 }
 0x349   : > { %v414_v3 = vrot.slane %v413_v1, 2  ;;  %v404_v4 = vrot.slane %v403_v2, 1 }
 0x34b   : > { %v415_v5 = vadd.f32 %v414_v3, %v413_v1  ;;  %v405_v6 = vadd.f32 %v404_v4, %v403_v2 }
 0x34d   : > { %512 = vpush %v405_v6  ;;  %v416_v7 = vrot.slane %v415_v5, 1 }
 0x34f   : > { %v417_v8 = vadd.f32 %v416_v7, %v415_v5 }
 0x351   : > { %514 = vpush %v417_v8 }
 0x37e   : > { %s513_s25 = spop %512 }
 0x37f   : > { %v423_v10 = vstv %s513_s25 }
 0x382   : > { %s515_s9 = spop %514 }
 0x383   : > { %v421_v9 = vstv %s515_s9 }
 0x384   : > { %v422_v11 = vsel %vm420_vm4, %v421_v9, 0.0 }
 0x385   : > { %v424_v12 = vsel %vm419_vm5, %v423_v10, %v422_v11 }
 0x386   : > { %425 = vst [vmem:[%s207_s12] sm:$0x1] %v424_v12 }
 0x387 PF: > { %s14_s15 = sadd.s32 1, %s566_s15  }
 0x388   : > { %p11_p4 = scmp.ge.s32.totalorder %s14_s15, 8  }
 0x38a   :  { %13 = sbr.rel (!%p11_p4) target bundleno = 1 (0x1), region = 69 }

// kernel: blip2_forward.21
= control target key start
LH: loop header
LB: loop body
LE: loop exit
PB: predicated region body
PF: predicated region fallthrough
CT: control target
= control target key end

     0   :  { %s3132_s13 = smov 0   ;;  %s3889_s0 = inlined_call_operand.vmem [shape: f32[2,22,128], index: 0, kind: input, shape index: {}]   ;;  %s3890_s1 = inlined_call_operand.vmem [shape: s32[2,1,22], index: 1, kind: input, shape index: {}]   ;;  %s3891_s2 = inlined_call_operand.vmem [shape: f32[22,32], index: 2, kind: input, shape index: {}]   ;;  %s3892_s3 = inlined_call_operand.vmem [shape: f32[22,32], index: 3, kind: input, shape index: {}]   ;;  %s3893_s4 = inlined_call_operand.vmem [shape: f32[1,128], index: 4, kind: input, shape index: {}]   ;;  %s3894_s5 = inlined_call_operand.vmem [shape: bf16[128,384], index: 5, kind: input, shape index: {}]   ;;  %s3895_s6 = inlined_call_operand.vmem [shape: bf16[128,128], index: 6, kind: input, shape index: {}]   ;;  %s3896_s7 = inlined_call_operand.vmem [shape: f32[1,128], index: 7, kind: input, shape index: {}]   ;;  %s3897_s8 = inlined_call_operand.vmem [shape: bf16[128,512], index: 8, kind: input, shape index: {}]   ;;  %s3898_s9 = inlined_call_operand.vmem [shape: bf16[256,128], index: 9, kind: input, shape index: {}]   ;;  %s3899_s10 = inlined_call_operand.vmem [shape: f32[2,22,128], index: 10, kind: output, shape index: {}]  }
   0x1 LB: > { %s2533_s14 = sadd.s32 4294967295, %s3066_s13   ;;  %p2537_p0 = scmp.ge.s32.totalorder %s3066_s13, 1  ;;  %s3066_s13 = sphi %s3132_s13, %s20_s13  }
   0x2   : > { %p320_p1 = scmp.lt.s32.totalorder %s3066_s13, 3 }
   0x4   : > { %p321_p2 = pnand %p2537_p0, %p320_p1 }
   0x5   : > { %p361_p3 = scmp.lt.s32.totalorder (!%p321_p2), %s2533_s14, 1  ;;  %s3069_s19 = smov (!%p321_p2), 112  }
   0x6   : > { %324 = sbr.rel (%p321_p2) target bundleno = 3921 (0xf51), region = 60  ;;  %s3070_s20 = smov (!%p321_p2), 16  }
   0x7   : > { %s3071_s22 = smov (!%p321_p2), 80   ;;  %s3073_s26 = smov (!%p321_p2), 32  }
   0x8   : > { %s3075_s27 = smov (!%p321_p2), 48   ;;  %s3076_s28 = smov (!%p321_p2), 64  }
   0xb   : > { %v2869_v0 = vld [vmem:[%s3894_s5 + $0xac] ss:$12 sps:$4 sm:$0xff]   ;;  %v2871_v1 = vld [vmem:[%s3894_s5 + $0xa8] ss:$12 sps:$4 sm:$0xff]   ;;  %s3901_s14 = smov (!%p361_p3, %s2533_s14), 1  ;;  %vm409_vm0 = vcmask 1045504  }
   0xc   : > { %597 = vmatprep.subr.bf16.mxu0 %v2869_v0  ;;  %v2872_v2 = vld [vmem:[%s3894_s5 + $0xb0] ss:$12 sps:$4 sm:$0xff]   ;;  %s2836_s21 = smul.u32 24, %s3901_s14  ;;  %v2873_v10 = vld [vmem:[%s3894_s5 + $0x94] ss:$12 sps:$4 sm:$0xff]   ;;  %v3068_v27 = vmov 0   ;;  %s368_s25 = scalar_lea.vmem %s3890_s1, %s3901_s14 }
   0xd   : > { %598 = vmatpush1.bf16.msra.mxu0 %v2871_v1  ;;  %2720 = vmatprep.subr.bf16.mxu1 %v2872_v2  ;;  %v2875_v11 = vld [vmem:[%s3894_s5 + $0x90] ss:$12 sps:$4 sm:$0xff]   ;;  %v2876_v12 = vld [vmem:[%s3894_s5 + $0x98] ss:$12 sps:$4 sm:$0xff]   ;;  %v2880_v15 = vld [vmem:[%s3894_s5 + $0x80] ss:$12 sps:$4 sm:$0xff]  }
   0xe   : > { %2721 = vmatpush3.bf16.msra.mxu1 %v2872_v2  ;;  %s3157_s24 = scalar_lea.vmem %s3889_s0, %s2836_s21  ;;  %599 = vmatprep.subr.bf16.mxu0 %v2873_v10  ;;  %v2877_v13 = vld [vmem:[%s3894_s5 + $0x7c] ss:$12 sps:$4 sm:$0xff]   ;;  %v2879_v14 = vld [vmem:[%s3894_s5 + $0x78] ss:$12 sps:$4 sm:$0xff]   ;;  %v2883_v17 = vld [vmem:[%s3894_s5 + $0x60] ss:$12 sps:$4 sm:$0xff]  }
   0xf   : > { %v3160_v3 = vld [vmem:[%s3157_s24] sm:$0xff]  ;;  %v3163_v4 = vld [vmem:[%s3157_s24 + $0x8] sm:$0xff]  ;;  %v3166_v5 = vld [vmem:[%s3157_s24 + $0x10] sm:$0x3f]  ;;  %2722 = vmatprep.subr.bf16.mxu1 %v2876_v12  ;;  %629 = vmatprep.mubr.bf16.mxu0 %v3068_v27  ;;  %vm894_vm1 = vcmask 1042432   ;;  %vm732_vm2 = vcmask 130048  }
  0x10   : > { %v402_v6 = vmul.f32 %v3160_v3, %v3160_v3  ;;  %v404_v7 = vmul.f32 %v3166_v5, %v3166_v5  ;;  %v403_v8 = vmul.f32 %v3163_v4, %v3163_v4  ;;  %v2881_v16 = vld [vmem:[%s3894_s5 + $0x64] ss:$12 sps:$4 sm:$0xff]   ;;  %v2884_v18 = vld [vmem:[%s3894_s5 + $0x68] ss:$12 sps:$4 sm:$0xff]   ;;  %v2885_v19 = vld [vmem:[%s3894_s5 + $0x4c] ss:$12 sps:$4 sm:$0xff]  }
  0x11   : > { %600 = vmatpush1.bf16.msra.mxu0 %v2875_v11  ;;  %v2888_v20 = vld [vmem:[%s3894_s5 + $0x50] ss:$12 sps:$4 sm:$0xff]   ;;  %v2887_v21 = vld [vmem:[%s3894_s5 + $0x48] ss:$12 sps:$4 sm:$0xff]   ;;  %v2892_v24 = vld [vmem:[%s3894_s5 + $0x38] ss:$12 sps:$4 sm:$0xff]  }
  0x12   : > { %405 = vadd.xlane.f32.xlu0 %v402_v6  ;;  %v410_v9 = vsel %vm409_vm0, %v404_v7, 0.0  ;;  %2723 = vmatpush3.bf16.msra.mxu1 %v2876_v12  ;;  %v2889_v22 = vld [vmem:[%s3894_s5 + $0x34] ss:$12 sps:$4 sm:$0xff]   ;;  %v2891_v23 = vld [vmem:[%s3894_s5 + $0x30] ss:$12 sps:$4 sm:$0xff]   ;;  %vm790_vm3 = vcmask 261120  }
  0x13   : > { %411 = vadd.xlane.f32.xlu1 %v410_v9  ;;  %601 = vmatprep.subr.bf16.mxu0 %v2877_v13  ;;  %v2893_v25 = vld [vmem:[%s3894_s5 + $0x1c] ss:$12 sps:$4 sm:$0xff]   ;;  %v2896_v26 = vld [vmem:[%s3894_s5 + $0x20] ss:$12 sps:$4 sm:$0xff]   ;;  %v2895_v28 = vld [vmem:[%s3894_s5 + $0x18] ss:$12 sps:$4 sm:$0xff]  }
  0x14   : > { %2724 = vmatprep.subr.bf16.mxu1 %v2880_v15  ;;  %v2897_v29 = vld [vmem:[%s3894_s5 + $0x4] ss:$12 sps:$4 sm:$0xff]   ;;  %v2900_v30 = vld [vmem:[%s3894_s5 + $0x8] ss:$12 sps:$4 sm:$0xff]   ;;  %v2899_v31 = vld [vmem:[%s3894_s5] ss:$12 sps:$4 sm:$0xff]  }
  0x15   : > { %602 = vmatpush1.bf16.msra.mxu0 %v2879_v14  ;;  %v2540_v44 = vld [vmem:[%s3893_s4] ss:$0 sm:$0xff]  ;;  %vm858_vm11 = vcmask 177152   ;;  %vm851_vm13 = vcmask 179200   ;;  %vm1788_vm14 = vcmask 523264   ;;  %vm1792_vm15 = vcmask 785408  }
  0x16   : > { %407 = vadd.xlane.f32.xlu0 %v403_v8  ;;  %2725 = vmatpush3.bf16.msra.mxu1 %v2880_v15 }
  0x17   : > { %603 = vmatprep.subr.bf16.mxu0 %v2881_v16  ;;  %2726 = vmatprep.subr.bf16.mxu1 %v2884_v18  ;;  %v3333_v16 = vld [vmem:[%s3891_s2 + $0x10] sm:$0x3f] }
  0x19   : > { %604 = vmatpush1.bf16.msra.mxu0 %v2883_v17  ;;  %v3338_v17 = vld [vmem:[%s3892_s3 + $0x10] sm:$0x3f] }
  0x1a   : > { %2727 = vmatpush3.bf16.msra.mxu1 %v2884_v18  ;;  %605 = vmatprep.subr.bf16.mxu0 %v2885_v19 }
  0x1b   : > { %2728 = vmatprep.subr.bf16.mxu1 %v2888_v20 }
  0x1d   : > { %606 = vmatpush1.bf16.msra.mxu0 %v2887_v21 }
  0x1e   : > { %2729 = vmatpush3.bf16.msra.mxu1 %v2888_v20  ;;  %607 = vmatprep.subr.bf16.mxu0 %v2889_v22  ;;  %v3344_v20 = vld [vmem:[%s3892_s3 + $0x8] sm:$0xff] }
  0x1f   : > { %2730 = vmatprep.subr.bf16.mxu1 %v2892_v24 }
  0x21   : > { %608 = vmatpush1.bf16.msra.mxu0 %v2891_v23 }
  0x22   : > { %2731 = vmatpush3.bf16.msra.mxu1 %v2892_v24  ;;  %609 = vmatprep.subr.bf16.mxu0 %v2893_v25  ;;  %v3352_v24 = vld [vmem:[%s3891_s2 + $0x8] sm:$0xff] }
  0x23   : > { %2732 = vmatprep.subr.bf16.mxu1 %v2896_v26 }
  0x25   : > { %610 = vmatpush1.bf16.msra.mxu0 %v2895_v28  ;;  %v3363_v28 = vld [vmem:[%s3892_s3] sm:$0xff] }
  0x26   : > { %2733 = vmatpush3.bf16.msra.mxu1 %v2896_v26  ;;  %611 = vmatprep.subr.bf16.mxu0 %v2897_v29  ;;  %v3358_v26 = vld [vmem:[%s3891_s2] sm:$0xff] }
  0x27   : > { %2734 = vmatprep.subr.bf16.mxu1 %v2900_v30 }
  0x29   : > { %612 = vmatpush1.bf16.msra.mxu0 %v2899_v31 }
  0x2a   : > { %2735 = vmatpush3.bf16.msra.mxu1 %v2900_v30 }
  0x9b   : > { %v406_v32 = vpop.xlane.xlu0 %405 }
  0x9c   : > { %v414_v33 = vmul.f32 0.0078125, %v406_v32  ;;  %v412_v34 = vpop.xlane.xlu1 %411 }
  0x9d   : > { %v416_v35 = vmul.f32 0.0078125, %v412_v34 }
  0x9e   : > { %v417_v36 = vadd.f32 1e-06, %v414_v33 }
  0x9f   : > { %v408_v37 = vpop.xlane.xlu0 %407  ;;  %v419_v38 = vadd.f32 1e-06, %v416_v35 }
  0xa0   : > { %2973 = vrsqrt.f32 %v417_v36  ;;  %v415_v39 = vmul.f32 0.0078125, %v408_v37 }
  0xa1   : > { %2975 = vrsqrt.f32 %v419_v38 }
  0xa2   : > { %v418_v40 = vadd.f32 1e-06, %v415_v39 }
  0xa4   : > { %2977 = vrsqrt.f32 %v418_v40 }
  0xad   : > { %v2974_v41 = vpop.eup %2973 }
  0xae   : > { %v2976_v42 = vpop.eup %2975  ;;  %v423_v45 = vmul.f32 %v2974_v41, %v3160_v3 }
  0xaf   : > { %v425_v43 = vmul.f32 %v2976_v42, %v3166_v5 }
  0xb0   : > { %v432_v49 = vmul.f32 %v2540_v44, %v423_v45 }
  0xb1   : > { %v2978_v46 = vpop.eup %2977  ;;  %v434_v47 = vmul.f32 %v2540_v44, %v425_v43 }
  0xb2   : > { %v424_v48 = vmul.f32 %v2978_v46, %v3163_v4 }
  0xb3   : > { %v468_v51 = vpack.c.bf16 %v434_v47, %v434_v47 }
  0xb4   : > { %v433_v50 = vmul.f32 %v2540_v44, %v424_v48 }
  0xb6   : > { %v467_v52 = vpack.c.bf16 %v433_v50, %v432_v49 }
  0xb8   : > { %630 = vmatmul.mubr.bf16.vlgmr.msra.gmra.mxu0 %v467_v52  ;;  %2736 = vmatprep.mubr.bf16.mxu1 %v467_v52 }
  0xb9   : > { %2737 = vmatmul.mubr.bf16.vlgmr.msra.gmra.mxu1 %v468_v51  ;;  %639 = vmatprep.mubr.bf16.mxu0 %v3068_v27 }
  0xc0   : > { %640 = vmatmul.mubr.bf16.gmra.mxu0 %v468_v51 }
 0x178   : > { %v631_v53 = vpop.f32.mrf.mxu0 }
 0x179   : > { %v2738_v54 = vpop.f32.mrf.mxu1  ;;  %v3281_v8 = vmul.f32 0.17677669, %v631_v53 }
 0x17a   : > { %v3246_v55 = vpack.c.bf16 %v2738_v54, %v2738_v54  ;;  %v3248_v56 = vpop.f32.mrf.mxu0 }
 0x17b   : > { %v682_v57 = vpop.f32.mrf.mxu1  ;;  %v3251_v58 = vsub.f32 0.0, %v3248_v56  ;;  %v3293_v10 = vsub.f32 0.0, %v3281_v8  ;;  %v777_v35 = vmul.f32 %v3358_v26, %v3248_v56  ;;  %v736_v49 = vmul.f32 %v3358_v26, %v3281_v8 }
 0x17c   : > { %v635_v59 = vpop.f32.mrf.mxu0  ;;  %2826 = vmatprep.subr.msk.bf16.mxu1 %vm894_vm1, %v3246_v55  ;;  %v896_v60 = vsel %vm894_vm1, %v3246_v55, 0 }
 0x17d   : > { %v2739_v61 = vpop.f32.mrf.mxu1  ;;  %753 = vrot.lane.b32.xlu1 %v3251_v58, %s3069_s19  ;;  %2749 = vmatpush3.bf16.msra.mxu1 %v896_v60  ;;  %v3277_v6 = vmul.f32 0.17677669, %v635_v59 }
 0x17e   : > { %v3259_v62 = vpop.f32.mrf.mxu0 }
 0x17f   : > { %v685_v63 = vpop.f32.mrf.mxu1  ;;  %v3262_v0 = vsub.f32 0.0, %v3259_v62  ;;  %v3288_v9 = vsub.f32 0.0, %v3277_v6  ;;  %v778_v34 = vmul.f32 %v3352_v24, %v3259_v62  ;;  %v737_v48 = vmul.f32 %v3352_v24, %v3277_v6 }
 0x180   : > { %v3264_v1 = vpack.c.bf16 %v685_v63, %v682_v57  ;;  %v641_v2 = vpop.f32.mrf.mxu0 }
 0x181   : > { %755 = vrot.lane.b32.xlu1 %v3262_v0, %s3069_s19  ;;  %v3297_v11 = vmul.f32 0.17677669, %v641_v2 }
 0x182   : > { %v3268_v3 = vpop.f32.mrf.mxu0  ;;  %2750 = vmatprep.subr.bf16.mxu1 %v3264_v1 }
 0x183   : > { %2751 = vmatpush3.bf16.msra.mxu1 %v3264_v1  ;;  %769 = vrot.lane.b32.xlu0 %v3268_v3, %s3070_s20  ;;  %v3275_v4 = vsub.f32 0.0, %v3268_v3  ;;  %v3306_v12 = vsub.f32 0.0, %v3297_v11  ;;  %v779_v21 = vmul.f32 %v3333_v16, %v3268_v3  ;;  %v738_v61 = vmul.f32 %v3333_v16, %v3297_v11 }
 0x184   : > { %v645_v5 = vpop.f32.mrf.mxu0 }
 0x185   : > { %757 = vrot.lane.b32.xlu1 %v3275_v4, %s3069_s19 }
 0x186   : > { %v646_v7 = vpop.f32.mrf.mxu0 }
 0x187   : > { %767 = vrot.lane.b32.xlu0 %v3259_v62, %s3070_s20  ;;  %v379_v7 = vlaneseq }
 0x189   : > { %765 = vrot.lane.b32.xlu1 %v3248_v56, %s3070_s20 }
 0x18b   : > { %713 = vrot.lane.b32.xlu0 %v3288_v9, %s3069_s19 }
 0x18d   : > { %711 = vrot.lane.b32.xlu1 %v3293_v10, %s3069_s19 }
 0x18f   : > { %725 = vrot.lane.b32.xlu0 %v3277_v6, %s3070_s20 }
 0x191   : > { %723 = vrot.lane.b32.xlu1 %v3281_v8, %s3070_s20 }
 0x193   : > { %727 = vrot.lane.b32.xlu0 %v3297_v11, %s3070_s20 }
 0x195   : > { %715 = vrot.lane.b32.xlu1 %v3306_v12, %s3069_s19 }
 0x197   : > { %1015 = vrot.lane.b32.xlu0 %v3268_v3, %s3069_s19 }
 0x199   : > { %1004 = vrot.lane.b32.xlu1 %v3262_v0, %s3071_s22 }
 0x19b   : > { %1002 = vrot.lane.b32.xlu0 %v3251_v58, %s3071_s22 }
 0x19d   : > { %1011 = vrot.lane.b32.xlu1 %v3248_v56, %s3069_s19 }
 0x19f   : > { %946 = vrot.lane.b32.xlu0 %v3293_v10, %s3071_s22 }
 0x1a1   : > { %1013 = vrot.lane.b32.xlu1 %v3259_v62, %s3069_s19 }
 0x1a3   : > { %955 = vrot.lane.b32.xlu0 %v3281_v8, %s3069_s19 }
 0x1a5   : > { %948 = vrot.lane.b32.xlu1 %v3288_v9, %s3071_s22 }
 0x1a9   : > { %957 = vrot.lane.b32.xlu1 %v3277_v6, %s3069_s19 }
 0x1ad   : > { %1006 = vrot.lane.b32.xlu1 %v3275_v4, %s3071_s22 }
 0x1ef   : > { %v754_v13 = vpop.permute.xlu1 %753 }
 0x1f3   : > { %v756_v14 = vpop.permute.xlu1 %755 }
 0x1f5   : > { %v770_v15 = vpop.permute.xlu0 %769 }
 0x1f7   : > { %v758_v18 = vpop.permute.xlu1 %757 }
 0x1f8   : > { %v776_v19 = vsel %vm732_vm2, %v758_v18, %v770_v15 }
 0x1f9   : > { %v782_v22 = vmul.f32 %v776_v19, %v3338_v17  ;;  %v768_v23 = vpop.permute.xlu0 %767 }
 0x1fa   : > { %v775_v25 = vsel %vm732_vm2, %v756_v14, %v768_v23  ;;  %v380_v14 = vshrl.u32 %v379_v7, 7 }
 0x1fb   : > { %v785_v29 = vadd.f32 %v782_v22, %v779_v21  ;;  %v781_v30 = vmul.f32 %v775_v25, %v3344_v20  ;;  %v766_v31 = vpop.permute.xlu1 %765  ;;  %v384_v21 = vand.u32 127, %v379_v7 }
 0x1fc   : > { %v774_v32 = vsel %vm732_vm2, %v754_v13, %v766_v31  ;;  %v378_v13 = vld [vmem:[%s368_s25] sm:$0x1]  ;;  %v392_v15 = vsub.s32 0, %v380_v14  ;;  %v382_v19 = vadd.s32 16, %v380_v14  ;;  %v381_v25 = vadd.s32 8, %v380_v14 }
 0x1fd   : > { %v787_v33 = vpack.c.bf16 %v785_v29, %v785_v29  ;;  %v780_v36 = vmul.f32 %v774_v32, %v3363_v28  ;;  %v714_v37 = vpop.permute.xlu0 %713  ;;  %v784_v38 = vadd.f32 %v781_v30, %v778_v34  ;;  %vm388_vm4 = vcmp.gt.s32.totalorder %v378_v13, 0 }
 0x1fe   : > { %v389_v18 = vsel %vm388_vm4, 1, %v3068_v27  ;;  %vm387_vm5 = vcmp.le.s32.totalorder %v384_v21, %v382_v19  ;;  %vm385_vm7 = vcmp.le.s32.totalorder %v384_v21, %v380_v14  ;;  %v3072_v30 = vmov -1e+09  }
 0x1ff   : > { %v783_v39 = vadd.f32 %v780_v36, %v777_v35  ;;  %2824 = vmatprep.subr.msk.bf16.mxu0 %vm790_vm3, %v787_v33  ;;  %v712_v40 = vpop.permute.xlu1 %711  ;;  %v801_v41 = vsel %vm790_vm3, %v787_v33, 0  ;;  %v393_v22 = vrot.slane %v389_v18, %v392_v15  ;;  %vm386_vm10 = vcmp.le.s32.totalorder %v384_v21, %v381_v25 }
 0x200   : > { %2741 = vmatpush3.bf16.xpose.msra.mxu0 %v801_v41 }
 0x201   : > { %v786_v42 = vpack.c.bf16 %v784_v38, %v783_v39  ;;  %v726_v43 = vpop.permute.xlu0 %725  ;;  %vm394_vm6 = vcmp.eq.s32.totalorder %v393_v22, 1 }
 0x202   : > { %v734_v44 = vsel %vm732_vm2, %v714_v37, %v726_v43  ;;  %vm397_vm8 = vmand %vm387_vm5, %vm394_vm6 }
 0x203   : > { %v740_v45 = vmul.f32 %v734_v44, %v3344_v20  ;;  %2825 = vmatprep.subr.msk.bf16.mxu0 %vm790_vm3, %v786_v42  ;;  %v724_v46 = vpop.permute.xlu1 %723  ;;  %v798_v57 = vsel %vm790_vm3, %v786_v42, 0  ;;  %vm395_vm9 = vmand %vm385_vm7, %vm394_vm6  ;;  %v3395_v31 = vsel %vm397_vm8, 0.0, %v3072_v30 }
 0x204   : > { %v733_v47 = vsel %vm732_vm2, %v712_v40, %v724_v46  ;;  %v3397_v33 = vsel %vm395_vm9, 0.0, %v3072_v30  ;;  %vm396_vm12 = vmand %vm386_vm10, %vm394_vm6 }
 0x205   : > { %v739_v50 = vmul.f32 %v733_v47, %v3363_v28  ;;  %v743_v51 = vadd.f32 %v740_v45, %v737_v48  ;;  %v728_v53 = vpop.permute.xlu0 %727  ;;  %v3402_v40 = vsel %vm396_vm12, 0.0, %v3072_v30 }
 0x207   : > { %v742_v52 = vadd.f32 %v739_v50, %v736_v49  ;;  %v716_v54 = vpop.permute.xlu1 %715 }
 0x208   : > { %v735_v59 = vsel %vm732_vm2, %v716_v54, %v728_v53  ;;  %2743 = vmatpush3.bf16.xpose.msra.mxu0 %v798_v57 }
 0x209   : > { %v745_v60 = vpack.c.bf16 %v743_v51, %v742_v52  ;;  %v741_v63 = vmul.f32 %v735_v59, %v3338_v17  ;;  %v1016_v48 = vpop.permute.xlu0 %1015 }
 0x20b   : > { %v744_v2 = vadd.f32 %v741_v63, %v738_v61  ;;  %2744 = vmatprep.mubr.msk.bf16.mxu0 %vm790_vm3, %v745_v60  ;;  %v1005_v23 = vpop.permute.xlu1 %1004 }
 0x20d   : > { %v746_v5 = vpack.c.bf16 %v744_v2, %v744_v2  ;;  %v1003_v51 = vpop.permute.xlu0 %1002 }
 0x20f   : > { %2745 = vmatmul.mubr.msk.bf16.vlgmr.msra.gmra.mxu0 %vm790_vm3, %v746_v5  ;;  %v1012_v29 = vpop.permute.xlu1 %1011 }
 0x210   : > { %v1020_v60 = vsel %vm732_vm2, %v1003_v51, %v1012_v29 }
 0x211   : > { %v947_v54 = vpop.permute.xlu0 %946  ;;  %v1026_v63 = vmul.f32 %v1020_v60, %v3363_v28 }
 0x213   : > { %v1014_v34 = vpop.permute.xlu1 %1013 }
 0x214   : > { %v1021_v52 = vsel %vm732_vm2, %v1005_v23, %v1014_v34 }
 0x215   : > { %v1027_v53 = vmul.f32 %v1021_v52, %v3344_v20  ;;  %v956_v61 = vpop.permute.xlu0 %955 }
 0x216   : > { %v964_v2 = vsel %vm732_vm2, %v947_v54, %v956_v61 }
 0x217   : > { %v949_v43 = vpop.permute.xlu1 %948  ;;  %v982_v5 = vmul.f32 %v964_v2, %v3363_v28 }
 0x21b   : > { %v958_v46 = vpop.permute.xlu1 %957 }
 0x21c   : > { %v965_v57 = vsel %vm732_vm2, %v949_v43, %v958_v46 }
 0x21d   : > { %v983_v59 = vmul.f32 %v965_v57, %v3344_v20 }
 0x21f   : > { %v1007_v47 = vpop.permute.xlu1 %1006 }
 0x220   : > { %v1022_v49 = vsel %vm732_vm2, %v1007_v47, %v1016_v48 }
 0x221   : > { %v1028_v50 = vmul.f32 %v1022_v49, %v3338_v17 }
 0x2cf   : > { %v2746_v32 = vpop.f32.mrf.mxu0 }
 0x2d0   : > { %v846_v35 = vadd.f32 %v2746_v32, %v3395_v31 }
 0x2d1   : > { %v837_v36 = vpop.f32.mrf.mxu0 }
 0x2d2   : > { %v838_v37 = vadd.f32 %v837_v36, %v3397_v33  ;;  %v859_v38 = vsel %vm858_vm11, %v846_v35, -inf }
 0x2d3   : > { %860 = vmax.xlane.f32.xlu0 %v859_v38  ;;  %v2747_v39 = vpop.f32.mrf.mxu0 }
 0x2d4   : > { %v852_v41 = vsel %vm851_vm13, %v838_v37, -inf }
 0x2d5   : > { %v840_v42 = vpop.f32.mrf.mxu0  ;;  %853 = vmax.xlane.f32.xlu1 %v852_v41 }
 0x2d6   : > { %v841_v44 = vadd.f32 %v840_v42, %v3402_v40 }
 0x2d8   : > { %v855_v45 = vsel %vm851_vm13, %v841_v44, -inf }
 0x2d9   : > { %856 = vmax.xlane.f32.xlu0 %v855_v45 }
 0x2e6   : > { %959 = vrot.lane.b32.xlu1 %v3297_v11, %s3069_s19  ;;  %s3074_s19 = smov 96  }
 0x2ea   : > { %1036 = vrot.lane.b32.xlu1 %v1028_v50, %s3073_s26 }
 0x2ee   : > { %972 = vrot.lane.b32.xlu1 %v3352_v24, %s3073_s26 }
 0x2ef   : > { %950 = vrot.lane.b32.xlu0 %v3306_v12, %s3071_s22 }
 0x2f2   : > { %1034 = vrot.lane.b32.xlu1 %v1027_v53, %s3073_s26 }
 0x2f3   : > { %974 = vrot.lane.b32.xlu0 %v3333_v16, %s3073_s26 }
 0x2f6   : > { %990 = vrot.lane.b32.xlu1 %v983_v59, %s3073_s26 }
 0x2f7   : > { %970 = vrot.lane.b32.xlu0 %v3358_v26, %s3073_s26 }
 0x2fb   : > { %1032 = vrot.lane.b32.xlu0 %v1026_v63, %s3073_s26 }
 0x2ff   : > { %988 = vrot.lane.b32.xlu0 %v982_v5, %s3073_s26 }
 0x35c   : > { %v861_v7 = vpop.xlane.xlu0 %860 }
 0x35d   : > { %v864_v32 = vsub.f32 %v846_v35, %v861_v7 }
 0x35e   : > { %v854_v13 = vpop.xlane.xlu1 %853 }
 0x35f   : > { %v862_v14 = vsub.f32 %v838_v37, %v854_v13  ;;  %v869_v37 = vmul.f32 1.442695, %v864_v32 }
 0x361   : > { %v865_v15 = vmul.f32 1.442695, %v862_v14 }
 0x362   : > { %v857_v18 = vpop.xlane.xlu0 %856  ;;  %v960_v19 = vpop.permute.xlu1 %959 }
 0x363   : > { %2979 = vpow2.f32 %v865_v15  ;;  %v863_v38 = vsub.f32 %v841_v44, %v857_v18 }
 0x364   : > { %2981 = vpow2.f32 %v869_v37 }
 0x365   : > { %v867_v41 = vmul.f32 1.442695, %v863_v38 }
 0x366   : > { %v951_v21 = vpop.permute.xlu0 %950  ;;  %v1037_v29 = vpop.permute.xlu1 %1036 }
 0x367   : > { %v966_v22 = vsel %vm732_vm2, %v951_v21, %v960_v19  ;;  %2983 = vpow2.f32 %v867_v41 }
 0x368   : > { %v984_v23 = vmul.f32 %v966_v22, %v3338_v17 }
 0x36a   : > { %992 = vrot.lane.b32.xlu0 %v984_v23, %s3073_s26  ;;  %v975_v25 = vpop.permute.xlu0 %974  ;;  %v973_v39 = vpop.permute.xlu1 %972 }
 0x36b   : > { %v1024_v46 = vmul.f32 %v973_v39, %v3259_v62  ;;  %v980_v51 = vmul.f32 %v973_v39, %v3277_v6  ;;  %v1025_v63 = vmul.f32 %v975_v25, %v3268_v3  ;;  %v981_v7 = vmul.f32 %v975_v25, %v3297_v11 }
 0x36d   : > { %v1043_v2 = vadd.f32 %v1037_v29, %v1025_v63 }
 0x36e   : > { %v971_v36 = vpop.permute.xlu0 %970  ;;  %v1035_v43 = vpop.permute.xlu1 %1034 }
 0x36f   : > { %v1023_v45 = vmul.f32 %v971_v36, %v3248_v56  ;;  %v979_v35 = vmul.f32 %v971_v36, %v3281_v8  ;;  %v1042_v49 = vadd.f32 %v1035_v43, %v1024_v46  ;;  %v1045_v5 = vpack.c.bf16 %v1043_v2, %v1043_v2 }
 0x370   : > { %v3435_v30 = vpop.eup %2979 }
 0x371   : > { %v871_v34 = vsel %vm851_vm13, %v3435_v30, 0.0  ;;  %v2982_v54 = vpop.eup %2981 }
 0x372   : > { %872 = vadd.xlane.f32.xlu1 %v871_v34  ;;  %v1033_v42 = vpop.permute.xlu0 %1032  ;;  %v991_v50 = vpop.permute.xlu1 %990  ;;  %v877_v59 = vsel %vm858_vm11, %v2982_v54, 0.0 }
 0x373   : > { %v1041_v47 = vadd.f32 %v1033_v42, %v1023_v45  ;;  %v998_v53 = vadd.f32 %v991_v50, %v980_v51 }
 0x374   : > { %v2984_v60 = vpop.eup %2983 }
 0x375   : > { %v1044_v52 = vpack.c.bf16 %v1042_v49, %v1041_v47  ;;  %v874_v61 = vsel %vm851_vm13, %v2984_v60, 0.0 }
 0x376   : > { %v989_v48 = vpop.permute.xlu0 %988 }
 0x377   : > { %v997_v44 = vadd.f32 %v989_v48, %v979_v35 }
 0x379   : > { %v1000_v57 = vpack.c.bf16 %v998_v53, %v997_v44 }
 0x383   : > { %1054 = vrot.lane.b32.xlu1 %v1044_v52, %s3074_s19 }
 0x387   : > { %1048 = vrot.lane.b32.xlu1 %v1000_v57, %s3074_s19 }
 0x389   : > { %878 = vadd.xlane.f32.xlu0 %v877_v59 }
 0x38d   : > { %875 = vadd.xlane.f32.xlu0 %v874_v61 }
 0x3a3   : > { %1056 = vrot.lane.b32.xlu0 %v1045_v5, %s3074_s19 }
 0x3a7   : > { %1274 = vrot.lane.b32.xlu0 %v3275_v4, %s3075_s27 }
 0x3ab   : > { %1270 = vrot.lane.b32.xlu0 %v3251_v58, %s3075_s27 }
 0x3af   : > { %1281 = vrot.lane.b32.xlu0 %v3259_v62, %s3071_s22 }
 0x3b3   : > { %1219 = vrot.lane.b32.xlu0 %v3288_v9, %s3075_s27 }
 0x3b7   : > { %1228 = vrot.lane.b32.xlu0 %v3277_v6, %s3071_s22 }
 0x3dc   : > { %v993_v13 = vpop.permute.xlu0 %992 }
 0x3dd   : > { %v999_v14 = vadd.f32 %v993_v13, %v981_v7 }
 0x3df   : > { %v1001_v15 = vpack.c.bf16 %v999_v14, %v999_v14 }
 0x3e1   : > { %1050 = vrot.lane.b32.xlu1 %v1001_v15, %s3074_s19 }
 0x3e5   : > { %1283 = vrot.lane.b32.xlu1 %v3268_v3, %s3071_s22 }
 0x3e9   : > { %1272 = vrot.lane.b32.xlu1 %v3262_v0, %s3075_s27 }
 0x3ed   : > { %1279 = vrot.lane.b32.xlu1 %v3248_v56, %s3071_s22 }
 0x3f1   : > { %1217 = vrot.lane.b32.xlu1 %v3293_v10, %s3075_s27 }
 0x3f5   : > { %1226 = vrot.lane.b32.xlu1 %v3281_v8, %s3071_s22 }
 0x3fb   : > { %v873_v18 = vpop.xlane.xlu1 %872 }
 0x3ff   : > { %v1055_v32 = vpop.permute.xlu1 %1054 }
 0x400   : > { %v1065_v43 = vsel %vm790_vm3, %v1055_v32, 0 }
 0x403   : > { %v1049_v41 = vpop.permute.xlu1 %1048 }
 0x412   : > { %v879_v19 = vpop.xlane.xlu0 %878 }
 0x413   : > { %2985 = vrcp.f32 %v879_v19 }
 0x414   : > { %2987 = vrcp.f32 %v873_v18 }
 0x416   : > { %v876_v21 = vpop.xlane.xlu0 %875 }
 0x417   : > { %2989 = vrcp.f32 %v876_v21 }
 0x41a   : > { %v1057_v22 = vpop.permute.xlu0 %1056 }
 0x41b   : > { %2827 = vmatprep.subr.msk.bf16.mxu1 %vm790_vm3, %v1057_v22  ;;  %v1068_v42 = vsel %vm790_vm3, %v1057_v22, 0 }
 0x41e   : > { %v1275_v61 = vpop.permute.xlu0 %1274 }
 0x420   : > { %v2986_v23 = vpop.eup %2985 }
 0x421   : > { %v2988_v25 = vpop.eup %2987  ;;  %v885_v34 = vmul.f32 %v2986_v23, %v2982_v54 }
 0x422   : > { %v883_v36 = vmul.f32 %v2988_v25, %v3435_v30  ;;  %v1271_v2 = vpop.permute.xlu0 %1270 }
 0x423   : > { %v887_v39 = vpack.c.bf16 %v885_v34, %v885_v34 }
 0x424   : > { %v2990_v29 = vpop.eup %2989 }
 0x425   : > { %v884_v37 = vmul.f32 %v2990_v29, %v2984_v60 }
 0x426   : > { %v1282_v7 = vpop.permute.xlu0 %1281 }
 0x427   : > { %v886_v38 = vpack.c.bf16 %v884_v37, %v883_v36 }
 0x429   : > { %2752 = vmatprep.mubr.msk.bf16.mxu1 %vm851_vm13, %v886_v38 }
 0x42a   : > { %2753 = vmatmul.mubr.msk.bf16.vlgmr.msra.gmra.mxu1 %vm851_vm13, %v887_v39  ;;  %v1220_v15 = vpop.permute.xlu0 %1219 }
 0x42b   : > { %2757 = vmatpush3.bf16.xpose.msra.mxu1 %v1068_v42  ;;  %2760 = vmatprep.mubr.msk.bf16.mxu1 %vm790_vm3, %v1049_v41 }
 0x42c   : > { %2828 = vmatprep.subr.msk.bf16.mxu1 %vm790_vm3, %v1055_v32 }
 0x42e   : > { %v1229_v25 = vpop.permute.xlu0 %1228 }
 0x42f   : > { %v1236_v34 = vsel %vm732_vm2, %v1220_v15, %v1229_v25 }
 0x430   : > { %v1251_v37 = vmul.f32 %v1236_v34, %v3344_v20 }
 0x433   : > { %2759 = vmatpush3.bf16.xpose.msra.mxu1 %v1065_v43 }
 0x453   : > { %v1051_v45 = vpop.permute.xlu1 %1050 }
 0x454   : > { %2761 = vmatmul.mubr.msk.bf16.vlgmr.msra.gmra.mxu1 %vm790_vm3, %v1051_v45 }
 0x457   : > { %v1284_v60 = vpop.permute.xlu1 %1283 }
 0x458   : > { %v1290_v13 = vsel %vm732_vm2, %v1275_v61, %v1284_v60 }
 0x459   : > { %v1296_v18 = vmul.f32 %v1290_v13, %v3338_v17 }
 0x45b   : > { %v1273_v63 = vpop.permute.xlu1 %1272 }
 0x45c   : > { %v1289_v22 = vsel %vm732_vm2, %v1273_v63, %v1282_v7 }
 0x45d   : > { %v1295_v32 = vmul.f32 %v1289_v22, %v3344_v20 }
 0x45f   : > { %v1280_v5 = vpop.permute.xlu1 %1279 }
 0x460   : > { %v1288_v19 = vsel %vm732_vm2, %v1271_v2, %v1280_v5 }
 0x461   : > { %v1294_v23 = vmul.f32 %v1288_v19, %v3363_v28 }
 0x463   : > { %v1218_v14 = vpop.permute.xlu1 %1217 }
 0x467   : > { %v1227_v21 = vpop.permute.xlu1 %1226 }
 0x468   : > { %v1235_v29 = vsel %vm732_vm2, %v1218_v14, %v1227_v21 }
 0x469   : > { %v1250_v36 = vmul.f32 %v1235_v29, %v3363_v28 }
 0x4ea   : > { %v3480_v30 = vpop.f32.mrf.mxu1 }
 0x4ec   : > { %v3482_v46 = vpop.f32.mrf.mxu1 }
 0x4ee   : > { %v2755_v47 = vpop.f32.mrf.mxu1 }
 0x4f0   : > { %v3484_v48 = vpop.f32.mrf.mxu1 }
 0x514   : > { %v2762_v35 = vpop.f32.mrf.mxu1 }
 0x515   : > { %v1113_v49 = vadd.f32 %v2762_v35, %v3395_v31 }
 0x516   : > { %v1104_v50 = vpop.f32.mrf.mxu1 }
 0x517   : > { %v1105_v51 = vadd.f32 %v1104_v50, %v3397_v33  ;;  %v1124_v52 = vsel %vm858_vm11, %v1113_v49, -inf }
 0x518   : > { %1125 = vmax.xlane.f32.xlu0 %v1124_v52  ;;  %v2763_v44 = vpop.f32.mrf.mxu1 }
 0x519   : > { %v1118_v57 = vsel %vm851_vm13, %v1105_v51, -inf }
 0x51a   : > { %v1107_v53 = vpop.f32.mrf.mxu1 }
 0x51b   : > { %v1108_v54 = vadd.f32 %v1107_v53, %v3402_v40 }
 0x51c   : > { %1119 = vmax.xlane.f32.xlu0 %v1118_v57 }
 0x51d   : > { %v1121_v59 = vsel %vm851_vm13, %v1108_v54, -inf }
 0x51e   : > { %1122 = vmax.xlane.f32.xlu1 %v1121_v59 }
 0x52f   : > { %1221 = vrot.lane.b32.xlu1 %v3306_v12, %s3075_s27 }
 0x532   : > { %1230 = vrot.lane.b32.xlu0 %v3297_v11, %s3071_s22 }
 0x533   : > { %1242 = vrot.lane.b32.xlu1 %v3333_v16, %s3076_s28 }
 0x536   : > { %1304 = vrot.lane.b32.xlu0 %v1296_v18, %s3076_s28 }
 0x537   : > { %1238 = vrot.lane.b32.xlu1 %v3358_v26, %s3076_s28 }
 0x53a   : > { %1240 = vrot.lane.b32.xlu0 %v3352_v24, %s3076_s28 }
 0x53b   : > { %1300 = vrot.lane.b32.xlu1 %v1294_v23, %s3076_s28 }
 0x53e   : > { %1302 = vrot.lane.b32.xlu0 %v1295_v32, %s3076_s28 }
 0x53f   : > { %1256 = vrot.lane.b32.xlu1 %v1250_v36, %s3076_s28 }
 0x542   : > { %1258 = vrot.lane.b32.xlu0 %v1251_v37, %s3076_s28 }
 0x5a1   : > { %v1126_v38 = vpop.xlane.xlu0 %1125 }
 0x5a2   : > { %v1129_v39 = vsub.f32 %v1113_v49, %v1126_v38 }
 0x5a4   : > { %v1134_v41 = vmul.f32 1.442695, %v1129_v39 }
 0x5a5   : > { %v1120_v42 = vpop.xlane.xlu0 %1119 }
 0x5a6   : > { %2991 = vpow2.f32 %v1134_v41  ;;  %v1127_v43 = vsub.f32 %v1105_v51, %v1120_v42 }
 0x5a7   : > { %v1123_v45 = vpop.xlane.xlu1 %1122 }
 0x5a8   : > { %v1130_v47 = vmul.f32 1.442695, %v1127_v43  ;;  %v1128_v59 = vsub.f32 %v1108_v54, %v1123_v45 }
 0x5a9   : > { %v1231_v35 = vpop.permute.xlu0 %1230 }
 0x5aa   : > { %2993 = vpow2.f32 %v1130_v47  ;;  %v1132_v63 = vmul.f32 1.442695, %v1128_v59 }
 0x5ab   : > { %v1222_v50 = vpop.permute.xlu1 %1221 }
 0x5ac   : > { %v1237_v52 = vsel %vm732_vm2, %v1222_v50, %v1231_v35  ;;  %2995 = vpow2.f32 %v1132_v63 }
 0x5ad   : > { %v1252_v44 = vmul.f32 %v1237_v52, %v3338_v17  ;;  %v1305_v61 = vpop.permute.xlu0 %1304 }
 0x5af   : > { %1260 = vrot.lane.b32.xlu1 %v1252_v44, %s3076_s28  ;;  %v1243_v60 = vpop.permute.xlu1 %1242 }
 0x5b0   : > { %v1293_v23 = vmul.f32 %v1243_v60, %v3268_v3  ;;  %v1249_v42 = vmul.f32 %v1243_v60, %v3297_v11 }
 0x5b1   : > { %v1241_v5 = vpop.permute.xlu0 %1240 }
 0x5b2   : > { %v1292_v15 = vmul.f32 %v1241_v5, %v3259_v62  ;;  %v1311_v25 = vadd.f32 %v1305_v61, %v1293_v23  ;;  %v1248_v36 = vmul.f32 %v1241_v5, %v3277_v6 }
 0x5b3   : > { %v3520_v53 = vpop.eup %2991  ;;  %1155 = vrot.lane.b32.xlu1 %v3264_v1, %s3074_s19  ;;  %v1239_v2 = vpop.permute.xlu1 %1238 }
 0x5b4   : > { %v1142_v49 = vsel %vm858_vm11, %v3520_v53, 0.0  ;;  %v1291_v13 = vmul.f32 %v1239_v2, %v3248_v56  ;;  %v1247_v32 = vmul.f32 %v1239_v2, %v3281_v8  ;;  %v1313_v38 = vpack.c.bf16 %v1311_v25, %v1311_v25 }
 0x5b5   : > { %1143 = vadd.xlane.f32.xlu0 %v1142_v49  ;;  %v1303_v14 = vpop.permute.xlu0 %1302 }
 0x5b6   : > { %v1310_v19 = vadd.f32 %v1303_v14, %v1292_v15 }
 0x5b7   : > { %v3526_v51 = vpop.eup %2993  ;;  %v1301_v7 = vpop.permute.xlu1 %1300 }
 0x5b8   : > { %v1136_v57 = vsel %vm851_vm13, %v3526_v51, 0.0  ;;  %v1309_v18 = vadd.f32 %v1301_v7, %v1291_v13 }
 0x5b9   : > { %1137 = vadd.xlane.f32.xlu0 %v1136_v57  ;;  %v2996_v22 = vpop.eup %2995  ;;  %v1259_v34 = vpop.permute.xlu0 %1258 }
 0x5ba   : > { %v1312_v21 = vpack.c.bf16 %v1310_v19, %v1309_v18  ;;  %v1139_v54 = vsel %vm851_vm13, %v2996_v22, 0.0  ;;  %v1266_v39 = vadd.f32 %v1259_v34, %v1248_v36 }
 0x5bb   : > { %v1257_v29 = vpop.permute.xlu1 %1256 }
 0x5bc   : > { %v1265_v37 = vadd.f32 %v1257_v29, %v1247_v32 }
 0x5be   : > { %v1268_v41 = vpack.c.bf16 %v1266_v39, %v1265_v37 }
 0x5cf   : > { %1157 = vrot.lane.b32.xlu0 %v3246_v55, %s3074_s19 }
 0x5d3   : > { %1322 = vrot.lane.b32.xlu0 %v1312_v21, %s3076_s28 }
 0x5d7   : > { %1140 = vadd.xlane.f32.xlu1 %v1139_v54 }
 0x5e8   : > { %1324 = vrot.lane.b32.xlu1 %v1313_v38, %s3076_s28 }
 0x5ec   : > { %1316 = vrot.lane.b32.xlu1 %v1268_v41, %s3076_s28 }
 0x5f0   : > { %1540 = vrot.lane.b32.xlu1 %v3275_v4, %s3070_s20 }
 0x5f4   : > { %1538 = vrot.lane.b32.xlu1 %v3262_v0, %s3070_s20 }
 0x5f8   : > { %1545 = vrot.lane.b32.xlu1 %v3248_v56, %s3075_s27 }
 0x5fc   : > { %1547 = vrot.lane.b32.xlu1 %v3259_v62, %s3075_s27 }
 0x600   : > { %1485 = vrot.lane.b32.xlu1 %v3288_v9, %s3070_s20 }
 0x604   : > { %1494 = vrot.lane.b32.xlu1 %v3277_v6, %s3075_s27 }
 0x621   : > { %v1261_v43 = vpop.permute.xlu1 %1260 }
 0x622   : > { %v1267_v45 = vadd.f32 %v1261_v43, %v1249_v42 }
 0x624   : > { %v1269_v4 = vpack.c.bf16 %v1267_v45, %v1267_v45 }
 0x625   : > { %v1156_v50 = vpop.permute.xlu1 %1155 }
 0x626   : > { %1318 = vrot.lane.b32.xlu0 %v1269_v4, %s3076_s28 }
 0x62a   : > { %1549 = vrot.lane.b32.xlu0 %v3268_v3, %s3075_s27 }
 0x62e   : > { %1536 = vrot.lane.b32.xlu0 %v3251_v58, %s3070_s20 }
 0x632   : > { %1483 = vrot.lane.b32.xlu0 %v3293_v10, %s3070_s20 }
 0x636   : > { %1492 = vrot.lane.b32.xlu0 %v3281_v8, %s3075_s27 }
 0x63e   : > { %v1144_v0 = vpop.xlane.xlu0 %1143 }
 0x63f   : > { %2997 = vrcp.f32 %v1144_v0 }
 0x642   : > { %v1138_v9 = vpop.xlane.xlu0 %1137 }
 0x643   : > { %2999 = vrcp.f32 %v1138_v9 }
 0x646   : > { %v1158_v47 = vpop.permute.xlu0 %1157 }
 0x647   : > { %v1167_v35 = vsel %vm894_vm1, %v1158_v47, 0  ;;  %2829 = vmatprep.subr.msk.bf16.mxu0 %vm894_vm1, %v1158_v47 }
 0x648   : > { %2765 = vmatpush3.bf16.msra.mxu0 %v1167_v35 }
 0x649   : > { %2766 = vmatprep.subr.bf16.mxu0 %v1156_v50 }
 0x64a   : > { %v1323_v7 = vpop.permute.xlu0 %1322 }
 0x64c   : > { %2767 = vmatpush3.bf16.msra.mxu0 %v1156_v50  ;;  %v2998_v10 = vpop.eup %2997 }
 0x64d   : > { %v1150_v57 = vmul.f32 %v2998_v10, %v3520_v53  ;;  %v1333_v53 = vsel %vm790_vm3, %v1323_v7, 0 }
 0x64f   : > { %v1152_v63 = vpack.c.bf16 %v1150_v57, %v1150_v57 }
 0x650   : > { %v3000_v44 = vpop.eup %2999 }
 0x651   : > { %v1148_v59 = vmul.f32 %v3000_v44, %v3526_v51 }
 0x660   : > { %v1141_v58 = vpop.xlane.xlu1 %1140 }
 0x661   : > { %3001 = vrcp.f32 %v1141_v58 }
 0x664   : > { %v1325_v52 = vpop.permute.xlu1 %1324 }
 0x665   : > { %2830 = vmatprep.subr.msk.bf16.mxu0 %vm790_vm3, %v1325_v52  ;;  %v1336_v2 = vsel %vm790_vm3, %v1325_v52, 0 }
 0x668   : > { %v1317_v5 = vpop.permute.xlu1 %1316 }
 0x66e   : > { %v3002_v49 = vpop.eup %3001 }
 0x66f   : > { %v1149_v60 = vmul.f32 %v3002_v49, %v2996_v22  ;;  %v1541_v22 = vpop.permute.xlu1 %1540 }
 0x671   : > { %v1151_v61 = vpack.c.bf16 %v1149_v60, %v1148_v59 }
 0x673   : > { %2768 = vmatprep.mubr.msk.bf16.mxu0 %vm851_vm13, %v1151_v61  ;;  %v1539_v37 = vpop.permute.xlu1 %1538 }
 0x674   : > { %2769 = vmatmul.mubr.msk.bf16.vlgmr.msra.gmra.mxu0 %vm851_vm13, %v1152_v63 }
 0x675   : > { %2773 = vmatpush3.bf16.xpose.msra.mxu0 %v1336_v2  ;;  %2776 = vmatprep.mubr.msk.bf16.mxu0 %vm790_vm3, %v1317_v5 }
 0x676   : > { %2831 = vmatprep.subr.msk.bf16.mxu0 %vm790_vm3, %v1323_v7 }
 0x677   : > { %v1546_v41 = vpop.permute.xlu1 %1545 }
 0x67b   : > { %v1548_v42 = vpop.permute.xlu1 %1547 }
 0x67c   : > { %v1555_v47 = vsel %vm732_vm2, %v1539_v37, %v1548_v42 }
 0x67d   : > { %2775 = vmatpush3.bf16.xpose.msra.mxu0 %v1333_v53  ;;  %v1561_v50 = vmul.f32 %v1555_v47, %v3344_v20 }
 0x67f   : > { %v1486_v4 = vpop.permute.xlu1 %1485 }
 0x683   : > { %v1495_v35 = vpop.permute.xlu1 %1494 }
 0x684   : > { %v1502_v58 = vsel %vm732_vm2, %v1486_v4, %v1495_v35 }
 0x685   : > { %v1517_v10 = vmul.f32 %v1502_v58, %v3344_v20 }
 0x698   : > { %v1319_v51 = vpop.permute.xlu0 %1318 }
 0x699   : > { %2777 = vmatmul.mubr.msk.bf16.vlgmr.msra.gmra.mxu0 %vm790_vm3, %v1319_v51 }
 0x69c   : > { %v1550_v43 = vpop.permute.xlu0 %1549 }
 0x69d   : > { %v1556_v45 = vsel %vm732_vm2, %v1541_v22, %v1550_v43 }
 0x69e   : > { %v1562_v0 = vmul.f32 %v1556_v45, %v3338_v17 }
 0x6a0   : > { %v1537_v9 = vpop.permute.xlu0 %1536 }
 0x6a1   : > { %v1554_v44 = vsel %vm732_vm2, %v1537_v9, %v1546_v41 }
 0x6a4   : > { %v1484_v52 = vpop.permute.xlu0 %1483 }
 0x734   : > { %v3575_v13 = vpop.f32.mrf.mxu0 }
 0x736   : > { %v3577_v14 = vpop.f32.mrf.mxu0 }
 0x738   : > { %v2771_v15 = vpop.f32.mrf.mxu0 }
 0x73a   : > { %v3579_v18 = vpop.f32.mrf.mxu0 }
 0x73b   : > { %v2854_v19 = vpack.i.bf16 %v3579_v18, %v3577_v14 }
 0x759   : > { %v2778_v21 = vpop.f32.mrf.mxu0 }
 0x75a   : > { %v1381_v54 = vadd.f32 %v2778_v21, %v3395_v31 }
 0x75b   : > { %v1372_v23 = vpop.f32.mrf.mxu0 }
 0x75c   : > { %v1373_v25 = vadd.f32 %v1372_v23, %v3397_v33  ;;  %v1392_v29 = vsel %vm858_vm11, %v1381_v54, -inf }
 0x75d   : > { %1393 = vmax.xlane.f32.xlu0 %v1392_v29  ;;  %v2779_v32 = vpop.f32.mrf.mxu0 }
 0x75e   : > { %v1386_v34 = vsel %vm851_vm13, %v1373_v25, -inf }
 0x75f   : > { %v1375_v36 = vpop.f32.mrf.mxu0  ;;  %1387 = vmax.xlane.f32.xlu1 %v1386_v34 }
 0x760   : > { %v1376_v38 = vadd.f32 %v1375_v36, %v3402_v40 }
 0x762   : > { %v1389_v39 = vsel %vm851_vm13, %v1376_v38, -inf }
 0x763   : > { %1390 = vmax.xlane.f32.xlu0 %v1389_v39 }
 0x770   : > { %1496 = vrot.lane.b32.xlu1 %v3297_v11, %s3075_s27 }
 0x774   : > { %1570 = vrot.lane.b32.xlu1 %v1562_v0, %s3074_s19 }
 0x778   : > { %1506 = vrot.lane.b32.xlu1 %v3352_v24, %s3074_s19  ;;  %v1493_v24 = vpop.permute.xlu0 %1492 }
 0x779   : > { %1487 = vrot.lane.b32.xlu0 %v3306_v12, %s3070_s20  ;;  %v1560_v12 = vmul.f32 %v1554_v44, %v3363_v28  ;;  %v1501_v49 = vsel %vm732_vm2, %v1484_v52, %v1493_v24 }
 0x77a   : > { %v1516_v57 = vmul.f32 %v1501_v49, %v3363_v28 }
 0x77c   : > { %1568 = vrot.lane.b32.xlu1 %v1561_v50, %s3074_s19 }
 0x77d   : > { %1508 = vrot.lane.b32.xlu0 %v3333_v16, %s3074_s19 }
 0x780   : > { %1524 = vrot.lane.b32.xlu1 %v1517_v10, %s3074_s19 }
 0x781   : > { %1504 = vrot.lane.b32.xlu0 %v3358_v26, %s3074_s19 }
 0x785   : > { %1566 = vrot.lane.b32.xlu0 %v1560_v12, %s3074_s19 }
 0x789   : > { %1522 = vrot.lane.b32.xlu0 %v1516_v57, %s3074_s19 }
 0x7e6   : > { %v1394_v16 = vpop.xlane.xlu0 %1393 }
 0x7e7   : > { %v1397_v53 = vsub.f32 %v1381_v54, %v1394_v16 }
 0x7e8   : > { %v1388_v20 = vpop.xlane.xlu1 %1387 }
 0x7e9   : > { %v1395_v59 = vsub.f32 %v1373_v25, %v1388_v20  ;;  %v1402_v51 = vmul.f32 1.442695, %v1397_v53 }
 0x7eb   : > { %v1398_v60 = vmul.f32 1.442695, %v1395_v59 }
 0x7ec   : > { %v1391_v61 = vpop.xlane.xlu0 %1390  ;;  %v1497_v63 = vpop.permute.xlu1 %1496 }
 0x7ed   : > { %3003 = vpow2.f32 %v1398_v60  ;;  %v1396_v15 = vsub.f32 %v1376_v38, %v1391_v61 }
 0x7ee   : > { %3005 = vpow2.f32 %v1402_v51 }
 0x7ef   : > { %v1400_v22 = vmul.f32 1.442695, %v1396_v15 }
 0x7f0   : > { %v1488_v2 = vpop.permute.xlu0 %1487  ;;  %v1571_v23 = vpop.permute.xlu1 %1570 }
 0x7f1   : > { %v1503_v26 = vsel %vm732_vm2, %v1488_v2, %v1497_v63  ;;  %3007 = vpow2.f32 %v1400_v22 }
 0x7f2   : > { %v1518_v5 = vmul.f32 %v1503_v26, %v3338_v17 }
 0x7f4   : > { %1526 = vrot.lane.b32.xlu0 %v1518_v5, %s3074_s19  ;;  %v1509_v21 = vpop.permute.xlu0 %1508  ;;  %v1507_v17 = vpop.permute.xlu1 %1506 }
 0x7f5   : > { %v1559_v29 = vmul.f32 %v1509_v21, %v3268_v3  ;;  %v1558_v38 = vmul.f32 %v1507_v17, %v3259_v62  ;;  %v1514_v62 = vmul.f32 %v1507_v17, %v3277_v6  ;;  %v1515_v58 = vmul.f32 %v1509_v21, %v3297_v11 }
 0x7f7   : > { %v1577_v32 = vadd.f32 %v1571_v23, %v1559_v29 }
 0x7f8   : > { %v1505_v25 = vpop.permute.xlu0 %1504  ;;  %v1569_v54 = vpop.permute.xlu1 %1568 }
 0x7f9   : > { %v1557_v36 = vmul.f32 %v1505_v25, %v3248_v56  ;;  %v1579_v39 = vpack.c.bf16 %v1577_v32, %v1577_v32  ;;  %v1576_v42 = vadd.f32 %v1569_v54, %v1558_v38  ;;  %v1513_v0 = vmul.f32 %v1505_v25, %v3281_v8 }
 0x7fa   : > { %v3617_v7 = vpop.eup %3003 }
 0x7fb   : > { %v1404_v28 = vsel %vm851_vm13, %v3617_v7, 0.0  ;;  %v3006_v37 = vpop.eup %3005 }
 0x7fc   : > { %1405 = vadd.xlane.f32.xlu1 %v1404_v28  ;;  %v1567_v34 = vpop.permute.xlu0 %1566  ;;  %v1410_v43 = vsel %vm858_vm11, %v3006_v37, 0.0  ;;  %v1525_v9 = vpop.permute.xlu1 %1524 }
 0x7fd   : > { %v1575_v41 = vadd.f32 %v1567_v34, %v1557_v36  ;;  %v1532_v35 = vadd.f32 %v1525_v9, %v1514_v62 }
 0x7fe   : > { %v3008_v3 = vpop.eup %3007 }
 0x7ff   : > { %v1578_v45 = vpack.c.bf16 %v1576_v42, %v1575_v41  ;;  %v1407_v56 = vsel %vm851_vm13, %v3008_v3, 0.0 }
 0x800   : > { %v1523_v4 = vpop.permute.xlu0 %1522 }
 0x801   : > { %v1531_v47 = vadd.f32 %v1523_v4, %v1513_v0 }
 0x803   : > { %v1534_v50 = vpack.c.bf16 %v1532_v35, %v1531_v47 }
 0x80d   : > { %1421 = vrot.lane.b32.xlu1 %v3264_v1, %s3076_s28 }
 0x811   : > { %1590 = vrot.lane.b32.xlu1 %v1579_v39, %s3073_s26 }
 0x813   : > { %1411 = vadd.xlane.f32.xlu0 %v1410_v43 }
 0x815   : > { %1588 = vrot.lane.b32.xlu1 %v1578_v45, %s3073_s26 }
 0x817   : > { %1408 = vadd.xlane.f32.xlu0 %v1407_v56 }
 0x82d   : > { %1423 = vrot.lane.b32.xlu0 %v3246_v55, %s3076_s28 }
 0x831   : > { %1582 = vrot.lane.b32.xlu0 %v1534_v50, %s3073_s26 }
 0x866   : > { %v1527_v52 = vpop.permute.xlu0 %1526 }
 0x867   : > { %v1533_v10 = vadd.f32 %v1527_v52, %v1515_v58 }
 0x869   : > { %v1535_v44 = vpack.c.bf16 %v1533_v10, %v1533_v10 }
 0x86b   : > { %1584 = vrot.lane.b32.xlu1 %v1535_v44, %s3073_s26 }
 0x885   : > { %v1406_v24 = vpop.xlane.xlu1 %1405 }
 0x889   : > { %v1422_v12 = vpop.permute.xlu1 %1421 }
 0x88d   : > { %v1591_v11 = vpop.permute.xlu1 %1590 }
 0x88e   : > { %v1602_v5 = vsel %vm790_vm3, %v1591_v11, 0 }
 0x891   : > { %v1589_v28 = vpop.permute.xlu1 %1588 }
 0x892   : > { %v1599_v51 = vsel %vm790_vm3, %v1589_v28, 0 }
 0x89c   : > { %v1412_v8 = vpop.xlane.xlu0 %1411 }
 0x89d   : > { %3009 = vrcp.f32 %v1412_v8 }
 0x89e   : > { %3011 = vrcp.f32 %v1406_v24 }
 0x8a0   : > { %v1409_v6 = vpop.xlane.xlu0 %1408 }
 0x8a1   : > { %3013 = vrcp.f32 %v1409_v6 }
 0x8a4   : > { %v1424_v49 = vpop.permute.xlu0 %1423 }
 0x8a5   : > { %v1433_v57 = vsel %vm894_vm1, %v1424_v49, 0  ;;  %2832 = vmatprep.subr.msk.bf16.mxu1 %vm894_vm1, %v1424_v49  ;;  %v2901_v49 = vld [vmem:[%s3895_s6 + $0x38] sm:$0xff]  }
 0x8a6   : > { %2781 = vmatpush3.bf16.msra.mxu1 %v1433_v57  ;;  %v2902_v57 = vld [vmem:[%s3895_s6 + $0x30] sm:$0xff]  }
 0x8a7   : > { %2782 = vmatprep.subr.bf16.mxu1 %v1422_v12 }
 0x8a8   : > { %v1583_v53 = vpop.permute.xlu0 %1582 }
 0x8aa   : > { %2783 = vmatpush3.bf16.msra.mxu1 %v1422_v12  ;;  %v3010_v16 = vpop.eup %3009 }
 0x8ab   : > { %2833 = vmatprep.subr.msk.bf16.mxu1 %vm790_vm3, %v1591_v11  ;;  %v3012_v20 = vpop.eup %3011  ;;  %v1418_v60 = vmul.f32 %v3010_v16, %v3006_v37  ;;  %v2903_v11 = vld [vmem:[%s3895_s6 + $0x28] sm:$0xff]   ;;  %v2904_v16 = vld [vmem:[%s3895_s6 + $0x20] sm:$0xff]  }
 0x8ac   : > { %v1416_v61 = vmul.f32 %v3012_v20, %v3617_v7  ;;  %v2905_v20 = vld [vmem:[%s3895_s6 + $0x18] sm:$0xff]  }
 0x8ad   : > { %v1420_v26 = vpack.c.bf16 %v1418_v60, %v1418_v60  ;;  %v2907_v60 = vld [vmem:[%s3895_s6 + $0x8] sm:$0xff]  }
 0x8ae   : > { %v3014_v59 = vpop.eup %3013 }
 0x8af   : > { %v1417_v63 = vmul.f32 %v3014_v59, %v3008_v3  ;;  %v2906_v59 = vld [vmem:[%s3895_s6 + $0x10] sm:$0xff]  }
 0x8b1   : > { %v1419_v2 = vpack.c.bf16 %v1417_v63, %v1416_v61  ;;  %v2908_v61 = vld [vmem:[%s3895_s6] sm:$0xff]  }
 0x8b3   : > { %2784 = vmatprep.mubr.msk.bf16.mxu1 %vm851_vm13, %v1419_v2 }
 0x8b4   : > { %2785 = vmatmul.mubr.msk.bf16.vlgmr.msra.gmra.mxu1 %vm851_vm13, %v1420_v26 }
 0x8b5   : > { %2789 = vmatpush3.bf16.xpose.msra.mxu1 %v1602_v5  ;;  %2792 = vmatprep.mubr.msk.bf16.mxu1 %vm790_vm3, %v1583_v53 }
 0x8b6   : > { %2834 = vmatprep.subr.msk.bf16.mxu1 %vm790_vm3, %v1589_v28 }
 0x8bd   : > { %2791 = vmatpush3.bf16.xpose.msra.mxu1 %v1599_v51 }
 0x8dd   : > { %v1585_v7 = vpop.permute.xlu1 %1584 }
 0x8de   : > { %2793 = vmatmul.mubr.msk.bf16.vlgmr.msra.gmra.mxu1 %vm790_vm3, %v1585_v7 }
 0x8df   : > { %2171 = vmatprep.mubr.bf16.mxu1 %v3068_v27 }
 0x974   : > { %v2786_v15 = vpop.f32.mrf.mxu1 }
 0x976   : > { %v1469_v21 = vpop.f32.mrf.mxu1 }
 0x978   : > { %v2787_v22 = vpop.f32.mrf.mxu1 }
 0x97a   : > { %v1472_v23 = vpop.f32.mrf.mxu1 }
 0x97b   : > { %v2859_v25 = vpack.i.bf16 %v1472_v23, %v1469_v21 }
 0x99e   : > { %v2794_v29 = vpop.f32.mrf.mxu1 }
 0x99f   : > { %v1647_v36 = vadd.f32 %v2794_v29, %v3395_v31 }
 0x9a0   : > { %v1638_v17 = vpop.f32.mrf.mxu1 }
 0x9a1   : > { %v1639_v32 = vadd.f32 %v1638_v17, %v3397_v33  ;;  %v1658_v41 = vsel %vm858_vm11, %v1647_v36, -inf }
 0x9a2   : > { %v2795_v34 = vpop.f32.mrf.mxu1 }
 0x9a3   : > { %v1652_v54 = vsel %vm851_vm13, %v1639_v32, -inf }
 0x9a4   : > { %v1641_v37 = vpop.f32.mrf.mxu1  ;;  %1653 = vmax.xlane.f32.xlu0 %v1652_v54 }
 0x9a5   : > { %v1642_v39 = vadd.f32 %v1641_v37, %v3402_v40 }
 0x9a7   : > { %v1655_v38 = vsel %vm851_vm13, %v1642_v39, -inf }
 0x9a8   : > { %1656 = vmax.xlane.f32.xlu1 %v1655_v38  ;;  %1659 = vmax.xlane.f32.xlu0 %v1658_v41 }
 0xa2d   : > { %v1654_v42 = vpop.xlane.xlu0 %1653 }
 0xa2e   : > { %v1661_v43 = vsub.f32 %v1639_v32, %v1654_v42 }
 0xa30   : > { %v1664_v3 = vmul.f32 1.442695, %v1661_v43 }
 0xa31   : > { %v1657_v45 = vpop.xlane.xlu1 %1656  ;;  %v1660_v33 = vpop.xlane.xlu0 %1659 }
 0xa32   : > { %3015 = vpow2.f32 %v1664_v3  ;;  %v1662_v56 = vsub.f32 %v1642_v39, %v1657_v45  ;;  %v1663_v31 = vsub.f32 %v1647_v36, %v1660_v33  ;;  %v2912_v33 = vld [vmem:[%s3897_s8 + $0xe8] ss:$16 sps:$4 sm:$0xff]  }
 0xa34   : > { %v1666_v4 = vmul.f32 1.442695, %v1662_v56  ;;  %v1668_v0 = vmul.f32 1.442695, %v1663_v31  ;;  %v2914_v56 = vld [vmem:[%s3897_s8 + $0xec] ss:$16 sps:$4 sm:$0xff]  }
 0xa36   : > { %3017 = vpow2.f32 %v1666_v4  ;;  %v3057_v4 = vld [vmem:[%s3157_s24 + $0x10] sm:$0x3f] }
 0xa37   : > { %3019 = vpow2.f32 %v1668_v0 }
 0xa3f   : > { %v3016_v9 = vpop.eup %3015 }
 0xa40   : > { %v1670_v40 = vsel %vm851_vm13, %v3016_v9, 0.0 }
 0xa41   : > { %1671 = vadd.xlane.f32.xlu0 %v1670_v40  ;;  %v3058_v40 = vld [vmem:[%s3157_s24] sm:$0xff] }
 0xa43   : > { %v3018_v62 = vpop.eup %3017 }
 0xa44   : > { %v3020_v47 = vpop.eup %3019  ;;  %v1673_v35 = vsel %vm851_vm13, %v3018_v62, 0.0 }
 0xa45   : > { %1674 = vadd.xlane.f32.xlu0 %v1673_v35  ;;  %v1676_v50 = vsel %vm858_vm11, %v3020_v47, 0.0 }
 0xa46   : > { %1677 = vadd.xlane.f32.xlu1 %v1676_v50 }
 0xa57   : > { %1687 = vrot.lane.b32.xlu1 %v3264_v1, %s3073_s26 }
 0xa5b   : > { %2855 = vrot.lane.b32.xlu1 %v2854_v19, %s3073_s26  ;;  %1689 = vrot.lane.b32.xlu0 %v3246_v55, %s3073_s26 }
 0xa5f   : > { %1756 = vrot.lane.b32.xlu1 %v3575_v13, %s3073_s26  ;;  %2860 = vrot.lane.b32.xlu0 %v2859_v25, %s3076_s28 }
 0xa63   : > { %1768 = vrot.lane.b32.xlu1 %v2786_v15, %s3076_s28  ;;  %s373_s28 = scalar_lea.vmem %s3899_s10, %s2836_s21 }
 0xaca   : > { %v1672_v58 = vpop.xlane.xlu0 %1671 }
 0xacb   : > { %3021 = vrcp.f32 %v1672_v58 }
 0xace   : > { %v1675_v52 = vpop.xlane.xlu0 %1674 }
 0xacf   : > { %v1678_v10 = vpop.xlane.xlu1 %1677  ;;  %3023 = vrcp.f32 %v1675_v52  ;;  %v3059_v52 = vld [vmem:[%s3157_s24 + $0x8] sm:$0xff] }
 0xad0   : > { %3025 = vrcp.f32 %v1678_v10 }
 0xad2   : > { %v1690_v1 = vpop.permute.xlu0 %1689 }
 0xad3   : > { %v1699_v14 = vsel %vm894_vm1, %v1690_v1, 0  ;;  %2835 = vmatprep.subr.msk.bf16.mxu0 %vm894_vm1, %v1690_v1  ;;  %v1688_v18 = vpop.permute.xlu1 %1687 }
 0xad4   : > { %2797 = vmatpush3.bf16.msra.mxu0 %v1699_v14 }
 0xad5   : > { %2798 = vmatprep.subr.bf16.mxu0 %v1688_v18 }
 0xad6   : > { %v2861_v21 = vpop.permute.xlu0 %2860 }
 0xad7   : > { %v2856_v28 = vpop.permute.xlu1 %2855  ;;  %v2863_v23 = vunpack.i.h.bf16 %v2861_v21  ;;  %v2862_v25 = vunpack.i.l.bf16 %v2861_v21  ;;  %v2951_v21 = vld [vmem:[%s3897_s8] ss:$16 sps:$4 sm:$0xff]  }
 0xad8   : > { %2799 = vmatpush3.bf16.msra.mxu0 %v1688_v18  ;;  %v3022_v55 = vpop.eup %3021  ;;  %v2858_v7 = vunpack.i.h.bf16 %v2856_v28  ;;  %v2857_v15 = vunpack.i.l.bf16 %v2856_v28  ;;  %v2917_v18 = vld [vmem:[%s3897_s8 + $0xc4] ss:$16 sps:$4 sm:$0xff]   ;;  %v2945_v28 = vld [vmem:[%s3897_s8 + $0x20] ss:$16 sps:$4 sm:$0xff]  }
 0xad9   : > { %v1682_v44 = vmul.f32 %v3022_v55, %v3016_v9  ;;  %2804 = vmatprep.subr.bf16.mxu0 %v2901_v49  ;;  %v2920_v55 = vld [vmem:[%s3897_s8 + $0xcc] ss:$16 sps:$4 sm:$0xff]  }
 0xada   : > { %v1786_v29 = vsel %vm790_vm3, %v3484_v48, %v2858_v7  ;;  %v1785_v17 = vsel %vm790_vm3, %v3482_v46, %v2857_v15  ;;  %v2911_v46 = vld [vmem:[%s3897_s8 + $0xe4] ss:$16 sps:$4 sm:$0xff]   ;;  %v2956_v15 = vld [vmem:[%s3897_s8 + $0xc] ss:$16 sps:$4 sm:$0xff]  }
 0xadb   : > { %v1757_v51 = vpop.permute.xlu1 %1756  ;;  %v1789_v38 = vsel %vm1788_vm14, %v1785_v17, %v2862_v25  ;;  %v1790_v41 = vsel %vm1788_vm14, %v1786_v29, %v2863_v23  ;;  %2139 = vmatprep.subr.bf16.mxu1 %v2911_v46  ;;  %v2953_v7 = vld [vmem:[%s3897_s8 + $0x4] ss:$16 sps:$4 sm:$0xff]  }
 0xadc   : > { %v3024_v13 = vpop.eup %3023  ;;  %v1787_v34 = vsel %vm790_vm3, %v3480_v30, %v1757_v51  ;;  %v2909_v30 = vld [vmem:[%s3897_s8 + $0xe0] ss:$16 sps:$4 sm:$0xff]   ;;  %v2948_v51 = vld [vmem:[%s3897_s8 + $0x28] ss:$16 sps:$4 sm:$0xff]  }
 0xadd   : > { %v3026_v19 = vpop.eup %3025  ;;  %v1683_v24 = vmul.f32 %v3024_v13, %v3018_v62  ;;  %2140 = vmatpush1.bf16.msra.mxu1 %v2909_v30  ;;  %v2915_v13 = vld [vmem:[%s3897_s8 + $0xc0] ss:$16 sps:$4 sm:$0xff]  }
 0xade   : > { %v1684_v8 = vmul.f32 %v3026_v19, %v3020_v47  ;;  %v2918_v19 = vld [vmem:[%s3897_s8 + $0xc8] ss:$16 sps:$4 sm:$0xff]   ;;  %2141 = vmatprep.subr.bf16.mxu1 %v2917_v18 }
 0xadf   : > { %v1685_v6 = vpack.c.bf16 %v1683_v24, %v1682_v44  ;;  %v1769_v22 = vpop.permute.xlu1 %1768  ;;  %v2923_v44 = vld [vmem:[%s3897_s8 + $0xa4] ss:$16 sps:$4 sm:$0xff]   ;;  %v2926_v24 = vld [vmem:[%s3897_s8 + $0xac] ss:$16 sps:$4 sm:$0xff]  }
 0xae0   : > { %v1686_v12 = vpack.c.bf16 %v1684_v8, %v1684_v8  ;;  %v1791_v54 = vsel %vm1788_vm14, %v1787_v34, %v1769_v22  ;;  %v2921_v8 = vld [vmem:[%s3897_s8 + $0xa0] ss:$16 sps:$4 sm:$0xff]   ;;  %v2954_v22 = vld [vmem:[%s3897_s8 + $0x8] ss:$16 sps:$4 sm:$0xff]  }
 0xae1   : > { %2800 = vmatprep.mubr.msk.bf16.mxu0 %vm851_vm13, %v1685_v6  ;;  %2142 = vmatpush1.bf16.msra.mxu1 %v2915_v13  ;;  %v2924_v6 = vld [vmem:[%s3897_s8 + $0xa8] ss:$16 sps:$4 sm:$0xff]   ;;  %v2971_v13 = vld [vmem:[%s3898_s9 + $0x40] sm:$0xff]  }
 0xae2   : > { %2801 = vmatmul.mubr.msk.bf16.vlgmr.msra.gmra.mxu0 %vm851_vm13, %v1686_v12  ;;  %2143 = vmatprep.subr.bf16.mxu1 %v2923_v44  ;;  %v2929_v12 = vld [vmem:[%s3897_s8 + $0x84] ss:$16 sps:$4 sm:$0xff]   ;;  %v2969_v18 = vld [vmem:[%s3898_s9 + $0x48] sm:$0xff]  }
 0xae3   : > { %2805 = vmatpush3.bf16.msra.mxu0 %v2901_v49  ;;  %v2932_v49 = vld [vmem:[%s3897_s8 + $0x8c] ss:$16 sps:$4 sm:$0xff]  }
 0xae4   : > { %2806 = vmatprep.subr.bf16.mxu0 %v2902_v57 }
 0xae5   : > { %2144 = vmatpush1.bf16.msra.mxu1 %v2921_v8 }
 0xae6   : > { %2145 = vmatprep.subr.bf16.mxu1 %v2929_v12 }
 0xae7   : > { %2807 = vmatpush3.bf16.msra.mxu0 %v2902_v57  ;;  %v2927_v57 = vld [vmem:[%s3897_s8 + $0x80] ss:$16 sps:$4 sm:$0xff]  }
 0xae8   : > { %2808 = vmatprep.subr.bf16.mxu0 %v2903_v11 }
 0xae9   : > { %2146 = vmatpush1.bf16.msra.mxu1 %v2927_v57 }
 0xaeb   : > { %2809 = vmatpush3.bf16.msra.mxu0 %v2903_v11  ;;  %v2930_v11 = vld [vmem:[%s3897_s8 + $0x88] ss:$16 sps:$4 sm:$0xff]  }
 0xaec   : > { %2810 = vmatprep.subr.bf16.mxu0 %v2904_v16 }
 0xaef   : > { %2811 = vmatpush3.bf16.msra.mxu0 %v2904_v16  ;;  %v2935_v16 = vld [vmem:[%s3897_s8 + $0x64] ss:$16 sps:$4 sm:$0xff]  }
 0xaf0   : > { %2812 = vmatprep.subr.bf16.mxu0 %v2905_v20  ;;  %2147 = vmatprep.subr.bf16.mxu1 %v2935_v16 }
 0xaf3   : > { %2813 = vmatpush3.bf16.msra.mxu0 %v2905_v20  ;;  %v2933_v20 = vld [vmem:[%s3897_s8 + $0x60] ss:$16 sps:$4 sm:$0xff]  }
 0xaf4   : > { %2814 = vmatprep.subr.bf16.mxu0 %v2906_v59  ;;  %2148 = vmatpush1.bf16.msra.mxu1 %v2933_v20 }
 0xaf7   : > { %2815 = vmatpush3.bf16.msra.mxu0 %v2906_v59  ;;  %v2936_v59 = vld [vmem:[%s3897_s8 + $0x68] ss:$16 sps:$4 sm:$0xff]  }
 0xaf8   : > { %2816 = vmatprep.subr.bf16.mxu0 %v2907_v60 }
 0xafb   : > { %2817 = vmatpush3.bf16.msra.mxu0 %v2907_v60  ;;  %v2938_v60 = vld [vmem:[%s3897_s8 + $0x6c] ss:$16 sps:$4 sm:$0xff]  }
 0xafc   : > { %2818 = vmatprep.subr.bf16.mxu0 %v2908_v61 }
 0xaff   : > { %2819 = vmatpush3.bf16.msra.mxu0 %v2908_v61  ;;  %v2941_v61 = vld [vmem:[%s3897_s8 + $0x44] ss:$16 sps:$4 sm:$0xff]  }
 0xb00   : > { %2190 = vmatprep.subr.bf16.mxu0 %v2914_v56  ;;  %2149 = vmatprep.subr.bf16.mxu1 %v2941_v61 }
 0xba2   : > { %v2802_v63 = vpop.f32.mrf.mxu0 }
 0xba3   : > { %1780 = vrot.lane.b32.xlu1 %v2802_v63, %s3074_s19  ;;  %v2944_v63 = vld [vmem:[%s3897_s8 + $0x4c] ss:$16 sps:$4 sm:$0xff]  }
 0xba4   : > { %v1735_v2 = vpop.f32.mrf.mxu0 }
 0xba6   : > { %v2803_v26 = vpop.f32.mrf.mxu0 }
 0xba7   : > { %v2942_v26 = vld [vmem:[%s3897_s8 + $0x48] ss:$16 sps:$4 sm:$0xff]  }
 0xba8   : > { %v1738_v5 = vpop.f32.mrf.mxu0 }
 0xba9   : > { %v2864_v53 = vpack.i.bf16 %v1738_v5, %v1735_v2  ;;  %v2939_v2 = vld [vmem:[%s3897_s8 + $0x40] ss:$16 sps:$4 sm:$0xff]   ;;  %v2947_v5 = vld [vmem:[%s3897_s8 + $0x24] ss:$16 sps:$4 sm:$0xff]  }
 0xbaa   : > { %2150 = vmatpush1.bf16.msra.mxu1 %v2939_v2 }
 0xbab   : > { %2865 = vrot.lane.b32.xlu0 %v2864_v53, %s3074_s19  ;;  %v2950_v53 = vld [vmem:[%s3897_s8 + $0x2c] ss:$16 sps:$4 sm:$0xff]   ;;  %2151 = vmatprep.subr.bf16.mxu1 %v2947_v5 }
 0xbae   : > { %2152 = vmatpush1.bf16.msra.mxu1 %v2945_v28 }
 0xbaf   : > { %2153 = vmatprep.subr.bf16.mxu1 %v2953_v7 }
 0xbb2   : > { %2154 = vmatpush1.bf16.msra.mxu1 %v2951_v21 }
 0xc15   : > { %v1781_v32 = vpop.permute.xlu1 %1780 }
 0xc16   : > { %v1795_v42 = vsel %vm1792_vm15, %v1791_v54, %v1781_v32 }
 0xc17   : > { %v1813_v45 = vpack.c.bf16 %v1795_v42, %v1795_v42  ;;  %v2589_v42 = vld [vmem:[%s3896_s7] ss:$0 sm:$0xff] }
 0xc1d   : > { %v2866_v36 = vpop.permute.xlu0 %2865 }
 0xc1e   : > { %v2868_v37 = vunpack.i.h.bf16 %v2866_v36  ;;  %v2867_v39 = vunpack.i.l.bf16 %v2866_v36 }
 0xc20   : > { %v1793_v43 = vsel %vm1792_vm15, %v1789_v38, %v2867_v39  ;;  %v1794_v3 = vsel %vm1792_vm15, %v1790_v41, %v2868_v37 }
 0xc21   : > { %v1812_v48 = vpack.c.bf16 %v1794_v3, %v1793_v43 }
 0xc23   : > { %2820 = vmatprep.mubr.bf16.mxu0 %v1812_v48 }
 0xc24   : > { %2821 = vmatmul.mubr.bf16.vlgmr.msra.gmra.mxu0 %v1813_v45 }
 0xc25   : > { %2222 = vmatprep.mubr.bf16.mxu0 %v3068_v27  ;;  %2191 = vmatpush1.bf16.msra.mxu0 %v2912_v33 }
 0xc26   : > { %2192 = vmatprep.subr.bf16.mxu0 %v2920_v55  ;;  %v2970_v55 = vld [vmem:[%s3898_s9 + $0x8] sm:$0xff]  }
 0xc29   : > { %2193 = vmatpush1.bf16.msra.mxu0 %v2918_v19  ;;  %v2972_v19 = vld [vmem:[%s3898_s9] sm:$0xff]  }
 0xc2a   : > { %2194 = vmatprep.subr.bf16.mxu0 %v2926_v24 }
 0xc2d   : > { %2195 = vmatpush1.bf16.msra.mxu0 %v2924_v6 }
 0xc2e   : > { %2196 = vmatprep.subr.bf16.mxu0 %v2932_v49 }
 0xc31   : > { %2197 = vmatpush1.bf16.msra.mxu0 %v2930_v11 }
 0xc32   : > { %2198 = vmatprep.subr.bf16.mxu0 %v2938_v60 }
 0xc35   : > { %2199 = vmatpush1.bf16.msra.mxu0 %v2936_v59 }
 0xc36   : > { %2200 = vmatprep.subr.bf16.mxu0 %v2944_v63 }
 0xc39   : > { %2201 = vmatpush1.bf16.msra.mxu0 %v2942_v26 }
 0xc3a   : > { %2202 = vmatprep.subr.bf16.mxu0 %v2950_v53 }
 0xc3d   : > { %2203 = vmatpush1.bf16.msra.mxu0 %v2948_v51 }
 0xc3e   : > { %2204 = vmatprep.subr.bf16.mxu0 %v2956_v15 }
 0xc41   : > { %2205 = vmatpush1.bf16.msra.mxu0 %v2954_v22 }
 0xce4   : > { %v2822_v31 = vpop.f32.mrf.mxu0 }
 0xce5   : > { %v3720_v0 = vadd.f32 %v3057_v4, %v2822_v31  ;;  %v2957_v31 = vld [vmem:[%s3898_s9 + $0x78] sm:$0xff]  }
 0xce6   : > { %v1896_v9 = vpop.f32.mrf.mxu0  ;;  %v2958_v4 = vld [vmem:[%s3898_s9 + $0x38] sm:$0xff]   ;;  %2692 = vmatprep.subr.bf16.mxu1 %v2957_v31 }
 0xce7   : > { %v3723_v62 = vadd.f32 %v3058_v40, %v1896_v9  ;;  %v1916_v58 = vmul.f32 %v3720_v0, %v3720_v0  ;;  %v2959_v9 = vld [vmem:[%s3898_s9 + $0x70] sm:$0xff]   ;;  %v2961_v40 = vld [vmem:[%s3898_s9 + $0x68] sm:$0xff]  }
 0xce8   : > { %v2823_v47 = vpop.f32.mrf.mxu0 }
 0xce9   : > { %v1914_v35 = vmul.f32 %v3723_v62, %v3723_v62  ;;  %v1921_v14 = vsel %vm409_vm0, %v1916_v58, 0.0  ;;  %v2962_v47 = vld [vmem:[%s3898_s9 + $0x28] sm:$0xff]   ;;  %v2965_v58 = vld [vmem:[%s3898_s9 + $0x58] sm:$0xff]  }
 0xcea   : > { %v1899_v50 = vpop.f32.mrf.mxu0 }
 0xceb   : > { %v3730_v10 = vadd.f32 %v3059_v52, %v1899_v50  ;;  %1917 = vadd.xlane.f32.xlu0 %v1914_v35  ;;  %v2963_v35 = vld [vmem:[%s3898_s9 + $0x60] sm:$0xff]   ;;  %v2966_v52 = vld [vmem:[%s3898_s9 + $0x18] sm:$0xff]  }
 0xcec   : > { %v2964_v50 = vld [vmem:[%s3898_s9 + $0x20] sm:$0xff]  }
 0xced   : > { %v1915_v1 = vmul.f32 %v3730_v10, %v3730_v10 }
 0xcef   : > { %1922 = vadd.xlane.f32.xlu0 %v1921_v14  ;;  %1919 = vadd.xlane.f32.xlu1 %v1915_v1  ;;  %v2967_v1 = vld [vmem:[%s3898_s9 + $0x50] sm:$0xff]  }
 0xcf0   : > { %v2968_v14 = vld [vmem:[%s3898_s9 + $0x10] sm:$0xff]  }
 0xd74   : > { %v1918_v23 = vpop.xlane.xlu0 %1917 }
 0xd75   : > { %v1924_v25 = vmul.f32 0.0078125, %v1918_v23 }
 0xd77   : > { %v1927_v29 = vadd.f32 1e-06, %v1924_v25 }
 0xd78   : > { %v1923_v17 = vpop.xlane.xlu0 %1922  ;;  %v1920_v32 = vpop.xlane.xlu1 %1919 }
 0xd79   : > { %v1926_v34 = vmul.f32 0.0078125, %v1923_v17  ;;  %v1925_v36 = vmul.f32 0.0078125, %v1920_v32  ;;  %3027 = vrsqrt.f32 %v1927_v29 }
 0xd7b   : > { %v1928_v54 = vadd.f32 1e-06, %v1925_v36  ;;  %v1929_v37 = vadd.f32 1e-06, %v1926_v34 }
 0xd7d   : > { %3029 = vrsqrt.f32 %v1928_v54 }
 0xd7e   : > { %3031 = vrsqrt.f32 %v1929_v37 }
 0xd86   : > { %v3028_v39 = vpop.eup %3027 }
 0xd87   : > { %v1933_v38 = vmul.f32 %v3028_v39, %v3723_v62 }
 0xd89   : > { %v1942_v48 = vmul.f32 %v2589_v42, %v1933_v38 }
 0xd8a   : > { %v3030_v41 = vpop.eup %3029 }
 0xd8b   : > { %v1934_v43 = vmul.f32 %v3030_v41, %v3730_v10  ;;  %v3032_v3 = vpop.eup %3031 }
 0xd8c   : > { %v1935_v46 = vmul.f32 %v3032_v3, %v3720_v0 }
 0xd8d   : > { %v1943_v45 = vmul.f32 %v2589_v42, %v1934_v43 }
 0xd8e   : > { %v1944_v33 = vmul.f32 %v2589_v42, %v1935_v46 }
 0xd8f   : > { %v1977_v30 = vpack.c.bf16 %v1943_v45, %v1942_v48 }
 0xd90   : > { %v1978_v56 = vpack.c.bf16 %v1944_v33, %v1944_v33 }
 0xd91   : > { %2172 = vmatmul.mubr.bf16.vlgmr.msra.gmra.mxu1 %v1977_v30  ;;  %2223 = vmatmul.mubr.bf16.vlgmr.msra.gmra.mxu0 %v1977_v30 }
 0xd92   : > { %2181 = vmatprep.mubr.bf16.mxu1 %v3068_v27  ;;  %2232 = vmatprep.mubr.bf16.mxu0 %v3068_v27  ;;  %v2960_v27 = vld [vmem:[%s3898_s9 + $0x30] sm:$0xff]  }
 0xd93   : > { %2693 = vmatpush3.bf16.msra.mxu1 %v2958_v4 }
 0xd94   : > { %2694 = vmatprep.subr.bf16.mxu1 %v2959_v9 }
 0xd97   : > { %2695 = vmatpush3.bf16.msra.mxu1 %v2960_v27 }
 0xd98   : > { %2696 = vmatprep.subr.bf16.mxu1 %v2961_v40 }
 0xd99   : > { %2182 = vmatmul.mubr.bf16.gmra.mxu1 %v1978_v56  ;;  %2233 = vmatmul.mubr.bf16.gmra.mxu0 %v1978_v56 }
 0xd9b   : > { %2697 = vmatpush3.bf16.msra.mxu1 %v2962_v47 }
 0xd9c   : > { %2698 = vmatprep.subr.bf16.mxu1 %v2963_v35 }
 0xd9f   : > { %2699 = vmatpush3.bf16.msra.mxu1 %v2964_v50 }
 0xda0   : > { %2700 = vmatprep.subr.bf16.mxu1 %v2965_v58 }
 0xda3   : > { %2701 = vmatpush3.bf16.msra.mxu1 %v2966_v52 }
 0xda4   : > { %2702 = vmatprep.subr.bf16.mxu1 %v2967_v1 }
 0xda7   : > { %2703 = vmatpush3.bf16.msra.mxu1 %v2968_v14 }
 0xda8   : > { %2704 = vmatprep.subr.bf16.mxu1 %v2969_v18 }
 0xdab   : > { %2705 = vmatpush3.bf16.msra.mxu1 %v2970_v55 }
 0xdac   : > { %2706 = vmatprep.subr.bf16.mxu1 %v2971_v13 }
 0xdaf   : > { %2707 = vmatpush3.bf16.msra.mxu1 %v2972_v19 }
 0xe51   : > { %v2173_v44 = vpop.f32.mrf.mxu1  ;;  %v3875_v24 = vpop.f32.mrf.mxu0 }
 0xe52   : > { %v2241_v8 = vsub.f32 0.0, %v2173_v44 }
 0xe53   : > { %v2175_v6 = vpop.f32.mrf.mxu1  ;;  %v2226_v12 = vpop.f32.mrf.mxu0 }
 0xe54   : > { %v2247_v49 = vmul.f32 1.442695, %v2241_v8  ;;  %v2242_v57 = vsub.f32 0.0, %v2175_v6 }
 0xe55   : > { %v2177_v11 = vpop.f32.mrf.mxu1  ;;  %v2228_v16 = vpop.f32.mrf.mxu0 }
 0xe56   : > { %3033 = vpow2.f32 %v2247_v49  ;;  %v2249_v20 = vmul.f32 1.442695, %v2242_v57  ;;  %v2243_v59 = vsub.f32 0.0, %v2177_v11 }
 0xe57   : > { %v2179_v60 = vpop.f32.mrf.mxu1  ;;  %v2230_v61 = vpop.f32.mrf.mxu0 }
 0xe58   : > { %3035 = vpow2.f32 %v2249_v20  ;;  %v2251_v63 = vmul.f32 1.442695, %v2243_v59  ;;  %v2244_v2 = vsub.f32 0.0, %v2179_v60 }
 0xe59   : > { %v2183_v26 = vpop.f32.mrf.mxu1  ;;  %v2234_v5 = vpop.f32.mrf.mxu0 }
 0xe5a   : > { %3037 = vpow2.f32 %v2251_v63  ;;  %v2253_v53 = vmul.f32 1.442695, %v2244_v2  ;;  %v2245_v28 = vsub.f32 0.0, %v2183_v26 }
 0xe5b   : > { %v2185_v51 = vpop.f32.mrf.mxu1  ;;  %v2236_v7 = vpop.f32.mrf.mxu0 }
 0xe5c   : > { %3039 = vpow2.f32 %v2253_v53  ;;  %v2255_v15 = vmul.f32 1.442695, %v2245_v28  ;;  %v2246_v21 = vsub.f32 0.0, %v2185_v51 }
 0xe5d   : > { %v2187_v22 = vpop.f32.mrf.mxu1  ;;  %v2238_v23 = vpop.f32.mrf.mxu0 }
 0xe5e   : > { %3041 = vpow2.f32 %v2255_v15  ;;  %v2257_v25 = vmul.f32 1.442695, %v2246_v21 }
 0xe5f   : > { %v2188_v29 = vpop.f32.mrf.mxu1  ;;  %v2239_v17 = vpop.f32.mrf.mxu0 }
 0xe60   : > { %3043 = vpow2.f32 %v2257_v25 }
 0xe63   : > { %v3034_v32 = vpop.eup %3033 }
 0xe64   : > { %v2259_v36 = vadd.f32 1.0, %v3034_v32 }
 0xe65   : > { %v3036_v34 = vpop.eup %3035 }
 0xe66   : > { %v2260_v54 = vadd.f32 1.0, %v3036_v34 }
 0xe67   : > { %v3038_v37 = vpop.eup %3037 }
 0xe68   : > { %3045 = vrcp.f32 %v2260_v54  ;;  %v2261_v39 = vadd.f32 1.0, %v3038_v37 }
 0xe69   : > { %v3040_v38 = vpop.eup %3039  ;;  %3047 = vrcp.f32 %v2259_v36 }
 0xe6a   : > { %3049 = vrcp.f32 %v2261_v39  ;;  %v2262_v41 = vadd.f32 1.0, %v3040_v38 }
 0xe6b   : > { %v3042_v42 = vpop.eup %3041 }
 0xe6c   : > { %3051 = vrcp.f32 %v2262_v41  ;;  %v2263_v43 = vadd.f32 1.0, %v3042_v42 }
 0xe6d   : > { %v3044_v3 = vpop.eup %3043 }
 0xe6e   : > { %v2264_v48 = vadd.f32 1.0, %v3044_v3  ;;  %3053 = vrcp.f32 %v2263_v43 }
 0xe70   : > { %3055 = vrcp.f32 %v2264_v48 }
 0xe75   : > { %v3046_v45 = vpop.eup %3045 }
 0xe76   : > { %v3048_v30 = vpop.eup %3047  ;;  %v2272_v33 = vmul.f32 %v3046_v45, %v2175_v6 }
 0xe77   : > { %v3050_v46 = vpop.eup %3049  ;;  %v2271_v4 = vmul.f32 %v3048_v30, %v2173_v44 }
 0xe78   : > { %v2273_v56 = vmul.f32 %v3050_v46, %v2177_v11  ;;  %v2278_v47 = vmul.f32 %v2272_v33, %v2226_v12 }
 0xe79   : > { %v3052_v31 = vpop.eup %3051  ;;  %v2277_v58 = vmul.f32 %v2271_v4, %v3875_v24 }
 0xe7a   : > { %v2274_v9 = vmul.f32 %v3052_v31, %v2179_v60  ;;  %v2279_v27 = vmul.f32 %v2273_v56, %v2228_v16 }
 0xe7b   : > { %v3054_v40 = vpop.eup %3053 }
 0xe7c   : > { %v2280_v35 = vmul.f32 %v2274_v9, %v2230_v61  ;;  %v2315_v14 = vpack.c.bf16 %v2279_v27, %v2277_v58  ;;  %v2275_v18 = vmul.f32 %v3054_v40, %v2183_v26 }
 0xe7d   : > { %v3056_v50 = vpop.eup %3055 }
 0xe7e   : > { %v2316_v52 = vpack.c.bf16 %v2280_v35, %v2278_v47  ;;  %v2276_v1 = vmul.f32 %v3056_v50, %v2185_v51  ;;  %v2281_v19 = vmul.f32 %v2275_v18, %v2234_v5 }
 0xe80   : > { %v2282_v55 = vmul.f32 %v2276_v1, %v2236_v7  ;;  %2447 = vmatprep.mubr.bf16.mxu1 %v2316_v52  ;;  %v2317_v44 = vpack.c.bf16 %v2281_v19, %v2281_v19 }
 0xe81   : > { %2448 = vmatmul.mubr.bf16.vlgmr.msra.gmra.mxu1 %v2315_v14 }
 0xe82   : > { %v2318_v13 = vpack.c.bf16 %v2282_v55, %v2282_v55 }
 0xe84   : > { %2455 = vmatprep.mubr.bf16.mxu1 %v2318_v13 }
 0xe89   : > { %2456 = vmatmul.mubr.bf16.gmra.mxu1 %v2317_v44 }
 0xf41   : > { %v2708_v8 = vpop.f32.mrf.mxu1 }
 0xf43   : > { %v2709_v6 = vpop.f32.mrf.mxu1 }
 0xf44   : > { %v2710_v12 = vadd.f32 %v2709_v6, %v2708_v8 }
 0xf45   : > { %v2711_v24 = vpop.f32.mrf.mxu1 }
 0xf46   : > { %v2463_v49 = vadd.f32 %v2710_v12, %v3723_v62 }
 0xf47   : > { %v2712_v57 = vpop.f32.mrf.mxu1 }
 0xf48   : > { %2466 = vst [vmem:[%s373_s28] sm:$0xff] %v2463_v49  ;;  %v2713_v11 = vadd.f32 %v2712_v57, %v2711_v24 }
 0xf49   : > { %v2714_v16 = vpop.f32.mrf.mxu1 }
 0xf4a   : > { %v2464_v20 = vadd.f32 %v2713_v11, %v3730_v10 }
 0xf4b   : > { %v2715_v59 = vpop.f32.mrf.mxu1 }
 0xf4c   : > { %2467 = vst [vmem:[%s373_s28 + $0x8] sm:$0xff] %v2464_v20  ;;  %v2716_v60 = vadd.f32 %v2715_v59, %v2714_v16 }
 0xf4d   : > { %v2717_v61 = vpop.f32.mrf.mxu1 }
 0xf4e   : > { %v2465_v63 = vadd.f32 %v2716_v60, %v3720_v0 }
 0xf4f   : > { %v2718_v2 = vpop.f32.mrf.mxu1 }
 0xf50   : > { %2468 = vst [vmem:[%s373_s28 + $0x10] sm:$0x3f] %v2465_v63 }
 0xf51 PF: > { %s20_s13 = sadd.s32 1, %s3066_s13  }
 0xf52   : > { %p17_p4 = scmp.ge.s32.totalorder %s20_s13, 4  }
 0xf54   :  { %19 = sbr.rel (!%p17_p4) target bundleno = 1 (0x1), region = 93 }

</bundles_post_ra>
